<compile_context>
chip_gen: v7x
topology: tpu7x:2x2x1
jax: 0.10.0
libtpu: 0.0.40
codegen_flags: <defaults>
</compile_context>

<pallas_src>
import functools

import jax
import jax.numpy as jnp
from jax.experimental import pallas as pl
from jax.experimental.pallas import tpu as pltpu

BN_EPS = 1e-5
VMEM_LIMIT = 32 * 1024 * 1024  # explicit budget, safe on v5e/v6e/v7x


def _pick_tile(n, cap):
    """Largest divisor of n that is <= cap."""
    t = min(n, cap)
    while n % t:
        t -= 1
    return t


# --------------------------------------------------------------------------
# Kernel 1: ConvTranspose2d(2x2, stride 2) + BN1 partial stats
# --------------------------------------------------------------------------
def _conv_transpose_kernel(x_ref, skip_ref, w0_ref, w1_ref, b_ref,
                           o_ref, st_ref):
    """x_ref   : (1, TH, W, Cin)      input row-tile
       skip_ref: (1, 2TH, 2W, F)      matching skip rows (read only for stats)
       w0_ref  : (Cin, 2F)            taps for output-row parity a=0, cols (b,f)
       w1_ref  : (Cin, 2F)            taps for a=1
       b_ref   : (1, 2F)              bias tiled over b
       o_ref   : (1, 2TH, W, 2F)      packed: o[.,2th+a,w,b*F+f] = out[2th+a,2w+b,f]
       st_ref  : (1, 1, 4, F)         [sum_skip, sq_skip, sum_dec, sq_dec]
    """
    TH, W, Cin = x_ref.shape[1], x_ref.shape[2], x_ref.shape[3]
    F2 = w0_ref.shape[1]
    F = F2 // 2

    x = x_ref[0].astype(jnp.float32).reshape(TH * W, Cin)
    bias = b_ref[...]
    y0 = jnp.dot(x, w0_ref[...], preferred_element_type=jnp.float32) + bias
    y1 = jnp.dot(x, w1_ref[...], preferred_element_type=jnp.float32) + bias

    # interleave the two output-row parities (leading-axis concat, no transpose)
    r0 = y0.reshape(TH, 1, W, F2)
    r1 = y1.reshape(TH, 1, W, F2)
    dec = jnp.concatenate([r0, r1], axis=1).reshape(2 * TH, W, F2)
    o_ref[0] = dec.astype(o_ref.dtype)

    # partial BN1 statistics (skip half + dec half)
    skip = skip_ref[0].astype(jnp.float32)
    sflat = skip.reshape(-1, F)
    dflat = dec.reshape(-1, F2)                       # columns ordered (b, f)
    dsum = jnp.sum(dflat, axis=0, keepdims=True)
    dsq = jnp.sum(dflat * dflat, axis=0, keepdims=True)
    st_ref[0, 0, 0:1, :] = jnp.sum(sflat, axis=0, keepdims=True)
    st_ref[0, 0, 1:2, :] = jnp.sum(sflat * sflat, axis=0, keepdims=True)
    st_ref[0, 0, 2:3, :] = dsum[:, 0:F] + dsum[:, F:F2]
    st_ref[0, 0, 3:4, :] = dsq[:, 0:F] + dsq[:, F:F2]


def conv_transpose_2x2_s2(x, skip, w, b, row_tile=4):
    """Returns (dec_packed (N, 2H, W, 2F), bn1 partials (N, Hb, 4, F))."""
    N, H, W, Cin = x.shape
    F = w.shape[1]
    TH = _pick_tile(H, row_tile)
    Hb = H // TH
    # per output-row-parity weight matrices, columns ordered (b, f)
    w0 = jnp.transpose(w[:, :, 0, :], (0, 2, 1)).reshape(Cin, 2 * F)
    w1 = jnp.transpose(w[:, :, 1, :], (0, 2, 1)).reshape(Cin, 2 * F)
    b2 = jnp.tile(b, 2).reshape(1, 2 * F)
    return pl.pallas_call(
        _conv_transpose_kernel,
        out_shape=(jax.ShapeDtypeStruct((N, 2 * H, W, 2 * F), jnp.float32),
                   jax.ShapeDtypeStruct((N, Hb, 4, F), jnp.float32)),
        grid=(N, Hb),
        in_specs=[pl.BlockSpec((1, TH, W, Cin), lambda n, h: (n, h, 0, 0)),
                  pl.BlockSpec((1, 2 * TH, 2 * W, F), lambda n, h: (n, h, 0, 0)),
                  pl.BlockSpec((Cin, 2 * F), lambda n, h: (0, 0)),
                  pl.BlockSpec((Cin, 2 * F), lambda n, h: (0, 0)),
                  pl.BlockSpec((1, 2 * F), lambda n, h: (0, 0))],
        out_specs=(pl.BlockSpec((1, 2 * TH, W, 2 * F), lambda n, h: (n, h, 0, 0)),
                   pl.BlockSpec((1, 1, 4, F), lambda n, h: (n, h, 0, 0))),
        compiler_params=pltpu.CompilerParams(
            dimension_semantics=("parallel", "parallel"),
            vmem_limit_bytes=VMEM_LIMIT),
    )(x, skip, w0, w1, b2)


# --------------------------------------------------------------------------
# Kernels 2/3: BN-apply + ReLU + 3x3 conv (im2col) + next-BN partial stats
# --------------------------------------------------------------------------
def _conv3x3_epilogue(pad_ref, patch_ref, w_ref, b_ref, o_ref, st_ref):
    """Shared conv body.  pad_ref holds the zero-padded (H+2, W+2, Cin) plane."""
    Cin = patch_ref.shape[1] // 9
    Cout = w_ref.shape[1]
    H, W = o_ref.shape[1], o_ref.shape[2]
    # im2col: build the (H*W, 9*Cin) patch matrix in VMEM
    for dy in range(3):
        for dx in range(3):
            k = dy * 3 + dx
            patch_ref[:, k * Cin:(k + 1) * Cin] = (
                pad_ref[dy:dy + H, dx:dx + W, :].reshape(H * W, Cin))
    # single K = 9*Cin MXU matmul
    y = jnp.dot(patch_ref[...], w_ref[...],
                preferred_element_type=jnp.float32) + b_ref[...]
    o_ref[0] = y.reshape(H, W, Cout).astype(o_ref.dtype)
    # partial statistics of the (pre-BN) conv output for the next BatchNorm
    st_ref[0, 0:1, :] = jnp.sum(y, axis=0, keepdims=True)
    st_ref[0, 1:2, :] = jnp.sum(y * y, axis=0, keepdims=True)


def _bn_relu_cat_conv3x3_kernel(skip_ref, dec_ref, sc_s_ref, sh_s_ref,
                                sc_d_ref, sh_d_ref, w_ref, b_ref,
                                o_ref, st_ref, pad_ref, patch_ref):
    """BN1-apply + ReLU on (skip, dec), concat in-register, 3x3 conv, BN2 partials."""
    H, W, F = skip_ref.shape[1], skip_ref.shape[2], skip_ref.shape[3]
    a_skip = jnp.maximum(
        skip_ref[0].astype(jnp.float32) * sc_s_ref[...] + sh_s_ref[...], 0.0)
    a_dec = jnp.maximum(
        dec_ref[0].astype(jnp.float32) * sc_d_ref[...] + sh_d_ref[...], 0.0)
    # zero-padded plane lives in VMEM (no HBM pad pass); channel concat happens here
    pad_ref[...] = jnp.zeros(pad_ref.shape, pad_ref.dtype)
    pad_ref[1:H + 1, 1:W + 1, 0:F] = a_skip
    pad_ref[1:H + 1, 1:W + 1, F:2 * F] = a_dec
    _conv3x3_epilogue(pad_ref, patch_ref, w_ref, b_ref, o_ref, st_ref)


def _bn_relu_conv3x3_kernel(x_ref, sc_ref, sh_ref, w_ref, b_ref,
                            o_ref, st_ref, pad_ref, patch_ref):
    """BN-apply + ReLU + 3x3 conv + next-BN partials (single-input version)."""
    H, W, C = x_ref.shape[1], x_ref.shape[2], x_ref.shape[3]
    a = jnp.maximum(x_ref[0].astype(jnp.float32) * sc_ref[...] + sh_ref[...], 0.0)
    pad_ref[...] = jnp.zeros(pad_ref.shape, pad_ref.dtype)
    pad_ref[1:H + 1, 1:W + 1, :] = a
    _conv3x3_epilogue(pad_ref, patch_ref, w_ref, b_ref, o_ref, st_ref)


# TODO(synk): for large spatial sizes, tile H with a 1-row halo per block and
# budget the im2col scratch against v7x's 64 MiB VMEM; at these toy sizes one
# full plane per batch element fits comfortably.
def bn_relu_cat_conv3x3(skip, dec, scale, shift, w, b):
    N, H, W, F = skip.shape
    Cin, Cout = 2 * F, w.shape[0]
    w_mat = jnp.transpose(w, (2, 3, 1, 0)).reshape(9 * Cin, Cout)
    b_mat = b.reshape(1, Cout)
    sc_s, sc_d = scale[:F].reshape(1, F), scale[F:].reshape(1, F)
    sh_s, sh_d = shift[:F].reshape(1, F), shift[F:].reshape(1, F)
    return pl.pallas_call(
        _bn_relu_cat_conv3x3_kernel,
        out_shape=(jax.ShapeDtypeStruct((N, H, W, Cout), jnp.float32),
                   jax.ShapeDtypeStruct((N, 2, Cout), jnp.float32)),
        grid=(N,),
        in_specs=[pl.BlockSpec((1, H, W, F), lambda n: (n, 0, 0, 0)),
                  pl.BlockSpec((1, H, W, F), lambda n: (n, 0, 0, 0)),
                  pl.BlockSpec((1, F), lambda n: (0, 0)),
                  pl.BlockSpec((1, F), lambda n: (0, 0)),
                  pl.BlockSpec((1, F), lambda n: (0, 0)),
                  pl.BlockSpec((1, F), lambda n: (0, 0)),
                  pl.BlockSpec((9 * Cin, Cout), lambda n: (0, 0)),
                  pl.BlockSpec((1, Cout), lambda n: (0, 0))],
        out_specs=(pl.BlockSpec((1, H, W, Cout), lambda n: (n, 0, 0, 0)),
                   pl.BlockSpec((1, 2, Cout), lambda n: (n, 0, 0))),
        scratch_shapes=[pltpu.VMEM((H + 2, W + 2, Cin), jnp.float32),
                        pltpu.VMEM((H * W, 9 * Cin), jnp.float32)],
        compiler_params=pltpu.CompilerParams(
            dimension_semantics=("parallel",),
            vmem_limit_bytes=VMEM_LIMIT),
    )(skip, dec, sc_s, sh_s, sc_d, sh_d, w_mat, b_mat)


def bn_relu_conv3x3(x, scale, shift, w, b):
    N, H, W, C = x.shape
    Cout = w.shape[0]
    w_mat = jnp.transpose(w, (2, 3, 1, 0)).reshape(9 * C, Cout)
    b_mat = b.reshape(1, Cout)
    return pl.pallas_call(
        _bn_relu_conv3x3_kernel,
        out_shape=(jax.ShapeDtypeStruct((N, H, W, Cout), jnp.float32),
                   jax.ShapeDtypeStruct((N, 2, Cout), jnp.float32)),
        grid=(N,),
        in_specs=[pl.BlockSpec((1, H, W, C), lambda n: (n, 0, 0, 0)),
                  pl.BlockSpec((1, C), lambda n: (0, 0)),
                  pl.BlockSpec((1, C), lambda n: (0, 0)),
                  pl.BlockSpec((9 * C, Cout), lambda n: (0, 0)),
                  pl.BlockSpec((1, Cout), lambda n: (0, 0))],
        out_specs=(pl.BlockSpec((1, H, W, Cout), lambda n: (n, 0, 0, 0)),
                   pl.BlockSpec((1, 2, Cout), lambda n: (n, 0, 0))),
        scratch_shapes=[pltpu.VMEM((H + 2, W + 2, C), jnp.float32),
                        pltpu.VMEM((H * W, 9 * C), jnp.float32)],
        compiler_params=pltpu.CompilerParams(
            dimension_semantics=("parallel",),
            vmem_limit_bytes=VMEM_LIMIT),
    )(x, scale.reshape(1, C), shift.reshape(1, C), w_mat, b_mat)


# --------------------------------------------------------------------------
# Kernel 4: final BN-apply + ReLU (lane-dense elementwise)
# --------------------------------------------------------------------------
def _bn_relu_kernel(x_ref, sc_ref, sh_ref, o_ref):
    y = x_ref[...].astype(jnp.float32) * sc_ref[...] + sh_ref[...]
    o_ref[...] = jnp.maximum(y, 0.0).astype(o_ref.dtype)


def batchnorm_relu_apply(x, scale, shift, row_tile=8):
    N, H, W, C = x.shape
    TH = _pick_tile(H, row_tile)
    Hb = H // TH
    WC = W * C
    x_flat = x.reshape(N, H, WC)                     # free bitcast reshape
    sc_t = jnp.tile(scale, W).reshape(1, WC)         # per-channel -> lane-dense
    sh_t = jnp.tile(shift, W).reshape(1, WC)
    y = pl.pallas_call(
        _bn_relu_kernel,
        out_shape=jax.ShapeDtypeStruct((N, H, WC), jnp.float32),
        grid=(N, Hb),
        in_specs=[pl.BlockSpec((1, TH, WC), lambda n, h: (n, h, 0)),
                  pl.BlockSpec((1, WC), lambda n, h: (0, 0)),
                  pl.BlockSpec((1, WC), lambda n, h: (0, 0))],
        out_specs=pl.BlockSpec((1, TH, WC), lambda n, h: (n, h, 0)),
        compiler_params=pltpu.CompilerParams(
            dimension_semantics=("parallel", "parallel"),
            vmem_limit_bytes=VMEM_LIMIT),
    )(x_flat, sc_t, sh_t)
    return y.reshape(N, H, W, C)


# --------------------------------------------------------------------------
# BatchNorm scale/shift from fused [sum, sumsq] partials (tiny XLA glue)
# --------------------------------------------------------------------------
def _bn_scale_shift(bn_sum, bn_sumsq, count, gamma, beta):
    mean = bn_sum / count
    var = bn_sumsq / count - mean * mean             # biased variance (train mode)
    inv = jax.lax.rsqrt(var + BN_EPS)
    scale = gamma * inv
    shift = beta - mean * scale
    return scale, shift


# --------------------------------------------------------------------------
# decoder_block forward
# --------------------------------------------------------------------------
def init_params(key, num_channels, num_filters):
    ks = jax.random.split(key, 13)
    f, c = num_filters, num_channels
    return {
        "convT_w": 0.1 * jax.random.normal(ks[0], (c, f, 2, 2), jnp.float32),
        "convT_b": 0.1 * jax.random.normal(ks[1], (f,), jnp.float32),
        "bn1_g": 1.0 + 0.1 * jax.random.normal(ks[2], (2 * f,), jnp.float32),
        "bn1_b": 0.1 * jax.random.normal(ks[3], (2 * f,), jnp.float32),
        "conv2_w": 0.1 * jax.random.normal(ks[4], (f, 2 * f, 3, 3), jnp.float32),
        "conv2_b": 0.1 * jax.random.normal(ks[5], (f,), jnp.float32),
        "bn2_g": 1.0 + 0.1 * jax.random.normal(ks[6], (f,), jnp.float32),
        "bn2_b": 0.1 * jax.random.normal(ks[7], (f,), jnp.float32),
        "conv3_w": 0.1 * jax.random.normal(ks[8], (f, f, 3, 3), jnp.float32),
        "conv3_b": 0.1 * jax.random.normal(ks[9], (f,), jnp.float32),
        "bn3_g": 1.0 + 0.1 * jax.random.normal(ks[10], (f,), jnp.float32),
        "bn3_b": 0.1 * jax.random.normal(ks[11], (f,), jnp.float32),
    }


def decoder_block_forward(params, inp_nchw, concat_nchw):
    # NCHW <-> NHWC conversion once at the module boundary (interface parity).
    x = jnp.transpose(inp_nchw, (0, 2, 3, 1))        # (N, H, W, Cin)
    skip = jnp.transpose(concat_nchw, (0, 2, 3, 1))  # (N, 2H, 2W, F)
    N, H, W, _ = x.shape
    F = params["convT_w"].shape[1]
    count = float(N * (2 * H) * (2 * W))             # BN element count per channel

    # Stage 1: ConvTranspose(2x2, s2) + BN1 partial stats (skip & dec halves).
    dec_packed, st1 = conv_transpose_2x2_s2(x, skip, params["convT_w"],
                                            params["convT_b"])
    dec = dec_packed.reshape(N, 2 * H, 2 * W, F)     # free: packed == NHWC bytes
    tot1 = jnp.sum(st1, axis=(0, 1))                 # (4, F)
    bn1_sum = jnp.concatenate([tot1[0], tot1[2]])    # channel order [skip | dec]
    bn1_ssq = jnp.concatenate([tot1[1], tot1[3]])
    sc1, sh1 = _bn_scale_shift(bn1_sum, bn1_ssq, count,
                               params["bn1_g"], params["bn1_b"])

    # Stage 2: BN1+ReLU + in-register concat + conv2(3x3) + BN2 partial stats.
    y2, st2 = bn_relu_cat_conv3x3(skip, dec, sc1, sh1,
                                  params["conv2_w"], params["conv2_b"])
    tot2 = jnp.sum(st2, axis=0)
    sc2, sh2 = _bn_scale_shift(tot2[0], tot2[1], count,
                               params["bn2_g"], params["bn2_b"])

    # Stage 3: BN2+ReLU + conv3(3x3) + BN3 partial stats.
    y3, st3 = bn_relu_conv3x3(y2, sc2, sh2, params["conv3_w"], params["conv3_b"])
    tot3 = jnp.sum(st3, axis=0)
    sc3, sh3 = _bn_scale_shift(tot3[0], tot3[1], count,
                               params["bn3_g"], params["bn3_b"])

    # Stage 4: final BN3+ReLU (lane-dense elementwise).
    out = batchnorm_relu_apply(y3, sc3, sh3)

    # back to NCHW for parity with the PyTorch module
    return jnp.transpose(out, (0, 3, 1, 2))


if __name__ == "__main__":
    key = jax.random.PRNGKey(0)
    num_channels, num_filters = 8, 8
    N, H, W = 2, 8, 8

    k_params, k_inp, k_skip = jax.random.split(key, 3)
    params = init_params(k_params, num_channels, num_filters)

    inp_tensor = jax.random.normal(k_inp, (N, num_channels, H, W), jnp.float32)
    concat_tensor = jax.random.normal(k_skip, (N, num_filters, 2 * H, 2 * W),
                                      jnp.float32)

    fwd = jax.jit(functools.partial(decoder_block_forward, params))
    out = fwd(inp_tensor, concat_tensor)
    jax.block_until_ready(out)

    assert out.shape == (N, num_filters, 2 * H, 2 * W), out.shape
    assert out.dtype == jnp.float32
    print("KERNEL_OK")
</pallas_src>

<mosaic_0001>
module attributes {stable_mosaic.version = 11 : i64} {
  func.func @_conv_transpose_kernel(%arg0: i32, %arg1: i32, %arg2: memref<1x4x8x8xf32, #tpu.memory_space<vmem>>, %arg3: memref<1x8x16x8xf32, #tpu.memory_space<vmem>>, %arg4: memref<8x16xf32, #tpu.memory_space<vmem>>, %arg5: memref<8x16xf32, #tpu.memory_space<vmem>>, %arg6: memref<1x16xf32, #tpu.memory_space<vmem>>, %arg7: memref<1x8x8x16xf32, #tpu.memory_space<vmem>>, %arg8: memref<1x1x4x8xf32, #tpu.memory_space<vmem>>) attributes {dimension_semantics = [#tpu.dimension_semantics<parallel>, #tpu.dimension_semantics<parallel>], iteration_bounds = array<i64: 2, 2>, scalar_prefetch = 0 : i64, scratch_operands = 0 : i64, tpu.core_type = #tpu.core_type<tc>, window_params = [{transform_indices = @transform_0, window_bounds = array<i64: 1, 4, 8, 8>}, {transform_indices = @transform_1, window_bounds = array<i64: 1, 8, 16, 8>}, {pipeline_mode = #tpu.pipeline_mode<synchronous>, transform_indices = @transform_2, window_bounds = array<i64: 8, 16>}, {pipeline_mode = #tpu.pipeline_mode<synchronous>, transform_indices = @transform_3, window_bounds = array<i64: 8, 16>}, {pipeline_mode = #tpu.pipeline_mode<synchronous>, transform_indices = @transform_4, window_bounds = array<i64: 1, 16>}, {transform_indices = @transform_5, window_bounds = array<i64: 1, 8, 8, 16>}, {transform_indices = @transform_6, window_bounds = array<i64: 1, 1, 4, 8>}]} {
    %c0 = arith.constant 0 : index
    %c0_0 = arith.constant 0 : index
    %c0_1 = arith.constant 0 : index
    %c0_2 = arith.constant 0 : index
    %0 = vector.load %arg2[%c0, %c0_0, %c0_1, %c0_2] : memref<1x4x8x8xf32, #tpu.memory_space<vmem>>, vector<1x4x8x8xf32>
    %1 = vector.shape_cast %0 : vector<1x4x8x8xf32> to vector<4x8x8xf32>
    %2 = vector.shape_cast %1 : vector<4x8x8xf32> to vector<32x8xf32>
    %c0_3 = arith.constant 0 : index
    %c0_4 = arith.constant 0 : index
    %3 = vector.load %arg6[%c0_3, %c0_4] : memref<1x16xf32, #tpu.memory_space<vmem>>, vector<1x16xf32>
    %c0_5 = arith.constant 0 : index
    %c0_6 = arith.constant 0 : index
    %4 = vector.load %arg4[%c0_5, %c0_6] : memref<8x16xf32, #tpu.memory_space<vmem>>, vector<8x16xf32>
    %cst = arith.constant dense<0.000000e+00> : vector<32x16xf32>
    %5 = tpu.matmul %2, %4, %cst {dimension_numbers = #tpu.dot_dimension_numbers<[1], [0], [0], [1], [0, 0, 1, 1], [], []>} : vector<32x8xf32>, vector<8x16xf32>, vector<32x16xf32> -> vector<32x16xf32>
    %6 = vector.broadcast %3 : vector<1x16xf32> to vector<32x16xf32>
    %7 = arith.addf %5, %6 : vector<32x16xf32>
    %c0_7 = arith.constant 0 : index
    %c0_8 = arith.constant 0 : index
    %8 = vector.load %arg5[%c0_7, %c0_8] : memref<8x16xf32, #tpu.memory_space<vmem>>, vector<8x16xf32>
    %cst_9 = arith.constant dense<0.000000e+00> : vector<32x16xf32>
    %9 = tpu.matmul %2, %8, %cst_9 {dimension_numbers = #tpu.dot_dimension_numbers<[1], [0], [0], [1], [0, 0, 1, 1], [], []>} : vector<32x8xf32>, vector<8x16xf32>, vector<32x16xf32> -> vector<32x16xf32>
    %10 = vector.broadcast %3 : vector<1x16xf32> to vector<32x16xf32>
    %11 = arith.addf %9, %10 : vector<32x16xf32>
    %12 = vector.shape_cast %7 : vector<32x16xf32> to vector<4x1x8x16xf32>
    %13 = vector.shape_cast %11 : vector<32x16xf32> to vector<4x1x8x16xf32>
    %14 = tpu.concatenate %12, %13 in 1 : vector<4x1x8x16xf32>, vector<4x1x8x16xf32> -> vector<4x2x8x16xf32>
    %15 = vector.shape_cast %14 : vector<4x2x8x16xf32> to vector<8x8x16xf32>
    %c0_10 = arith.constant 0 : index
    %c0_11 = arith.constant 0 : index
    %c0_12 = arith.constant 0 : index
    %c0_13 = arith.constant 0 : index
    %16 = vector.load %arg7[%c0_10, %c0_11, %c0_12, %c0_13] : memref<1x8x8x16xf32, #tpu.memory_space<vmem>>, vector<1x8x8x16xf32>
    %17 = vector.shape_cast %16 : vector<1x8x8x16xf32> to vector<8x8x16xf32>
    %18 = vector.shape_cast %15 : vector<8x8x16xf32> to vector<1x8x8x16xf32>
    tpu.vector_store %arg7[%c0_10, %c0_11, %c0_12, %c0_13], %18 {strides = array<i32>} : memref<1x8x8x16xf32, #tpu.memory_space<vmem>>, vector<1x8x8x16xf32>,
    %c0_14 = arith.constant 0 : index
    %c0_15 = arith.constant 0 : index
    %c0_16 = arith.constant 0 : index
    %c0_17 = arith.constant 0 : index
    %19 = vector.load %arg3[%c0_14, %c0_15, %c0_16, %c0_17] : memref<1x8x16x8xf32, #tpu.memory_space<vmem>>, vector<1x8x16x8xf32>
    %20 = vector.shape_cast %19 : vector<1x8x16x8xf32> to vector<8x16x8xf32>
    %21 = vector.shape_cast %20 : vector<8x16x8xf32> to vector<128x8xf32>
    %22 = vector.shape_cast %15 : vector<8x8x16xf32> to vector<64x16xf32>
    %cst_18 = arith.constant dense<0.000000e+00> : vector<16xf32>
    %23 = vector.multi_reduction <add>, %22, %cst_18 [0] : vector<64x16xf32> to vector<16xf32>
    %24 = vector.shape_cast %23 : vector<16xf32> to vector<1x16xf32>
    %25 = arith.mulf %22, %22 : vector<64x16xf32>
    %cst_19 = arith.constant dense<0.000000e+00> : vector<16xf32>
    %26 = vector.multi_reduction <add>, %25, %cst_19 [0] : vector<64x16xf32> to vector<16xf32>
    %27 = vector.shape_cast %26 : vector<16xf32> to vector<1x16xf32>
    %cst_20 = arith.constant dense<0.000000e+00> : vector<8xf32>
    %28 = vector.multi_reduction <add>, %21, %cst_20 [0] : vector<128x8xf32> to vector<8xf32>
    %29 = vector.shape_cast %28 : vector<8xf32> to vector<1x8xf32>
    %c0_21 = arith.constant 0 : index
    %c0_22 = arith.constant 0 : index
    %c0_23 = arith.constant 0 : index
    %c0_24 = arith.constant 0 : index
    %30 = vector.load %arg8[%c0_21, %c0_22, %c0_23, %c0_24] : memref<1x1x4x8xf32, #tpu.memory_space<vmem>>, vector<1x1x1x8xf32>
    %31 = vector.shape_cast %30 : vector<1x1x1x8xf32> to vector<1x8xf32>
    %32 = vector.shape_cast %29 : vector<1x8xf32> to vector<1x1x1x8xf32>
    tpu.vector_store %arg8[%c0_21, %c0_22, %c0_23, %c0_24], %32 {strides = array<i32>} : memref<1x1x4x8xf32, #tpu.memory_space<vmem>>, vector<1x1x1x8xf32>,
    %33 = arith.mulf %21, %21 : vector<128x8xf32>
    %cst_25 = arith.constant dense<0.000000e+00> : vector<8xf32>
    %34 = vector.multi_reduction <add>, %33, %cst_25 [0] : vector<128x8xf32> to vector<8xf32>
    %35 = vector.shape_cast %34 : vector<8xf32> to vector<1x8xf32>
    %c0_26 = arith.constant 0 : index
    %c0_27 = arith.constant 0 : index
    %c1 = arith.constant 1 : index
    %c0_28 = arith.constant 0 : index
    %36 = vector.load %arg8[%c0_26, %c0_27, %c1, %c0_28] : memref<1x1x4x8xf32, #tpu.memory_space<vmem>>, vector<1x1x1x8xf32>
    %37 = vector.shape_cast %36 : vector<1x1x1x8xf32> to vector<1x8xf32>
    %38 = vector.shape_cast %35 : vector<1x8xf32> to vector<1x1x1x8xf32>
    tpu.vector_store %arg8[%c0_26, %c0_27, %c1, %c0_28], %38 {strides = array<i32>} : memref<1x1x4x8xf32, #tpu.memory_space<vmem>>, vector<1x1x1x8xf32>,
    %39 = vector.extract_strided_slice %24 {offsets = [0, 0], sizes = [1, 8], strides = [1, 1]} : vector<1x16xf32> to vector<1x8xf32>
    %40 = vector.extract_strided_slice %24 {offsets = [0, 8], sizes = [1, 8], strides = [1, 1]} : vector<1x16xf32> to vector<1x8xf32>
    %41 = arith.addf %39, %40 : vector<1x8xf32>
    %c0_29 = arith.constant 0 : index
    %c0_30 = arith.constant 0 : index
    %c2 = arith.constant 2 : index
    %c0_31 = arith.constant 0 : index
    %42 = vector.load %arg8[%c0_29, %c0_30, %c2, %c0_31] : memref<1x1x4x8xf32, #tpu.memory_space<vmem>>, vector<1x1x1x8xf32>
    %43 = vector.shape_cast %42 : vector<1x1x1x8xf32> to vector<1x8xf32>
    %44 = vector.shape_cast %41 : vector<1x8xf32> to vector<1x1x1x8xf32>
    tpu.vector_store %arg8[%c0_29, %c0_30, %c2, %c0_31], %44 {strides = array<i32>} : memref<1x1x4x8xf32, #tpu.memory_space<vmem>>, vector<1x1x1x8xf32>,
    %45 = vector.extract_strided_slice %27 {offsets = [0, 0], sizes = [1, 8], strides = [1, 1]} : vector<1x16xf32> to vector<1x8xf32>
    %46 = vector.extract_strided_slice %27 {offsets = [0, 8], sizes = [1, 8], strides = [1, 1]} : vector<1x16xf32> to vector<1x8xf32>
    %47 = arith.addf %45, %46 : vector<1x8xf32>
    %c0_32 = arith.constant 0 : index
    %c0_33 = arith.constant 0 : index
    %c3 = arith.constant 3 : index
    %c0_34 = arith.constant 0 : index
    %48 = vector.load %arg8[%c0_32, %c0_33, %c3, %c0_34] : memref<1x1x4x8xf32, #tpu.memory_space<vmem>>, vector<1x1x1x8xf32>
    %49 = vector.shape_cast %48 : vector<1x1x1x8xf32> to vector<1x8xf32>
    %50 = vector.shape_cast %47 : vector<1x8xf32> to vector<1x1x1x8xf32>
    tpu.vector_store %arg8[%c0_32, %c0_33, %c3, %c0_34], %50 {strides = array<i32>} : memref<1x1x4x8xf32, #tpu.memory_space<vmem>>, vector<1x1x1x8xf32>,
    return
  }
  func.func @transform_0(%arg0: i32, %arg1: i32) -> (i32, i32, i32, i32) {
    %c0_i32 = arith.constant 0 : i32
    %c0_i32_0 = arith.constant 0 : i32
    %c0_i32_1 = arith.constant 0 : i32
    return %arg0, %arg1, %c0_i32, %c0_i32_0 : i32, i32, i32, i32
  }
  func.func @transform_1(%arg0: i32, %arg1: i32) -> (i32, i32, i32, i32) {
    %c0_i32 = arith.constant 0 : i32
    %c0_i32_0 = arith.constant 0 : i32
    %c0_i32_1 = arith.constant 0 : i32
    return %arg0, %arg1, %c0_i32, %c0_i32_0 : i32, i32, i32, i32
  }
  func.func @transform_2(%arg0: i32, %arg1: i32) -> (i32, i32) {
    %c0_i32 = arith.constant 0 : i32
    %c0_i32_0 = arith.constant 0 : i32
    %c0_i32_1 = arith.constant 0 : i32
    return %c0_i32, %c0_i32_0 : i32, i32
  }
  func.func @transform_3(%arg0: i32, %arg1: i32) -> (i32, i32) {
    %c0_i32 = arith.constant 0 : i32
    %c0_i32_0 = arith.constant 0 : i32
    %c0_i32_1 = arith.constant 0 : i32
    return %c0_i32, %c0_i32_0 : i32, i32
  }
  func.func @transform_4(%arg0: i32, %arg1: i32) -> (i32, i32) {
    %c0_i32 = arith.constant 0 : i32
    %c0_i32_0 = arith.constant 0 : i32
    %c0_i32_1 = arith.constant 0 : i32
    return %c0_i32, %c0_i32_0 : i32, i32
  }
  func.func @transform_5(%arg0: i32, %arg1: i32) -> (i32, i32, i32, i32) {
    %c0_i32 = arith.constant 0 : i32
    %c0_i32_0 = arith.constant 0 : i32
    %c0_i32_1 = arith.constant 0 : i32
    return %arg0, %arg1, %c0_i32, %c0_i32_0 : i32, i32, i32, i32
  }
  func.func @transform_6(%arg0: i32, %arg1: i32) -> (i32, i32, i32, i32) {
    %c0_i32 = arith.constant 0 : i32
    %c0_i32_0 = arith.constant 0 : i32
    %c0_i32_1 = arith.constant 0 : i32
    return %arg0, %arg1, %c0_i32, %c0_i32_0 : i32, i32, i32, i32
  }
}

module attributes {stable_mosaic.version = 11 : i64} {
  func.func @_bn_relu_conv3x3_kernel(%arg0: i32, %arg1: memref<1x16x16x8xf32, #tpu.memory_space<vmem>>, %arg2: memref<1x8xf32, #tpu.memory_space<vmem>>, %arg3: memref<1x8xf32, #tpu.memory_space<vmem>>, %arg4: memref<72x8xf32, #tpu.memory_space<vmem>>, %arg5: memref<1x8xf32, #tpu.memory_space<vmem>>, %arg6: memref<1x16x16x8xf32, #tpu.memory_space<vmem>>, %arg7: memref<1x2x8xf32, #tpu.memory_space<vmem>>, %arg8: memref<18x18x8xf32, #tpu.memory_space<vmem>>, %arg9: memref<256x72xf32, #tpu.memory_space<vmem>>) attributes {dimension_semantics = [#tpu.dimension_semantics<parallel>], iteration_bounds = array<i64: 2>, scalar_prefetch = 0 : i64, scratch_operands = 2 : i64, tpu.core_type = #tpu.core_type<tc>, window_params = [{transform_indices = @transform_0, window_bounds = array<i64: 1, 16, 16, 8>}, {pipeline_mode = #tpu.pipeline_mode<synchronous>, transform_indices = @transform_1, window_bounds = array<i64: 1, 8>}, {pipeline_mode = #tpu.pipeline_mode<synchronous>, transform_indices = @transform_2, window_bounds = array<i64: 1, 8>}, {pipeline_mode = #tpu.pipeline_mode<synchronous>, transform_indices = @transform_3, window_bounds = array<i64: 72, 8>}, {pipeline_mode = #tpu.pipeline_mode<synchronous>, transform_indices = @transform_4, window_bounds = array<i64: 1, 8>}, {transform_indices = @transform_5, window_bounds = array<i64: 1, 16, 16, 8>}, {transform_indices = @transform_6, window_bounds = array<i64: 1, 2, 8>}]} {
    %c0 = arith.constant 0 : index
    %c0_0 = arith.constant 0 : index
    %c0_1 = arith.constant 0 : index
    %c0_2 = arith.constant 0 : index
    %0 = vector.load %arg1[%c0, %c0_0, %c0_1, %c0_2] : memref<1x16x16x8xf32, #tpu.memory_space<vmem>>, vector<1x16x16x8xf32>
    %1 = vector.shape_cast %0 : vector<1x16x16x8xf32> to vector<16x16x8xf32>
    %c0_3 = arith.constant 0 : index
    %c0_4 = arith.constant 0 : index
    %2 = vector.load %arg2[%c0_3, %c0_4] : memref<1x8xf32, #tpu.memory_space<vmem>>, vector<1x8xf32>
    %3 = vector.shape_cast %2 : vector<1x8xf32> to vector<1x1x8xf32>
    %4 = vector.broadcast %3 : vector<1x1x8xf32> to vector<16x16x8xf32>
    %5 = arith.mulf %1, %4 : vector<16x16x8xf32>
    %c0_5 = arith.constant 0 : index
    %c0_6 = arith.constant 0 : index
    %6 = vector.load %arg3[%c0_5, %c0_6] : memref<1x8xf32, #tpu.memory_space<vmem>>, vector<1x8xf32>
    %7 = vector.shape_cast %6 : vector<1x8xf32> to vector<1x1x8xf32>
    %8 = vector.broadcast %7 : vector<1x1x8xf32> to vector<16x16x8xf32>
    %9 = arith.addf %5, %8 : vector<16x16x8xf32>
    %cst = arith.constant 0.000000e+00 : f32
    %10 = vector.broadcast %cst : f32 to vector<16x16x8xf32>
    %11 = arith.maximumf %9, %10 : vector<16x16x8xf32>
    %cst_7 = arith.constant 0.000000e+00 : f32
    %12 = vector.broadcast %cst_7 : f32 to vector<18x18x8xf32>
    %c0_8 = arith.constant 0 : index
    %c0_9 = arith.constant 0 : index
    %c0_10 = arith.constant 0 : index
    %13 = vector.load %arg8[%c0_8, %c0_9, %c0_10] : memref<18x18x8xf32, #tpu.memory_space<vmem>>, vector<18x18x8xf32>
    tpu.vector_store %arg8[%c0_8, %c0_9, %c0_10], %12 {strides = array<i32>} : memref<18x18x8xf32, #tpu.memory_space<vmem>>, vector<18x18x8xf32>,
    %c1 = arith.constant 1 : index
    %c1_11 = arith.constant 1 : index
    %c0_12 = arith.constant 0 : index
    %14 = vector.load %arg8[%c1, %c1_11, %c0_12] : memref<18x18x8xf32, #tpu.memory_space<vmem>>, vector<16x16x8xf32>
    tpu.vector_store %arg8[%c1, %c1_11, %c0_12], %11 {strides = array<i32>} : memref<18x18x8xf32, #tpu.memory_space<vmem>>, vector<16x16x8xf32>,
    %c0_13 = arith.constant 0 : index
    %c0_14 = arith.constant 0 : index
    %c0_15 = arith.constant 0 : index
    %15 = vector.load %arg8[%c0_13, %c0_14, %c0_15] : memref<18x18x8xf32, #tpu.memory_space<vmem>>, vector<16x16x8xf32>
    %16 = vector.shape_cast %15 : vector<16x16x8xf32> to vector<256x8xf32>
    %c0_16 = arith.constant 0 : index
    %c0_17 = arith.constant 0 : index
    %17 = vector.load %arg9[%c0_16, %c0_17] : memref<256x72xf32, #tpu.memory_space<vmem>>, vector<256x8xf32>
    tpu.vector_store %arg9[%c0_16, %c0_17], %16 {strides = array<i32>} : memref<256x72xf32, #tpu.memory_space<vmem>>, vector<256x8xf32>,
    %c0_18 = arith.constant 0 : index
    %c1_19 = arith.constant 1 : index
    %c0_20 = arith.constant 0 : index
    %18 = vector.load %arg8[%c0_18, %c1_19, %c0_20] : memref<18x18x8xf32, #tpu.memory_space<vmem>>, vector<16x16x8xf32>
    %19 = vector.shape_cast %18 : vector<16x16x8xf32> to vector<256x8xf32>
    %c0_21 = arith.constant 0 : index
    %c8 = arith.constant 8 : index
    %20 = vector.load %arg9[%c0_21, %c8] : memref<256x72xf32, #tpu.memory_space<vmem>>, vector<256x8xf32>
    tpu.vector_store %arg9[%c0_21, %c8], %19 {strides = array<i32>} : memref<256x72xf32, #tpu.memory_space<vmem>>, vector<256x8xf32>,
    %c0_22 = arith.constant 0 : index
    %c2 = arith.constant 2 : index
    %c0_23 = arith.constant 0 : index
    %21 = vector.load %arg8[%c0_22, %c2, %c0_23] : memref<18x18x8xf32, #tpu.memory_space<vmem>>, vector<16x16x8xf32>
    %22 = vector.shape_cast %21 : vector<16x16x8xf32> to vector<256x8xf32>
    %c0_24 = arith.constant 0 : index
    %c16 = arith.constant 16 : index
    %23 = vector.load %arg9[%c0_24, %c16] : memref<256x72xf32, #tpu.memory_space<vmem>>, vector<256x8xf32>
    tpu.vector_store %arg9[%c0_24, %c16], %22 {strides = array<i32>} : memref<256x72xf32, #tpu.memory_space<vmem>>, vector<256x8xf32>,
    %c1_25 = arith.constant 1 : index
    %c0_26 = arith.constant 0 : index
    %c0_27 = arith.constant 0 : index
    %24 = vector.load %arg8[%c1_25, %c0_26, %c0_27] : memref<18x18x8xf32, #tpu.memory_space<vmem>>, vector<16x16x8xf32>
    %25 = vector.shape_cast %24 : vector<16x16x8xf32> to vector<256x8xf32>
    %c0_28 = arith.constant 0 : index
    %c24 = arith.constant 24 : index
    %26 = vector.load %arg9[%c0_28, %c24] : memref<256x72xf32, #tpu.memory_space<vmem>>, vector<256x8xf32>
    tpu.vector_store %arg9[%c0_28, %c24], %25 {strides = array<i32>} : memref<256x72xf32, #tpu.memory_space<vmem>>, vector<256x8xf32>,
    %c1_29 = arith.constant 1 : index
    %c1_30 = arith.constant 1 : index
    %c0_31 = arith.constant 0 : index
    %27 = vector.load %arg8[%c1_29, %c1_30, %c0_31] : memref<18x18x8xf32, #tpu.memory_space<vmem>>, vector<16x16x8xf32>
    %28 = vector.shape_cast %27 : vector<16x16x8xf32> to vector<256x8xf32>
    %c0_32 = arith.constant 0 : index
    %c32 = arith.constant 32 : index
    %29 = vector.load %arg9[%c0_32, %c32] : memref<256x72xf32, #tpu.memory_space<vmem>>, vector<256x8xf32>
    tpu.vector_store %arg9[%c0_32, %c32], %28 {strides = array<i32>} : memref<256x72xf32, #tpu.memory_space<vmem>>, vector<256x8xf32>,
    %c1_33 = arith.constant 1 : index
    %c2_34 = arith.constant 2 : index
    %c0_35 = arith.constant 0 : index
    %30 = vector.load %arg8[%c1_33, %c2_34, %c0_35] : memref<18x18x8xf32, #tpu.memory_space<vmem>>, vector<16x16x8xf32>
    %31 = vector.shape_cast %30 : vector<16x16x8xf32> to vector<256x8xf32>
    %c0_36 = arith.constant 0 : index
    %c40 = arith.constant 40 : index
    %32 = vector.load %arg9[%c0_36, %c40] : memref<256x72xf32, #tpu.memory_space<vmem>>, vector<256x8xf32>
    tpu.vector_store %arg9[%c0_36, %c40], %31 {strides = array<i32>} : memref<256x72xf32, #tpu.memory_space<vmem>>, vector<256x8xf32>,
    %c2_37 = arith.constant 2 : index
    %c0_38 = arith.constant 0 : index
    %c0_39 = arith.constant 0 : index
    %33 = vector.load %arg8[%c2_37, %c0_38, %c0_39] : memref<18x18x8xf32, #tpu.memory_space<vmem>>, vector<16x16x8xf32>
    %34 = vector.shape_cast %33 : vector<16x16x8xf32> to vector<256x8xf32>
    %c0_40 = arith.constant 0 : index
    %c48 = arith.constant 48 : index
    %35 = vector.load %arg9[%c0_40, %c48] : memref<256x72xf32, #tpu.memory_space<vmem>>, vector<256x8xf32>
    tpu.vector_store %arg9[%c0_40, %c48], %34 {strides = array<i32>} : memref<256x72xf32, #tpu.memory_space<vmem>>, vector<256x8xf32>,
    %c2_41 = arith.constant 2 : index
    %c1_42 = arith.constant 1 : index
    %c0_43 = arith.constant 0 : index
    %36 = vector.load %arg8[%c2_41, %c1_42, %c0_43] : memref<18x18x8xf32, #tpu.memory_space<vmem>>, vector<16x16x8xf32>
    %37 = vector.shape_cast %36 : vector<16x16x8xf32> to vector<256x8xf32>
    %c0_44 = arith.constant 0 : index
    %c56 = arith.constant 56 : index
    %38 = vector.load %arg9[%c0_44, %c56] : memref<256x72xf32, #tpu.memory_space<vmem>>, vector<256x8xf32>
    tpu.vector_store %arg9[%c0_44, %c56], %37 {strides = array<i32>} : memref<256x72xf32, #tpu.memory_space<vmem>>, vector<256x8xf32>,
    %c2_45 = arith.constant 2 : index
    %c2_46 = arith.constant 2 : index
    %c0_47 = arith.constant 0 : index
    %39 = vector.load %arg8[%c2_45, %c2_46, %c0_47] : memref<18x18x8xf32, #tpu.memory_space<vmem>>, vector<16x16x8xf32>
    %40 = vector.shape_cast %39 : vector<16x16x8xf32> to vector<256x8xf32>
    %c0_48 = arith.constant 0 : index
    %c64 = arith.constant 64 : index
    %41 = vector.load %arg9[%c0_48, %c64] : memref<256x72xf32, #tpu.memory_space<vmem>>, vector<256x8xf32>
    tpu.vector_store %arg9[%c0_48, %c64], %40 {strides = array<i32>} : memref<256x72xf32, #tpu.memory_space<vmem>>, vector<256x8xf32>,
    %c0_49 = arith.constant 0 : index
    %c0_50 = arith.constant 0 : index
    %42 = vector.load %arg9[%c0_49, %c0_50] : memref<256x72xf32, #tpu.memory_space<vmem>>, vector<256x72xf32>
    %c0_51 = arith.constant 0 : index
    %c0_52 = arith.constant 0 : index
    %43 = vector.load %arg4[%c0_51, %c0_52] : memref<72x8xf32, #tpu.memory_space<vmem>>, vector<72x8xf32>
    %cst_53 = arith.constant dense<0.000000e+00> : vector<256x8xf32>
    %44 = tpu.matmul %42, %43, %cst_53 {dimension_numbers = #tpu.dot_dimension_numbers<[1], [0], [0], [1], [0, 0, 1, 1], [], []>} : vector<256x72xf32>, vector<72x8xf32>, vector<256x8xf32> -> vector<256x8xf32>
    %c0_54 = arith.constant 0 : index
    %c0_55 = arith.constant 0 : index
    %45 = vector.load %arg5[%c0_54, %c0_55] : memref<1x8xf32, #tpu.memory_space<vmem>>, vector<1x8xf32>
    %46 = vector.broadcast %45 : vector<1x8xf32> to vector<256x8xf32>
    %47 = arith.addf %44, %46 : vector<256x8xf32>
    %48 = vector.shape_cast %47 : vector<256x8xf32> to vector<16x16x8xf32>
    %c0_56 = arith.constant 0 : index
    %c0_57 = arith.constant 0 : index
    %c0_58 = arith.constant 0 : index
    %c0_59 = arith.constant 0 : index
    %49 = vector.load %arg6[%c0_56, %c0_57, %c0_58, %c0_59] : memref<1x16x16x8xf32, #tpu.memory_space<vmem>>, vector<1x16x16x8xf32>
    %50 = vector.shape_cast %49 : vector<1x16x16x8xf32> to vector<16x16x8xf32>
    %51 = vector.shape_cast %48 : vector<16x16x8xf32> to vector<1x16x16x8xf32>
    tpu.vector_store %arg6[%c0_56, %c0_57, %c0_58, %c0_59], %51 {strides = array<i32>} : memref<1x16x16x8xf32, #tpu.memory_space<vmem>>, vector<1x16x16x8xf32>,
    %cst_60 = arith.constant dense<0.000000e+00> : vector<8xf32>
    %52 = vector.multi_reduction <add>, %47, %cst_60 [0] : vector<256x8xf32> to vector<8xf32>
    %53 = vector.shape_cast %52 : vector<8xf32> to vector<1x8xf32>
    %c0_61 = arith.constant 0 : index
    %c0_62 = arith.constant 0 : index
    %c0_63 = arith.constant 0 : index
    %54 = vector.load %arg7[%c0_61, %c0_62, %c0_63] : memref<1x2x8xf32, #tpu.memory_space<vmem>>, vector<1x1x8xf32>
    %55 = vector.shape_cast %54 : vector<1x1x8xf32> to vector<1x8xf32>
    %56 = vector.shape_cast %53 : vector<1x8xf32> to vector<1x1x8xf32>
    tpu.vector_store %arg7[%c0_61, %c0_62, %c0_63], %56 {strides = array<i32>} : memref<1x2x8xf32, #tpu.memory_space<vmem>>, vector<1x1x8xf32>,
    %57 = arith.mulf %47, %47 : vector<256x8xf32>
    %cst_64 = arith.constant dense<0.000000e+00> : vector<8xf32>
    %58 = vector.multi_reduction <add>, %57, %cst_64 [0] : vector<256x8xf32> to vector<8xf32>
    %59 = vector.shape_cast %58 : vector<8xf32> to vector<1x8xf32>
    %c0_65 = arith.constant 0 : index
    %c1_66 = arith.constant 1 : index
    %c0_67 = arith.constant 0 : index
    %60 = vector.load %arg7[%c0_65, %c1_66, %c0_67] : memref<1x2x8xf32, #tpu.memory_space<vmem>>, vector<1x1x8xf32>
    %61 = vector.shape_cast %60 : vector<1x1x8xf32> to vector<1x8xf32>
    %62 = vector.shape_cast %59 : vector<1x8xf32> to vector<1x1x8xf32>
    tpu.vector_store %arg7[%c0_65, %c1_66, %c0_67], %62 {strides = array<i32>} : memref<1x2x8xf32, #tpu.memory_space<vmem>>, vector<1x1x8xf32>,
    return
  }
  func.func @transform_0(%arg0: i32) -> (i32, i32, i32, i32) {
    %c0_i32 = arith.constant 0 : i32
    %c0_i32_0 = arith.constant 0 : i32
    %c0_i32_1 = arith.constant 0 : i32
    %c0_i32_2 = arith.constant 0 : i32
    return %arg0, %c0_i32, %c0_i32_0, %c0_i32_1 : i32, i32, i32, i32
  }
  func.func @transform_1(%arg0: i32) -> (i32, i32) {
    %c0_i32 = arith.constant 0 : i32
    %c0_i32_0 = arith.constant 0 : i32
    %c0_i32_1 = arith.constant 0 : i32
    return %c0_i32, %c0_i32_0 : i32, i32
  }
  func.func @transform_2(%arg0: i32) -> (i32, i32) {
    %c0_i32 = arith.constant 0 : i32
    %c0_i32_0 = arith.constant 0 : i32
    %c0_i32_1 = arith.constant 0 : i32
    return %c0_i32, %c0_i32_0 : i32, i32
  }
  func.func @transform_3(%arg0: i32) -> (i32, i32) {
    %c0_i32 = arith.constant 0 : i32
    %c0_i32_0 = arith.constant 0 : i32
    %c0_i32_1 = arith.constant 0 : i32
    return %c0_i32, %c0_i32_0 : i32, i32
  }
  func.func @transform_4(%arg0: i32) -> (i32, i32) {
    %c0_i32 = arith.constant 0 : i32
    %c0_i32_0 = arith.constant 0 : i32
    %c0_i32_1 = arith.constant 0 : i32
    return %c0_i32, %c0_i32_0 : i32, i32
  }
  func.func @transform_5(%arg0: i32) -> (i32, i32, i32, i32) {
    %c0_i32 = arith.constant 0 : i32
    %c0_i32_0 = arith.constant 0 : i32
    %c0_i32_1 = arith.constant 0 : i32
    %c0_i32_2 = arith.constant 0 : i32
    return %arg0, %c0_i32, %c0_i32_0, %c0_i32_1 : i32, i32, i32, i32
  }
  func.func @transform_6(%arg0: i32) -> (i32, i32, i32) {
    %c0_i32 = arith.constant 0 : i32
    %c0_i32_0 = arith.constant 0 : i32
    %c0_i32_1 = arith.constant 0 : i32
    return %arg0, %c0_i32, %c0_i32_0 : i32, i32, i32
  }
}

module attributes {stable_mosaic.version = 11 : i64} {
  func.func @_bn_relu_cat_conv3x3_kernel(%arg0: i32, %arg1: memref<1x16x16x8xf32, #tpu.memory_space<vmem>>, %arg2: memref<1x16x16x8xf32, #tpu.memory_space<vmem>>, %arg3: memref<1x8xf32, #tpu.memory_space<vmem>>, %arg4: memref<1x8xf32, #tpu.memory_space<vmem>>, %arg5: memref<1x8xf32, #tpu.memory_space<vmem>>, %arg6: memref<1x8xf32, #tpu.memory_space<vmem>>, %arg7: memref<144x8xf32, #tpu.memory_space<vmem>>, %arg8: memref<1x8xf32, #tpu.memory_space<vmem>>, %arg9: memref<1x16x16x8xf32, #tpu.memory_space<vmem>>, %arg10: memref<1x2x8xf32, #tpu.memory_space<vmem>>, %arg11: memref<18x18x16xf32, #tpu.memory_space<vmem>>, %arg12: memref<256x144xf32, #tpu.memory_space<vmem>>) attributes {dimension_semantics = [#tpu.dimension_semantics<parallel>], iteration_bounds = array<i64: 2>, scalar_prefetch = 0 : i64, scratch_operands = 2 : i64, tpu.core_type = #tpu.core_type<tc>, window_params = [{transform_indices = @transform_0, window_bounds = array<i64: 1, 16, 16, 8>}, {transform_indices = @transform_1, window_bounds = array<i64: 1, 16, 16, 8>}, {pipeline_mode = #tpu.pipeline_mode<synchronous>, transform_indices = @transform_2, window_bounds = array<i64: 1, 8>}, {pipeline_mode = #tpu.pipeline_mode<synchronous>, transform_indices = @transform_3, window_bounds = array<i64: 1, 8>}, {pipeline_mode = #tpu.pipeline_mode<synchronous>, transform_indices = @transform_4, window_bounds = array<i64: 1, 8>}, {pipeline_mode = #tpu.pipeline_mode<synchronous>, transform_indices = @transform_5, window_bounds = array<i64: 1, 8>}, {pipeline_mode = #tpu.pipeline_mode<synchronous>, transform_indices = @transform_6, window_bounds = array<i64: 144, 8>}, {pipeline_mode = #tpu.pipeline_mode<synchronous>, transform_indices = @transform_7, window_bounds = array<i64: 1, 8>}, {transform_indices = @transform_8, window_bounds = array<i64: 1, 16, 16, 8>}, {transform_indices = @transform_9, window_bounds = array<i64: 1, 2, 8>}]} {
    %c0 = arith.constant 0 : index
    %c0_0 = arith.constant 0 : index
    %c0_1 = arith.constant 0 : index
    %c0_2 = arith.constant 0 : index
    %0 = vector.load %arg1[%c0, %c0_0, %c0_1, %c0_2] : memref<1x16x16x8xf32, #tpu.memory_space<vmem>>, vector<1x16x16x8xf32>
    %1 = vector.shape_cast %0 : vector<1x16x16x8xf32> to vector<16x16x8xf32>
    %c0_3 = arith.constant 0 : index
    %c0_4 = arith.constant 0 : index
    %2 = vector.load %arg3[%c0_3, %c0_4] : memref<1x8xf32, #tpu.memory_space<vmem>>, vector<1x8xf32>
    %3 = vector.shape_cast %2 : vector<1x8xf32> to vector<1x1x8xf32>
    %4 = vector.broadcast %3 : vector<1x1x8xf32> to vector<16x16x8xf32>
    %5 = arith.mulf %1, %4 : vector<16x16x8xf32>
    %c0_5 = arith.constant 0 : index
    %c0_6 = arith.constant 0 : index
    %6 = vector.load %arg4[%c0_5, %c0_6] : memref<1x8xf32, #tpu.memory_space<vmem>>, vector<1x8xf32>
    %7 = vector.shape_cast %6 : vector<1x8xf32> to vector<1x1x8xf32>
    %8 = vector.broadcast %7 : vector<1x1x8xf32> to vector<16x16x8xf32>
    %9 = arith.addf %5, %8 : vector<16x16x8xf32>
    %cst = arith.constant 0.000000e+00 : f32
    %10 = vector.broadcast %cst : f32 to vector<16x16x8xf32>
    %11 = arith.maximumf %9, %10 : vector<16x16x8xf32>
    %c0_7 = arith.constant 0 : index
    %c0_8 = arith.constant 0 : index
    %c0_9 = arith.constant 0 : index
    %c0_10 = arith.constant 0 : index
    %12 = vector.load %arg2[%c0_7, %c0_8, %c0_9, %c0_10] : memref<1x16x16x8xf32, #tpu.memory_space<vmem>>, vector<1x16x16x8xf32>
    %13 = vector.shape_cast %12 : vector<1x16x16x8xf32> to vector<16x16x8xf32>
    %c0_11 = arith.constant 0 : index
    %c0_12 = arith.constant 0 : index
    %14 = vector.load %arg5[%c0_11, %c0_12] : memref<1x8xf32, #tpu.memory_space<vmem>>, vector<1x8xf32>
    %15 = vector.shape_cast %14 : vector<1x8xf32> to vector<1x1x8xf32>
    %16 = vector.broadcast %15 : vector<1x1x8xf32> to vector<16x16x8xf32>
    %17 = arith.mulf %13, %16 : vector<16x16x8xf32>
    %c0_13 = arith.constant 0 : index
    %c0_14 = arith.constant 0 : index
    %18 = vector.load %arg6[%c0_13, %c0_14] : memref<1x8xf32, #tpu.memory_space<vmem>>, vector<1x8xf32>
    %19 = vector.shape_cast %18 : vector<1x8xf32> to vector<1x1x8xf32>
    %20 = vector.broadcast %19 : vector<1x1x8xf32> to vector<16x16x8xf32>
    %21 = arith.addf %17, %20 : vector<16x16x8xf32>
    %cst_15 = arith.constant 0.000000e+00 : f32
    %22 = vector.broadcast %cst_15 : f32 to vector<16x16x8xf32>
    %23 = arith.maximumf %21, %22 : vector<16x16x8xf32>
    %cst_16 = arith.constant 0.000000e+00 : f32
    %24 = vector.broadcast %cst_16 : f32 to vector<18x18x16xf32>
    %c0_17 = arith.constant 0 : index
    %c0_18 = arith.constant 0 : index
    %c0_19 = arith.constant 0 : index
    %25 = vector.load %arg11[%c0_17, %c0_18, %c0_19] : memref<18x18x16xf32, #tpu.memory_space<vmem>>, vector<18x18x16xf32>
    tpu.vector_store %arg11[%c0_17, %c0_18, %c0_19], %24 {strides = array<i32>} : memref<18x18x16xf32, #tpu.memory_space<vmem>>, vector<18x18x16xf32>,
    %c1 = arith.constant 1 : index
    %c1_20 = arith.constant 1 : index
    %c0_21 = arith.constant 0 : index
    %26 = vector.load %arg11[%c1, %c1_20, %c0_21] : memref<18x18x16xf32, #tpu.memory_space<vmem>>, vector<16x16x8xf32>
    tpu.vector_store %arg11[%c1, %c1_20, %c0_21], %11 {strides = array<i32>} : memref<18x18x16xf32, #tpu.memory_space<vmem>>, vector<16x16x8xf32>,
    %c1_22 = arith.constant 1 : index
    %c1_23 = arith.constant 1 : index
    %c8 = arith.constant 8 : index
    %27 = vector.load %arg11[%c1_22, %c1_23, %c8] : memref<18x18x16xf32, #tpu.memory_space<vmem>>, vector<16x16x8xf32>
    tpu.vector_store %arg11[%c1_22, %c1_23, %c8], %23 {strides = array<i32>} : memref<18x18x16xf32, #tpu.memory_space<vmem>>, vector<16x16x8xf32>,
    %c0_24 = arith.constant 0 : index
    %c0_25 = arith.constant 0 : index
    %c0_26 = arith.constant 0 : index
    %28 = vector.load %arg11[%c0_24, %c0_25, %c0_26] : memref<18x18x16xf32, #tpu.memory_space<vmem>>, vector<16x16x16xf32>
    %29 = vector.shape_cast %28 : vector<16x16x16xf32> to vector<256x16xf32>
    %c0_27 = arith.constant 0 : index
    %c0_28 = arith.constant 0 : index
    %30 = vector.load %arg12[%c0_27, %c0_28] : memref<256x144xf32, #tpu.memory_space<vmem>>, vector<256x16xf32>
    tpu.vector_store %arg12[%c0_27, %c0_28], %29 {strides = array<i32>} : memref<256x144xf32, #tpu.memory_space<vmem>>, vector<256x16xf32>,
    %c0_29 = arith.constant 0 : index
    %c1_30 = arith.constant 1 : index
    %c0_31 = arith.constant 0 : index
    %31 = vector.load %arg11[%c0_29, %c1_30, %c0_31] : memref<18x18x16xf32, #tpu.memory_space<vmem>>, vector<16x16x16xf32>
    %32 = vector.shape_cast %31 : vector<16x16x16xf32> to vector<256x16xf32>
    %c0_32 = arith.constant 0 : index
    %c16 = arith.constant 16 : index
    %33 = vector.load %arg12[%c0_32, %c16] : memref<256x144xf32, #tpu.memory_space<vmem>>, vector<256x16xf32>
    tpu.vector_store %arg12[%c0_32, %c16], %32 {strides = array<i32>} : memref<256x144xf32, #tpu.memory_space<vmem>>, vector<256x16xf32>,
    %c0_33 = arith.constant 0 : index
    %c2 = arith.constant 2 : index
    %c0_34 = arith.constant 0 : index
    %34 = vector.load %arg11[%c0_33, %c2, %c0_34] : memref<18x18x16xf32, #tpu.memory_space<vmem>>, vector<16x16x16xf32>
    %35 = vector.shape_cast %34 : vector<16x16x16xf32> to vector<256x16xf32>
    %c0_35 = arith.constant 0 : index
    %c32 = arith.constant 32 : index
    %36 = vector.load %arg12[%c0_35, %c32] : memref<256x144xf32, #tpu.memory_space<vmem>>, vector<256x16xf32>
    tpu.vector_store %arg12[%c0_35, %c32], %35 {strides = array<i32>} : memref<256x144xf32, #tpu.memory_space<vmem>>, vector<256x16xf32>,
    %c1_36 = arith.constant 1 : index
    %c0_37 = arith.constant 0 : index
    %c0_38 = arith.constant 0 : index
    %37 = vector.load %arg11[%c1_36, %c0_37, %c0_38] : memref<18x18x16xf32, #tpu.memory_space<vmem>>, vector<16x16x16xf32>
    %38 = vector.shape_cast %37 : vector<16x16x16xf32> to vector<256x16xf32>
    %c0_39 = arith.constant 0 : index
    %c48 = arith.constant 48 : index
    %39 = vector.load %arg12[%c0_39, %c48] : memref<256x144xf32, #tpu.memory_space<vmem>>, vector<256x16xf32>
    tpu.vector_store %arg12[%c0_39, %c48], %38 {strides = array<i32>} : memref<256x144xf32, #tpu.memory_space<vmem>>, vector<256x16xf32>,
    %c1_40 = arith.constant 1 : index
    %c1_41 = arith.constant 1 : index
    %c0_42 = arith.constant 0 : index
    %40 = vector.load %arg11[%c1_40, %c1_41, %c0_42] : memref<18x18x16xf32, #tpu.memory_space<vmem>>, vector<16x16x16xf32>
    %41 = vector.shape_cast %40 : vector<16x16x16xf32> to vector<256x16xf32>
    %c0_43 = arith.constant 0 : index
    %c64 = arith.constant 64 : index
    %42 = vector.load %arg12[%c0_43, %c64] : memref<256x144xf32, #tpu.memory_space<vmem>>, vector<256x16xf32>
    tpu.vector_store %arg12[%c0_43, %c64], %41 {strides = array<i32>} : memref<256x144xf32, #tpu.memory_space<vmem>>, vector<256x16xf32>,
    %c1_44 = arith.constant 1 : index
    %c2_45 = arith.constant 2 : index
    %c0_46 = arith.constant 0 : index
    %43 = vector.load %arg11[%c1_44, %c2_45, %c0_46] : memref<18x18x16xf32, #tpu.memory_space<vmem>>, vector<16x16x16xf32>
    %44 = vector.shape_cast %43 : vector<16x16x16xf32> to vector<256x16xf32>
    %c0_47 = arith.constant 0 : index
    %c80 = arith.constant 80 : index
    %45 = vector.load %arg12[%c0_47, %c80] : memref<256x144xf32, #tpu.memory_space<vmem>>, vector<256x16xf32>
    tpu.vector_store %arg12[%c0_47, %c80], %44 {strides = array<i32>} : memref<256x144xf32, #tpu.memory_space<vmem>>, vector<256x16xf32>,
    %c2_48 = arith.constant 2 : index
    %c0_49 = arith.constant 0 : index
    %c0_50 = arith.constant 0 : index
    %46 = vector.load %arg11[%c2_48, %c0_49, %c0_50] : memref<18x18x16xf32, #tpu.memory_space<vmem>>, vector<16x16x16xf32>
    %47 = vector.shape_cast %46 : vector<16x16x16xf32> to vector<256x16xf32>
    %c0_51 = arith.constant 0 : index
    %c96 = arith.constant 96 : index
    %48 = vector.load %arg12[%c0_51, %c96] : memref<256x144xf32, #tpu.memory_space<vmem>>, vector<256x16xf32>
    tpu.vector_store %arg12[%c0_51, %c96], %47 {strides = array<i32>} : memref<256x144xf32, #tpu.memory_space<vmem>>, vector<256x16xf32>,
    %c2_52 = arith.constant 2 : index
    %c1_53 = arith.constant 1 : index
    %c0_54 = arith.constant 0 : index
    %49 = vector.load %arg11[%c2_52, %c1_53, %c0_54] : memref<18x18x16xf32, #tpu.memory_space<vmem>>, vector<16x16x16xf32>
    %50 = vector.shape_cast %49 : vector<16x16x16xf32> to vector<256x16xf32>
    %c0_55 = arith.constant 0 : index
    %c112 = arith.constant 112 : index
    %51 = vector.load %arg12[%c0_55, %c112] : memref<256x144xf32, #tpu.memory_space<vmem>>, vector<256x16xf32>
    tpu.vector_store %arg12[%c0_55, %c112], %50 {strides = array<i32>} : memref<256x144xf32, #tpu.memory_space<vmem>>, vector<256x16xf32>,
    %c2_56 = arith.constant 2 : index
    %c2_57 = arith.constant 2 : index
    %c0_58 = arith.constant 0 : index
    %52 = vector.load %arg11[%c2_56, %c2_57, %c0_58] : memref<18x18x16xf32, #tpu.memory_space<vmem>>, vector<16x16x16xf32>
    %53 = vector.shape_cast %52 : vector<16x16x16xf32> to vector<256x16xf32>
    %c0_59 = arith.constant 0 : index
    %c128 = arith.constant 128 : index
    %54 = vector.load %arg12[%c0_59, %c128] : memref<256x144xf32, #tpu.memory_space<vmem>>, vector<256x16xf32>
    tpu.vector_store %arg12[%c0_59, %c128], %53 {strides = array<i32>} : memref<256x144xf32, #tpu.memory_space<vmem>>, vector<256x16xf32>,
    %c0_60 = arith.constant 0 : index
    %c0_61 = arith.constant 0 : index
    %55 = vector.load %arg12[%c0_60, %c0_61] : memref<256x144xf32, #tpu.memory_space<vmem>>, vector<256x144xf32>
    %c0_62 = arith.constant 0 : index
    %c0_63 = arith.constant 0 : index
    %56 = vector.load %arg7[%c0_62, %c0_63] : memref<144x8xf32, #tpu.memory_space<vmem>>, vector<144x8xf32>
    %cst_64 = arith.constant dense<0.000000e+00> : vector<256x8xf32>
    %57 = tpu.matmul %55, %56, %cst_64 {dimension_numbers = #tpu.dot_dimension_numbers<[1], [0], [0], [1], [0, 0, 1, 1], [], []>} : vector<256x144xf32>, vector<144x8xf32>, vector<256x8xf32> -> vector<256x8xf32>
    %c0_65 = arith.constant 0 : index
    %c0_66 = arith.constant 0 : index
    %58 = vector.load %arg8[%c0_65, %c0_66] : memref<1x8xf32, #tpu.memory_space<vmem>>, vector<1x8xf32>
    %59 = vector.broadcast %58 : vector<1x8xf32> to vector<256x8xf32>
    %60 = arith.addf %57, %59 : vector<256x8xf32>
    %61 = vector.shape_cast %60 : vector<256x8xf32> to vector<16x16x8xf32>
    %c0_67 = arith.constant 0 : index
    %c0_68 = arith.constant 0 : index
    %c0_69 = arith.constant 0 : index
    %c0_70 = arith.constant 0 : index
    %62 = vector.load %arg9[%c0_67, %c0_68, %c0_69, %c0_70] : memref<1x16x16x8xf32, #tpu.memory_space<vmem>>, vector<1x16x16x8xf32>
    %63 = vector.shape_cast %62 : vector<1x16x16x8xf32> to vector<16x16x8xf32>
    %64 = vector.shape_cast %61 : vector<16x16x8xf32> to vector<1x16x16x8xf32>
    tpu.vector_store %arg9[%c0_67, %c0_68, %c0_69, %c0_70], %64 {strides = array<i32>} : memref<1x16x16x8xf32, #tpu.memory_space<vmem>>, vector<1x16x16x8xf32>,
    %cst_71 = arith.constant dense<0.000000e+00> : vector<8xf32>
    %65 = vector.multi_reduction <add>, %60, %cst_71 [0] : vector<256x8xf32> to vector<8xf32>
    %66 = vector.shape_cast %65 : vector<8xf32> to vector<1x8xf32>
    %c0_72 = arith.constant 0 : index
    %c0_73 = arith.constant 0 : index
    %c0_74 = arith.constant 0 : index
    %67 = vector.load %arg10[%c0_72, %c0_73, %c0_74] : memref<1x2x8xf32, #tpu.memory_space<vmem>>, vector<1x1x8xf32>
    %68 = vector.shape_cast %67 : vector<1x1x8xf32> to vector<1x8xf32>
    %69 = vector.shape_cast %66 : vector<1x8xf32> to vector<1x1x8xf32>
    tpu.vector_store %arg10[%c0_72, %c0_73, %c0_74], %69 {strides = array<i32>} : memref<1x2x8xf32, #tpu.memory_space<vmem>>, vector<1x1x8xf32>,
    %70 = arith.mulf %60, %60 : vector<256x8xf32>
    %cst_75 = arith.constant dense<0.000000e+00> : vector<8xf32>
    %71 = vector.multi_reduction <add>, %70, %cst_75 [0] : vector<256x8xf32> to vector<8xf32>
    %72 = vector.shape_cast %71 : vector<8xf32> to vector<1x8xf32>
    %c0_76 = arith.constant 0 : index
    %c1_77 = arith.constant 1 : index
    %c0_78 = arith.constant 0 : index
    %73 = vector.load %arg10[%c0_76, %c1_77, %c0_78] : memref<1x2x8xf32, #tpu.memory_space<vmem>>, vector<1x1x8xf32>
    %74 = vector.shape_cast %73 : vector<1x1x8xf32> to vector<1x8xf32>
    %75 = vector.shape_cast %72 : vector<1x8xf32> to vector<1x1x8xf32>
    tpu.vector_store %arg10[%c0_76, %c1_77, %c0_78], %75 {strides = array<i32>} : memref<1x2x8xf32, #tpu.memory_space<vmem>>, vector<1x1x8xf32>,
    return
  }
  func.func @transform_0(%arg0: i32) -> (i32, i32, i32, i32) {
    %c0_i32 = arith.constant 0 : i32
    %c0_i32_0 = arith.constant 0 : i32
    %c0_i32_1 = arith.constant 0 : i32
    %c0_i32_2 = arith.constant 0 : i32
    return %arg0, %c0_i32, %c0_i32_0, %c0_i32_1 : i32, i32, i32, i32
  }
  func.func @transform_1(%arg0: i32) -> (i32, i32, i32, i32) {
    %c0_i32 = arith.constant 0 : i32
    %c0_i32_0 = arith.constant 0 : i32
    %c0_i32_1 = arith.constant 0 : i32
    %c0_i32_2 = arith.constant 0 : i32
    return %arg0, %c0_i32, %c0_i32_0, %c0_i32_1 : i32, i32, i32, i32
  }
  func.func @transform_2(%arg0: i32) -> (i32, i32) {
    %c0_i32 = arith.constant 0 : i32
    %c0_i32_0 = arith.constant 0 : i32
    %c0_i32_1 = arith.constant 0 : i32
    return %c0_i32, %c0_i32_0 : i32, i32
  }
  func.func @transform_3(%arg0: i32) -> (i32, i32) {
    %c0_i32 = arith.constant 0 : i32
    %c0_i32_0 = arith.constant 0 : i32
    %c0_i32_1 = arith.constant 0 : i32
    return %c0_i32, %c0_i32_0 : i32, i32
  }
  func.func @transform_4(%arg0: i32) -> (i32, i32) {
    %c0_i32 = arith.constant 0 : i32
    %c0_i32_0 = arith.constant 0 : i32
    %c0_i32_1 = arith.constant 0 : i32
    return %c0_i32, %c0_i32_0 : i32, i32
  }
  func.func @transform_5(%arg0: i32) -> (i32, i32) {
    %c0_i32 = arith.constant 0 : i32
    %c0_i32_0 = arith.constant 0 : i32
    %c0_i32_1 = arith.constant 0 : i32
    return %c0_i32, %c0_i32_0 : i32, i32
  }
  func.func @transform_6(%arg0: i32) -> (i32, i32) {
    %c0_i32 = arith.constant 0 : i32
    %c0_i32_0 = arith.constant 0 : i32
    %c0_i32_1 = arith.constant 0 : i32
    return %c0_i32, %c0_i32_0 : i32, i32
  }
  func.func @transform_7(%arg0: i32) -> (i32, i32) {
    %c0_i32 = arith.constant 0 : i32
    %c0_i32_0 = arith.constant 0 : i32
    %c0_i32_1 = arith.constant 0 : i32
    return %c0_i32, %c0_i32_0 : i32, i32
  }
  func.func @transform_8(%arg0: i32) -> (i32, i32, i32, i32) {
    %c0_i32 = arith.constant 0 : i32
    %c0_i32_0 = arith.constant 0 : i32
    %c0_i32_1 = arith.constant 0 : i32
    %c0_i32_2 = arith.constant 0 : i32
    return %arg0, %c0_i32, %c0_i32_0, %c0_i32_1 : i32, i32, i32, i32
  }
  func.func @transform_9(%arg0: i32) -> (i32, i32, i32) {
    %c0_i32 = arith.constant 0 : i32
    %c0_i32_0 = arith.constant 0 : i32
    %c0_i32_1 = arith.constant 0 : i32
    return %arg0, %c0_i32, %c0_i32_0 : i32, i32, i32
  }
}

module attributes {stable_mosaic.version = 11 : i64} {
  func.func @_bn_relu_kernel(%arg0: i32, %arg1: i32, %arg2: memref<1x8x128xf32, #tpu.memory_space<vmem>>, %arg3: memref<1x128xf32, #tpu.memory_space<vmem>>, %arg4: memref<1x128xf32, #tpu.memory_space<vmem>>, %arg5: memref<1x8x128xf32, #tpu.memory_space<vmem>>) attributes {dimension_semantics = [#tpu.dimension_semantics<parallel>, #tpu.dimension_semantics<parallel>], iteration_bounds = array<i64: 2, 2>, scalar_prefetch = 0 : i64, scratch_operands = 0 : i64, tpu.core_type = #tpu.core_type<tc>, window_params = [{transform_indices = @transform_0, window_bounds = array<i64: 1, 8, 128>}, {pipeline_mode = #tpu.pipeline_mode<synchronous>, transform_indices = @transform_1, window_bounds = array<i64: 1, 128>}, {pipeline_mode = #tpu.pipeline_mode<synchronous>, transform_indices = @transform_2, window_bounds = array<i64: 1, 128>}, {transform_indices = @transform_3, window_bounds = array<i64: 1, 8, 128>}]} {
    %c0 = arith.constant 0 : index
    %c0_0 = arith.constant 0 : index
    %c0_1 = arith.constant 0 : index
    %0 = vector.load %arg2[%c0, %c0_0, %c0_1] : memref<1x8x128xf32, #tpu.memory_space<vmem>>, vector<1x8x128xf32>
    %c0_2 = arith.constant 0 : index
    %c0_3 = arith.constant 0 : index
    %1 = vector.load %arg3[%c0_2, %c0_3] : memref<1x128xf32, #tpu.memory_space<vmem>>, vector<1x128xf32>
    %2 = vector.shape_cast %1 : vector<1x128xf32> to vector<1x1x128xf32>
    %3 = vector.broadcast %2 : vector<1x1x128xf32> to vector<1x8x128xf32>
    %4 = arith.mulf %0, %3 : vector<1x8x128xf32>
    %c0_4 = arith.constant 0 : index
    %c0_5 = arith.constant 0 : index
    %5 = vector.load %arg4[%c0_4, %c0_5] : memref<1x128xf32, #tpu.memory_space<vmem>>, vector<1x128xf32>
    %6 = vector.shape_cast %5 : vector<1x128xf32> to vector<1x1x128xf32>
    %7 = vector.broadcast %6 : vector<1x1x128xf32> to vector<1x8x128xf32>
    %8 = arith.addf %4, %7 : vector<1x8x128xf32>
    %cst = arith.constant 0.000000e+00 : f32
    %9 = vector.broadcast %cst : f32 to vector<1x8x128xf32>
    %10 = arith.maximumf %8, %9 : vector<1x8x128xf32>
    %c0_6 = arith.constant 0 : index
    %c0_7 = arith.constant 0 : index
    %c0_8 = arith.constant 0 : index
    %11 = vector.load %arg5[%c0_6, %c0_7, %c0_8] : memref<1x8x128xf32, #tpu.memory_space<vmem>>, vector<1x8x128xf32>
    tpu.vector_store %arg5[%c0_6, %c0_7, %c0_8], %10 {strides = array<i32>} : memref<1x8x128xf32, #tpu.memory_space<vmem>>, vector<1x8x128xf32>,
    return
  }
  func.func @transform_0(%arg0: i32, %arg1: i32) -> (i32, i32, i32) {
    %c0_i32 = arith.constant 0 : i32
    %c0_i32_0 = arith.constant 0 : i32
    return %arg0, %arg1, %c0_i32 : i32, i32, i32
  }
  func.func @transform_1(%arg0: i32, %arg1: i32) -> (i32, i32) {
    %c0_i32 = arith.constant 0 : i32
    %c0_i32_0 = arith.constant 0 : i32
    %c0_i32_1 = arith.constant 0 : i32
    return %c0_i32, %c0_i32_0 : i32, i32
  }
  func.func @transform_2(%arg0: i32, %arg1: i32) -> (i32, i32) {
    %c0_i32 = arith.constant 0 : i32
    %c0_i32_0 = arith.constant 0 : i32
    %c0_i32_1 = arith.constant 0 : i32
    return %c0_i32, %c0_i32_0 : i32, i32
  }
  func.func @transform_3(%arg0: i32, %arg1: i32) -> (i32, i32, i32) {
    %c0_i32 = arith.constant 0 : i32
    %c0_i32_0 = arith.constant 0 : i32
    return %arg0, %arg1, %c0_i32 : i32, i32, i32
  }
}

</mosaic_0001>

<bundles_post_ra>
// kernel: tile.17
= control target key start
LH: loop header
LB: loop body
LE: loop exit
PB: predicated region body
PF: predicated region fallthrough
CT: control target
= control target key end

     0   :  { %vm7_vm0 = vcmask 64512   ;;  %vm13_vm1 = vcmask 130112   ;;  %s39_s0 = inlined_call_operand.vmem [shape: f32[2,8], index: 0, kind: input, shape index: {}]   ;;  %s40_s1 = inlined_call_operand.vmem [shape: f32[1,16], index: 1, kind: output, shape index: {}]  }
   0x1   :  { %v4_v0 = vld [vmem:[%s39_s0] sm:$0x3]  ;;  %s22_s0 = smov 8  }
   0x2   :  { %5 = vst [vmem:[#allocation1] sm:$0x3] %v4_v0 }
   0x9   :  { %v10_v1 = vld [vmem:[#allocation1 + $0x1] sm:$0x1]   ;;  %v6_v2 = vld [vmem:[#allocation1] sm:$0x1]  }
   0xa   :  { %11 = vrot.lane.b32.xlu0 %v10_v1, %s22_s0  ;;  %8 = vst.msk [vmem:[#allocation0] sm:$0x1] %vm7_vm0, %v6_v2  }
  0x7c   :  { %v12_v3 = vpop.permute.xlu0 %11  }
  0x7d   :  { %14 = vst.msk [vmem:[#allocation0] sm:$0x1] %vm13_vm1, %v12_v3  }
  0x84   :  { %v18_v4 = vld [vmem:[#allocation0] sm:$0x1] }
  0x85   :  { %20 = vst [vmem:[%s40_s1] sm:$0x1] %v18_v4 }

// kernel: tile.16
= control target key start
LH: loop header
LB: loop body
LE: loop exit
PB: predicated region body
PF: predicated region fallthrough
CT: control target
= control target key end

     0   :  { %s22_s0 = inlined_call_operand.vmem [shape: f32[8], index: 0, kind: input, shape index: {}]   ;;  %s23_s1 = inlined_call_operand.vmem [shape: f32[2,8], index: 1, kind: output, shape index: {}]  }
   0x1   :  { %v4_v0 = vld [vmem:[%s22_s0] ss:$0 sm:$0xff] }
   0x2   :  { %5 = vst [vmem:[%s23_s1] sm:$0x3] %v4_v0 }

// kernel: decoder_block_forward.4
= control target key start
LH: loop header
LB: loop body
LE: loop exit
PB: predicated region body
PF: predicated region fallthrough
CT: control target
= control target key end

     0   :  { %s1056_s21 = smov 0   ;;  %s1058_s22 = smov 0   ;;  %s1240_s0 = inlined_call_operand.vmem [shape: f32[2,8,8,8], index: 0, kind: input, shape index: {}]   ;;  %s1241_s1 = inlined_call_operand.vmem [shape: f32[2,16,16,8], index: 1, kind: input, shape index: {}]   ;;  %s1242_s2 = inlined_call_operand.vmem [shape: f32[8,16], index: 2, kind: input, shape index: {}]   ;;  %s1243_s3 = inlined_call_operand.vmem [shape: f32[8,16], index: 3, kind: input, shape index: {}]   ;;  %s1244_s4 = inlined_call_operand.vmem [shape: f32[1,16], index: 4, kind: input, shape index: {}]   ;;  %s1245_s5 = inlined_call_operand.vmem [shape: f32[2,16,8,16], index: 5, kind: output, shape index: {0}]   ;;  %s1246_s6 = inlined_call_operand.vmem [shape: f32[2,2,4,8], index: 6, kind: output, shape index: {1}]  }
   0x1   :  { %s1060_s23 = smov 0   ;;  %s1062_s24 = smov 0  }
   0x2   :  { %s1064_s25 = smov 0  }
   0x3 LB: > { %s26_s26 = sadd.s32 1, %s1010_s23  ;;  %s29_s27 = sadd.s32 1, %s1014_s24  ;;  %s1018_s25 = sphi %s1064_s25, %s17_s25   ;;  %s1014_s24 = sphi %s1062_s24, %s1250_s24   ;;  %s1010_s23 = sphi %s1060_s23, %s1249_s23   ;;  %s1006_s22 = sphi %s1058_s22, %s1248_s22   ;;  %s1002_s21 = sphi %s1056_s21, %s1247_s21  }
   0x4   : > { %p27_p0 = scmp.ge.s32.totalorder %s26_s26, 2  ;;  %p889_p1 = scmp.ge.s32.totalorder %s1018_s25, 1 }
   0x5   : > { %p256_p2 = scmp.lt.s32.totalorder %s1018_s25, 5 }
   0x6   : > { %s1252_s26 = smov (%p27_p0, %s26_s26), 0  ;;  %s1254_s27 = smov (!%p27_p0, %s29_s27), %s1014_s24 }
   0x7   : > { %p257_p3 = pnand %p889_p1, %p256_p2  ;;  %p31_p4 = scmp.ge.s32.totalorder %s1254_s27, 2 }
   0x8   : > { %v356_v0 = vld [vmem:[%s1242_s2] sm:$0xff] (!%p257_p3)  ;;  %s890_s8 = sshll.u32 (!%p257_p3), %s1002_s21, 2  ;;  %p313_p5 = scmp.lt.s32.totalorder (!%p257_p3), %s1006_s22, 1  ;;  %vm363_vm0 = vcmask (!%p257_p3), 64512   ;;  %vm659_vm1 = vcmask (!%p257_p3), 57344   ;;  %vm547_vm2 = vcmask (!%p257_p3), 130048  }
   0x9   : > { %s1256_s27 = smov (%p31_p4, %s1254_s27), 0  ;;  %260 = sbr.rel (%p257_p3) target bundleno = 387 (0x183), region = 40 }
   0xa   : > { %v461_v1 = vld [vmem:[%s1243_s3] sm:$0xff] (!%p257_p3)  ;;  %923 = vmatprep.subr.mxu0 (!%p257_p3), %v356_v0  ;;  %p315_p6 = scmp.lt.s32.totalorder (!%p257_p3), %s890_s8, 7  ;;  %s893_s15 = sshll.u32 (!%p257_p3), %s1002_s21, 3 }
   0xb   : > { %931 = vmatprep.subr.mxu1 (!%p257_p3), %v461_v1  ;;  %924 = vmatpush3.msra.mxu0 (!%p257_p3), %v356_v0  ;;  %p325_p7 = scmp.lt.s32.totalorder (!%p257_p3), %s893_s15, 15  ;;  %p345_p8 = scmp.lt.s32.totalorder (!%p257_p3), %s1002_s21, 1 }
   0xc   : > { %932 = vmatpush3.msra.mxu1 (!%p257_p3), %v461_v1 }
  0x10   : > { %s1258_s22 = smov (!%p313_p5, %s1006_s22), 1  ;;  %s1260_s8 = smov (!%p315_p6, %s890_s8), 7 }
  0x11   : > { %s891_s9 = sshll.u32 %s1258_s22, 3  ;;  %s1262_s15 = smov (!%p325_p7, %s893_s15), 15 }
  0x12   : > { %s318_s10 = sadd.s32 %s891_s9, %s1260_s8  ;;  %s894_s16 = sshll.u32 %s1262_s15, 1 }
  0x13   : > { %s892_s11 = sshll.u32 %s318_s10, 3  ;;  %s895_s17 = sshll.u32 %s1258_s22, 5 }
  0x14   : > { %s320_s14 = scalar_lea.vmem %s1240_s0, %s892_s11  ;;  %s329_s18 = sadd.s32 %s895_s17, %s894_s16 }
  0x15   : > { %v351_v2 = vld [vmem:[%s320_s14] sm:$0xff]  ;;  %v352_v3 = vld [vmem:[%s320_s14 + $0x8] sm:$0xff]  ;;  %v353_v4 = vld [vmem:[%s320_s14 + $0x10] sm:$0xff]  ;;  %s896_s19 = sshll.u32 %s329_s18, 3  ;;  %s1264_s21 = smov (!%p345_p8, %s1002_s21), 1 }
  0x16   : > { %925 = vmatprep.mubr.msk.f32.mxu0 %vm363_vm0, %v351_v2  ;;  %933 = vmatprep.mubr.msk.f32.mxu1 %vm363_vm0, %v351_v2  ;;  %v354_v5 = vld [vmem:[%s320_s14 + $0x18] sm:$0xff]  ;;  %s1117_s29 = scalar_lea.vmem %s1241_s1, %s896_s19  ;;  %s900_s30 = sshll.u32 %s1258_s22, 1 }
  0x17   : > { %926 = vmatmul.mubr.msk.f32.vlgmr.msra.gmra.mrb[0].mxu0 %vm363_vm0, %v352_v3  ;;  %934 = vmatmul.mubr.msk.f32.vlgmr.msra.gmra.mrb[0].mxu1 %vm363_vm0, %v352_v3  ;;  %v556_v6 = vld [vmem:[%s1117_s29] sm:$0xff]  ;;  %v557_v7 = vld [vmem:[%s1117_s29 + $0x8] sm:$0xff]  ;;  %v558_v8 = vld [vmem:[%s1117_s29 + $0x10] sm:$0xff]  ;;  %s348_s7 = sadd.s32 %s900_s30, %s1264_s21  ;;  %s898_s21 = sshll.u32 %s1258_s22, 4 }
  0x18   : > { %928 = vmatprep.mubr.msk.f32.mxu0 %vm363_vm0, %v353_v4  ;;  %936 = vmatprep.mubr.msk.f32.mxu1 %vm363_vm0, %v353_v4  ;;  %v622_v9 = vsel %vm363_vm0, %v556_v6, 0.0  ;;  %v623_v10 = vsel %vm363_vm0, %v557_v7, 0.0  ;;  %v625_v11 = vsel %vm363_vm0, %v558_v8, 0.0  ;;  %v559_v12 = vld [vmem:[%s1117_s29 + $0x18] sm:$0xff]  ;;  %v560_v15 = vld [vmem:[%s1117_s29 + $0x20] sm:$0xff]  ;;  %v561_v18 = vld [vmem:[%s1117_s29 + $0x28] sm:$0xff]  ;;  %v661_v20 = vmul.f32 %v556_v6, %v556_v6  ;;  %s339_s12 = sadd.s32 %s898_s21, %s1262_s15 }
  0x19   : > { %v624_v13 = vadd.f32 %v623_v10, %v622_v9  ;;  %v627_v14 = vsel %vm363_vm0, %v559_v12, 0.0  ;;  %v629_v17 = vsel %vm363_vm0, %v560_v15, 0.0  ;;  %v662_v21 = vmul.f32 %v557_v7, %v557_v7  ;;  %v562_v24 = vld [vmem:[%s1117_s29 + $0x30] sm:$0xff]  ;;  %v563_v29 = vld [vmem:[%s1117_s29 + $0x38] sm:$0xff]  ;;  %v564_v36 = vld [vmem:[%s1117_s29 + $0x40] sm:$0xff]  ;;  %s901_s8 = sshll.u32 %s348_s7, 2 }
  0x1a   : > { %v663_v22 = vmul.f32 %v558_v8, %v558_v8  ;;  %v631_v23 = vsel %vm363_vm0, %v561_v18, 0.0  ;;  %v664_v26 = vmul.f32 %v559_v12, %v559_v12  ;;  %v633_v27 = vsel %vm363_vm0, %v562_v24, 0.0  ;;  %v565_v42 = vld [vmem:[%s1117_s29 + $0x48] sm:$0xff]  ;;  %v566_v48 = vld [vmem:[%s1117_s29 + $0x50] sm:$0xff]  ;;  %v567_v54 = vld [vmem:[%s1117_s29 + $0x58] sm:$0xff]  ;;  %s1173_s11 = scalar_lea.vmem %s1246_s6, %s901_s8  ;;  %s899_s13 = sshll.u32 %s339_s12, 3 }
  0x1b   : > { %929 = vmatmul.mubr.msk.f32.gmra.mrb[2].mxu0 %vm363_vm0, %v354_v5  ;;  %937 = vmatmul.mubr.msk.f32.gmra.mrb[2].mxu1 %vm363_vm0, %v354_v5  ;;  %v626_v16 = vadd.f32 %v625_v11, %v624_v13  ;;  %v665_v28 = vmul.f32 %v560_v15, %v560_v15  ;;  %v677_v31 = vsel %vm363_vm0, %v661_v20, 0.0  ;;  %v678_v32 = vsel %vm363_vm0, %v662_v21, 0.0  ;;  %v568_v60 = vld [vmem:[%s1117_s29 + $0x60] sm:$0xff]  ;;  %v569_v2 = vld [vmem:[%s1117_s29 + $0x68] sm:$0xff]  ;;  %v570_v8 = vld [vmem:[%s1117_s29 + $0x70] sm:$0xff]  ;;  %s1187_s19 = scalar_lea.vmem %s1245_s5, %s899_s13  ;;  %s1020_s22 = smov 120  }
  0x1c   : > { %v680_v33 = vsel %vm363_vm0, %v663_v22, 0.0  ;;  %v635_v34 = vsel %vm363_vm0, %v563_v29, 0.0  ;;  %v679_v35 = vadd.f32 %v678_v32, %v677_v31  ;;  %v666_v38 = vmul.f32 %v561_v18, %v561_v18 }
  0x1d   : > { %v628_v19 = vadd.f32 %v627_v14, %v626_v16  ;;  %v682_v39 = vsel %vm363_vm0, %v664_v26, 0.0  ;;  %v637_v40 = vsel %vm363_vm0, %v564_v36, 0.0  ;;  %v667_v44 = vmul.f32 %v562_v24, %v562_v24  ;;  %v571_v14 = vld [vmem:[%s1117_s29 + $0x78] sm:$0xff] }
  0x1e   : > { %v681_v41 = vadd.f32 %v680_v33, %v679_v35  ;;  %v684_v45 = vsel %vm363_vm0, %v665_v28, 0.0  ;;  %v639_v46 = vsel %vm363_vm0, %v565_v42, 0.0  ;;  %v668_v50 = vmul.f32 %v563_v29, %v563_v29 }
  0x1f   : > { %v630_v25 = vadd.f32 %v629_v17, %v628_v19  ;;  %v686_v51 = vsel %vm363_vm0, %v666_v38, 0.0  ;;  %v641_v52 = vsel %vm363_vm0, %v566_v48, 0.0  ;;  %v669_v56 = vmul.f32 %v564_v36, %v564_v36 }
  0x20   : > { %v683_v47 = vadd.f32 %v682_v39, %v681_v41  ;;  %v688_v57 = vsel %vm363_vm0, %v667_v44, 0.0  ;;  %v643_v58 = vsel %vm363_vm0, %v567_v54, 0.0  ;;  %v670_v62 = vmul.f32 %v565_v42, %v565_v42 }
  0x21   : > { %v632_v30 = vadd.f32 %v631_v23, %v630_v25  ;;  %v690_v63 = vsel %vm363_vm0, %v668_v50, 0.0  ;;  %v645_v0 = vsel %vm363_vm0, %v568_v60, 0.0  ;;  %v671_v4 = vmul.f32 %v566_v48, %v566_v48  ;;  %v902_v48 = vld [vmem:[%s1244_s4] ss:$0 sm:$0xff] }
  0x22   : > { %v685_v53 = vadd.f32 %v684_v45, %v683_v47  ;;  %v692_v5 = vsel %vm363_vm0, %v669_v56, 0.0  ;;  %v647_v6 = vsel %vm363_vm0, %v569_v2, 0.0  ;;  %v672_v10 = vmul.f32 %v567_v54, %v567_v54 }
  0x23   : > { %v634_v37 = vadd.f32 %v633_v27, %v632_v30  ;;  %v694_v11 = vsel %vm363_vm0, %v670_v62, 0.0  ;;  %v649_v12 = vsel %vm363_vm0, %v570_v8, 0.0  ;;  %v673_v16 = vmul.f32 %v568_v60, %v568_v60 }
  0x24   : > { %v687_v59 = vadd.f32 %v686_v51, %v685_v53  ;;  %v696_v17 = vsel %vm363_vm0, %v671_v4, 0.0  ;;  %v651_v18 = vsel %vm363_vm0, %v571_v14, 0.0  ;;  %v674_v21 = vmul.f32 %v569_v2, %v569_v2 }
  0x25   : > { %v636_v43 = vadd.f32 %v635_v34, %v634_v37  ;;  %v698_v22 = vsel %vm363_vm0, %v672_v10, 0.0  ;;  %v675_v25 = vmul.f32 %v570_v8, %v570_v8  ;;  %v700_v26 = vsel %vm363_vm0, %v673_v16, 0.0 }
  0x26   : > { %v689_v1 = vadd.f32 %v688_v57, %v687_v59  ;;  %v676_v29 = vmul.f32 %v571_v14, %v571_v14  ;;  %v702_v30 = vsel %vm363_vm0, %v674_v21, 0.0 }
  0x27   : > { %v638_v49 = vadd.f32 %v637_v40, %v636_v43  ;;  %v704_v33 = vsel %vm363_vm0, %v675_v25, 0.0 }
  0x28   : > { %v691_v7 = vadd.f32 %v690_v63, %v689_v1  ;;  %v706_v36 = vsel %vm363_vm0, %v676_v29, 0.0 }
  0x29   : > { %v640_v55 = vadd.f32 %v639_v46, %v638_v49 }
  0x2a   : > { %v693_v13 = vadd.f32 %v692_v5, %v691_v7 }
  0x2b   : > { %v642_v61 = vadd.f32 %v641_v52, %v640_v55 }
  0x2c   : > { %v695_v19 = vadd.f32 %v694_v11, %v693_v13 }
  0x2d   : > { %v644_v3 = vadd.f32 %v643_v58, %v642_v61 }
  0x2e   : > { %v697_v23 = vadd.f32 %v696_v17, %v695_v19 }
  0x2f   : > { %v646_v9 = vadd.f32 %v645_v0, %v644_v3 }
  0x30   : > { %v699_v27 = vadd.f32 %v698_v22, %v697_v23 }
  0x31   : > { %v648_v15 = vadd.f32 %v647_v6, %v646_v9 }
  0x32   : > { %v701_v31 = vadd.f32 %v700_v26, %v699_v27 }
  0x33   : > { %v650_v20 = vadd.f32 %v649_v12, %v648_v15 }
  0x34   : > { %v703_v34 = vadd.f32 %v702_v30, %v701_v31 }
  0x35   : > { %v652_v24 = vadd.f32 %v651_v18, %v650_v20 }
  0x36   : > { %v705_v37 = vadd.f32 %v704_v33, %v703_v34 }
  0x37   : > { %v653_v28 = vrot.slane %v652_v24, 4 }
  0x38   : > { %v707_v39 = vadd.f32 %v706_v36, %v705_v37 }
  0x39   : > { %v654_v32 = vadd.f32 %v653_v28, %v652_v24 }
  0x3a   : > { %v708_v41 = vrot.slane %v707_v39, 4 }
  0x3b   : > { %v655_v35 = vrot.slane %v654_v32, 2 }
  0x3c   : > { %v709_v43 = vadd.f32 %v708_v41, %v707_v39 }
  0x3d   : > { %v656_v38 = vadd.f32 %v655_v35, %v654_v32 }
  0x3e   : > { %v710_v44 = vrot.slane %v709_v43, 2 }
  0x3f   : > { %v657_v40 = vrot.slane %v656_v38, 1 }
  0x40   : > { %v711_v45 = vadd.f32 %v710_v44, %v709_v43 }
  0x41   : > { %v658_v42 = vadd.f32 %v657_v40, %v656_v38 }
  0x42   : > { %v712_v46 = vrot.slane %v711_v45, 1 }
  0x43   : > { %660 = vst.msk [vmem:[%s1173_s11] sm:$0x1] %vm659_vm1, %v658_v42 }
  0x44   : > { %v713_v47 = vadd.f32 %v712_v46, %v711_v45 }
  0x46   : > { %714 = vst.msk [vmem:[%s1173_s11 + $0x1] sm:$0x1] %vm659_vm1, %v713_v47 }
  0xea   : > { %v927_v49 = vpop.f32.mrb[0].mxu0  ;;  %v935_v50 = vpop.f32.mrb[0].mxu1 }
  0xeb   : > { %v448_v51 = vadd.f32 %v927_v49, %v902_v48  ;;  %v534_v52 = vadd.f32 %v935_v50, %v902_v48  ;;  %v442_v53 = vpop.f32.mrb[1].mxu0  ;;  %v528_v54 = vpop.f32.mrb[1].mxu1 }
  0xec   : > { %v443_v55 = vadd.f32 %v902_v48, %v442_v53  ;;  %v529_v56 = vadd.f32 %v902_v48, %v528_v54 }
  0xed   : > { %550 = vst.msk [vmem:[%s1187_s19 + $0x10] sm:$0xff] %vm547_vm2, %v448_v51  ;;  %v595_v57 = vmul.f32 %v448_v51, %v448_v51  ;;  %551 = vst.msk [vmem:[%s1187_s19 + $0x18] sm:$0xff] %vm547_vm2, %v534_v52  ;;  %v575_v0 = vsel %vm547_vm2, %v448_v51, 0.0  ;;  %v596_v1 = vmul.f32 %v534_v52, %v534_v52  ;;  %v577_v13 = vsel %vm547_vm2, %v534_v52, 0.0 }
  0xee   : > { %548 = vst.msk [vmem:[%s1187_s19] sm:$0xff] %vm547_vm2, %v443_v55  ;;  %v572_v58 = vsel %vm547_vm2, %v443_v55, 0.0  ;;  %v593_v59 = vmul.f32 %v443_v55, %v443_v55  ;;  %549 = vst.msk [vmem:[%s1187_s19 + $0x8] sm:$0xff] %vm547_vm2, %v529_v56  ;;  %v573_v60 = vsel %vm547_vm2, %v529_v56, 0.0  ;;  %v594_v61 = vmul.f32 %v529_v56, %v529_v56  ;;  %v930_v62 = vpop.f32.mrb[2].mxu0  ;;  %v938_v63 = vpop.f32.mrb[2].mxu1 }
  0xef   : > { %v574_v2 = vadd.f32 %v573_v60, %v572_v58  ;;  %v458_v3 = vadd.f32 %v930_v62, %v902_v48  ;;  %v452_v4 = vpop.f32.mrb[3].mxu0  ;;  %v538_v5 = vpop.f32.mrb[3].mxu1  ;;  %v544_v9 = vadd.f32 %v938_v63, %v902_v48  ;;  %v604_v12 = vsel %vm547_vm2, %v595_v57, 0.0 }
  0xf0   : > { %v601_v6 = vsel %vm547_vm2, %v593_v59, 0.0  ;;  %v602_v7 = vsel %vm547_vm2, %v594_v61, 0.0  ;;  %v453_v8 = vadd.f32 %v902_v48, %v452_v4  ;;  %v539_v18 = vadd.f32 %v902_v48, %v538_v5 }
  0xf1   : > { %v576_v10 = vadd.f32 %v575_v0, %v574_v2  ;;  %v603_v11 = vadd.f32 %v602_v7, %v601_v6  ;;  %554 = vst.msk [vmem:[%s1187_s19 + $0x30] sm:$0xff] %vm547_vm2, %v458_v3  ;;  %555 = vst.msk [vmem:[%s1187_s19 + $0x38] sm:$0xff] %vm547_vm2, %v544_v9  ;;  %v606_v19 = vsel %vm547_vm2, %v596_v1, 0.0  ;;  %v599_v25 = vmul.f32 %v458_v3, %v458_v3 }
  0xf2   : > { %552 = vst.msk [vmem:[%s1187_s19 + $0x20] sm:$0xff] %vm547_vm2, %v453_v8  ;;  %v579_v14 = vsel %vm547_vm2, %v453_v8, 0.0  ;;  %v597_v15 = vmul.f32 %v453_v8, %v453_v8  ;;  %553 = vst.msk [vmem:[%s1187_s19 + $0x28] sm:$0xff] %vm547_vm2, %v539_v18  ;;  %v581_v23 = vsel %vm547_vm2, %v539_v18, 0.0  ;;  %v598_v24 = vmul.f32 %v539_v18, %v539_v18 }
  0xf3   : > { %v605_v16 = vadd.f32 %v604_v12, %v603_v11  ;;  %v578_v17 = vadd.f32 %v577_v13, %v576_v10  ;;  %v583_v29 = vsel %vm547_vm2, %v458_v3, 0.0  ;;  %v600_v30 = vmul.f32 %v544_v9, %v544_v9 }
  0xf4   : > { %v608_v20 = vsel %vm547_vm2, %v597_v15, 0.0  ;;  %v610_v28 = vsel %vm547_vm2, %v598_v24, 0.0  ;;  %v612_v33 = vsel %vm547_vm2, %v599_v25, 0.0  ;;  %v585_v34 = vsel %vm547_vm2, %v544_v9, 0.0 }
  0xf5   : > { %v580_v21 = vadd.f32 %v579_v14, %v578_v17  ;;  %v607_v22 = vadd.f32 %v606_v19, %v605_v16  ;;  %v614_v37 = vsel %vm547_vm2, %v600_v30, 0.0 }
  0xf7   : > { %v609_v26 = vadd.f32 %v608_v20, %v607_v22  ;;  %v582_v27 = vadd.f32 %v581_v23, %v580_v21 }
  0xf9   : > { %v584_v31 = vadd.f32 %v583_v29, %v582_v27  ;;  %v611_v32 = vadd.f32 %v610_v28, %v609_v26 }
  0xfb   : > { %v613_v35 = vadd.f32 %v612_v33, %v611_v32  ;;  %v586_v36 = vadd.f32 %v585_v34, %v584_v31 }
  0xfd   : > { %v587_v38 = vrot.slane %v586_v36, 4  ;;  %v615_v39 = vadd.f32 %v614_v37, %v613_v35 }
  0xff   : > { %v588_v40 = vadd.f32 %v587_v38, %v586_v36  ;;  %v616_v41 = vrot.slane %v615_v39, 4 }
 0x101   : > { %v589_v42 = vrot.slane %v588_v40, 2  ;;  %v617_v43 = vadd.f32 %v616_v41, %v615_v39 }
 0x103   : > { %v590_v44 = vadd.f32 %v589_v42, %v588_v40  ;;  %v618_v45 = vrot.slane %v617_v43, 2 }
 0x105   : > { %v591_v46 = vrot.slane %v590_v44, 1  ;;  %v619_v47 = vadd.f32 %v618_v45, %v617_v43 }
 0x107   : > { %v592_v48 = vadd.f32 %v591_v46, %v590_v44  ;;  %v620_v49 = vrot.slane %v619_v47, 1 }
 0x109   : > { %716 = vrot.lane.b32.xlu0 %v592_v48, %s1020_s22  ;;  %v621_v50 = vadd.f32 %v620_v49, %v619_v47 }
 0x10d   : > { %722 = vrot.lane.b32.xlu0 %v621_v50, %s1020_s22 }
 0x17b   : > { %v717_v51 = vpop.permute.xlu0 %716 }
 0x17c   : > { %v719_v52 = vadd.f32 %v717_v51, %v592_v48 }
 0x17e   : > { %720 = vst.msk [vmem:[%s1173_s11 + $0x2] sm:$0x1] %vm659_vm1, %v719_v52 }
 0x17f   : > { %v723_v53 = vpop.permute.xlu0 %722 }
 0x180   : > { %v725_v54 = vadd.f32 %v723_v53, %v621_v50 }
 0x182   : > { %726 = vst.msk [vmem:[%s1173_s11 + $0x3] sm:$0x1] %vm659_vm1, %v725_v54 }
 0x183 PF: > { %s17_s25 = sadd.s32 1, %s1018_s25   ;;  %s1247_s21 = smov %s1010_s23 }
 0x184   : > { %p14_p9 = scmp.ge.s32.totalorder %s17_s25, 6   ;;  %s1248_s22 = smov %s1014_s24 }
 0x185   : > { %s1249_s23 = smov %s1252_s26  ;;  %s1250_s24 = smov %s1256_s27 }
 0x186   :  { %16 = sbr.rel (!%p14_p9) target bundleno = 3 (0x3), region = 85 }

// kernel: tile.21
= control target key start
LH: loop header
LB: loop body
LE: loop exit
PB: predicated region body
PF: predicated region fallthrough
CT: control target
= control target key end

     0   :  { %s28_s0 = inlined_call_operand.vmem [shape: f32[8], index: 0, kind: input, shape index: {}]   ;;  %s29_s1 = inlined_call_operand.vmem [shape: f32[16,8], index: 1, kind: output, shape index: {}]  }
   0x1   :  { %v4_v0 = vld [vmem:[%s28_s0] ss:$0 sm:$0xff] }
   0x2   :  { %5 = vst [vmem:[%s29_s1] sm:$0xff] %v4_v0  ;;  %8 = vst [vmem:[%s29_s1 + $0x8] sm:$0xff] %v4_v0 }

// kernel: tile.22
= control target key start
LH: loop header
LB: loop body
LE: loop exit
PB: predicated region body
PF: predicated region fallthrough
CT: control target
= control target key end

     0   :  { %s131_s10 = smov 120   ;;  %s132_s11 = smov 104   ;;  %vm3_vm0 = vcmask 64512   ;;  %vm9_vm1 = vcmask 1048512   ;;  %vm15_vm2 = vcmask 982912   ;;  %vm21_vm3 = vcmask 917312   ;;  %s207_s0 = inlined_call_operand.vmem [shape: f32[16,8], index: 0, kind: input, shape index: {}]   ;;  %s208_s1 = inlined_call_operand.vmem [shape: f32[1,128], index: 1, kind: output, shape index: {}]  }
   0x1   :  { %v101_v0 = vld [vmem:[%s207_s0 + $0xf] sm:$0x1]   ;;  %v103_v1 = vld [vmem:[%s207_s0 + $0xd] sm:$0x1]   ;;  %v102_v2 = vld [vmem:[%s207_s0 + $0xe] sm:$0x1]  }
   0x2   :  { %7 = vrot.lane.b32.xlu0 %v101_v0, %s131_s10  ;;  %19 = vrot.lane.b32.xlu1 %v103_v1, %s132_s11  ;;  %v104_v3 = vld [vmem:[%s207_s0 + $0xc] sm:$0x1]   ;;  %s133_s16 = smov 112   ;;  %s134_s17 = smov 96   ;;  %v105_v4 = vld [vmem:[%s207_s0 + $0xb] sm:$0x1]  }
   0x3   :  { %v106_v5 = vld [vmem:[%s207_s0 + $0xa] sm:$0x1]   ;;  %v2_v6 = vld [vmem:[%s207_s0] sm:$0x1]   ;;  %s135_s24 = smov 88   ;;  %s136_s25 = smov 80  }
   0x4   :  { %4 = vst.msk [vmem:[#allocation0] sm:$0x1] %vm3_vm0, %v2_v6   ;;  %v107_v7 = vld [vmem:[%s207_s0 + $0x9] sm:$0x1]   ;;  %v108_v8 = vld [vmem:[%s207_s0 + $0x8] sm:$0x1]  }
   0x5   :  { %s137_s30 = smov 72   ;;  %s138_s2 = smov 64   ;;  %v109_v9 = vld [vmem:[%s207_s0 + $0x7] sm:$0x1]   ;;  %v110_v10 = vld [vmem:[%s207_s0 + $0x6] sm:$0x1]  }
   0x6   :  { %13 = vrot.lane.b32.xlu0 %v102_v2, %s133_s16  ;;  %25 = vrot.lane.b32.xlu1 %v104_v3, %s134_s17  ;;  %s139_s7 = smov 56   ;;  %s140_s8 = smov 48   ;;  %v111_v11 = vld [vmem:[%s207_s0 + $0x5] sm:$0x1]   ;;  %v112_v12 = vld [vmem:[%s207_s0 + $0x4] sm:$0x1]  }
   0x7   :  { %s141_s13 = smov 40   ;;  %s142_s14 = smov 32   ;;  %v113_v13 = vld [vmem:[%s207_s0 + $0x3] sm:$0x1]   ;;  %v114_v14 = vld [vmem:[%s207_s0 + $0x2] sm:$0x1]  }
   0x8   :  { %s143_s19 = smov 24   ;;  %s144_s20 = smov 16   ;;  %v115_v15 = vld [vmem:[%s207_s0 + $0x1] sm:$0x1]   ;;  %vm27_vm4 = vcmask 851712   ;;  %vm33_vm5 = vcmask 786112  }
   0x9   :  { %s145_s0 = smov 8   ;;  %vm39_vm6 = vcmask 720512   ;;  %vm45_vm7 = vcmask 654912   ;;  %vm51_vm8 = vcmask 589312   ;;  %vm57_vm9 = vcmask 523712  }
   0xa   :  { %31 = vrot.lane.b32.xlu0 %v105_v4, %s135_s24  ;;  %37 = vrot.lane.b32.xlu1 %v106_v5, %s136_s25  ;;  %vm63_vm10 = vcmask 458112   ;;  %vm69_vm11 = vcmask 392512   ;;  %vm75_vm12 = vcmask 326912   ;;  %vm81_vm13 = vcmask 261312  }
   0xb   :  { %vm87_vm14 = vcmask 195712   ;;  %vm93_vm15 = vcmask 130112  }
   0xe   :  { %43 = vrot.lane.b32.xlu0 %v107_v7, %s137_s30  ;;  %49 = vrot.lane.b32.xlu1 %v108_v8, %s138_s2 }
  0x12   :  { %55 = vrot.lane.b32.xlu0 %v109_v9, %s139_s7  ;;  %61 = vrot.lane.b32.xlu1 %v110_v10, %s140_s8 }
  0x16   :  { %67 = vrot.lane.b32.xlu0 %v111_v11, %s141_s13  ;;  %73 = vrot.lane.b32.xlu1 %v112_v12, %s142_s14 }
  0x1a   :  { %79 = vrot.lane.b32.xlu0 %v113_v13, %s143_s19  ;;  %85 = vrot.lane.b32.xlu1 %v114_v14, %s144_s20 }
  0x1e   :  { %91 = vrot.lane.b32.xlu0 %v115_v15, %s145_s0 }
  0x74   :  { %v8_v16 = vpop.permute.xlu0 %7   ;;  %v20_v17 = vpop.permute.xlu1 %19  }
  0x75   :  { %10 = vst.msk [vmem:[#allocation0] sm:$0x1] %vm9_vm1, %v8_v16  }
  0x78   :  { %v14_v18 = vpop.permute.xlu0 %13   ;;  %v26_v19 = vpop.permute.xlu1 %25  }
  0x79   :  { %16 = vst.msk [vmem:[#allocation0] sm:$0x1] %vm15_vm2, %v14_v18  }
  0x7a   :  { %22 = vst.msk [vmem:[#allocation0] sm:$0x1] %vm21_vm3, %v20_v17  }
  0x7b   :  { %28 = vst.msk [vmem:[#allocation0] sm:$0x1] %vm27_vm4, %v26_v19  }
  0x7c   :  { %v32_v20 = vpop.permute.xlu0 %31   ;;  %v38_v21 = vpop.permute.xlu1 %37  }
  0x7d   :  { %34 = vst.msk [vmem:[#allocation0] sm:$0x1] %vm33_vm5, %v32_v20  }
  0x7e   :  { %40 = vst.msk [vmem:[#allocation0] sm:$0x1] %vm39_vm6, %v38_v21  }
  0x80   :  { %v44_v22 = vpop.permute.xlu0 %43   ;;  %v50_v23 = vpop.permute.xlu1 %49  }
  0x81   :  { %46 = vst.msk [vmem:[#allocation0] sm:$0x1] %vm45_vm7, %v44_v22  }
  0x82   :  { %52 = vst.msk [vmem:[#allocation0] sm:$0x1] %vm51_vm8, %v50_v23  }
  0x84   :  { %v56_v24 = vpop.permute.xlu0 %55   ;;  %v62_v25 = vpop.permute.xlu1 %61  }
  0x85   :  { %58 = vst.msk [vmem:[#allocation0] sm:$0x1] %vm57_vm9, %v56_v24  }
  0x86   :  { %64 = vst.msk [vmem:[#allocation0] sm:$0x1] %vm63_vm10, %v62_v25  }
  0x88   :  { %v68_v26 = vpop.permute.xlu0 %67   ;;  %v74_v27 = vpop.permute.xlu1 %73  }
  0x89   :  { %70 = vst.msk [vmem:[#allocation0] sm:$0x1] %vm69_vm11, %v68_v26  }
  0x8a   :  { %76 = vst.msk [vmem:[#allocation0] sm:$0x1] %vm75_vm12, %v74_v27  }
  0x8c   :  { %v80_v28 = vpop.permute.xlu0 %79   ;;  %v86_v29 = vpop.permute.xlu1 %85  }
  0x8d   :  { %82 = vst.msk [vmem:[#allocation0] sm:$0x1] %vm81_vm13, %v80_v28  }
  0x8e   :  { %88 = vst.msk [vmem:[#allocation0] sm:$0x1] %vm87_vm14, %v86_v29  }
  0x90   :  { %v92_v30 = vpop.permute.xlu0 %91  }
  0x91   :  { %94 = vst.msk [vmem:[#allocation0] sm:$0x1] %vm93_vm15, %v92_v30  }
  0x98   :  { %v98_v31 = vld [vmem:[#allocation0] sm:$0x1] }
  0x99   :  { %100 = vst [vmem:[%s208_s1] sm:$0x1] %v98_v31 }

// kernel: decoder_block_forward.7
= control target key start
LH: loop header
LB: loop body
LE: loop exit
PB: predicated region body
PF: predicated region fallthrough
CT: control target
= control target key end

     0   :  { %s420_s12 = smov 0   ;;  %s422_s13 = smov 0   ;;  %s471_s0 = inlined_call_operand.vmem [shape: f32[2,16,128], index: 0, kind: input, shape index: {}]   ;;  %s472_s1 = inlined_call_operand.vmem [shape: f32[1,128], index: 1, kind: input, shape index: {}]   ;;  %s473_s2 = inlined_call_operand.vmem [shape: f32[1,128], index: 2, kind: input, shape index: {}]   ;;  %s474_s3 = inlined_call_operand.vmem [shape: f32[2,16,128], index: 3, kind: output, shape index: {}]  }
   0x1   :  { %s424_s14 = smov 0   ;;  %s426_s15 = smov 0  }
   0x2   :  { %s428_s16 = smov 0  }
   0x3 LB: > { %s22_s17 = sadd.s32 1, %s390_s14  ;;  %s25_s18 = sadd.s32 1, %s394_s15  ;;  %s398_s16 = sphi %s428_s16, %s13_s16   ;;  %s394_s15 = sphi %s426_s15, %s478_s15   ;;  %s390_s14 = sphi %s424_s14, %s477_s14   ;;  %s386_s13 = sphi %s422_s13, %s476_s13   ;;  %s382_s12 = sphi %s420_s12, %s475_s12  }
   0x4   : > { %p23_p0 = scmp.ge.s32.totalorder %s22_s17, 2  ;;  %p311_p1 = scmp.ge.s32.totalorder %s398_s16, 1 }
   0x5   : > { %p156_p2 = scmp.lt.s32.totalorder %s398_s16, 5 }
   0x6   : > { %s480_s17 = smov (%p23_p0, %s22_s17), 0  ;;  %s482_s18 = smov (!%p23_p0, %s25_s18), %s394_s15 }
   0x7   : > { %p157_p3 = pnand %p311_p1, %p156_p2  ;;  %p27_p4 = scmp.ge.s32.totalorder %s482_s18, 2 }
   0x8   : > { %p186_p5 = scmp.lt.s32.totalorder (!%p157_p3), %s386_s13, 1  ;;  %p188_p6 = scmp.lt.s32.totalorder (!%p157_p3), %s382_s12, 1  ;;  %v316_v0 = vld [vmem:[%s472_s1] ss:$0 sm:$0xff] (!%p157_p3) }
   0x9   : > { %s484_s18 = smov (%p27_p4, %s482_s18), 0  ;;  %160 = sbr.rel (%p157_p3) target bundleno = 29 (0x1d), region = 32 }
   0xa   : > { %v317_v2 = vld [vmem:[%s473_s2] ss:$0 sm:$0xff] (!%p157_p3) }
  0x10   : > { %s486_s13 = smov (!%p186_p5, %s386_s13), 1  ;;  %s488_s12 = smov (!%p188_p6, %s382_s12), 1 }
  0x11   : > { %s312_s19 = sshll.u32 %s486_s13, 1 }
  0x12   : > { %s191_s20 = sadd.s32 %s312_s19, %s488_s12 }
  0x13   : > { %s313_s21 = sshll.u32 %s191_s20, 3 }
  0x14   : > { %s193_s26 = scalar_lea.vmem %s471_s0, %s313_s21  ;;  %s201_s4 = scalar_lea.vmem %s474_s3, %s313_s21 }
  0x15   : > { %v202_v1 = vld [vmem:[%s193_s26] sm:$0xff] }
  0x16   : > { %v210_v3 = vmul.f32 %v316_v0, %v202_v1 }
  0x18   : > { %v218_v4 = vadd.f32 %v317_v2, %v210_v3 }
  0x1a   : > { %v219_v5 = vmax.f32 %v218_v4, 0.0 }
  0x1c   : > { %220 = vst [vmem:[%s201_s4] sm:$0xff] %v219_v5 }
  0x1d PF: > { %s13_s16 = sadd.s32 1, %s398_s16   ;;  %s475_s12 = smov %s390_s14 }
  0x1e   : > { %p10_p7 = scmp.ge.s32.totalorder %s13_s16, 6   ;;  %s476_s13 = smov %s394_s15 }
  0x1f   : > { %s477_s14 = smov %s480_s17  ;;  %s478_s15 = smov %s484_s18 }
  0x20   :  { %12 = sbr.rel (!%p10_p7) target bundleno = 3 (0x3), region = 62 }

// kernel: decoder_block_forward.6
= control target key start
LH: loop header
LB: loop body
LE: loop exit
PB: predicated region body
PF: predicated region fallthrough
CT: control target
= control target key end

     0   :  { %s3017_s21 = smov 0   ;;  %s4268_s0 = inlined_call_operand.vmem [shape: f32[2,16,16,8], index: 0, kind: input, shape index: {}]   ;;  %s4269_s1 = inlined_call_operand.vmem [shape: f32[1,8], index: 1, kind: input, shape index: {}]   ;;  %s4270_s2 = inlined_call_operand.vmem [shape: f32[1,8], index: 2, kind: input, shape index: {}]   ;;  %s4271_s3 = inlined_call_operand.vmem [shape: f32[72,8], index: 3, kind: input, shape index: {}]   ;;  %s4272_s4 = inlined_call_operand.vmem [shape: f32[1,8], index: 4, kind: input, shape index: {}]   ;;  %s4273_s5 = inlined_call_operand.vmem [shape: f32[2,16,16,8], index: 5, kind: output, shape index: {0}]   ;;  %s4274_s6 = inlined_call_operand.vmem [shape: f32[2,2,8], index: 6, kind: output, shape index: {1}]  }
   0x1 LB: > { %s2764_s22 = sadd.s32 4294967295, %s2971_s21   ;;  %p2768_p0 = scmp.ge.s32.totalorder %s2971_s21, 1  ;;  %s2971_s21 = sphi %s3017_s21, %s17_s21  }
   0x2   : > { %p215_p1 = scmp.lt.s32.totalorder %s2971_s21, 3 }
   0x4   : > { %p216_p2 = pnand %p2768_p0, %p215_p1 }
   0x5   : > { %vm405_vm0 = vcmask (!%p216_p2), 64512   ;;  %vm408_vm1 = vcmask (!%p216_p2), 58368   ;;  %p3027_p3 = scmp.lt.s32.totalorder (!%p216_p2), %s2764_s22, 1  ;;  %v2973_v0 = vmov (!%p216_p2), 0.0   ;;  %v3095_v1 = vld [vmem:[%s4269_s1] ss:$0 sm:$0xff] (!%p216_p2) }
   0x6   : > { %219 = sbr.rel (%p216_p2) target bundleno = 907 (0x38b), region = 40  ;;  %406 = vst.msk [vmem:[#allocation2] sm:$0xff] (!%p216_p2), %vm405_vm0, %v2973_v0  ;;  %407 = vst.msk [vmem:[#allocation2 + $0x8] sm:$0xff] (!%p216_p2), %vm405_vm0, %v2973_v0  ;;  %v3107_v2 = vld [vmem:[%s4270_s2] ss:$0 sm:$0xff] (!%p216_p2)  ;;  %s2974_s8 = smov (!%p216_p2), 8  }
   0x7   : > { %410 = vst.msk [vmem:[#allocation2 + $0x18] sm:$0xff] (!%p216_p2), %vm405_vm0, %v2973_v0  ;;  %411 = vst.msk [vmem:[#allocation2 + $0x20] sm:$0xff] (!%p216_p2), %vm405_vm0, %v2973_v0  ;;  %s2975_s9 = smov (!%p216_p2), 16   ;;  %vm718_vm2 = vcmask (!%p216_p2), 130112   ;;  %s2976_s10 = smov (!%p216_p2), 24   ;;  %vm911_vm3 = vcmask (!%p216_p2), 195712  }
   0x8   : > { %413 = vst.msk [vmem:[#allocation2 + $0x30] sm:$0xff] (!%p216_p2), %vm405_vm0, %v2973_v0  ;;  %414 = vst.msk [vmem:[#allocation2 + $0x38] sm:$0xff] (!%p216_p2), %vm405_vm0, %v2973_v0  ;;  %s2977_s11 = smov (!%p216_p2), 32   ;;  %s2978_s12 = smov (!%p216_p2), 40   ;;  %vm1104_vm4 = vcmask (!%p216_p2), 261312   ;;  %vm1297_vm5 = vcmask (!%p216_p2), 326912  }
   0x9   : > { %416 = vst.msk [vmem:[#allocation2 + $0x48] sm:$0xff] (!%p216_p2), %vm405_vm0, %v2973_v0  ;;  %417 = vst.msk [vmem:[#allocation2 + $0x50] sm:$0xff] (!%p216_p2), %vm405_vm0, %v2973_v0  ;;  %s2979_s17 = smov (!%p216_p2), 48   ;;  %s2980_s25 = smov (!%p216_p2), 56   ;;  %vm1490_vm6 = vcmask (!%p216_p2), 392512   ;;  %vm1684_vm7 = vcmask (!%p216_p2), 458112  }
   0xa   : > { %419 = vst.msk [vmem:[#allocation2 + $0x60] sm:$0xff] (!%p216_p2), %vm405_vm0, %v2973_v0  ;;  %420 = vst.msk [vmem:[#allocation2 + $0x68] sm:$0xff] (!%p216_p2), %vm405_vm0, %v2973_v0  ;;  %s2981_s16 = smov (!%p216_p2), 64   ;;  %vm1877_vm8 = vcmask (!%p216_p2), 523712   ;;  %vm2070_vm9 = vcmask (!%p216_p2), 589312   ;;  %vm2151_vm10 = vcmask (!%p216_p2), 588800  }
   0xb   : > { %422 = vst.msk [vmem:[#allocation2 + $0x78] sm:$0xff] (!%p216_p2), %vm405_vm0, %v2973_v0  ;;  %423 = vst.msk [vmem:[#allocation2 + $0x80] sm:$0xff] (!%p216_p2), %vm405_vm0, %v2973_v0  ;;  %vm2574_vm11 = vcmask (!%p216_p2), 57344  }
   0xc   : > { %425 = vst.msk [vmem:[#allocation2 + $0x90] sm:$0xff] (!%p216_p2), %vm405_vm0, %v2973_v0  ;;  %426 = vst.msk [vmem:[#allocation2 + $0x98] sm:$0xff] (!%p216_p2), %vm405_vm0, %v2973_v0 }
   0xd   : > { %428 = vst.msk [vmem:[#allocation2 + $0xa8] sm:$0xff] %vm405_vm0, %v2973_v0  ;;  %429 = vst.msk [vmem:[#allocation2 + $0xb0] sm:$0xff] %vm405_vm0, %v2973_v0  ;;  %s4277_s22 = smov (!%p3027_p3, %s2764_s22), 1  ;;  %v558_v12 = vld [vmem:[#allocation2 + $0x1] sm:$0xff] }
   0xe   : > { %431 = vst.msk [vmem:[#allocation2 + $0xc0] sm:$0xff] %vm405_vm0, %v2973_v0  ;;  %432 = vst.msk [vmem:[#allocation2 + $0xc8] sm:$0xff] %vm405_vm0, %v2973_v0  ;;  %s2811_s24 = sshll.u32 %s4277_s22, 8  ;;  %622 = vrot.lane.b32.xlu0 %v558_v12, %s2974_s8 }
   0xf   : > { %434 = vst.msk [vmem:[#allocation2 + $0xd8] sm:$0xff] %vm405_vm0, %v2973_v0  ;;  %435 = vst.msk [vmem:[#allocation2 + $0xe0] sm:$0xff] %vm405_vm0, %v2973_v0  ;;  %s3102_s29 = scalar_lea.vmem %s4268_s0, %s2811_s24  ;;  %s4024_s26 = scalar_lea.vmem %s4273_s5, %s2811_s24 }
  0x10   : > { %437 = vst.msk [vmem:[#allocation2 + $0xf0] sm:$0xff] %vm405_vm0, %v2973_v0  ;;  %438 = vst.msk [vmem:[#allocation2 + $0xf8] sm:$0xff] %vm405_vm0, %v2973_v0  ;;  %v263_v3 = vld [vmem:[%s3102_s29] sm:$0xff]  ;;  %v265_v4 = vld [vmem:[%s3102_s29 + $0x10] sm:$0xff]  ;;  %s2773_s24 = sshll.u32 %s4277_s22, 1 }
  0x11   : > { %440 = vst.msk [vmem:[#allocation2 + $0x108] sm:$0xff] %vm405_vm0, %v2973_v0  ;;  %441 = vst.msk [vmem:[#allocation2 + $0x110] sm:$0xff] %vm405_vm0, %v2973_v0  ;;  %v264_v5 = vld [vmem:[%s3102_s29 + $0x8] sm:$0xff]  ;;  %v302_v6 = vmul.f32 %v3095_v1, %v263_v3  ;;  %v304_v7 = vmul.f32 %v3095_v1, %v265_v4  ;;  %v267_v9 = vld [vmem:[%s3102_s29 + $0x20] sm:$0xff]  ;;  %s262_s27 = scalar_lea.vmem %s4274_s6, %s2773_s24 }
  0x12   : > { %443 = vst.msk [vmem:[#allocation2 + $0x120] sm:$0xff] %vm405_vm0, %v2973_v0  ;;  %444 = vst.msk [vmem:[#allocation2 + $0x128] sm:$0xff] %vm405_vm0, %v2973_v0  ;;  %v303_v8 = vmul.f32 %v3095_v1, %v264_v5  ;;  %v266_v10 = vld [vmem:[%s3102_s29 + $0x18] sm:$0xff]  ;;  %v269_v11 = vld [vmem:[%s3102_s29 + $0x30] sm:$0xff]  ;;  %v306_v13 = vmul.f32 %v3095_v1, %v267_v9 }
  0x13   : > { %446 = vst.msk [vmem:[#allocation2 + $0x138] sm:$0xff] %vm405_vm0, %v2973_v0  ;;  %447 = vst.msk [vmem:[#allocation2 + $0x140] sm:$0xff] %vm405_vm0, %v2973_v0  ;;  %v305_v14 = vmul.f32 %v3095_v1, %v266_v10  ;;  %v308_v15 = vmul.f32 %v3095_v1, %v269_v11  ;;  %v268_v16 = vld [vmem:[%s3102_s29 + $0x28] sm:$0xff]  ;;  %v341_v18 = vadd.f32 %v3107_v2, %v302_v6  ;;  %v271_v22 = vld [vmem:[%s3102_s29 + $0x40] sm:$0xff] }
  0x14   : > { %449 = vst.msk [vmem:[#allocation2 + $0x150] sm:$0xff] %vm405_vm0, %v2973_v0  ;;  %450 = vst.msk [vmem:[#allocation2 + $0x158] sm:$0xff] %vm405_vm0, %v2973_v0  ;;  %v343_v19 = vadd.f32 %v3107_v2, %v304_v7  ;;  %v342_v20 = vadd.f32 %v3107_v2, %v303_v8  ;;  %v307_v21 = vmul.f32 %v3095_v1, %v268_v16  ;;  %v270_v27 = vld [vmem:[%s3102_s29 + $0x38] sm:$0xff]  ;;  %v273_v28 = vld [vmem:[%s3102_s29 + $0x50] sm:$0xff] }
  0x15   : > { %452 = vst.msk [vmem:[#allocation2 + $0x168] sm:$0xff] %vm405_vm0, %v2973_v0  ;;  %453 = vst.msk [vmem:[#allocation2 + $0x170] sm:$0xff] %vm405_vm0, %v2973_v0  ;;  %v345_v23 = vadd.f32 %v3107_v2, %v306_v13  ;;  %v344_v24 = vadd.f32 %v3107_v2, %v305_v14  ;;  %v347_v25 = vadd.f32 %v3107_v2, %v308_v15  ;;  %v272_v29 = vld [vmem:[%s3102_s29 + $0x48] sm:$0xff]  ;;  %v373_v30 = vmax.f32 %v341_v18, 0.0  ;;  %v275_v34 = vld [vmem:[%s3102_s29 + $0x60] sm:$0xff] }
  0x16   : > { %455 = vst.msk [vmem:[#allocation2 + $0x180] sm:$0xff] %vm405_vm0, %v2973_v0  ;;  %456 = vst.msk [vmem:[#allocation2 + $0x188] sm:$0xff] %vm405_vm0, %v2973_v0  ;;  %v310_v26 = vmul.f32 %v3095_v1, %v271_v22  ;;  %v375_v31 = vmax.f32 %v343_v19, 0.0  ;;  %v374_v32 = vmax.f32 %v342_v20, 0.0  ;;  %v346_v33 = vadd.f32 %v3107_v2, %v307_v21  ;;  %v274_v35 = vld [vmem:[%s3102_s29 + $0x58] sm:$0xff]  ;;  %v277_v36 = vld [vmem:[%s3102_s29 + $0x70] sm:$0xff] }
  0x17   : > { %458 = vst.msk [vmem:[#allocation2 + $0x198] sm:$0xff] %vm405_vm0, %v2973_v0  ;;  %459 = vst.msk [vmem:[#allocation2 + $0x1a0] sm:$0xff] %vm405_vm0, %v2973_v0  ;;  %v377_v37 = vmax.f32 %v345_v23, 0.0  ;;  %v376_v38 = vmax.f32 %v344_v24, 0.0  ;;  %v379_v39 = vmax.f32 %v347_v25, 0.0  ;;  %v276_v41 = vld [vmem:[%s3102_s29 + $0x68] sm:$0xff]  ;;  %v309_v43 = vmul.f32 %v3095_v1, %v270_v27 }
  0x18   : > { %409 = vst.msk [vmem:[#allocation2 + $0x10] sm:$0x3] %vm408_vm1, %v2973_v0  ;;  %412 = vst.msk [vmem:[#allocation2 + $0x28] sm:$0x3] %vm408_vm1, %v2973_v0  ;;  %v349_v40 = vadd.f32 %v3107_v2, %v310_v26  ;;  %v378_v42 = vmax.f32 %v346_v33, 0.0  ;;  %v312_v44 = vmul.f32 %v3095_v1, %v273_v28  ;;  %v311_v45 = vmul.f32 %v3095_v1, %v272_v29  ;;  %v279_v46 = vld [vmem:[%s3102_s29 + $0x80] sm:$0xff] }
  0x19   : > { %415 = vst.msk [vmem:[#allocation2 + $0x40] sm:$0x3] %vm408_vm1, %v2973_v0  ;;  %418 = vst.msk [vmem:[#allocation2 + $0x58] sm:$0x3] %vm408_vm1, %v2973_v0  ;;  %v314_v48 = vmul.f32 %v3095_v1, %v275_v34  ;;  %v313_v49 = vmul.f32 %v3095_v1, %v274_v35  ;;  %v316_v50 = vmul.f32 %v3095_v1, %v277_v36  ;;  %v278_v55 = vld [vmem:[%s3102_s29 + $0x78] sm:$0xff]  ;;  %v281_v56 = vld [vmem:[%s3102_s29 + $0x90] sm:$0xff] }
  0x1a   : > { %421 = vst.msk [vmem:[#allocation2 + $0x70] sm:$0x3] %vm408_vm1, %v2973_v0  ;;  %424 = vst.msk [vmem:[#allocation2 + $0x88] sm:$0x3] %vm408_vm1, %v2973_v0  ;;  %v381_v47 = vmax.f32 %v349_v40, 0.0  ;;  %v348_v51 = vadd.f32 %v3107_v2, %v309_v43  ;;  %v351_v52 = vadd.f32 %v3107_v2, %v312_v44  ;;  %v350_v53 = vadd.f32 %v3107_v2, %v311_v45  ;;  %v280_v61 = vld [vmem:[%s3102_s29 + $0x88] sm:$0xff] }
  0x1b   : > { %427 = vst.msk [vmem:[#allocation2 + $0xa0] sm:$0x3] %vm408_vm1, %v2973_v0  ;;  %430 = vst.msk [vmem:[#allocation2 + $0xb8] sm:$0x3] %vm408_vm1, %v2973_v0  ;;  %v315_v54 = vmul.f32 %v3095_v1, %v276_v41  ;;  %v353_v57 = vadd.f32 %v3107_v2, %v314_v48  ;;  %v352_v58 = vadd.f32 %v3107_v2, %v313_v49  ;;  %v283_v62 = vld [vmem:[%s3102_s29 + $0xa0] sm:$0xff]  ;;  %v282_v63 = vld [vmem:[%s3102_s29 + $0x98] sm:$0xff] }
  0x1c   : > { %433 = vst.msk [vmem:[#allocation2 + $0xd0] sm:$0x3] %vm408_vm1, %v2973_v0  ;;  %436 = vst.msk [vmem:[#allocation2 + $0xe8] sm:$0x3] %vm408_vm1, %v2973_v0  ;;  %v355_v59 = vadd.f32 %v3107_v2, %v316_v50  ;;  %v318_v60 = vmul.f32 %v3095_v1, %v279_v46  ;;  %v383_v3 = vmax.f32 %v351_v52, 0.0  ;;  %v382_v4 = vmax.f32 %v350_v53, 0.0 }
  0x1d   : > { %439 = vst.msk [vmem:[#allocation2 + $0x100] sm:$0x3] %vm408_vm1, %v2973_v0  ;;  %442 = vst.msk [vmem:[#allocation2 + $0x118] sm:$0x3] %vm408_vm1, %v2973_v0  ;;  %v354_v5 = vadd.f32 %v3107_v2, %v315_v54  ;;  %v285_v6 = vld [vmem:[%s3102_s29 + $0xb0] sm:$0xff]  ;;  %v494_v7 = vld [vmem:[#allocation2] sm:$0xff]  ;;  %v317_v14 = vmul.f32 %v3095_v1, %v278_v55  ;;  %v320_v15 = vmul.f32 %v3095_v1, %v281_v56 }
  0x1e   : > { %445 = vst.msk [vmem:[#allocation2 + $0x130] sm:$0x3] %vm408_vm1, %v2973_v0  ;;  %448 = vst.msk [vmem:[#allocation2 + $0x148] sm:$0x3] %vm408_vm1, %v2973_v0  ;;  %v495_v8 = vld [vmem:[#allocation2 + $0x8] sm:$0xff]  ;;  %v385_v9 = vmax.f32 %v353_v57, 0.0  ;;  %v357_v12 = vadd.f32 %v3107_v2, %v318_v60  ;;  %v319_v16 = vmul.f32 %v3095_v1, %v280_v61  ;;  %v322_v21 = vmul.f32 %v3095_v1, %v283_v62 }
  0x1f   : > { %451 = vst.msk [vmem:[#allocation2 + $0x160] sm:$0x3] %vm408_vm1, %v2973_v0  ;;  %454 = vst.msk [vmem:[#allocation2 + $0x178] sm:$0x3] %vm408_vm1, %v2973_v0  ;;  %v559_v17 = vld [vmem:[#allocation2 + $0x9] sm:$0xff]  ;;  %v384_v10 = vmax.f32 %v352_v58, 0.0  ;;  %v321_v22 = vmul.f32 %v3095_v1, %v282_v63  ;;  %v324_v23 = vmul.f32 %v3095_v1, %v285_v6  ;;  %v356_v25 = vadd.f32 %v3107_v2, %v317_v14 }
  0x20   : > { %457 = vst.msk [vmem:[#allocation2 + $0x190] sm:$0x3] %vm408_vm1, %v2973_v0  ;;  %460 = vst.msk [vmem:[#allocation2 + $0x1a8] sm:$0x3] %vm408_vm1, %v2973_v0  ;;  %624 = vrot.lane.b32.xlu0 %v559_v17, %s2974_s8  ;;  %v380_v0 = vmax.f32 %v348_v51, 0.0  ;;  %v387_v11 = vmax.f32 %v355_v59, 0.0  ;;  %v359_v26 = vadd.f32 %v3107_v2, %v320_v15  ;;  %v358_v27 = vadd.f32 %v3107_v2, %v319_v16 }
  0x21   : > { %462 = vst.msk [vmem:[#allocation2 + $0x19] sm:$0xff] %vm405_vm0, %v373_v30  ;;  %464 = vst.msk [vmem:[#allocation2 + $0x31] sm:$0xff] %vm405_vm0, %v375_v31  ;;  %v386_v13 = vmax.f32 %v354_v5, 0.0  ;;  %v284_v17 = vld [vmem:[%s3102_s29 + $0xa8] sm:$0xff]  ;;  %v389_v20 = vmax.f32 %v357_v12, 0.0  ;;  %v287_v24 = vld [vmem:[%s3102_s29 + $0xc0] sm:$0xff]  ;;  %v361_v31 = vadd.f32 %v3107_v2, %v322_v21  ;;  %v363_v33 = vadd.f32 %v3107_v2, %v324_v23 }
  0x22   : > { %463 = vst.msk [vmem:[#allocation2 + $0x21] sm:$0xff] %vm405_vm0, %v374_v32  ;;  %466 = vst.msk [vmem:[#allocation2 + $0x49] sm:$0xff] %vm405_vm0, %v377_v37  ;;  %v286_v28 = vld [vmem:[%s3102_s29 + $0xb8] sm:$0xff]  ;;  %v360_v32 = vadd.f32 %v3107_v2, %v321_v22  ;;  %v323_v34 = vmul.f32 %v3095_v1, %v284_v17  ;;  %v289_v35 = vld [vmem:[%s3102_s29 + $0xd0] sm:$0xff]  ;;  %v388_v36 = vmax.f32 %v356_v25, 0.0  ;;  %v391_v37 = vmax.f32 %v359_v26, 0.0 }
  0x23   : > { %465 = vst.msk [vmem:[#allocation2 + $0x39] sm:$0xff] %vm405_vm0, %v376_v38  ;;  %468 = vst.msk [vmem:[#allocation2 + $0x61] sm:$0xff] %vm405_vm0, %v379_v39  ;;  %v390_v38 = vmax.f32 %v358_v27, 0.0  ;;  %v326_v39 = vmul.f32 %v3095_v1, %v287_v24  ;;  %v288_v40 = vld [vmem:[%s3102_s29 + $0xc8] sm:$0xff]  ;;  %v291_v41 = vld [vmem:[%s3102_s29 + $0xe0] sm:$0xff]  ;;  %v393_v43 = vmax.f32 %v361_v31, 0.0  ;;  %v325_v50 = vmul.f32 %v3095_v1, %v286_v28 }
  0x24   : > { %467 = vst.msk [vmem:[#allocation2 + $0x51] sm:$0xff] %vm405_vm0, %v378_v42  ;;  %470 = vst.msk [vmem:[#allocation2 + $0x79] sm:$0xff] %vm405_vm0, %v381_v47  ;;  %v290_v42 = vld [vmem:[%s3102_s29 + $0xd8] sm:$0xff]  ;;  %v392_v44 = vmax.f32 %v360_v32, 0.0  ;;  %v395_v45 = vmax.f32 %v363_v33, 0.0  ;;  %v362_v46 = vadd.f32 %v3107_v2, %v323_v34  ;;  %v292_v47 = vld [vmem:[%s3102_s29 + $0xe8] sm:$0xff]  ;;  %v328_v51 = vmul.f32 %v3095_v1, %v289_v35 }
  0x25   : > { %526 = vst.msk [vmem:[#allocation3] sm:$0xff] %vm405_vm0, %v494_v7  ;;  %527 = vst.msk [vmem:[#allocation3 + $0x8] sm:$0xff] %vm405_vm0, %v495_v8  ;;  %v365_v49 = vadd.f32 %v3107_v2, %v326_v39  ;;  %v327_v58 = vmul.f32 %v3095_v1, %v288_v40  ;;  %v330_v59 = vmul.f32 %v3095_v1, %v291_v41 }
  0x26   : > { %469 = vst.msk [vmem:[#allocation2 + $0x69] sm:$0xff] %vm405_vm0, %v380_v0  ;;  %472 = vst.msk [vmem:[#allocation2 + $0x91] sm:$0xff] %vm405_vm0, %v383_v3  ;;  %v394_v57 = vmax.f32 %v362_v46, 0.0  ;;  %v329_v60 = vmul.f32 %v3095_v1, %v290_v42  ;;  %v364_v62 = vadd.f32 %v3107_v2, %v325_v50  ;;  %v367_v63 = vadd.f32 %v3107_v2, %v328_v51 }
  0x27   : > { %471 = vst.msk [vmem:[#allocation2 + $0x81] sm:$0xff] %vm405_vm0, %v382_v4  ;;  %474 = vst.msk [vmem:[#allocation2 + $0xa9] sm:$0xff] %vm405_vm0, %v385_v9  ;;  %v397_v61 = vmax.f32 %v365_v49, 0.0  ;;  %v331_v0 = vmul.f32 %v3095_v1, %v292_v47  ;;  %v366_v3 = vadd.f32 %v3107_v2, %v327_v58  ;;  %v369_v4 = vadd.f32 %v3107_v2, %v330_v59 }
  0x28   : > { %v3182_v18 = vld [vmem:[#allocation2 + $0x19] sm:$0xff]  ;;  %v3184_v19 = vld [vmem:[#allocation2 + $0x31] sm:$0xff]  ;;  %473 = vst.msk [vmem:[#allocation2 + $0x99] sm:$0xff] %vm405_vm0, %v384_v10  ;;  %476 = vst.msk [vmem:[#allocation2 + $0xc1] sm:$0xff] %vm405_vm0, %v387_v11  ;;  %v368_v5 = vadd.f32 %v3107_v2, %v329_v60  ;;  %v396_v6 = vmax.f32 %v364_v62, 0.0  ;;  %v399_v7 = vmax.f32 %v367_v63, 0.0 }
  0x29   : > { %626 = vrot.lane.b32.xlu1 %v3182_v18, %s2974_s8  ;;  %630 = vrot.lane.b32.xlu0 %v3184_v19, %s2974_s8  ;;  %475 = vst.msk [vmem:[#allocation2 + $0xb1] sm:$0xff] %vm405_vm0, %v386_v13  ;;  %v3202_v29 = vld [vmem:[#allocation2 + $0x21] sm:$0xff]  ;;  %v3204_v30 = vld [vmem:[#allocation2 + $0x49] sm:$0xff]  ;;  %478 = vst.msk [vmem:[#allocation2 + $0xd9] sm:$0xff] %vm405_vm0, %v389_v20  ;;  %v370_v1 = vadd.f32 %v3107_v2, %v331_v0  ;;  %v398_v10 = vmax.f32 %v366_v3, 0.0  ;;  %v401_v11 = vmax.f32 %v369_v4, 0.0 }
  0x2a   : > { %v3218_v48 = vld [vmem:[#allocation2 + $0x18] sm:$0xff]  ;;  %477 = vst.msk [vmem:[#allocation2 + $0xc9] sm:$0xff] %vm405_vm0, %v388_v36  ;;  %480 = vst.msk [vmem:[#allocation2 + $0xf1] sm:$0xff] %vm405_vm0, %v391_v37  ;;  %v3232_v52 = vld [vmem:[#allocation2 + $0x30] sm:$0xff]  ;;  %v400_v12 = vmax.f32 %v368_v5, 0.0 }
  0x2b   : > { %479 = vst.msk [vmem:[#allocation2 + $0xe1] sm:$0xff] %vm405_vm0, %v390_v38  ;;  %528 = vst.msk [vmem:[#allocation3 + $0x10] sm:$0xff] %vm405_vm0, %v3218_v48  ;;  %v3234_v53 = vld [vmem:[#allocation2 + $0x20] sm:$0xff]  ;;  %v3236_v54 = vld [vmem:[#allocation2 + $0x48] sm:$0xff]  ;;  %v402_v13 = vmax.f32 %v370_v1, 0.0 }
  0x2c   : > { %v3238_v55 = vld [vmem:[#allocation2 + $0x39] sm:$0xff]  ;;  %v3240_v56 = vld [vmem:[#allocation2 + $0x61] sm:$0xff]  ;;  %482 = vst.msk [vmem:[#allocation2 + $0x109] sm:$0xff] %vm405_vm0, %v393_v43  ;;  %481 = vst.msk [vmem:[#allocation2 + $0xf9] sm:$0xff] %vm405_vm0, %v392_v44 }
  0x2d   : > { %628 = vrot.lane.b32.xlu1 %v3202_v29, %s2974_s8  ;;  %634 = vrot.lane.b32.xlu0 %v3204_v30, %s2974_s8  ;;  %484 = vst.msk [vmem:[#allocation2 + $0x121] sm:$0xff] %vm405_vm0, %v395_v45  ;;  %530 = vst.msk [vmem:[#allocation3 + $0x20] sm:$0xff] %vm405_vm0, %v3232_v52  ;;  %v3267_v8 = vld [vmem:[#allocation2 + $0x51] sm:$0xff]  ;;  %v3269_v9 = vld [vmem:[#allocation2 + $0x79] sm:$0xff] }
  0x2e   : > { %529 = vst.msk [vmem:[#allocation3 + $0x18] sm:$0xff] %vm405_vm0, %v3234_v53  ;;  %532 = vst.msk [vmem:[#allocation3 + $0x30] sm:$0xff] %vm405_vm0, %v3236_v54  ;;  %v3273_v14 = vld [vmem:[#allocation2 + $0x38] sm:$0xff]  ;;  %v3275_v15 = vld [vmem:[#allocation2 + $0x60] sm:$0xff] }
  0x2f   : > { %483 = vst.msk [vmem:[#allocation2 + $0x111] sm:$0xff] %vm405_vm0, %v394_v57  ;;  %486 = vst.msk [vmem:[#allocation2 + $0x139] sm:$0xff] %vm405_vm0, %v397_v61  ;;  %v3289_v2 = vld [vmem:[#allocation2 + $0x69] sm:$0xff]  ;;  %v570_v16 = vld [vmem:[#allocation2 + $0x91] sm:$0xff] }
  0x30   : > { %485 = vst.msk [vmem:[#allocation2 + $0x129] sm:$0xff] %vm405_vm0, %v396_v6  ;;  %488 = vst.msk [vmem:[#allocation2 + $0x151] sm:$0xff] %vm405_vm0, %v399_v7  ;;  %v3294_v17 = vld [vmem:[#allocation2 + $0x50] sm:$0xff]  ;;  %v3296_v20 = vld [vmem:[#allocation2 + $0x78] sm:$0xff] }
  0x31   : > { %632 = vrot.lane.b32.xlu1 %v3238_v55, %s2974_s8  ;;  %638 = vrot.lane.b32.xlu0 %v3240_v56, %s2974_s8  ;;  %487 = vst.msk [vmem:[#allocation2 + $0x141] sm:$0xff] %vm405_vm0, %v398_v10  ;;  %490 = vst.msk [vmem:[#allocation2 + $0x169] sm:$0xff] %vm405_vm0, %v401_v11  ;;  %v3298_v21 = vld [vmem:[#allocation2 + $0x81] sm:$0xff]  ;;  %v572_v22 = vld [vmem:[#allocation2 + $0xa9] sm:$0xff] }
  0x32   : > { %489 = vst.msk [vmem:[#allocation2 + $0x159] sm:$0xff] %vm405_vm0, %v400_v12  ;;  %531 = vst.msk [vmem:[#allocation3 + $0x28] sm:$0xff] %vm405_vm0, %v3273_v14  ;;  %v3307_v23 = vld [vmem:[#allocation2 + $0x99] sm:$0xff]  ;;  %v574_v24 = vld [vmem:[#allocation2 + $0xc1] sm:$0xff] }
  0x33   : > { %534 = vst.msk [vmem:[#allocation3 + $0x40] sm:$0xff] %vm405_vm0, %v3275_v15  ;;  %491 = vst.msk [vmem:[#allocation2 + $0x171] sm:$0xff] %vm405_vm0, %v402_v13  ;;  %v3309_v25 = vld [vmem:[#allocation2 + $0x68] sm:$0xff]  ;;  %v3313_v26 = vld [vmem:[#allocation2 + $0x90] sm:$0xff] }
  0x34   : > { %533 = vst.msk [vmem:[#allocation3 + $0x38] sm:$0xff] %vm405_vm0, %v3294_v17  ;;  %536 = vst.msk [vmem:[#allocation3 + $0x50] sm:$0xff] %vm405_vm0, %v3296_v20  ;;  %v3315_v27 = vld [vmem:[#allocation2 + $0x80] sm:$0xff]  ;;  %v3317_v28 = vld [vmem:[#allocation2 + $0xa8] sm:$0xff] }
  0x35   : > { %636 = vrot.lane.b32.xlu1 %v3267_v8, %s2974_s8  ;;  %642 = vrot.lane.b32.xlu0 %v3269_v9, %s2974_s8  ;;  %535 = vst.msk [vmem:[#allocation3 + $0x48] sm:$0xff] %vm405_vm0, %v3309_v25  ;;  %v573_v31 = vld [vmem:[#allocation2 + $0xb1] sm:$0xff]  ;;  %v576_v32 = vld [vmem:[#allocation2 + $0xd9] sm:$0xff]  ;;  %538 = vst.msk [vmem:[#allocation3 + $0x60] sm:$0xff] %vm405_vm0, %v3313_v26 }
  0x36   : > { %537 = vst.msk [vmem:[#allocation3 + $0x58] sm:$0xff] %vm405_vm0, %v3315_v27  ;;  %540 = vst.msk [vmem:[#allocation3 + $0x70] sm:$0xff] %vm405_vm0, %v3317_v28  ;;  %v3325_v33 = vld [vmem:[#allocation2 + $0x98] sm:$0xff]  ;;  %v3327_v34 = vld [vmem:[#allocation2 + $0xc0] sm:$0xff] }
  0x37   : > { %v3329_v35 = vld [vmem:[#allocation2 + $0xb0] sm:$0xff]  ;;  %539 = vst.msk [vmem:[#allocation3 + $0x68] sm:$0xff] %vm405_vm0, %v3325_v33  ;;  %542 = vst.msk [vmem:[#allocation3 + $0x80] sm:$0xff] %vm405_vm0, %v3327_v34  ;;  %v3340_v36 = vld [vmem:[#allocation2 + $0xd8] sm:$0xff] }
  0x38   : > { %541 = vst.msk [vmem:[#allocation3 + $0x78] sm:$0xff] %vm405_vm0, %v3329_v35  ;;  %v3342_v37 = vld [vmem:[#allocation2 + $0xc8] sm:$0xff]  ;;  %v3344_v38 = vld [vmem:[#allocation2 + $0xf0] sm:$0xff]  ;;  %544 = vst.msk [vmem:[#allocation3 + $0x90] sm:$0xff] %vm405_vm0, %v3340_v36 }
  0x39   : > { %640 = vrot.lane.b32.xlu1 %v3289_v2, %s2974_s8  ;;  %646 = vrot.lane.b32.xlu0 %v570_v16, %s2974_s8  ;;  %543 = vst.msk [vmem:[#allocation3 + $0x88] sm:$0xff] %vm405_vm0, %v3342_v37  ;;  %546 = vst.msk [vmem:[#allocation3 + $0xa0] sm:$0xff] %vm405_vm0, %v3344_v38  ;;  %v3352_v39 = vld [vmem:[#allocation2 + $0xe0] sm:$0xff]  ;;  %v3354_v40 = vld [vmem:[#allocation2 + $0x108] sm:$0xff] }
  0x3a   : > { %v3356_v41 = vld [vmem:[#allocation2 + $0xf8] sm:$0xff]  ;;  %545 = vst.msk [vmem:[#allocation3 + $0x98] sm:$0xff] %vm405_vm0, %v3352_v39  ;;  %548 = vst.msk [vmem:[#allocation3 + $0xb0] sm:$0xff] %vm405_vm0, %v3354_v40  ;;  %v3364_v42 = vld [vmem:[#allocation2 + $0x120] sm:$0xff] }
  0x3b   : > { %547 = vst.msk [vmem:[#allocation3 + $0xa8] sm:$0xff] %vm405_vm0, %v3356_v41  ;;  %550 = vst.msk [vmem:[#allocation3 + $0xc0] sm:$0xff] %vm405_vm0, %v3364_v42  ;;  %v3370_v43 = vld [vmem:[#allocation2 + $0x110] sm:$0xff]  ;;  %v520_v46 = vld [vmem:[#allocation2 + $0x138] sm:$0xff] }
  0x3c   : > { %v575_v44 = vld [vmem:[#allocation2 + $0xc9] sm:$0xff]  ;;  %v578_v45 = vld [vmem:[#allocation2 + $0xf1] sm:$0xff]  ;;  %549 = vst.msk [vmem:[#allocation3 + $0xb8] sm:$0xff] %vm405_vm0, %v3370_v43  ;;  %552 = vst.msk [vmem:[#allocation3 + $0xd0] sm:$0xff] %vm405_vm0, %v520_v46 }
  0x3d   : > { %644 = vrot.lane.b32.xlu1 %v3298_v21, %s2974_s8  ;;  %650 = vrot.lane.b32.xlu0 %v572_v22, %s2974_s8  ;;  %v3377_v47 = vld [vmem:[#allocation2 + $0x128] sm:$0xff]  ;;  %v522_v51 = vld [vmem:[#allocation2 + $0x150] sm:$0xff]  ;;  %v521_v57 = vld [vmem:[#allocation2 + $0x140] sm:$0xff] }
  0x3e   : > { %v577_v49 = vld [vmem:[#allocation2 + $0xe1] sm:$0xff]  ;;  %v580_v50 = vld [vmem:[#allocation2 + $0x109] sm:$0xff]  ;;  %551 = vst.msk [vmem:[#allocation3 + $0xc8] sm:$0xff] %vm405_vm0, %v3377_v47  ;;  %554 = vst.msk [vmem:[#allocation3 + $0xe0] sm:$0xff] %vm405_vm0, %v522_v51 }
  0x3f   : > { %v579_v58 = vld [vmem:[#allocation2 + $0xf9] sm:$0xff]  ;;  %v582_v59 = vld [vmem:[#allocation2 + $0x121] sm:$0xff]  ;;  %553 = vst.msk [vmem:[#allocation3 + $0xd8] sm:$0xff] %vm405_vm0, %v521_v57  ;;  %v581_v62 = vld [vmem:[#allocation2 + $0x111] sm:$0xff] }
  0x40   : > { %v524_v60 = vld [vmem:[#allocation2 + $0x168] sm:$0xff]  ;;  %v523_v61 = vld [vmem:[#allocation2 + $0x158] sm:$0xff]  ;;  %v525_v0 = vld [vmem:[#allocation2 + $0x170] sm:$0xff] }
  0x41   : > { %648 = vrot.lane.b32.xlu1 %v3307_v23, %s2974_s8  ;;  %654 = vrot.lane.b32.xlu0 %v574_v24, %s2974_s8  ;;  %556 = vst.msk [vmem:[#allocation3 + $0xf0] sm:$0xff] %vm405_vm0, %v524_v60  ;;  %v584_v63 = vld [vmem:[#allocation2 + $0x139] sm:$0xff]  ;;  %555 = vst.msk [vmem:[#allocation3 + $0xe8] sm:$0xff] %vm405_vm0, %v523_v61  ;;  %v583_v3 = vld [vmem:[#allocation2 + $0x129] sm:$0xff] }
  0x42   : > { %v586_v4 = vld [vmem:[#allocation2 + $0x151] sm:$0xff]  ;;  %557 = vst.msk [vmem:[#allocation3 + $0xf8] sm:$0xff] %vm405_vm0, %v525_v0  ;;  %v585_v5 = vld [vmem:[#allocation2 + $0x141] sm:$0xff]  ;;  %v588_v6 = vld [vmem:[#allocation2 + $0x169] sm:$0xff] }
  0x43   : > { %v587_v7 = vld [vmem:[#allocation2 + $0x159] sm:$0xff]  ;;  %v751_v1 = vld [vmem:[#allocation2 + $0x2] sm:$0xff]  ;;  %v589_v10 = vld [vmem:[#allocation2 + $0x171] sm:$0xff] }
  0x44   : > { %v3398_v11 = vld [vmem:[#allocation2 + $0x1a] sm:$0xff]  ;;  %v752_v12 = vld [vmem:[#allocation2 + $0xa] sm:$0xff]  ;;  %v3403_v13 = vld [vmem:[#allocation2 + $0x32] sm:$0xff] }
  0x45   : > { %652 = vrot.lane.b32.xlu1 %v573_v31, %s2974_s8  ;;  %658 = vrot.lane.b32.xlu0 %v576_v32, %s2974_s8  ;;  %v3408_v16 = vld [vmem:[#allocation2 + $0x22] sm:$0xff]  ;;  %v3410_v22 = vld [vmem:[#allocation2 + $0x4a] sm:$0xff]  ;;  %v3416_v24 = vld [vmem:[#allocation2 + $0x3a] sm:$0xff] }
  0x46   : > { %v3418_v31 = vld [vmem:[#allocation2 + $0x62] sm:$0xff]  ;;  %v3424_v32 = vld [vmem:[#allocation2 + $0x52] sm:$0xff]  ;;  %v3448_v51 = vld [vmem:[#allocation2 + $0x9a] sm:$0xff] }
  0x47   : > { %v3434_v46 = vld [vmem:[#allocation2 + $0x92] sm:$0xff]  ;;  %v3450_v57 = vld [vmem:[#allocation2 + $0xc2] sm:$0xff]  ;;  %v3461_v60 = vld [vmem:[#allocation2 + $0xca] sm:$0xff] }
  0x48   : > { %v771_v61 = vld [vmem:[#allocation2 + $0xf2] sm:$0xff]  ;;  %v772_v0 = vld [vmem:[#allocation2 + $0xfa] sm:$0xff] }
  0x49   : > { %656 = vrot.lane.b32.xlu1 %v575_v44, %s2974_s8  ;;  %662 = vrot.lane.b32.xlu0 %v578_v45, %s2974_s8  ;;  %v3426_v44 = vld [vmem:[#allocation2 + $0x7a] sm:$0xff]  ;;  %v3432_v45 = vld [vmem:[#allocation2 + $0x6a] sm:$0xff] }
  0x4d   : > { %660 = vrot.lane.b32.xlu1 %v577_v49, %s2974_s8  ;;  %666 = vrot.lane.b32.xlu0 %v580_v50, %s2974_s8  ;;  %v3440_v49 = vld [vmem:[#allocation2 + $0x82] sm:$0xff]  ;;  %v3442_v50 = vld [vmem:[#allocation2 + $0xaa] sm:$0xff] }
  0x51   : > { %664 = vrot.lane.b32.xlu1 %v579_v58, %s2974_s8  ;;  %670 = vrot.lane.b32.xlu0 %v582_v59, %s2974_s8  ;;  %v3456_v58 = vld [vmem:[#allocation2 + $0xb2] sm:$0xff]  ;;  %v769_v59 = vld [vmem:[#allocation2 + $0xda] sm:$0xff] }
  0x55   : > { %668 = vrot.lane.b32.xlu1 %v581_v62, %s2974_s8  ;;  %674 = vrot.lane.b32.xlu0 %v584_v63, %s2974_s8  ;;  %v770_v62 = vld [vmem:[#allocation2 + $0xe2] sm:$0xff]  ;;  %v773_v63 = vld [vmem:[#allocation2 + $0x10a] sm:$0xff] }
  0x59   : > { %672 = vrot.lane.b32.xlu1 %v583_v3, %s2974_s8  ;;  %678 = vrot.lane.b32.xlu0 %v586_v4, %s2974_s8  ;;  %v775_v3 = vld [vmem:[#allocation2 + $0x122] sm:$0xff] }
  0x5d   : > { %676 = vrot.lane.b32.xlu1 %v585_v5, %s2974_s8  ;;  %682 = vrot.lane.b32.xlu0 %v588_v6, %s2974_s8  ;;  %v774_v5 = vld [vmem:[#allocation2 + $0x112] sm:$0xff]  ;;  %v777_v6 = vld [vmem:[#allocation2 + $0x13a] sm:$0xff] }
  0x61   : > { %680 = vrot.lane.b32.xlu1 %v587_v7, %s2974_s8  ;;  %815 = vrot.lane.b32.xlu0 %v751_v1, %s2975_s9  ;;  %v776_v1 = vld [vmem:[#allocation2 + $0x12a] sm:$0xff] }
  0x65   : > { %684 = vrot.lane.b32.xlu1 %v589_v10, %s2974_s8  ;;  %819 = vrot.lane.b32.xlu0 %v3398_v11, %s2975_s9  ;;  %v779_v10 = vld [vmem:[#allocation2 + $0x152] sm:$0xff] }
  0x69   : > { %817 = vrot.lane.b32.xlu1 %v752_v12, %s2975_s9  ;;  %823 = vrot.lane.b32.xlu0 %v3403_v13, %s2975_s9  ;;  %v778_v12 = vld [vmem:[#allocation2 + $0x142] sm:$0xff] }
  0x6d   : > { %821 = vrot.lane.b32.xlu1 %v3408_v16, %s2975_s9  ;;  %827 = vrot.lane.b32.xlu0 %v3410_v22, %s2975_s9 }
  0x71   : > { %825 = vrot.lane.b32.xlu1 %v3416_v24, %s2975_s9  ;;  %831 = vrot.lane.b32.xlu0 %v3418_v31, %s2975_s9 }
  0x75   : > { %829 = vrot.lane.b32.xlu1 %v3424_v32, %s2975_s9  ;;  %835 = vrot.lane.b32.xlu0 %v3426_v44, %s2975_s9 }
  0x79   : > { %833 = vrot.lane.b32.xlu1 %v3432_v45, %s2975_s9  ;;  %839 = vrot.lane.b32.xlu0 %v3434_v46, %s2975_s9 }
  0x7d   : > { %837 = vrot.lane.b32.xlu1 %v3440_v49, %s2975_s9  ;;  %843 = vrot.lane.b32.xlu0 %v3442_v50, %s2975_s9 }
  0x80   : > { %v623_v4 = vpop.permute.xlu0 %622 }
  0x81   : > { %841 = vrot.lane.b32.xlu1 %v3448_v51, %s2975_s9  ;;  %847 = vrot.lane.b32.xlu0 %v3450_v57, %s2975_s9  ;;  %719 = vst.msk [vmem:[#allocation3] sm:$0xff] %vm718_vm2, %v623_v4  ;;  %v782_v4 = vld [vmem:[#allocation2 + $0x172] sm:$0xff] }
  0x85   : > { %845 = vrot.lane.b32.xlu1 %v3456_v58, %s2975_s9  ;;  %851 = vrot.lane.b32.xlu0 %v769_v59, %s2975_s9  ;;  %v781_v59 = vld [vmem:[#allocation2 + $0x16a] sm:$0xff] }
  0x89   : > { %849 = vrot.lane.b32.xlu1 %v3461_v60, %s2975_s9  ;;  %855 = vrot.lane.b32.xlu0 %v771_v61, %s2975_s9 }
  0x8d   : > { %853 = vrot.lane.b32.xlu1 %v770_v62, %s2975_s9  ;;  %859 = vrot.lane.b32.xlu0 %v773_v63, %s2975_s9  ;;  %v780_v63 = vld [vmem:[#allocation2 + $0x15a] sm:$0xff] }
  0x91   : > { %857 = vrot.lane.b32.xlu1 %v772_v0, %s2975_s9  ;;  %863 = vrot.lane.b32.xlu0 %v775_v3, %s2975_s9 }
  0x92   : > { %v625_v7 = vpop.permute.xlu0 %624 }
  0x93   : > { %720 = vst.msk [vmem:[#allocation3 + $0x8] sm:$0xff] %vm718_vm2, %v625_v7 }
  0x95   : > { %861 = vrot.lane.b32.xlu1 %v774_v5, %s2975_s9  ;;  %867 = vrot.lane.b32.xlu0 %v777_v6, %s2975_s9 }
  0x99   : > { %865 = vrot.lane.b32.xlu1 %v776_v1, %s2975_s9  ;;  %871 = vrot.lane.b32.xlu0 %v779_v10, %s2975_s9 }
  0x9b   : > { %v627_v61 = vpop.permute.xlu1 %626  ;;  %v631_v62 = vpop.permute.xlu0 %630 }
  0x9c   : > { %721 = vst.msk [vmem:[#allocation3 + $0x10] sm:$0xff] %vm718_vm2, %v627_v61  ;;  %723 = vst.msk [vmem:[#allocation3 + $0x20] sm:$0xff] %vm718_vm2, %v631_v62 }
  0x9d   : > { %869 = vrot.lane.b32.xlu1 %v778_v12, %s2975_s9  ;;  %875 = vrot.lane.b32.xlu0 %v781_v59, %s2975_s9 }
  0x9f   : > { %v629_v0 = vpop.permute.xlu1 %628  ;;  %v635_v3 = vpop.permute.xlu0 %634 }
  0xa0   : > { %722 = vst.msk [vmem:[#allocation3 + $0x18] sm:$0xff] %vm718_vm2, %v629_v0  ;;  %725 = vst.msk [vmem:[#allocation3 + $0x30] sm:$0xff] %vm718_vm2, %v635_v3  ;;  %v2135_v0 = vld [vmem:[%s4271_s3] sm:$0xff] }
  0xa1   : > { %873 = vrot.lane.b32.xlu1 %v780_v63, %s2975_s9  ;;  %1008 = vrot.lane.b32.xlu0 %v3218_v48, %s2976_s10 }
  0xa3   : > { %v633_v5 = vpop.permute.xlu1 %632  ;;  %v639_v6 = vpop.permute.xlu0 %638 }
  0xa4   : > { %724 = vst.msk [vmem:[#allocation3 + $0x28] sm:$0xff] %vm718_vm2, %v633_v5  ;;  %727 = vst.msk [vmem:[#allocation3 + $0x40] sm:$0xff] %vm718_vm2, %v639_v6  ;;  %v2138_v6 = vld [vmem:[%s4271_s3 + $0x18] sm:$0xff] }
  0xa5   : > { %877 = vrot.lane.b32.xlu1 %v782_v4, %s2975_s9  ;;  %1012 = vrot.lane.b32.xlu0 %v3232_v52, %s2976_s10 }
  0xa7   : > { %v637_v7 = vpop.permute.xlu1 %636  ;;  %v643_v1 = vpop.permute.xlu0 %642 }
  0xa8   : > { %726 = vst.msk [vmem:[#allocation3 + $0x38] sm:$0xff] %vm718_vm2, %v637_v7  ;;  %729 = vst.msk [vmem:[#allocation3 + $0x50] sm:$0xff] %vm718_vm2, %v643_v1 }
  0xa9   : > { %1010 = vrot.lane.b32.xlu1 %v3234_v53, %s2976_s10  ;;  %1016 = vrot.lane.b32.xlu0 %v3236_v54, %s2976_s10 }
  0xab   : > { %v641_v48 = vpop.permute.xlu1 %640  ;;  %v647_v10 = vpop.permute.xlu0 %646 }
  0xac   : > { %728 = vst.msk [vmem:[#allocation3 + $0x48] sm:$0xff] %vm718_vm2, %v641_v48  ;;  %731 = vst.msk [vmem:[#allocation3 + $0x60] sm:$0xff] %vm718_vm2, %v647_v10 }
  0xad   : > { %1014 = vrot.lane.b32.xlu1 %v3273_v14, %s2976_s10  ;;  %1020 = vrot.lane.b32.xlu0 %v3275_v15, %s2976_s10 }
  0xaf   : > { %v645_v12 = vpop.permute.xlu1 %644  ;;  %v651_v59 = vpop.permute.xlu0 %650 }
  0xb0   : > { %730 = vst.msk [vmem:[#allocation3 + $0x58] sm:$0xff] %vm718_vm2, %v645_v12  ;;  %733 = vst.msk [vmem:[#allocation3 + $0x70] sm:$0xff] %vm718_vm2, %v651_v59 }
  0xb1   : > { %1018 = vrot.lane.b32.xlu1 %v3294_v17, %s2976_s10  ;;  %1024 = vrot.lane.b32.xlu0 %v3296_v20, %s2976_s10 }
  0xb3   : > { %v649_v53 = vpop.permute.xlu1 %648  ;;  %v655_v61 = vpop.permute.xlu0 %654 }
  0xb4   : > { %732 = vst.msk [vmem:[#allocation3 + $0x68] sm:$0xff] %vm718_vm2, %v649_v53  ;;  %735 = vst.msk [vmem:[#allocation3 + $0x80] sm:$0xff] %vm718_vm2, %v655_v61  ;;  %v2142_v53 = vld [vmem:[%s4271_s3 + $0x38] sm:$0xff] }
  0xb5   : > { %1022 = vrot.lane.b32.xlu1 %v3309_v25, %s2976_s10  ;;  %1201 = vrot.lane.b32.xlu0 %v3182_v18, %s2977_s11  ;;  %v2136_v18 = vld [vmem:[%s4271_s3 + $0x8] sm:$0xff] }
  0xb6   : > { %v2920_v3 = vpack.c.bf16 %v2136_v18, %v2135_v0  ;;  %v2143_v18 = vld [vmem:[%s4271_s3 + $0x40] sm:$0xff] }
  0xb7   : > { %v653_v62 = vpop.permute.xlu1 %652  ;;  %v659_v63 = vpop.permute.xlu0 %658 }
  0xb8   : > { %734 = vst.msk [vmem:[#allocation3 + $0x78] sm:$0xff] %vm718_vm2, %v653_v62  ;;  %737 = vst.msk [vmem:[#allocation3 + $0x90] sm:$0xff] %vm718_vm2, %v659_v63  ;;  %2921 = vmatprep.subr.bf16.mxu0 %v2920_v3  ;;  %2936 = vmatprep.subr.bf16.mxu1 %v2920_v3 }
  0xb9   : > { %1026 = vrot.lane.b32.xlu1 %v3315_v27, %s2976_s10  ;;  %1394 = vrot.lane.b32.xlu0 %v3398_v11, %s2978_s12  ;;  %v2137_v11 = vld [vmem:[%s4271_s3 + $0x10] sm:$0xff] }
  0xba   : > { %2923 = vmatpush3.bf16.msra.mxu0 %v2920_v3  ;;  %v2924_v7 = vpack.c.bf16 %v2138_v6, %v2137_v11  ;;  %2941 = vmatpush3.bf16.msra.mxu1 %v2920_v3 }
  0xbb   : > { %v657_v4 = vpop.permute.xlu1 %656  ;;  %v663_v5 = vpop.permute.xlu0 %662 }
  0xbc   : > { %736 = vst.msk [vmem:[#allocation3 + $0x88] sm:$0xff] %vm718_vm2, %v657_v4  ;;  %739 = vst.msk [vmem:[#allocation3 + $0xa0] sm:$0xff] %vm718_vm2, %v663_v5  ;;  %2925 = vmatprep.subr.bf16.mxu0 %v2924_v7  ;;  %2937 = vmatprep.subr.bf16.mxu1 %v2924_v7 }
  0xbd   : > { %1203 = vrot.lane.b32.xlu1 %v3202_v29, %s2977_s11  ;;  %1588 = vrot.lane.b32.xlu0 %v3232_v52, %s2979_s17  ;;  %v2139_v29 = vld [vmem:[%s4271_s3 + $0x20] sm:$0xff]  ;;  %v2140_v52 = vld [vmem:[%s4271_s3 + $0x28] sm:$0xff] }
  0xbe   : > { %2927 = vmatpush3.bf16.msra.mxu0 %v2924_v7  ;;  %v2928_v10 = vpack.c.bf16 %v2140_v52, %v2139_v29  ;;  %2942 = vmatpush3.bf16.msra.mxu1 %v2924_v7 }
  0xbf   : > { %v661_v1 = vpop.permute.xlu1 %660  ;;  %v667_v48 = vpop.permute.xlu0 %666 }
  0xc0   : > { %738 = vst.msk [vmem:[#allocation3 + $0x98] sm:$0xff] %vm718_vm2, %v661_v1  ;;  %741 = vst.msk [vmem:[#allocation3 + $0xb0] sm:$0xff] %vm718_vm2, %v667_v48  ;;  %2929 = vmatprep.subr.bf16.mxu0 %v2928_v10  ;;  %2938 = vmatprep.subr.bf16.mxu1 %v2928_v10 }
  0xc1   : > { %1396 = vrot.lane.b32.xlu1 %v3408_v16, %s2978_s12  ;;  %1781 = vrot.lane.b32.xlu0 %v3184_v19, %s2980_s25  ;;  %v2141_v16 = vld [vmem:[%s4271_s3 + $0x30] sm:$0xff] }
  0xc2   : > { %2931 = vmatpush3.bf16.msra.mxu0 %v2928_v10  ;;  %v2932_v61 = vpack.c.bf16 %v2142_v53, %v2141_v16  ;;  %2943 = vmatpush3.bf16.msra.mxu1 %v2928_v10 }
  0xc3   : > { %v665_v12 = vpop.permute.xlu1 %664  ;;  %v671_v59 = vpop.permute.xlu0 %670 }
  0xc4   : > { %740 = vst.msk [vmem:[#allocation3 + $0xa8] sm:$0xff] %vm718_vm2, %v665_v12  ;;  %743 = vst.msk [vmem:[#allocation3 + $0xc0] sm:$0xff] %vm718_vm2, %v671_v59  ;;  %2933 = vmatprep.subr.bf16.mxu0 %v2932_v61  ;;  %2939 = vmatprep.subr.bf16.mxu1 %v2932_v61 }
  0xc5   : > { %1590 = vrot.lane.b32.xlu1 %v3273_v14, %s2979_s17  ;;  %1783 = vrot.lane.b32.xlu0 %v3238_v55, %s2980_s25 }
  0xc6   : > { %2935 = vmatpush3.bf16.msra.mxu0 %v2932_v61  ;;  %2944 = vmatpush3.bf16.msra.mxu1 %v2932_v61 }
  0xc7   : > { %v669_v62 = vpop.permute.xlu1 %668  ;;  %v675_v63 = vpop.permute.xlu0 %674  ;;  %2870 = vmatprep.subr.mxu0 %v2143_v18  ;;  %2940 = vmatprep.subr.mxu1 %v2143_v18 }
  0xc8   : > { %742 = vst.msk [vmem:[#allocation3 + $0xb8] sm:$0xff] %vm718_vm2, %v669_v62  ;;  %745 = vst.msk [vmem:[#allocation3 + $0xd0] sm:$0xff] %vm718_vm2, %v675_v63 }
  0xc9   : > { %1205 = vrot.lane.b32.xlu1 %v3184_v19, %s2977_s11  ;;  %1207 = vrot.lane.b32.xlu0 %v3238_v55, %s2977_s11 }
  0xca   : > { %2871 = vmatpush3.msra.mxu0 %v2143_v18  ;;  %2945 = vmatpush3.msra.mxu1 %v2143_v18 }
  0xcb   : > { %v673_v14 = vpop.permute.xlu1 %672  ;;  %v679_v0 = vpop.permute.xlu0 %678 }
  0xcc   : > { %744 = vst.msk [vmem:[#allocation3 + $0xc8] sm:$0xff] %vm718_vm2, %v673_v14  ;;  %747 = vst.msk [vmem:[#allocation3 + $0xe0] sm:$0xff] %vm718_vm2, %v679_v0 }
  0xcd   : > { %1974 = vrot.lane.b32.xlu1 %v3403_v13, %s2981_s16  ;;  %1976 = vrot.lane.b32.xlu0 %v3416_v24, %s2981_s16 }
  0xcf   : > { %v677_v19 = vpop.permute.xlu1 %676  ;;  %v683_v55 = vpop.permute.xlu0 %682 }
  0xd0   : > { %746 = vst.msk [vmem:[#allocation3 + $0xd8] sm:$0xff] %vm718_vm2, %v677_v19  ;;  %749 = vst.msk [vmem:[#allocation3 + $0xf0] sm:$0xff] %vm718_vm2, %v683_v55 }
  0xd1   : > { %1398 = vrot.lane.b32.xlu1 %v3403_v13, %s2978_s12  ;;  %1592 = vrot.lane.b32.xlu0 %v3236_v54, %s2979_s17 }
  0xd3   : > { %v681_v3 = vpop.permute.xlu1 %680  ;;  %v816_v4 = vpop.permute.xlu0 %815 }
  0xd4   : > { %748 = vst.msk [vmem:[#allocation3 + $0xe8] sm:$0xff] %vm718_vm2, %v681_v3 }
  0xd5   : > { %912 = vst.msk [vmem:[#allocation3] sm:$0xff] %vm911_vm3, %v816_v4  ;;  %1400 = vrot.lane.b32.xlu1 %v3416_v24, %s2978_s12  ;;  %1785 = vrot.lane.b32.xlu0 %v3204_v30, %s2980_s25 }
  0xd7   : > { %v685_v5 = vpop.permute.xlu1 %684  ;;  %v820_v11 = vpop.permute.xlu0 %819 }
  0xd8   : > { %750 = vst.msk [vmem:[#allocation3 + $0xf8] sm:$0xff] %vm718_vm2, %v685_v5  ;;  %v1728_v5 = vld [vmem:[#allocation2 + $0xb1] sm:$0xff] }
  0xd9   : > { %914 = vst.msk [vmem:[#allocation3 + $0x10] sm:$0xff] %vm911_vm3, %v820_v11  ;;  %1594 = vrot.lane.b32.xlu1 %v3294_v17, %s2979_s17  ;;  %1787 = vrot.lane.b32.xlu0 %v3267_v8, %s2980_s25 }
  0xdb   : > { %v818_v54 = vpop.permute.xlu1 %817  ;;  %v824_v13 = vpop.permute.xlu0 %823 }
  0xdc   : > { %913 = vst.msk [vmem:[#allocation3 + $0x8] sm:$0xff] %vm911_vm3, %v818_v54  ;;  %916 = vst.msk [vmem:[#allocation3 + $0x20] sm:$0xff] %vm911_vm3, %v824_v13 }
  0xdd   : > { %1209 = vrot.lane.b32.xlu1 %v3204_v30, %s2977_s11  ;;  %1211 = vrot.lane.b32.xlu0 %v3267_v8, %s2977_s11 }
  0xdf   : > { %v822_v24 = vpop.permute.xlu1 %821  ;;  %v828_v6 = vpop.permute.xlu0 %827 }
  0xe0   : > { %915 = vst.msk [vmem:[#allocation3 + $0x18] sm:$0xff] %vm911_vm3, %v822_v24  ;;  %918 = vst.msk [vmem:[#allocation3 + $0x30] sm:$0xff] %vm911_vm3, %v828_v6 }
  0xe1   : > { %1978 = vrot.lane.b32.xlu1 %v3410_v22, %s2981_s16  ;;  %1980 = vrot.lane.b32.xlu0 %v3424_v32, %s2981_s16 }
  0xe3   : > { %v826_v17 = vpop.permute.xlu1 %825  ;;  %v832_v7 = vpop.permute.xlu0 %831 }
  0xe4   : > { %917 = vst.msk [vmem:[#allocation3 + $0x28] sm:$0xff] %vm911_vm3, %v826_v17  ;;  %920 = vst.msk [vmem:[#allocation3 + $0x40] sm:$0xff] %vm911_vm3, %v832_v7 }
  0xe5   : > { %1402 = vrot.lane.b32.xlu1 %v3410_v22, %s2978_s12  ;;  %1596 = vrot.lane.b32.xlu0 %v3275_v15, %s2979_s17 }
  0xe7   : > { %v830_v30 = vpop.permute.xlu1 %829  ;;  %v836_v8 = vpop.permute.xlu0 %835 }
  0xe8   : > { %919 = vst.msk [vmem:[#allocation3 + $0x38] sm:$0xff] %vm911_vm3, %v830_v30  ;;  %922 = vst.msk [vmem:[#allocation3 + $0x50] sm:$0xff] %vm911_vm3, %v836_v8 }
  0xe9   : > { %1404 = vrot.lane.b32.xlu1 %v3424_v32, %s2978_s12  ;;  %1789 = vrot.lane.b32.xlu0 %v3240_v56, %s2980_s25 }
  0xeb   : > { %v834_v1 = vpop.permute.xlu1 %833  ;;  %v840_v48 = vpop.permute.xlu0 %839 }
  0xec   : > { %921 = vst.msk [vmem:[#allocation3 + $0x48] sm:$0xff] %vm911_vm3, %v834_v1  ;;  %924 = vst.msk [vmem:[#allocation3 + $0x60] sm:$0xff] %vm911_vm3, %v840_v48  ;;  %v1730_v1 = vld [vmem:[#allocation2 + $0xc9] sm:$0xff] }
  0xed   : > { %1598 = vrot.lane.b32.xlu1 %v3309_v25, %s2979_s17  ;;  %1791 = vrot.lane.b32.xlu0 %v3289_v2, %s2980_s25 }
  0xef   : > { %v838_v15 = vpop.permute.xlu1 %837  ;;  %v844_v22 = vpop.permute.xlu0 %843 }
  0xf0   : > { %923 = vst.msk [vmem:[#allocation3 + $0x58] sm:$0xff] %vm911_vm3, %v838_v15  ;;  %926 = vst.msk [vmem:[#allocation3 + $0x70] sm:$0xff] %vm911_vm3, %v844_v22 }
  0xf1   : > { %1213 = vrot.lane.b32.xlu1 %v3240_v56, %s2977_s11  ;;  %1215 = vrot.lane.b32.xlu0 %v3289_v2, %s2977_s11 }
  0xf3   : > { %v842_v32 = vpop.permute.xlu1 %841  ;;  %v848_v29 = vpop.permute.xlu0 %847 }
  0xf4   : > { %925 = vst.msk [vmem:[#allocation3 + $0x68] sm:$0xff] %vm911_vm3, %v842_v32  ;;  %928 = vst.msk [vmem:[#allocation3 + $0x80] sm:$0xff] %vm911_vm3, %v848_v29 }
  0xf5   : > { %1982 = vrot.lane.b32.xlu1 %v3418_v31, %s2981_s16  ;;  %1984 = vrot.lane.b32.xlu0 %v3432_v45, %s2981_s16 }
  0xf7   : > { %v846_v25 = vpop.permute.xlu1 %845  ;;  %v852_v52 = vpop.permute.xlu0 %851 }
  0xf8   : > { %927 = vst.msk [vmem:[#allocation3 + $0x78] sm:$0xff] %vm911_vm3, %v846_v25  ;;  %930 = vst.msk [vmem:[#allocation3 + $0x90] sm:$0xff] %vm911_vm3, %v852_v52 }
  0xf9   : > { %1406 = vrot.lane.b32.xlu1 %v3418_v31, %s2978_s12  ;;  %1600 = vrot.lane.b32.xlu0 %v3296_v20, %s2979_s17 }
  0xfb   : > { %v850_v56 = vpop.permute.xlu1 %849  ;;  %v856_v2 = vpop.permute.xlu0 %855 }
  0xfc   : > { %929 = vst.msk [vmem:[#allocation3 + $0x88] sm:$0xff] %vm911_vm3, %v850_v56  ;;  %932 = vst.msk [vmem:[#allocation3 + $0xa0] sm:$0xff] %vm911_vm3, %v856_v2 }
  0xfd   : > { %1408 = vrot.lane.b32.xlu1 %v3432_v45, %s2978_s12  ;;  %1793 = vrot.lane.b32.xlu0 %v3269_v9, %s2980_s25 }
  0xff   : > { %v854_v10 = vpop.permute.xlu1 %853  ;;  %v860_v12 = vpop.permute.xlu0 %859 }
 0x100   : > { %931 = vst.msk [vmem:[#allocation3 + $0x98] sm:$0xff] %vm911_vm3, %v854_v10  ;;  %934 = vst.msk [vmem:[#allocation3 + $0xb0] sm:$0xff] %vm911_vm3, %v860_v12 }
 0x101   : > { %1602 = vrot.lane.b32.xlu1 %v3315_v27, %s2979_s17  ;;  %1795 = vrot.lane.b32.xlu0 %v3298_v21, %s2980_s25 }
 0x103   : > { %v858_v20 = vpop.permute.xlu1 %857  ;;  %v864_v31 = vpop.permute.xlu0 %863 }
 0x104   : > { %933 = vst.msk [vmem:[#allocation3 + $0xa8] sm:$0xff] %vm911_vm3, %v858_v20  ;;  %936 = vst.msk [vmem:[#allocation3 + $0xc0] sm:$0xff] %vm911_vm3, %v864_v31 }
 0x105   : > { %1217 = vrot.lane.b32.xlu1 %v3269_v9, %s2977_s11  ;;  %1219 = vrot.lane.b32.xlu0 %v3298_v21, %s2977_s11 }
 0x107   : > { %v862_v45 = vpop.permute.xlu1 %861  ;;  %v868_v59 = vpop.permute.xlu0 %867 }
 0x108   : > { %935 = vst.msk [vmem:[#allocation3 + $0xb8] sm:$0xff] %vm911_vm3, %v862_v45  ;;  %938 = vst.msk [vmem:[#allocation3 + $0xd0] sm:$0xff] %vm911_vm3, %v868_v59  ;;  %v1732_v59 = vld [vmem:[#allocation2 + $0xe1] sm:$0xff] }
 0x109   : > { %1986 = vrot.lane.b32.xlu1 %v3426_v44, %s2981_s16  ;;  %1988 = vrot.lane.b32.xlu0 %v3440_v49, %s2981_s16 }
 0x10b   : > { %v866_v27 = vpop.permute.xlu1 %865  ;;  %v872_v16 = vpop.permute.xlu0 %871 }
 0x10c   : > { %937 = vst.msk [vmem:[#allocation3 + $0xc8] sm:$0xff] %vm911_vm3, %v866_v27  ;;  %940 = vst.msk [vmem:[#allocation3 + $0xe0] sm:$0xff] %vm911_vm3, %v872_v16 }
 0x10d   : > { %1410 = vrot.lane.b32.xlu1 %v3426_v44, %s2978_s12  ;;  %1604 = vrot.lane.b32.xlu0 %v3313_v26, %s2979_s17  ;;  %v1725_v44 = vld [vmem:[#allocation2 + $0x91] sm:$0xff] }
 0x10f   : > { %v870_v9 = vpop.permute.xlu1 %869  ;;  %v876_v21 = vpop.permute.xlu0 %875 }
 0x110   : > { %939 = vst.msk [vmem:[#allocation3 + $0xd8] sm:$0xff] %vm911_vm3, %v870_v9  ;;  %942 = vst.msk [vmem:[#allocation3 + $0xf0] sm:$0xff] %vm911_vm3, %v876_v21  ;;  %v1925_v21 = vld [vmem:[#allocation2 + $0xe2] sm:$0xff] }
 0x111   : > { %1412 = vrot.lane.b32.xlu1 %v3440_v49, %s2978_s12  ;;  %1606 = vrot.lane.b32.xlu0 %v3325_v33, %s2979_s17  ;;  %v1148_v49 = vld [vmem:[#allocation2 + $0x99] sm:$0xff] }
 0x113   : > { %v874_v53 = vpop.permute.xlu1 %873  ;;  %v1009_v61 = vpop.permute.xlu0 %1008 }
 0x114   : > { %941 = vst.msk [vmem:[#allocation3 + $0xe8] sm:$0xff] %vm911_vm3, %v874_v53 }
 0x115   : > { %1105 = vst.msk [vmem:[#allocation3] sm:$0xff] %vm1104_vm4, %v1009_v61  ;;  %1028 = vrot.lane.b32.xlu1 %v3313_v26, %s2976_s10  ;;  %1030 = vrot.lane.b32.xlu0 %v3325_v33, %s2976_s10 }
 0x117   : > { %v878_v62 = vpop.permute.xlu1 %877  ;;  %v1013_v63 = vpop.permute.xlu0 %1012 }
 0x118   : > { %943 = vst.msk [vmem:[#allocation3 + $0xf8] sm:$0xff] %vm911_vm3, %v878_v62 }
 0x119   : > { %1107 = vst.msk [vmem:[#allocation3 + $0x10] sm:$0xff] %vm1104_vm4, %v1013_v63  ;;  %1797 = vrot.lane.b32.xlu1 %v1725_v44, %s2980_s25  ;;  %1799 = vrot.lane.b32.xlu0 %v3307_v23, %s2980_s25 }
 0x11b   : > { %v1011_v14 = vpop.permute.xlu1 %1010  ;;  %v1017_v0 = vpop.permute.xlu0 %1016 }
 0x11c   : > { %1106 = vst.msk [vmem:[#allocation3 + $0x8] sm:$0xff] %vm1104_vm4, %v1011_v14  ;;  %1109 = vst.msk [vmem:[#allocation3 + $0x20] sm:$0xff] %vm1104_vm4, %v1017_v0  ;;  %v293_v14 = vld [vmem:[%s3102_s29 + $0xf0] sm:$0xff]  ;;  %v2963_v0 = vld [vmem:[%s4269_s1] ss:$0 sm:$0xff] }
 0x11d   : > { %1221 = vrot.lane.b32.xlu1 %v1725_v44, %s2977_s11  ;;  %1223 = vrot.lane.b32.xlu0 %v1148_v49, %s2977_s11 }
 0x11f   : > { %v1015_v26 = vpop.permute.xlu1 %1014  ;;  %v1021_v33 = vpop.permute.xlu0 %1020 }
 0x120   : > { %1108 = vst.msk [vmem:[#allocation3 + $0x18] sm:$0xff] %vm1104_vm4, %v1015_v26  ;;  %1111 = vst.msk [vmem:[#allocation3 + $0x30] sm:$0xff] %vm1104_vm4, %v1021_v33  ;;  %v332_v26 = vmul.f32 %v2963_v0, %v293_v14  ;;  %v2964_v33 = vld [vmem:[%s4270_s2] ss:$0 sm:$0xff] }
 0x121   : > { %1990 = vrot.lane.b32.xlu1 %v3434_v46, %s2981_s16  ;;  %1992 = vrot.lane.b32.xlu0 %v3448_v51, %s2981_s16 }
 0x123   : > { %v1019_v23 = vpop.permute.xlu1 %1018  ;;  %v1025_v18 = vpop.permute.xlu0 %1024 }
 0x124   : > { %1110 = vst.msk [vmem:[#allocation3 + $0x28] sm:$0xff] %vm1104_vm4, %v1019_v23  ;;  %1113 = vst.msk [vmem:[#allocation3 + $0x40] sm:$0xff] %vm1104_vm4, %v1025_v18  ;;  %v371_v23 = vadd.f32 %v2964_v33, %v332_v26  ;;  %v1547_v26 = vld [vmem:[#allocation2 + $0x140] sm:$0xff] }
 0x125   : > { %1414 = vrot.lane.b32.xlu1 %v3434_v46, %s2978_s12  ;;  %1608 = vrot.lane.b32.xlu0 %v3317_v28, %s2979_s17  ;;  %v1727_v46 = vld [vmem:[#allocation2 + $0xa9] sm:$0xff] }
 0x127   : > { %v1023_v19 = vpop.permute.xlu1 %1022  ;;  %v1202_v55 = vpop.permute.xlu0 %1201 }
 0x128   : > { %1112 = vst.msk [vmem:[#allocation3 + $0x38] sm:$0xff] %vm1104_vm4, %v1023_v19 }
 0x129   : > { %1298 = vst.msk [vmem:[#allocation3] sm:$0xff] %vm1297_vm5, %v1202_v55  ;;  %1416 = vrot.lane.b32.xlu1 %v3448_v51, %s2978_s12  ;;  %1610 = vrot.lane.b32.xlu0 %v3329_v35, %s2979_s17  ;;  %v294_v55 = vld [vmem:[%s3102_s29 + $0xf8] sm:$0xff] }
 0x12b   : > { %v1027_v3 = vpop.permute.xlu1 %1026  ;;  %v1395_v4 = vpop.permute.xlu0 %1394 }
 0x12c   : > { %1114 = vst.msk [vmem:[#allocation3 + $0x48] sm:$0xff] %vm1104_vm4, %v1027_v3  ;;  %v403_v3 = vmax.f32 %v371_v23, 0.0 }
 0x12d   : > { %1491 = vst.msk [vmem:[#allocation3] sm:$0xff] %vm1490_vm6, %v1395_v4  ;;  %1032 = vrot.lane.b32.xlu1 %v3317_v28, %s2976_s10  ;;  %1034 = vrot.lane.b32.xlu0 %v3329_v35, %s2976_s10  ;;  %v333_v4 = vmul.f32 %v2963_v0, %v294_v55 }
 0x12e   : > { %492 = vst.msk [vmem:[#allocation2 + $0x181] sm:$0xff] %vm405_vm0, %v403_v3  ;;  %v1740_v3 = vld [vmem:[#allocation2 + $0x141] sm:$0xff] }
 0x12f   : > { %v1204_v51 = vpop.permute.xlu1 %1203  ;;  %v1589_v11 = vpop.permute.xlu0 %1588 }
 0x130   : > { %1299 = vst.msk [vmem:[#allocation3 + $0x8] sm:$0xff] %vm1297_vm5, %v1204_v51 }
 0x131   : > { %1685 = vst.msk [vmem:[#allocation3] sm:$0xff] %vm1684_vm7, %v1589_v11  ;;  %1801 = vrot.lane.b32.xlu1 %v1727_v46, %s2980_s25  ;;  %1803 = vrot.lane.b32.xlu0 %v1728_v5, %s2980_s25 }
 0x133   : > { %v1397_v54 = vpop.permute.xlu1 %1396  ;;  %v1782_v13 = vpop.permute.xlu0 %1781 }
 0x134   : > { %1492 = vst.msk [vmem:[#allocation3 + $0x8] sm:$0xff] %vm1490_vm6, %v1397_v54  ;;  %v1734_v54 = vld [vmem:[#allocation2 + $0xf9] sm:$0xff] }
 0x135   : > { %1878 = vst.msk [vmem:[#allocation3] sm:$0xff] %vm1877_vm8, %v1782_v13  ;;  %1225 = vrot.lane.b32.xlu1 %v1727_v46, %s2977_s11  ;;  %1227 = vrot.lane.b32.xlu0 %v1728_v5, %s2977_s11  ;;  %v1733_v46 = vld [vmem:[#allocation2 + $0xf1] sm:$0xff]  ;;  %v372_v5 = vadd.f32 %v2964_v33, %v333_v4 }
 0x137   : > { %v1591_v28 = vpop.permute.xlu1 %1590  ;;  %v1784_v35 = vpop.permute.xlu0 %1783  ;;  %v404_v13 = vmax.f32 %v372_v5, 0.0  ;;  %v1932_v5 = vld [vmem:[#allocation2 + $0x13a] sm:$0xff] }
 0x138   : > { %1686 = vst.msk [vmem:[#allocation3 + $0x8] sm:$0xff] %vm1684_vm7, %v1591_v28  ;;  %v1926_v28 = vld [vmem:[#allocation2 + $0xf2] sm:$0xff] }
 0x139   : > { %1879 = vst.msk [vmem:[#allocation3 + $0x8] sm:$0xff] %vm1877_vm8, %v1784_v35  ;;  %1994 = vrot.lane.b32.xlu1 %v3442_v50, %s2981_s16  ;;  %1996 = vrot.lane.b32.xlu0 %v3456_v58, %s2981_s16 }
 0x13a   : > { %493 = vst.msk [vmem:[#allocation2 + $0x189] sm:$0xff] %vm405_vm0, %v404_v13 }
 0x13b   : > { %v1206_v24 = vpop.permute.xlu1 %1205  ;;  %v1208_v6 = vpop.permute.xlu0 %1207 }
 0x13c   : > { %1300 = vst.msk [vmem:[#allocation3 + $0x10] sm:$0xff] %vm1297_vm5, %v1206_v24  ;;  %1301 = vst.msk [vmem:[#allocation3 + $0x18] sm:$0xff] %vm1297_vm5, %v1208_v6  ;;  %v1927_v6 = vld [vmem:[#allocation2 + $0xfa] sm:$0xff] }
 0x13d   : > { %1418 = vrot.lane.b32.xlu1 %v3442_v50, %s2978_s12  ;;  %1612 = vrot.lane.b32.xlu0 %v3327_v34, %s2979_s17  ;;  %v1729_v50 = vld [vmem:[#allocation2 + $0xc1] sm:$0xff] }
 0x13f   : > { %v1975_v17 = vpop.permute.xlu1 %1974  ;;  %v1977_v7 = vpop.permute.xlu0 %1976 }
 0x140   : > { %2071 = vst.msk [vmem:[#allocation3] sm:$0xff] %vm2070_vm9, %v1975_v17  ;;  %2072 = vst.msk [vmem:[#allocation3 + $0x8] sm:$0xff] %vm2070_vm9, %v1977_v7 }
 0x141   : > { %1420 = vrot.lane.b32.xlu1 %v3456_v58, %s2978_s12  ;;  %1614 = vrot.lane.b32.xlu0 %v3342_v37, %s2979_s17 }
 0x143   : > { %v1399_v30 = vpop.permute.xlu1 %1398  ;;  %v1593_v8 = vpop.permute.xlu0 %1592 }
 0x144   : > { %1493 = vst.msk [vmem:[#allocation3 + $0x10] sm:$0xff] %vm1490_vm6, %v1399_v30 }
 0x145   : > { %1687 = vst.msk [vmem:[#allocation3 + $0x10] sm:$0xff] %vm1684_vm7, %v1593_v8  ;;  %1036 = vrot.lane.b32.xlu1 %v3327_v34, %s2976_s10  ;;  %1038 = vrot.lane.b32.xlu0 %v3342_v37, %s2976_s10 }
 0x147   : > { %v1401_v48 = vpop.permute.xlu1 %1400  ;;  %v1786_v58 = vpop.permute.xlu0 %1785  ;;  %v2103_v15 = vld [vmem:[#allocation3] sm:$0xff]  ;;  %v2104_v22 = vld [vmem:[#allocation3 + $0x8] sm:$0xff] }
 0x148   : > { %1494 = vst.msk [vmem:[#allocation3 + $0x18] sm:$0xff] %vm1490_vm6, %v1401_v48  ;;  %2872 = vmatprep.mubr.msk.f32.mxu0 %vm2151_vm10, %v2103_v15  ;;  %v1735_v15 = vld [vmem:[#allocation2 + $0x109] sm:$0xff] }
 0x149   : > { %1880 = vst.msk [vmem:[#allocation3 + $0x10] sm:$0xff] %vm1877_vm8, %v1786_v58  ;;  %1805 = vrot.lane.b32.xlu1 %v1729_v50, %s2980_s25  ;;  %1807 = vrot.lane.b32.xlu0 %v1730_v1, %s2980_s25 }
 0x14a   : > { %2873 = vmatmul.mubr.msk.f32.vlgmr.msra.gmra.mrb[0].mxu0 %vm2151_vm10, %v2104_v22 }
 0x14b   : > { %v1595_v34 = vpop.permute.xlu1 %1594  ;;  %v1788_v37 = vpop.permute.xlu0 %1787 }
 0x14c   : > { %1688 = vst.msk [vmem:[#allocation3 + $0x18] sm:$0xff] %vm1684_vm7, %v1595_v34 }
 0x14d   : > { %1881 = vst.msk [vmem:[#allocation3 + $0x18] sm:$0xff] %vm1877_vm8, %v1788_v37  ;;  %1229 = vrot.lane.b32.xlu1 %v1729_v50, %s2977_s11  ;;  %1231 = vrot.lane.b32.xlu0 %v1730_v1, %s2977_s11  ;;  %v1736_v37 = vld [vmem:[#allocation2 + $0x111] sm:$0xff] }
 0x14f   : > { %v1210_v32 = vpop.permute.xlu1 %1209  ;;  %v1212_v29 = vpop.permute.xlu0 %1211 }
 0x150   : > { %1302 = vst.msk [vmem:[#allocation3 + $0x20] sm:$0xff] %vm1297_vm5, %v1210_v32  ;;  %1303 = vst.msk [vmem:[#allocation3 + $0x28] sm:$0xff] %vm1297_vm5, %v1212_v29 }
 0x151   : > { %1998 = vrot.lane.b32.xlu1 %v3450_v57, %s2981_s16  ;;  %2000 = vrot.lane.b32.xlu0 %v3461_v60, %s2981_s16 }
 0x153   : > { %v1979_v25 = vpop.permute.xlu1 %1978  ;;  %v1981_v52 = vpop.permute.xlu0 %1980 }
 0x154   : > { %2073 = vst.msk [vmem:[#allocation3 + $0x10] sm:$0xff] %vm2070_vm9, %v1979_v25  ;;  %2074 = vst.msk [vmem:[#allocation3 + $0x18] sm:$0xff] %vm2070_vm9, %v1981_v52  ;;  %v1929_v52 = vld [vmem:[#allocation2 + $0x112] sm:$0xff] }
 0x155   : > { %1422 = vrot.lane.b32.xlu1 %v3450_v57, %s2978_s12  ;;  %1616 = vrot.lane.b32.xlu0 %v3340_v36, %s2979_s17  ;;  %v1731_v57 = vld [vmem:[#allocation2 + $0xd9] sm:$0xff] }
 0x157   : > { %v1403_v56 = vpop.permute.xlu1 %1402  ;;  %v1597_v2 = vpop.permute.xlu0 %1596 }
 0x158   : > { %1495 = vst.msk [vmem:[#allocation3 + $0x20] sm:$0xff] %vm1490_vm6, %v1403_v56 }
 0x159   : > { %1689 = vst.msk [vmem:[#allocation3 + $0x20] sm:$0xff] %vm1684_vm7, %v1597_v2  ;;  %1424 = vrot.lane.b32.xlu1 %v3461_v60, %s2978_s12  ;;  %1618 = vrot.lane.b32.xlu0 %v3352_v39, %s2979_s17 }
 0x15b   : > { %v1405_v10 = vpop.permute.xlu1 %1404  ;;  %v1790_v12 = vpop.permute.xlu0 %1789  ;;  %v2105_v20 = vld [vmem:[#allocation3 + $0x10] sm:$0xff]  ;;  %v2106_v31 = vld [vmem:[#allocation3 + $0x18] sm:$0xff] }
 0x15c   : > { %1496 = vst.msk [vmem:[#allocation3 + $0x28] sm:$0xff] %vm1490_vm6, %v1405_v10  ;;  %2875 = vmatprep.mubr.msk.f32.mxu0 %vm2151_vm10, %v2105_v20 }
 0x15d   : > { %1882 = vst.msk [vmem:[#allocation3 + $0x20] sm:$0xff] %vm1877_vm8, %v1790_v12  ;;  %1040 = vrot.lane.b32.xlu1 %v3340_v36, %s2976_s10  ;;  %2876 = vmatmul.mubr.msk.f32.gmra.mrb[2].mxu0 %vm2151_vm10, %v2106_v31  ;;  %v1924_v36 = vld [vmem:[#allocation2 + $0xda] sm:$0xff] }
 0x15e   : > { %1042 = vrot.lane.b32.xlu0 %v3352_v39, %s2976_s10 }
 0x15f   : > { %v1599_v60 = vpop.permute.xlu1 %1598  ;;  %v1792_v45 = vpop.permute.xlu0 %1791 }
 0x160   : > { %1690 = vst.msk [vmem:[#allocation3 + $0x28] sm:$0xff] %vm1684_vm7, %v1599_v60 }
 0x161   : > { %1883 = vst.msk [vmem:[#allocation3 + $0x28] sm:$0xff] %vm1877_vm8, %v1792_v45  ;;  %1809 = vrot.lane.b32.xlu1 %v1731_v57, %s2980_s25 }
 0x162   : > { %1811 = vrot.lane.b32.xlu0 %v1732_v59, %s2980_s25 }
 0x163   : > { %v1214_v27 = vpop.permute.xlu1 %1213  ;;  %v1216_v16 = vpop.permute.xlu0 %1215 }
 0x164   : > { %1304 = vst.msk [vmem:[#allocation3 + $0x30] sm:$0xff] %vm1297_vm5, %v1214_v27  ;;  %1305 = vst.msk [vmem:[#allocation3 + $0x38] sm:$0xff] %vm1297_vm5, %v1216_v16  ;;  %v1738_v16 = vld [vmem:[#allocation2 + $0x129] sm:$0xff] }
 0x165   : > { %1233 = vrot.lane.b32.xlu1 %v1731_v57, %s2977_s11  ;;  %v966_v57 = vld [vmem:[#allocation2 + $0x120] sm:$0xff] }
 0x166   : > { %1235 = vrot.lane.b32.xlu0 %v1732_v59, %s2977_s11 }
 0x167   : > { %v1983_v39 = vpop.permute.xlu1 %1982  ;;  %v1985_v9 = vpop.permute.xlu0 %1984 }
 0x168   : > { %2075 = vst.msk [vmem:[#allocation3 + $0x20] sm:$0xff] %vm2070_vm9, %v1983_v39  ;;  %2076 = vst.msk [vmem:[#allocation3 + $0x28] sm:$0xff] %vm2070_vm9, %v1985_v9 }
 0x169   : > { %2002 = vrot.lane.b32.xlu1 %v1924_v36, %s2981_s16 }
 0x16a   : > { %2004 = vrot.lane.b32.xlu0 %v1925_v21, %s2981_s16 }
 0x16b   : > { %v1407_v53 = vpop.permute.xlu1 %1406  ;;  %v1601_v61 = vpop.permute.xlu0 %1600 }
 0x16c   : > { %1497 = vst.msk [vmem:[#allocation3 + $0x30] sm:$0xff] %vm1490_vm6, %v1407_v53  ;;  %v1931_v53 = vld [vmem:[#allocation2 + $0x12a] sm:$0xff] }
 0x16d   : > { %1691 = vst.msk [vmem:[#allocation3 + $0x30] sm:$0xff] %vm1684_vm7, %v1601_v61  ;;  %1426 = vrot.lane.b32.xlu1 %v1924_v36, %s2978_s12 }
 0x16e   : > { %1620 = vrot.lane.b32.xlu0 %v3344_v38, %s2979_s17 }
 0x16f   : > { %v1409_v44 = vpop.permute.xlu1 %1408  ;;  %v1794_v62 = vpop.permute.xlu0 %1793  ;;  %v2107_v63 = vld [vmem:[#allocation3 + $0x20] sm:$0xff]  ;;  %v2108_v49 = vld [vmem:[#allocation3 + $0x28] sm:$0xff] }
 0x170   : > { %1498 = vst.msk [vmem:[#allocation3 + $0x38] sm:$0xff] %vm1490_vm6, %v1409_v44  ;;  %2878 = vmatprep.mubr.msk.f32.mxu0 %vm2151_vm10, %v2107_v63 }
 0x171   : > { %1884 = vst.msk [vmem:[#allocation3 + $0x30] sm:$0xff] %vm1877_vm8, %v1794_v62  ;;  %1428 = vrot.lane.b32.xlu1 %v1925_v21, %s2978_s12  ;;  %2879 = vmatmul.mubr.msk.f32.gmra.mrb[4].mxu0 %vm2151_vm10, %v2108_v49  ;;  %v1546_v49 = vld [vmem:[#allocation2 + $0x138] sm:$0xff] }
 0x172   : > { %1622 = vrot.lane.b32.xlu0 %v3356_v41, %s2979_s17 }
 0x173   : > { %v1603_v18 = vpop.permute.xlu1 %1602  ;;  %v1796_v19 = vpop.permute.xlu0 %1795 }
 0x174   : > { %1692 = vst.msk [vmem:[#allocation3 + $0x38] sm:$0xff] %vm1684_vm7, %v1603_v18  ;;  %v1739_v18 = vld [vmem:[#allocation2 + $0x139] sm:$0xff] }
 0x175   : > { %1885 = vst.msk [vmem:[#allocation3 + $0x38] sm:$0xff] %vm1877_vm8, %v1796_v19  ;;  %1044 = vrot.lane.b32.xlu1 %v3344_v38, %s2976_s10 }
 0x176   : > { %1046 = vrot.lane.b32.xlu0 %v3356_v41, %s2976_s10 }
 0x177   : > { %v1218_v51 = vpop.permute.xlu1 %1217  ;;  %v1220_v11 = vpop.permute.xlu0 %1219 }
 0x178   : > { %1306 = vst.msk [vmem:[#allocation3 + $0x40] sm:$0xff] %vm1297_vm5, %v1218_v51  ;;  %1307 = vst.msk [vmem:[#allocation3 + $0x48] sm:$0xff] %vm1297_vm5, %v1220_v11 }
 0x179   : > { %1813 = vrot.lane.b32.xlu1 %v1733_v46, %s2980_s25 }
 0x17a   : > { %1815 = vrot.lane.b32.xlu0 %v1734_v54, %s2980_s25 }
 0x17b   : > { %v1987_v38 = vpop.permute.xlu1 %1986  ;;  %v1989_v41 = vpop.permute.xlu0 %1988 }
 0x17c   : > { %2077 = vst.msk [vmem:[#allocation3 + $0x30] sm:$0xff] %vm2070_vm9, %v1987_v38  ;;  %2078 = vst.msk [vmem:[#allocation3 + $0x38] sm:$0xff] %vm2070_vm9, %v1989_v41 }
 0x17d   : > { %1237 = vrot.lane.b32.xlu1 %v1733_v46, %s2977_s11 }
 0x17e   : > { %1239 = vrot.lane.b32.xlu0 %v1734_v54, %s2977_s11  ;;  %v1933_v54 = vld [vmem:[#allocation2 + $0x142] sm:$0xff] }
 0x17f   : > { %v1411_v35 = vpop.permute.xlu1 %1410  ;;  %v1605_v24 = vpop.permute.xlu0 %1604 }
 0x180   : > { %1499 = vst.msk [vmem:[#allocation3 + $0x40] sm:$0xff] %vm1490_vm6, %v1411_v35  ;;  %v1548_v35 = vld [vmem:[#allocation2 + $0x150] sm:$0xff] }
 0x181   : > { %1693 = vst.msk [vmem:[#allocation3 + $0x40] sm:$0xff] %vm1684_vm7, %v1605_v24  ;;  %2006 = vrot.lane.b32.xlu1 %v1926_v28, %s2981_s16 }
 0x182   : > { %2008 = vrot.lane.b32.xlu0 %v1927_v6, %s2981_s16 }
 0x183   : > { %v1413_v17 = vpop.permute.xlu1 %1412  ;;  %v1607_v7 = vpop.permute.xlu0 %1606  ;;  %v2109_v30 = vld [vmem:[#allocation3 + $0x30] sm:$0xff]  ;;  %v2110_v8 = vld [vmem:[#allocation3 + $0x38] sm:$0xff] }
 0x184   : > { %1500 = vst.msk [vmem:[#allocation3 + $0x48] sm:$0xff] %vm1490_vm6, %v1413_v17  ;;  %2881 = vmatprep.mubr.msk.f32.mxu0 %vm2151_vm10, %v2109_v30 }
 0x185   : > { %1694 = vst.msk [vmem:[#allocation3 + $0x48] sm:$0xff] %vm1684_vm7, %v1607_v7  ;;  %1430 = vrot.lane.b32.xlu1 %v1926_v28, %s2978_s12  ;;  %2882 = vmatmul.mubr.msk.f32.gmra.mrb[6].mxu0 %vm2151_vm10, %v2110_v8  ;;  %v1741_v8 = vld [vmem:[#allocation2 + $0x151] sm:$0xff] }
 0x186   : > { %1624 = vrot.lane.b32.xlu0 %v3354_v40, %s2979_s17 }
 0x187   : > { %v1029_v50 = vpop.permute.xlu1 %1028  ;;  %v1031_v1 = vpop.permute.xlu0 %1030 }
 0x188   : > { %1115 = vst.msk [vmem:[#allocation3 + $0x50] sm:$0xff] %vm1104_vm4, %v1029_v50  ;;  %1116 = vst.msk [vmem:[#allocation3 + $0x58] sm:$0xff] %vm1104_vm4, %v1031_v1  ;;  %v1742_v1 = vld [vmem:[#allocation2 + $0x159] sm:$0xff] }
 0x189   : > { %1432 = vrot.lane.b32.xlu1 %v1927_v6, %s2978_s12  ;;  %v1549_v6 = vld [vmem:[#allocation2 + $0x158] sm:$0xff] }
 0x18a   : > { %1626 = vrot.lane.b32.xlu0 %v3370_v43, %s2979_s17 }
 0x18b   : > { %v1798_v48 = vpop.permute.xlu1 %1797  ;;  %v1800_v58 = vpop.permute.xlu0 %1799 }
 0x18c   : > { %1886 = vst.msk [vmem:[#allocation3 + $0x40] sm:$0xff] %vm1877_vm8, %v1798_v48  ;;  %1887 = vst.msk [vmem:[#allocation3 + $0x48] sm:$0xff] %vm1877_vm8, %v1800_v58 }
 0x18d   : > { %1048 = vrot.lane.b32.xlu1 %v3354_v40, %s2976_s10  ;;  %v1928_v40 = vld [vmem:[#allocation2 + $0x10a] sm:$0xff] }
 0x18e   : > { %1050 = vrot.lane.b32.xlu0 %v3370_v43, %s2976_s10 }
 0x18f   : > { %v1222_v22 = vpop.permute.xlu1 %1221  ;;  %v1224_v34 = vpop.permute.xlu0 %1223 }
 0x190   : > { %1308 = vst.msk [vmem:[#allocation3 + $0x50] sm:$0xff] %vm1297_vm5, %v1222_v22  ;;  %1309 = vst.msk [vmem:[#allocation3 + $0x58] sm:$0xff] %vm1297_vm5, %v1224_v34  ;;  %v1934_v22 = vld [vmem:[#allocation2 + $0x152] sm:$0xff] }
 0x191   : > { %1817 = vrot.lane.b32.xlu1 %v1735_v15, %s2980_s25 }
 0x192   : > { %1819 = vrot.lane.b32.xlu0 %v1736_v37, %s2980_s25 }
 0x193   : > { %v1991_v32 = vpop.permute.xlu1 %1990  ;;  %v1993_v29 = vpop.permute.xlu0 %1992 }
 0x194   : > { %2079 = vst.msk [vmem:[#allocation3 + $0x40] sm:$0xff] %vm2070_vm9, %v1991_v32  ;;  %2080 = vst.msk [vmem:[#allocation3 + $0x48] sm:$0xff] %vm2070_vm9, %v1993_v29 }
 0x195   : > { %1241 = vrot.lane.b32.xlu1 %v1735_v15, %s2977_s11 }
 0x196   : > { %1243 = vrot.lane.b32.xlu0 %v1736_v37, %s2977_s11  ;;  %v1935_v37 = vld [vmem:[#allocation2 + $0x15a] sm:$0xff] }
 0x197   : > { %v1415_v43 = vpop.permute.xlu1 %1414  ;;  %v1609_v25 = vpop.permute.xlu0 %1608 }
 0x198   : > { %1501 = vst.msk [vmem:[#allocation3 + $0x50] sm:$0xff] %vm1490_vm6, %v1415_v43  ;;  %v1550_v43 = vld [vmem:[#allocation2 + $0x168] sm:$0xff] }
 0x199   : > { %1695 = vst.msk [vmem:[#allocation3 + $0x50] sm:$0xff] %vm1684_vm7, %v1609_v25  ;;  %2010 = vrot.lane.b32.xlu1 %v1928_v40, %s2981_s16 }
 0x19a   : > { %2012 = vrot.lane.b32.xlu0 %v1929_v52, %s2981_s16 }
 0x19b   : > { %v1417_v56 = vpop.permute.xlu1 %1416  ;;  %v1611_v2 = vpop.permute.xlu0 %1610  ;;  %v2111_v10 = vld [vmem:[#allocation3 + $0x40] sm:$0xff]  ;;  %v2112_v12 = vld [vmem:[#allocation3 + $0x48] sm:$0xff] }
 0x19c   : > { %1502 = vst.msk [vmem:[#allocation3 + $0x58] sm:$0xff] %vm1490_vm6, %v1417_v56  ;;  %2884 = vmatprep.mubr.msk.f32.mxu0 %vm2151_vm10, %v2111_v10 }
 0x19d   : > { %1696 = vst.msk [vmem:[#allocation3 + $0x58] sm:$0xff] %vm1684_vm7, %v1611_v2  ;;  %1434 = vrot.lane.b32.xlu1 %v1928_v40, %s2978_s12  ;;  %2885 = vmatmul.mubr.msk.f32.gmra.mrb[8].mxu0 %vm2151_vm10, %v2112_v12  ;;  %v1551_v2 = vld [vmem:[#allocation2 + $0x170] sm:$0xff] }
 0x19e   : > { %1628 = vrot.lane.b32.xlu0 %v3364_v42, %s2979_s17  ;;  %v1737_v42 = vld [vmem:[#allocation2 + $0x121] sm:$0xff] }
 0x19f   : > { %v1033_v20 = vpop.permute.xlu1 %1032  ;;  %v1035_v31 = vpop.permute.xlu0 %1034 }
 0x1a0   : > { %1117 = vst.msk [vmem:[#allocation3 + $0x60] sm:$0xff] %vm1104_vm4, %v1033_v20  ;;  %1118 = vst.msk [vmem:[#allocation3 + $0x68] sm:$0xff] %vm1104_vm4, %v1035_v31  ;;  %v1743_v31 = vld [vmem:[#allocation2 + $0x169] sm:$0xff] }
 0x1a1   : > { %1436 = vrot.lane.b32.xlu1 %v1929_v52, %s2978_s12 }
 0x1a2   : > { %1630 = vrot.lane.b32.xlu0 %v3377_v47, %s2979_s17 }
 0x1a3   : > { %v1802_v60 = vpop.permute.xlu1 %1801  ;;  %v1804_v45 = vpop.permute.xlu0 %1803 }
 0x1a4   : > { %1888 = vst.msk [vmem:[#allocation3 + $0x50] sm:$0xff] %vm1877_vm8, %v1802_v60  ;;  %1889 = vst.msk [vmem:[#allocation3 + $0x58] sm:$0xff] %vm1877_vm8, %v1804_v45  ;;  %v1744_v60 = vld [vmem:[#allocation2 + $0x171] sm:$0xff] }
 0x1a5   : > { %1052 = vrot.lane.b32.xlu1 %v966_v57, %s2976_s10 }
 0x1a6   : > { %1054 = vrot.lane.b32.xlu0 %v3377_v47, %s2976_s10  ;;  %v1930_v47 = vld [vmem:[#allocation2 + $0x122] sm:$0xff] }
 0x1a7   : > { %v1226_v59 = vpop.permute.xlu1 %1225  ;;  %v1228_v27 = vpop.permute.xlu0 %1227 }
 0x1a8   : > { %1310 = vst.msk [vmem:[#allocation3 + $0x60] sm:$0xff] %vm1297_vm5, %v1226_v59  ;;  %1311 = vst.msk [vmem:[#allocation3 + $0x68] sm:$0xff] %vm1297_vm5, %v1228_v27  ;;  %v1936_v27 = vld [vmem:[#allocation2 + $0x16a] sm:$0xff] }
 0x1a9   : > { %1821 = vrot.lane.b32.xlu1 %v1737_v42, %s2980_s25 }
 0x1aa   : > { %1823 = vrot.lane.b32.xlu0 %v1738_v16, %s2980_s25 }
 0x1ab   : > { %v1995_v36 = vpop.permute.xlu1 %1994  ;;  %v1997_v39 = vpop.permute.xlu0 %1996 }
 0x1ac   : > { %2081 = vst.msk [vmem:[#allocation3 + $0x50] sm:$0xff] %vm2070_vm9, %v1995_v36  ;;  %2082 = vst.msk [vmem:[#allocation3 + $0x58] sm:$0xff] %vm2070_vm9, %v1997_v39  ;;  %v1937_v36 = vld [vmem:[#allocation2 + $0x172] sm:$0xff] }
 0x1ad   : > { %1245 = vrot.lane.b32.xlu1 %v1737_v42, %s2977_s11 }
 0x1ae   : > { %1247 = vrot.lane.b32.xlu0 %v1738_v16, %s2977_s11 }
 0x1af   : > { %v1419_v9 = vpop.permute.xlu1 %1418  ;;  %v1613_v21 = vpop.permute.xlu0 %1612 }
 0x1b0   : > { %1503 = vst.msk [vmem:[#allocation3 + $0x60] sm:$0xff] %vm1490_vm6, %v1419_v9 }
 0x1b1   : > { %1697 = vst.msk [vmem:[#allocation3 + $0x60] sm:$0xff] %vm1684_vm7, %v1613_v21  ;;  %2014 = vrot.lane.b32.xlu1 %v1930_v47, %s2981_s16  ;;  %v1552_v21 = vld [vmem:[#allocation2 + $0x180] sm:$0xff] }
 0x1b2   : > { %2016 = vrot.lane.b32.xlu0 %v1931_v53, %s2981_s16 }
 0x1b3   : > { %v1421_v61 = vpop.permute.xlu1 %1420  ;;  %v1615_v44 = vpop.permute.xlu0 %1614  ;;  %v2113_v62 = vld [vmem:[#allocation3 + $0x50] sm:$0xff]  ;;  %v2114_v63 = vld [vmem:[#allocation3 + $0x58] sm:$0xff] }
 0x1b4   : > { %1504 = vst.msk [vmem:[#allocation3 + $0x68] sm:$0xff] %vm1490_vm6, %v1421_v61  ;;  %2887 = vmatprep.mubr.msk.f32.mxu0 %vm2151_vm10, %v2113_v62  ;;  %v1553_v62 = vld [vmem:[#allocation2 + $0x188] sm:$0xff] }
 0x1b5   : > { %1698 = vst.msk [vmem:[#allocation3 + $0x68] sm:$0xff] %vm1684_vm7, %v1615_v44  ;;  %1438 = vrot.lane.b32.xlu1 %v1930_v47, %s2978_s12  ;;  %2888 = vmatmul.mubr.msk.f32.gmra.mrb[10].mxu0 %vm2151_vm10, %v2114_v63 }
 0x1b6   : > { %1632 = vrot.lane.b32.xlu0 %v1546_v49, %s2979_s17 }
 0x1b7   : > { %v1037_v14 = vpop.permute.xlu1 %1036  ;;  %v1039_v0 = vpop.permute.xlu0 %1038 }
 0x1b8   : > { %1119 = vst.msk [vmem:[#allocation3 + $0x70] sm:$0xff] %vm1104_vm4, %v1037_v14  ;;  %1120 = vst.msk [vmem:[#allocation3 + $0x78] sm:$0xff] %vm1104_vm4, %v1039_v0  ;;  %v1745_v0 = vld [vmem:[#allocation2 + $0x181] sm:$0xff] }
 0x1b9   : > { %1440 = vrot.lane.b32.xlu1 %v1931_v53, %s2978_s12 }
 0x1ba   : > { %1634 = vrot.lane.b32.xlu0 %v1547_v26, %s2979_s17 }
 0x1bb   : > { %v1806_v33 = vpop.permute.xlu1 %1805  ;;  %v1808_v23 = vpop.permute.xlu0 %1807 }
 0x1bc   : > { %1890 = vst.msk [vmem:[#allocation3 + $0x60] sm:$0xff] %vm1877_vm8, %v1806_v33  ;;  %1891 = vst.msk [vmem:[#allocation3 + $0x68] sm:$0xff] %vm1877_vm8, %v1808_v23  ;;  %v1746_v33 = vld [vmem:[#allocation2 + $0x189] sm:$0xff] }
 0x1bd   : > { %1056 = vrot.lane.b32.xlu1 %v1546_v49, %s2976_s10 }
 0x1be   : > { %1058 = vrot.lane.b32.xlu0 %v1547_v26, %s2976_s10 }
 0x1bf   : > { %v1230_v19 = vpop.permute.xlu1 %1229  ;;  %v1232_v55 = vpop.permute.xlu0 %1231 }
 0x1c0   : > { %1312 = vst.msk [vmem:[#allocation3 + $0x70] sm:$0xff] %vm1297_vm5, %v1230_v19  ;;  %1313 = vst.msk [vmem:[#allocation3 + $0x78] sm:$0xff] %vm1297_vm5, %v1232_v55  ;;  %v1938_v55 = vld [vmem:[#allocation2 + $0x182] sm:$0xff] }
 0x1c1   : > { %1825 = vrot.lane.b32.xlu1 %v1739_v18, %s2980_s25 }
 0x1c2   : > { %1827 = vrot.lane.b32.xlu0 %v1740_v3, %s2980_s25 }
 0x1c3   : > { %v1999_v4 = vpop.permute.xlu1 %1998  ;;  %v2001_v46 = vpop.permute.xlu0 %2000 }
 0x1c4   : > { %2083 = vst.msk [vmem:[#allocation3 + $0x60] sm:$0xff] %vm2070_vm9, %v1999_v4  ;;  %2084 = vst.msk [vmem:[#allocation3 + $0x68] sm:$0xff] %vm2070_vm9, %v2001_v46  ;;  %v1939_v4 = vld [vmem:[#allocation2 + $0x18a] sm:$0xff] }
 0x1c5   : > { %1249 = vrot.lane.b32.xlu1 %v1739_v18, %s2977_s11 }
 0x1c6   : > { %1251 = vrot.lane.b32.xlu0 %v1740_v3, %s2977_s11 }
 0x1c7   : > { %v1423_v51 = vpop.permute.xlu1 %1422  ;;  %v1617_v11 = vpop.permute.xlu0 %1616 }
 0x1c8   : > { %1505 = vst.msk [vmem:[#allocation3 + $0x70] sm:$0xff] %vm1490_vm6, %v1423_v51 }
 0x1c9   : > { %1699 = vst.msk [vmem:[#allocation3 + $0x70] sm:$0xff] %vm1684_vm7, %v1617_v11  ;;  %2018 = vrot.lane.b32.xlu1 %v1932_v5, %s2981_s16  ;;  %v1554_v11 = vld [vmem:[#allocation2 + $0x198] sm:$0xff] }
 0x1ca   : > { %2020 = vrot.lane.b32.xlu0 %v1933_v54, %s2981_s16 }
 0x1cb   : > { %v1425_v13 = vpop.permute.xlu1 %1424  ;;  %v1619_v38 = vpop.permute.xlu0 %1618  ;;  %v2115_v41 = vld [vmem:[#allocation3 + $0x60] sm:$0xff]  ;;  %v2116_v28 = vld [vmem:[#allocation3 + $0x68] sm:$0xff] }
 0x1cc   : > { %1506 = vst.msk [vmem:[#allocation3 + $0x78] sm:$0xff] %vm1490_vm6, %v1425_v13  ;;  %2890 = vmatprep.mubr.msk.f32.mxu0 %vm2151_vm10, %v2115_v41  ;;  %v1747_v41 = vld [vmem:[#allocation2 + $0x199] sm:$0xff] }
 0x1cd   : > { %1700 = vst.msk [vmem:[#allocation3 + $0x78] sm:$0xff] %vm1684_vm7, %v1619_v38  ;;  %1442 = vrot.lane.b32.xlu1 %v1932_v5, %s2978_s12  ;;  %2891 = vmatmul.mubr.msk.f32.gmra.mrb[12].mxu0 %vm2151_vm10, %v2116_v28 }
 0x1ce   : > { %1636 = vrot.lane.b32.xlu0 %v1548_v35, %s2979_s17 }
 0x1cf   : > { %v1041_v24 = vpop.permute.xlu1 %1040 }
 0x1d0   : > { %1121 = vst.msk [vmem:[#allocation3 + $0x80] sm:$0xff] %vm1104_vm4, %v1041_v24  ;;  %v1043_v17 = vpop.permute.xlu0 %1042 }
 0x1d1   : > { %1122 = vst.msk [vmem:[#allocation3 + $0x88] sm:$0xff] %vm1104_vm4, %v1043_v17  ;;  %1444 = vrot.lane.b32.xlu1 %v1933_v54, %s2978_s12  ;;  %v1940_v17 = vld [vmem:[#allocation2 + $0x19a] sm:$0xff] }
 0x1d2   : > { %1638 = vrot.lane.b32.xlu0 %v1549_v6, %s2979_s17 }
 0x1d3   : > { %v1810_v7 = vpop.permute.xlu1 %1809 }
 0x1d4   : > { %1892 = vst.msk [vmem:[#allocation3 + $0x70] sm:$0xff] %vm1877_vm8, %v1810_v7  ;;  %v1812_v30 = vpop.permute.xlu0 %1811 }
 0x1d5   : > { %1893 = vst.msk [vmem:[#allocation3 + $0x78] sm:$0xff] %vm1877_vm8, %v1812_v30  ;;  %1060 = vrot.lane.b32.xlu1 %v1548_v35, %s2976_s10  ;;  %v1555_v35 = vld [vmem:[#allocation2 + $0x1a0] sm:$0xff] }
 0x1d6   : > { %1062 = vrot.lane.b32.xlu0 %v1549_v6, %s2976_s10  ;;  %v4014_v6 = vld [vmem:[%s4272_s4] ss:$0 sm:$0xff] }
 0x1d7   : > { %v1234_v50 = vpop.permute.xlu1 %1233 }
 0x1d8   : > { %1314 = vst.msk [vmem:[#allocation3 + $0x80] sm:$0xff] %vm1297_vm5, %v1234_v50  ;;  %v1236_v48 = vpop.permute.xlu0 %1235  ;;  %v1748_v50 = vld [vmem:[#allocation2 + $0x1a1] sm:$0xff] }
 0x1d9   : > { %1315 = vst.msk [vmem:[#allocation3 + $0x88] sm:$0xff] %vm1297_vm5, %v1236_v48  ;;  %1829 = vrot.lane.b32.xlu1 %v1741_v8, %s2980_s25 }
 0x1da   : > { %1831 = vrot.lane.b32.xlu0 %v1742_v1, %s2980_s25 }
 0x1db   : > { %v2003_v58 = vpop.permute.xlu1 %2002 }
 0x1dc   : > { %2085 = vst.msk [vmem:[#allocation3 + $0x70] sm:$0xff] %vm2070_vm9, %v2003_v58  ;;  %v2005_v15 = vpop.permute.xlu0 %2004 }
 0x1dd   : > { %2086 = vst.msk [vmem:[#allocation3 + $0x78] sm:$0xff] %vm2070_vm9, %v2005_v15  ;;  %1253 = vrot.lane.b32.xlu1 %v1741_v8, %s2977_s11 }
 0x1de   : > { %1255 = vrot.lane.b32.xlu0 %v1742_v1, %s2977_s11 }
 0x1df   : > { %v1427_v34 = vpop.permute.xlu1 %1426 }
 0x1e0   : > { %1507 = vst.msk [vmem:[#allocation3 + $0x80] sm:$0xff] %vm1490_vm6, %v1427_v34  ;;  %v1621_v32 = vpop.permute.xlu0 %1620 }
 0x1e1   : > { %1701 = vst.msk [vmem:[#allocation3 + $0x80] sm:$0xff] %vm1684_vm7, %v1621_v32  ;;  %2022 = vrot.lane.b32.xlu1 %v1934_v22, %s2981_s16 }
 0x1e2   : > { %2024 = vrot.lane.b32.xlu0 %v1935_v37, %s2981_s16 }
 0x1e3   : > { %v1429_v29 = vpop.permute.xlu1 %1428  ;;  %v2117_v40 = vld [vmem:[#allocation3 + $0x70] sm:$0xff] }
 0x1e4   : > { %1508 = vst.msk [vmem:[#allocation3 + $0x88] sm:$0xff] %vm1490_vm6, %v1429_v29  ;;  %v1623_v25 = vpop.permute.xlu0 %1622  ;;  %2893 = vmatprep.mubr.msk.f32.mxu0 %vm2151_vm10, %v2117_v40  ;;  %v2118_v52 = vld [vmem:[#allocation3 + $0x78] sm:$0xff] }
 0x1e5   : > { %1702 = vst.msk [vmem:[#allocation3 + $0x88] sm:$0xff] %vm1684_vm7, %v1623_v25  ;;  %1446 = vrot.lane.b32.xlu1 %v1934_v22, %s2978_s12  ;;  %2894 = vmatmul.mubr.msk.f32.gmra.mrb[14].mxu0 %vm2151_vm10, %v2118_v52 }
 0x1e6   : > { %1640 = vrot.lane.b32.xlu0 %v1550_v43, %s2979_s17 }
 0x1e7   : > { %v1045_v56 = vpop.permute.xlu1 %1044 }
 0x1e8   : > { %1123 = vst.msk [vmem:[#allocation3 + $0x90] sm:$0xff] %vm1104_vm4, %v1045_v56  ;;  %v1047_v10 = vpop.permute.xlu0 %1046 }
 0x1e9   : > { %1124 = vst.msk [vmem:[#allocation3 + $0x98] sm:$0xff] %vm1104_vm4, %v1047_v10  ;;  %1448 = vrot.lane.b32.xlu1 %v1935_v37, %s2978_s12 }
 0x1ea   : > { %1642 = vrot.lane.b32.xlu0 %v1551_v2, %s2979_s17 }
 0x1eb   : > { %v1814_v12 = vpop.permute.xlu1 %1813 }
 0x1ec   : > { %1894 = vst.msk [vmem:[#allocation3 + $0x80] sm:$0xff] %vm1877_vm8, %v1814_v12  ;;  %v1816_v20 = vpop.permute.xlu0 %1815 }
 0x1ed   : > { %1895 = vst.msk [vmem:[#allocation3 + $0x88] sm:$0xff] %vm1877_vm8, %v1816_v20  ;;  %1064 = vrot.lane.b32.xlu1 %v1550_v43, %s2976_s10  ;;  %v1941_v43 = vld [vmem:[#allocation2 + $0x1a2] sm:$0xff] }
 0x1ee   : > { %1066 = vrot.lane.b32.xlu0 %v1551_v2, %s2976_s10 }
 0x1ef   : > { %v1238_v57 = vpop.permute.xlu1 %1237 }
 0x1f0   : > { %1316 = vst.msk [vmem:[#allocation3 + $0x90] sm:$0xff] %vm1297_vm5, %v1238_v57  ;;  %v1240_v45 = vpop.permute.xlu0 %1239 }
 0x1f1   : > { %1317 = vst.msk [vmem:[#allocation3 + $0x98] sm:$0xff] %vm1297_vm5, %v1240_v45  ;;  %1833 = vrot.lane.b32.xlu1 %v1743_v31, %s2980_s25 }
 0x1f2   : > { %1835 = vrot.lane.b32.xlu0 %v1744_v60, %s2980_s25 }
 0x1f3   : > { %v2007_v42 = vpop.permute.xlu1 %2006 }
 0x1f4   : > { %2087 = vst.msk [vmem:[#allocation3 + $0x80] sm:$0xff] %vm2070_vm9, %v2007_v42  ;;  %v2009_v59 = vpop.permute.xlu0 %2008 }
 0x1f5   : > { %2088 = vst.msk [vmem:[#allocation3 + $0x88] sm:$0xff] %vm2070_vm9, %v2009_v59  ;;  %1257 = vrot.lane.b32.xlu1 %v1743_v31, %s2977_s11 }
 0x1f6   : > { %1259 = vrot.lane.b32.xlu0 %v1744_v60, %s2977_s11 }
 0x1f7   : > { %v1431_v16 = vpop.permute.xlu1 %1430 }
 0x1f8   : > { %1509 = vst.msk [vmem:[#allocation3 + $0x90] sm:$0xff] %vm1490_vm6, %v1431_v16  ;;  %v1625_v39 = vpop.permute.xlu0 %1624 }
 0x1f9   : > { %1703 = vst.msk [vmem:[#allocation3 + $0x90] sm:$0xff] %vm1684_vm7, %v1625_v39  ;;  %2026 = vrot.lane.b32.xlu1 %v1936_v27, %s2981_s16 }
 0x1fa   : > { %2028 = vrot.lane.b32.xlu0 %v1937_v36, %s2981_s16 }
 0x1fb   : > { %v1433_v47 = vpop.permute.xlu1 %1432  ;;  %v2119_v9 = vld [vmem:[#allocation3 + $0x80] sm:$0xff] }
 0x1fc   : > { %1510 = vst.msk [vmem:[#allocation3 + $0x98] sm:$0xff] %vm1490_vm6, %v1433_v47  ;;  %v1627_v53 = vpop.permute.xlu0 %1626  ;;  %2896 = vmatprep.mubr.msk.f32.mxu1 %vm2151_vm10, %v2119_v9  ;;  %v2120_v61 = vld [vmem:[#allocation3 + $0x88] sm:$0xff] }
 0x1fd   : > { %1704 = vst.msk [vmem:[#allocation3 + $0x98] sm:$0xff] %vm1684_vm7, %v1627_v53  ;;  %1450 = vrot.lane.b32.xlu1 %v1936_v27, %s2978_s12  ;;  %2897 = vmatmul.mubr.msk.f32.vlgmr.msra.gmra.mrb[0].mxu1 %vm2151_vm10, %v2120_v61 }
 0x1fe   : > { %1644 = vrot.lane.b32.xlu0 %v1552_v21, %s2979_s17 }
 0x1ff   : > { %v1049_v44 = vpop.permute.xlu1 %1048 }
 0x200   : > { %1125 = vst.msk [vmem:[#allocation3 + $0xa0] sm:$0xff] %vm1104_vm4, %v1049_v44  ;;  %v1051_v63 = vpop.permute.xlu0 %1050 }
 0x201   : > { %1126 = vst.msk [vmem:[#allocation3 + $0xa8] sm:$0xff] %vm1104_vm4, %v1051_v63  ;;  %1452 = vrot.lane.b32.xlu1 %v1937_v36, %s2978_s12 }
 0x202   : > { %1646 = vrot.lane.b32.xlu0 %v1553_v62, %s2979_s17 }
 0x203   : > { %v1818_v49 = vpop.permute.xlu1 %1817 }
 0x204   : > { %1896 = vst.msk [vmem:[#allocation3 + $0x90] sm:$0xff] %vm1877_vm8, %v1818_v49  ;;  %v1820_v14 = vpop.permute.xlu0 %1819 }
 0x205   : > { %1897 = vst.msk [vmem:[#allocation3 + $0x98] sm:$0xff] %vm1877_vm8, %v1820_v14  ;;  %1068 = vrot.lane.b32.xlu1 %v1552_v21, %s2976_s10 }
 0x206   : > { %1070 = vrot.lane.b32.xlu0 %v1553_v62, %s2976_s10 }
 0x207   : > { %v1242_v26 = vpop.permute.xlu1 %1241 }
 0x208   : > { %1318 = vst.msk [vmem:[#allocation3 + $0xa0] sm:$0xff] %vm1297_vm5, %v1242_v26  ;;  %v1244_v23 = vpop.permute.xlu0 %1243 }
 0x209   : > { %1319 = vst.msk [vmem:[#allocation3 + $0xa8] sm:$0xff] %vm1297_vm5, %v1244_v23  ;;  %1837 = vrot.lane.b32.xlu1 %v1745_v0, %s2980_s25 }
 0x20a   : > { %1839 = vrot.lane.b32.xlu0 %v1746_v33, %s2980_s25 }
 0x20b   : > { %v2011_v18 = vpop.permute.xlu1 %2010 }
 0x20c   : > { %2089 = vst.msk [vmem:[#allocation3 + $0x90] sm:$0xff] %vm2070_vm9, %v2011_v18  ;;  %v2013_v19 = vpop.permute.xlu0 %2012 }
 0x20d   : > { %2090 = vst.msk [vmem:[#allocation3 + $0x98] sm:$0xff] %vm2070_vm9, %v2013_v19  ;;  %1261 = vrot.lane.b32.xlu1 %v1745_v0, %s2977_s11 }
 0x20e   : > { %1263 = vrot.lane.b32.xlu0 %v1746_v33, %s2977_s11 }
 0x20f   : > { %v1435_v3 = vpop.permute.xlu1 %1434 }
 0x210   : > { %1511 = vst.msk [vmem:[#allocation3 + $0xa0] sm:$0xff] %vm1490_vm6, %v1435_v3  ;;  %v1629_v46 = vpop.permute.xlu0 %1628 }
 0x211   : > { %1705 = vst.msk [vmem:[#allocation3 + $0xa0] sm:$0xff] %vm1684_vm7, %v1629_v46  ;;  %2030 = vrot.lane.b32.xlu1 %v1938_v55, %s2981_s16 }
 0x212   : > { %2032 = vrot.lane.b32.xlu0 %v1939_v4, %s2981_s16 }
 0x213   : > { %v1437_v5 = vpop.permute.xlu1 %1436  ;;  %v2121_v51 = vld [vmem:[#allocation3 + $0x90] sm:$0xff] }
 0x214   : > { %1512 = vst.msk [vmem:[#allocation3 + $0xa8] sm:$0xff] %vm1490_vm6, %v1437_v5  ;;  %v1631_v54 = vpop.permute.xlu0 %1630  ;;  %2899 = vmatprep.mubr.msk.f32.mxu1 %vm2151_vm10, %v2121_v51  ;;  %v2122_v13 = vld [vmem:[#allocation3 + $0x98] sm:$0xff] }
 0x215   : > { %1706 = vst.msk [vmem:[#allocation3 + $0xa8] sm:$0xff] %vm1684_vm7, %v1631_v54  ;;  %1454 = vrot.lane.b32.xlu1 %v1938_v55, %s2978_s12  ;;  %2900 = vmatmul.mubr.msk.f32.gmra.mrb[2].mxu1 %vm2151_vm10, %v2122_v13 }
 0x216   : > { %1648 = vrot.lane.b32.xlu0 %v1554_v11, %s2979_s17 }
 0x217   : > { %v1053_v38 = vpop.permute.xlu1 %1052 }
 0x218   : > { %1127 = vst.msk [vmem:[#allocation3 + $0xb0] sm:$0xff] %vm1104_vm4, %v1053_v38  ;;  %v1055_v28 = vpop.permute.xlu0 %1054 }
 0x219   : > { %1128 = vst.msk [vmem:[#allocation3 + $0xb8] sm:$0xff] %vm1104_vm4, %v1055_v28  ;;  %1456 = vrot.lane.b32.xlu1 %v1939_v4, %s2978_s12 }
 0x21a   : > { %1841 = vrot.lane.b32.xlu0 %v1747_v41, %s2980_s25 }
 0x21b   : > { %v1822_v24 = vpop.permute.xlu1 %1821 }
 0x21c   : > { %1898 = vst.msk [vmem:[#allocation3 + $0xa0] sm:$0xff] %vm1877_vm8, %v1822_v24  ;;  %v1824_v7 = vpop.permute.xlu0 %1823 }
 0x21d   : > { %1899 = vst.msk [vmem:[#allocation3 + $0xa8] sm:$0xff] %vm1877_vm8, %v1824_v7  ;;  %1650 = vrot.lane.b32.xlu1 %v1555_v35, %s2979_s17  ;;  %v2874_v30 = vpop.f32.mrb[0].mxu0 }
 0x21e   : > { %v2320_v8 = vadd.f32 %v2874_v30, %v4014_v6  ;;  %v2314_v1 = vpop.f32.mrb[1].mxu0  ;;  %2034 = vrot.lane.b32.xlu0 %v1940_v17, %s2981_s16 }
 0x21f   : > { %v1246_v48 = vpop.permute.xlu1 %1245  ;;  %v2315_v58 = vadd.f32 %v4014_v6, %v2314_v1 }
 0x220   : > { %1320 = vst.msk [vmem:[#allocation3 + $0xb0] sm:$0xff] %vm1297_vm5, %v1246_v48  ;;  %v1248_v15 = vpop.permute.xlu0 %1247  ;;  %v2506_v22 = vsel %vm405_vm0, %v2320_v8, 0.0  ;;  %v2577_v34 = vmul.f32 %v2320_v8, %v2320_v8 }
 0x221   : > { %2474 = vst.msk [vmem:[%s4024_s26 + $0x8] sm:$0xff] %vm405_vm0, %v2320_v8  ;;  %1843 = vrot.lane.b32.xlu1 %v1748_v50, %s2980_s25  ;;  %2473 = vst.msk [vmem:[%s4024_s26] sm:$0xff] %vm405_vm0, %v2315_v58  ;;  %v2505_v37 = vsel %vm405_vm0, %v2315_v58, 0.0  ;;  %v2576_v32 = vmul.f32 %v2315_v58, %v2315_v58 }
 0x222   : > { %1321 = vst.msk [vmem:[#allocation3 + $0xb8] sm:$0xff] %vm1297_vm5, %v1248_v15  ;;  %v2609_v29 = vsel %vm405_vm0, %v2577_v34, 0.0  ;;  %v2507_v40 = vadd.f32 %v2506_v22, %v2505_v37 }
 0x223   : > { %v2608_v25 = vsel %vm405_vm0, %v2576_v32, 0.0  ;;  %v2015_v52 = vpop.permute.xlu1 %2014 }
 0x224   : > { %v2610_v56 = vadd.f32 %v2609_v29, %v2608_v25  ;;  %2091 = vst.msk [vmem:[#allocation3 + $0xa0] sm:$0xff] %vm2070_vm9, %v2015_v52  ;;  %v2017_v2 = vpop.permute.xlu0 %2016 }
 0x225   : > { %2092 = vst.msk [vmem:[#allocation3 + $0xa8] sm:$0xff] %vm2070_vm9, %v2017_v2  ;;  %2036 = vrot.lane.b32.xlu1 %v1941_v43, %s2981_s16 }
 0x227   : > { %v1439_v10 = vpop.permute.xlu1 %1438 }
 0x228   : > { %1513 = vst.msk [vmem:[#allocation3 + $0xb0] sm:$0xff] %vm1490_vm6, %v1439_v10  ;;  %v1633_v12 = vpop.permute.xlu0 %1632 }
 0x229   : > { %1707 = vst.msk [vmem:[#allocation3 + $0xb0] sm:$0xff] %vm1684_vm7, %v1633_v12 }
 0x22b   : > { %v1441_v20 = vpop.permute.xlu1 %1440  ;;  %v2123_v31 = vld [vmem:[#allocation3 + $0xa0] sm:$0xff] }
 0x22c   : > { %1514 = vst.msk [vmem:[#allocation3 + $0xb8] sm:$0xff] %vm1490_vm6, %v1441_v20  ;;  %v1635_v57 = vpop.permute.xlu0 %1634  ;;  %2902 = vmatprep.mubr.msk.f32.mxu1 %vm2151_vm10, %v2123_v31  ;;  %v2124_v60 = vld [vmem:[#allocation3 + $0xa8] sm:$0xff] }
 0x22d   : > { %1708 = vst.msk [vmem:[#allocation3 + $0xb8] sm:$0xff] %vm1684_vm7, %v1635_v57  ;;  %2903 = vmatmul.mubr.msk.f32.gmra.mrb[4].mxu1 %vm2151_vm10, %v2124_v60 }
 0x22f   : > { %v1057_v45 = vpop.permute.xlu1 %1056 }
 0x230   : > { %1129 = vst.msk [vmem:[#allocation3 + $0xc0] sm:$0xff] %vm1104_vm4, %v1057_v45  ;;  %v1059_v42 = vpop.permute.xlu0 %1058  ;;  %v2877_v59 = vpop.f32.mrb[2].mxu0 }
 0x231   : > { %1130 = vst.msk [vmem:[#allocation3 + $0xc8] sm:$0xff] %vm1104_vm4, %v1059_v42  ;;  %v2330_v27 = vadd.f32 %v2877_v59, %v4014_v6  ;;  %v2324_v16 = vpop.f32.mrb[3].mxu0 }
 0x232   : > { %v2325_v36 = vadd.f32 %v4014_v6, %v2324_v16 }
 0x233   : > { %2476 = vst.msk [vmem:[%s4024_s26 + $0x18] sm:$0xff] %vm405_vm0, %v2330_v27  ;;  %v2579_v39 = vmul.f32 %v2330_v27, %v2330_v27  ;;  %v1826_v47 = vpop.permute.xlu1 %1825  ;;  %v2510_v9 = vsel %vm405_vm0, %v2330_v27, 0.0 }
 0x234   : > { %2475 = vst.msk [vmem:[%s4024_s26 + $0x10] sm:$0xff] %vm405_vm0, %v2325_v36  ;;  %v2508_v21 = vsel %vm405_vm0, %v2325_v36, 0.0  ;;  %v2578_v53 = vmul.f32 %v2325_v36, %v2325_v36  ;;  %v1828_v61 = vpop.permute.xlu0 %1827 }
 0x235   : > { %1900 = vst.msk [vmem:[#allocation3 + $0xb0] sm:$0xff] %vm1877_vm8, %v1826_v47  ;;  %v2509_v44 = vadd.f32 %v2508_v21, %v2507_v40  ;;  %1901 = vst.msk [vmem:[#allocation3 + $0xb8] sm:$0xff] %vm1877_vm8, %v1828_v61  ;;  %v2613_v62 = vsel %vm405_vm0, %v2579_v39, 0.0 }
 0x236   : > { %v2611_v63 = vsel %vm405_vm0, %v2578_v53, 0.0 }
 0x237   : > { %v2612_v49 = vadd.f32 %v2611_v63, %v2610_v56  ;;  %v1250_v14 = vpop.permute.xlu1 %1249  ;;  %v2511_v0 = vadd.f32 %v2510_v9, %v2509_v44 }
 0x238   : > { %1322 = vst.msk [vmem:[#allocation3 + $0xc0] sm:$0xff] %vm1297_vm5, %v1250_v14  ;;  %v1252_v26 = vpop.permute.xlu0 %1251 }
 0x239   : > { %1323 = vst.msk [vmem:[#allocation3 + $0xc8] sm:$0xff] %vm1297_vm5, %v1252_v26  ;;  %v2614_v33 = vadd.f32 %v2613_v62, %v2612_v49 }
 0x23b   : > { %v2019_v23 = vpop.permute.xlu1 %2018 }
 0x23c   : > { %2093 = vst.msk [vmem:[#allocation3 + $0xb0] sm:$0xff] %vm2070_vm9, %v2019_v23  ;;  %v2021_v18 = vpop.permute.xlu0 %2020 }
 0x23d   : > { %2094 = vst.msk [vmem:[#allocation3 + $0xb8] sm:$0xff] %vm2070_vm9, %v2021_v18 }
 0x23f   : > { %v1443_v19 = vpop.permute.xlu1 %1442 }
 0x240   : > { %1515 = vst.msk [vmem:[#allocation3 + $0xc0] sm:$0xff] %vm1490_vm6, %v1443_v19  ;;  %v1637_v55 = vpop.permute.xlu0 %1636 }
 0x241   : > { %1709 = vst.msk [vmem:[#allocation3 + $0xc0] sm:$0xff] %vm1684_vm7, %v1637_v55 }
 0x243   : > { %v1445_v3 = vpop.permute.xlu1 %1444  ;;  %v2125_v4 = vld [vmem:[#allocation3 + $0xb0] sm:$0xff] }
 0x244   : > { %1516 = vst.msk [vmem:[#allocation3 + $0xc8] sm:$0xff] %vm1490_vm6, %v1445_v3  ;;  %v1639_v46 = vpop.permute.xlu0 %1638  ;;  %v2880_v5 = vpop.f32.mrb[4].mxu0  ;;  %2905 = vmatprep.mubr.msk.f32.mxu1 %vm2151_vm10, %v2125_v4  ;;  %v2126_v51 = vld [vmem:[#allocation3 + $0xb8] sm:$0xff] }
 0x245   : > { %1710 = vst.msk [vmem:[#allocation3 + $0xc8] sm:$0xff] %vm1684_vm7, %v1639_v46  ;;  %v2340_v11 = vadd.f32 %v2880_v5, %v4014_v6  ;;  %v2334_v54 = vpop.f32.mrb[5].mxu0  ;;  %2906 = vmatmul.mubr.msk.f32.gmra.mrb[6].mxu1 %vm2151_vm10, %v2126_v51 }
 0x246   : > { %v2335_v13 = vadd.f32 %v4014_v6, %v2334_v54 }
 0x247   : > { %2478 = vst.msk [vmem:[%s4024_s26 + $0x28] sm:$0xff] %vm405_vm0, %v2340_v11  ;;  %v2581_v38 = vmul.f32 %v2340_v11, %v2340_v11  ;;  %v1061_v41 = vpop.permute.xlu1 %1060  ;;  %v2514_v28 = vsel %vm405_vm0, %v2340_v11, 0.0 }
 0x248   : > { %2477 = vst.msk [vmem:[%s4024_s26 + $0x20] sm:$0xff] %vm405_vm0, %v2335_v13  ;;  %v2512_v35 = vsel %vm405_vm0, %v2335_v13, 0.0  ;;  %v2580_v24 = vmul.f32 %v2335_v13, %v2335_v13  ;;  %v1063_v17 = vpop.permute.xlu0 %1062 }
 0x249   : > { %1131 = vst.msk [vmem:[#allocation3 + $0xd0] sm:$0xff] %vm1104_vm4, %v1061_v41  ;;  %v2513_v7 = vadd.f32 %v2512_v35, %v2511_v0  ;;  %1132 = vst.msk [vmem:[#allocation3 + $0xd8] sm:$0xff] %vm1104_vm4, %v1063_v17  ;;  %v2617_v30 = vsel %vm405_vm0, %v2581_v38, 0.0 }
 0x24a   : > { %v2615_v8 = vsel %vm405_vm0, %v2580_v24, 0.0 }
 0x24b   : > { %v2616_v50 = vadd.f32 %v2615_v8, %v2614_v33  ;;  %v1830_v1 = vpop.permute.xlu1 %1829  ;;  %v2515_v48 = vadd.f32 %v2514_v28, %v2513_v7 }
 0x24c   : > { %1902 = vst.msk [vmem:[#allocation3 + $0xc0] sm:$0xff] %vm1877_vm8, %v1830_v1  ;;  %v1832_v58 = vpop.permute.xlu0 %1831 }
 0x24d   : > { %1903 = vst.msk [vmem:[#allocation3 + $0xc8] sm:$0xff] %vm1877_vm8, %v1832_v58  ;;  %v2618_v15 = vadd.f32 %v2617_v30, %v2616_v50 }
 0x24f   : > { %v1254_v22 = vpop.permute.xlu1 %1253 }
 0x250   : > { %1324 = vst.msk [vmem:[#allocation3 + $0xd0] sm:$0xff] %vm1297_vm5, %v1254_v22  ;;  %v1256_v34 = vpop.permute.xlu0 %1255 }
 0x251   : > { %1325 = vst.msk [vmem:[#allocation3 + $0xd8] sm:$0xff] %vm1297_vm5, %v1256_v34 }
 0x253   : > { %v2023_v37 = vpop.permute.xlu1 %2022 }
 0x254   : > { %2095 = vst.msk [vmem:[#allocation3 + $0xc0] sm:$0xff] %vm2070_vm9, %v2023_v37  ;;  %v2025_v32 = vpop.permute.xlu0 %2024 }
 0x255   : > { %2096 = vst.msk [vmem:[#allocation3 + $0xc8] sm:$0xff] %vm2070_vm9, %v2025_v32 }
 0x257   : > { %v1447_v29 = vpop.permute.xlu1 %1446 }
 0x258   : > { %1517 = vst.msk [vmem:[#allocation3 + $0xd0] sm:$0xff] %vm1490_vm6, %v1447_v29  ;;  %v1641_v40 = vpop.permute.xlu0 %1640  ;;  %v2883_v43 = vpop.f32.mrb[6].mxu0 }
 0x259   : > { %1711 = vst.msk [vmem:[#allocation3 + $0xd0] sm:$0xff] %vm1684_vm7, %v1641_v40  ;;  %v2350_v25 = vadd.f32 %v2883_v43, %v4014_v6  ;;  %v2344_v52 = vpop.f32.mrb[7].mxu0 }
 0x25a   : > { %v2345_v56 = vadd.f32 %v4014_v6, %v2344_v52 }
 0x25b   : > { %2480 = vst.msk [vmem:[%s4024_s26 + $0x38] sm:$0xff] %vm405_vm0, %v2350_v25  ;;  %v2583_v2 = vmul.f32 %v2350_v25, %v2350_v25  ;;  %v1449_v10 = vpop.permute.xlu1 %1448  ;;  %v2127_v12 = vld [vmem:[#allocation3 + $0xc0] sm:$0xff]  ;;  %v2518_v20 = vsel %vm405_vm0, %v2350_v25, 0.0 }
 0x25c   : > { %2479 = vst.msk [vmem:[%s4024_s26 + $0x30] sm:$0xff] %vm405_vm0, %v2345_v56  ;;  %v2516_v31 = vsel %vm405_vm0, %v2345_v56, 0.0  ;;  %v2582_v57 = vmul.f32 %v2345_v56, %v2345_v56  ;;  %v1643_v60 = vpop.permute.xlu0 %1642  ;;  %2908 = vmatprep.mubr.msk.f32.mxu1 %vm2151_vm10, %v2127_v12  ;;  %v2128_v45 = vld [vmem:[#allocation3 + $0xc8] sm:$0xff] }
 0x25d   : > { %1518 = vst.msk [vmem:[#allocation3 + $0xd8] sm:$0xff] %vm1490_vm6, %v1449_v10  ;;  %v2517_v42 = vadd.f32 %v2516_v31, %v2515_v48  ;;  %2909 = vmatmul.mubr.msk.f32.gmra.mrb[8].mxu1 %vm2151_vm10, %v2128_v45  ;;  %v2621_v59 = vsel %vm405_vm0, %v2583_v2, 0.0 }
 0x25e   : > { %1712 = vst.msk [vmem:[#allocation3 + $0xd8] sm:$0xff] %vm1684_vm7, %v1643_v60  ;;  %v2619_v27 = vsel %vm405_vm0, %v2582_v57, 0.0 }
 0x25f   : > { %v2620_v16 = vadd.f32 %v2619_v27, %v2618_v15  ;;  %v1065_v36 = vpop.permute.xlu1 %1064  ;;  %v2519_v39 = vadd.f32 %v2518_v20, %v2517_v42 }
 0x260   : > { %1133 = vst.msk [vmem:[#allocation3 + $0xe0] sm:$0xff] %vm1104_vm4, %v1065_v36  ;;  %v1067_v47 = vpop.permute.xlu0 %1066 }
 0x261   : > { %1134 = vst.msk [vmem:[#allocation3 + $0xe8] sm:$0xff] %vm1104_vm4, %v1067_v47  ;;  %v2622_v9 = vadd.f32 %v2621_v59, %v2620_v16 }
 0x263   : > { %v1834_v21 = vpop.permute.xlu1 %1833 }
 0x264   : > { %1904 = vst.msk [vmem:[#allocation3 + $0xd0] sm:$0xff] %vm1877_vm8, %v1834_v21  ;;  %v1836_v53 = vpop.permute.xlu0 %1835 }
 0x265   : > { %1905 = vst.msk [vmem:[#allocation3 + $0xd8] sm:$0xff] %vm1877_vm8, %v1836_v53 }
 0x267   : > { %v1258_v61 = vpop.permute.xlu1 %1257 }
 0x268   : > { %1326 = vst.msk [vmem:[#allocation3 + $0xe0] sm:$0xff] %vm1297_vm5, %v1258_v61  ;;  %v1260_v44 = vpop.permute.xlu0 %1259 }
 0x269   : > { %1327 = vst.msk [vmem:[#allocation3 + $0xe8] sm:$0xff] %vm1297_vm5, %v1260_v44 }
 0x26b   : > { %v2027_v62 = vpop.permute.xlu1 %2026 }
 0x26c   : > { %2097 = vst.msk [vmem:[#allocation3 + $0xd0] sm:$0xff] %vm2070_vm9, %v2027_v62  ;;  %v2029_v63 = vpop.permute.xlu0 %2028 }
 0x26d   : > { %2098 = vst.msk [vmem:[#allocation3 + $0xd8] sm:$0xff] %vm2070_vm9, %v2029_v63 }
 0x26f   : > { %v1451_v49 = vpop.permute.xlu1 %1450 }
 0x270   : > { %1519 = vst.msk [vmem:[#allocation3 + $0xe0] sm:$0xff] %vm1490_vm6, %v1451_v49  ;;  %v1645_v14 = vpop.permute.xlu0 %1644  ;;  %v2886_v0 = vpop.f32.mrb[8].mxu0 }
 0x271   : > { %1713 = vst.msk [vmem:[#allocation3 + $0xe0] sm:$0xff] %vm1684_vm7, %v1645_v14  ;;  %v2360_v26 = vadd.f32 %v2886_v0, %v4014_v6  ;;  %v2354_v33 = vpop.f32.mrb[9].mxu0 }
 0x272   : > { %v2355_v23 = vadd.f32 %v4014_v6, %v2354_v33 }
 0x273   : > { %2482 = vst.msk [vmem:[%s4024_s26 + $0x48] sm:$0xff] %vm405_vm0, %v2360_v26  ;;  %v2585_v18 = vmul.f32 %v2360_v26, %v2360_v26  ;;  %v1453_v19 = vpop.permute.xlu1 %1452  ;;  %v2129_v55 = vld [vmem:[#allocation3 + $0xd0] sm:$0xff]  ;;  %v2522_v3 = vsel %vm405_vm0, %v2360_v26, 0.0 }
 0x274   : > { %2481 = vst.msk [vmem:[%s4024_s26 + $0x40] sm:$0xff] %vm405_vm0, %v2355_v23  ;;  %v2520_v4 = vsel %vm405_vm0, %v2355_v23, 0.0  ;;  %v2584_v46 = vmul.f32 %v2355_v23, %v2355_v23  ;;  %v1647_v5 = vpop.permute.xlu0 %1646  ;;  %2911 = vmatprep.mubr.msk.f32.mxu1 %vm2151_vm10, %v2129_v55  ;;  %v2130_v51 = vld [vmem:[#allocation3 + $0xd8] sm:$0xff] }
 0x275   : > { %1520 = vst.msk [vmem:[#allocation3 + $0xe8] sm:$0xff] %vm1490_vm6, %v1453_v19  ;;  %v2521_v11 = vadd.f32 %v2520_v4, %v2519_v39  ;;  %2912 = vmatmul.mubr.msk.f32.gmra.mrb[10].mxu1 %vm2151_vm10, %v2130_v51  ;;  %v2625_v54 = vsel %vm405_vm0, %v2585_v18, 0.0 }
 0x276   : > { %1714 = vst.msk [vmem:[#allocation3 + $0xe8] sm:$0xff] %vm1684_vm7, %v1647_v5  ;;  %v2623_v13 = vsel %vm405_vm0, %v2584_v46, 0.0 }
 0x277   : > { %v2624_v38 = vadd.f32 %v2623_v13, %v2622_v9  ;;  %v1069_v41 = vpop.permute.xlu1 %1068  ;;  %v2523_v28 = vadd.f32 %v2522_v3, %v2521_v11 }
 0x278   : > { %1135 = vst.msk [vmem:[#allocation3 + $0xf0] sm:$0xff] %vm1104_vm4, %v1069_v41  ;;  %v1071_v35 = vpop.permute.xlu0 %1070 }
 0x279   : > { %1136 = vst.msk [vmem:[#allocation3 + $0xf8] sm:$0xff] %vm1104_vm4, %v1071_v35  ;;  %v2626_v24 = vadd.f32 %v2625_v54, %v2624_v38 }
 0x27b   : > { %v1838_v17 = vpop.permute.xlu1 %1837 }
 0x27c   : > { %1906 = vst.msk [vmem:[#allocation3 + $0xe0] sm:$0xff] %vm1877_vm8, %v1838_v17  ;;  %v1840_v7 = vpop.permute.xlu0 %1839 }
 0x27d   : > { %1907 = vst.msk [vmem:[#allocation3 + $0xe8] sm:$0xff] %vm1877_vm8, %v1840_v7 }
 0x27f   : > { %v1262_v30 = vpop.permute.xlu1 %1261 }
 0x280   : > { %1328 = vst.msk [vmem:[#allocation3 + $0xf0] sm:$0xff] %vm1297_vm5, %v1262_v30  ;;  %v1264_v8 = vpop.permute.xlu0 %1263 }
 0x281   : > { %1329 = vst.msk [vmem:[#allocation3 + $0xf8] sm:$0xff] %vm1297_vm5, %v1264_v8 }
 0x283   : > { %v2031_v50 = vpop.permute.xlu1 %2030 }
 0x284   : > { %2099 = vst.msk [vmem:[#allocation3 + $0xe0] sm:$0xff] %vm2070_vm9, %v2031_v50  ;;  %v2033_v1 = vpop.permute.xlu0 %2032 }
 0x285   : > { %2100 = vst.msk [vmem:[#allocation3 + $0xe8] sm:$0xff] %vm2070_vm9, %v2033_v1 }
 0x287   : > { %v1455_v48 = vpop.permute.xlu1 %1454 }
 0x288   : > { %1521 = vst.msk [vmem:[#allocation3 + $0xf0] sm:$0xff] %vm1490_vm6, %v1455_v48  ;;  %v2889_v58 = vpop.f32.mrb[10].mxu0  ;;  %v1649_v15 = vpop.permute.xlu0 %1648 }
 0x289   : > { %v2370_v22 = vadd.f32 %v2889_v58, %v4014_v6  ;;  %v2364_v34 = vpop.f32.mrb[11].mxu0  ;;  %1715 = vst.msk [vmem:[#allocation3 + $0xf0] sm:$0xff] %vm1684_vm7, %v1649_v15 }
 0x28a   : > { %v2365_v37 = vadd.f32 %v4014_v6, %v2364_v34 }
 0x28b   : > { %2484 = vst.msk [vmem:[%s4024_s26 + $0x58] sm:$0xff] %vm405_vm0, %v2370_v22  ;;  %v2587_v32 = vmul.f32 %v2370_v22, %v2370_v22  ;;  %v1457_v29 = vpop.permute.xlu1 %1456  ;;  %v2131_v40 = vld [vmem:[#allocation3 + $0xe0] sm:$0xff]  ;;  %v2526_v43 = vsel %vm405_vm0, %v2370_v22, 0.0 }
 0x28c   : > { %2483 = vst.msk [vmem:[%s4024_s26 + $0x50] sm:$0xff] %vm405_vm0, %v2365_v37  ;;  %v2524_v25 = vsel %vm405_vm0, %v2365_v37, 0.0  ;;  %v2586_v52 = vmul.f32 %v2365_v37, %v2365_v37  ;;  %2914 = vmatprep.mubr.msk.f32.mxu1 %vm2151_vm10, %v2131_v40  ;;  %v2132_v56 = vld [vmem:[#allocation3 + $0xe8] sm:$0xff]  ;;  %v1842_v2 = vpop.permute.xlu0 %1841 }
 0x28d   : > { %1522 = vst.msk [vmem:[#allocation3 + $0xf8] sm:$0xff] %vm1490_vm6, %v1457_v29  ;;  %v2525_v10 = vadd.f32 %v2524_v25, %v2523_v28  ;;  %2915 = vmatmul.mubr.msk.f32.gmra.mrb[12].mxu1 %vm2151_vm10, %v2132_v56  ;;  %v2629_v12 = vsel %vm405_vm0, %v2587_v32, 0.0 }
 0x28e   : > { %1908 = vst.msk [vmem:[#allocation3 + $0xf0] sm:$0xff] %vm1877_vm8, %v1842_v2  ;;  %v2627_v20 = vsel %vm405_vm0, %v2586_v52, 0.0 }
 0x28f   : > { %v2628_v31 = vadd.f32 %v2627_v20, %v2626_v24  ;;  %v1651_v57 = vpop.permute.xlu1 %1650  ;;  %v2527_v60 = vadd.f32 %v2526_v43, %v2525_v10 }
 0x290   : > { %1716 = vst.msk [vmem:[#allocation3 + $0xf8] sm:$0xff] %vm1684_vm7, %v1651_v57  ;;  %v2035_v45 = vpop.permute.xlu0 %2034 }
 0x291   : > { %2101 = vst.msk [vmem:[#allocation3 + $0xf0] sm:$0xff] %vm2070_vm9, %v2035_v45  ;;  %v2630_v42 = vadd.f32 %v2629_v12, %v2628_v31 }
 0x293   : > { %v1844_v59 = vpop.permute.xlu1 %1843 }
 0x294   : > { %1909 = vst.msk [vmem:[#allocation3 + $0xf8] sm:$0xff] %vm1877_vm8, %v1844_v59 }
 0x297   : > { %v2037_v27 = vpop.permute.xlu1 %2036 }
 0x298   : > { %2102 = vst.msk [vmem:[#allocation3 + $0xf8] sm:$0xff] %vm2070_vm9, %v2037_v27  ;;  %v2133_v16 = vld [vmem:[#allocation3 + $0xf0] sm:$0xff] }
 0x299   : > { %2917 = vmatprep.mubr.msk.f32.mxu1 %vm2151_vm10, %v2133_v16 }
 0x29f   : > { %v2134_v36 = vld [vmem:[#allocation3 + $0xf8] sm:$0xff] }
 0x2a0   : > { %v2892_v39 = vpop.f32.mrb[12].mxu0  ;;  %2918 = vmatmul.mubr.msk.f32.gmra.mrb[14].mxu1 %vm2151_vm10, %v2134_v36 }
 0x2a1   : > { %v2380_v47 = vadd.f32 %v2892_v39, %v4014_v6  ;;  %v2374_v9 = vpop.f32.mrb[13].mxu0 }
 0x2a2   : > { %v2375_v21 = vadd.f32 %v4014_v6, %v2374_v9 }
 0x2a3   : > { %2486 = vst.msk [vmem:[%s4024_s26 + $0x68] sm:$0xff] %vm405_vm0, %v2380_v47  ;;  %v2589_v53 = vmul.f32 %v2380_v47, %v2380_v47  ;;  %v2530_v61 = vsel %vm405_vm0, %v2380_v47, 0.0 }
 0x2a4   : > { %2485 = vst.msk [vmem:[%s4024_s26 + $0x60] sm:$0xff] %vm405_vm0, %v2375_v21  ;;  %v2528_v44 = vsel %vm405_vm0, %v2375_v21, 0.0  ;;  %v2588_v62 = vmul.f32 %v2375_v21, %v2375_v21 }
 0x2a5   : > { %v2529_v63 = vadd.f32 %v2528_v44, %v2527_v60  ;;  %v2633_v49 = vsel %vm405_vm0, %v2589_v53, 0.0 }
 0x2a6   : > { %v2631_v14 = vsel %vm405_vm0, %v2588_v62, 0.0 }
 0x2a7   : > { %v2632_v0 = vadd.f32 %v2631_v14, %v2630_v42  ;;  %v2531_v26 = vadd.f32 %v2530_v61, %v2529_v63 }
 0x2a9   : > { %v2634_v33 = vadd.f32 %v2633_v49, %v2632_v0 }
 0x2b8   : > { %v2895_v23 = vpop.f32.mrb[14].mxu0 }
 0x2b9   : > { %v2390_v18 = vadd.f32 %v2895_v23, %v4014_v6  ;;  %v2384_v19 = vpop.f32.mrb[15].mxu0 }
 0x2ba   : > { %v2385_v55 = vadd.f32 %v4014_v6, %v2384_v19 }
 0x2bb   : > { %2488 = vst.msk [vmem:[%s4024_s26 + $0x78] sm:$0xff] %vm405_vm0, %v2390_v18  ;;  %v2591_v3 = vmul.f32 %v2390_v18, %v2390_v18  ;;  %v2534_v4 = vsel %vm405_vm0, %v2390_v18, 0.0 }
 0x2bc   : > { %2487 = vst.msk [vmem:[%s4024_s26 + $0x70] sm:$0xff] %vm405_vm0, %v2385_v55  ;;  %v2532_v46 = vsel %vm405_vm0, %v2385_v55, 0.0  ;;  %v2590_v5 = vmul.f32 %v2385_v55, %v2385_v55 }
 0x2bd   : > { %v2533_v51 = vadd.f32 %v2532_v46, %v2531_v26  ;;  %v2637_v11 = vsel %vm405_vm0, %v2591_v3, 0.0 }
 0x2be   : > { %v2635_v54 = vsel %vm405_vm0, %v2590_v5, 0.0 }
 0x2bf   : > { %v2636_v13 = vadd.f32 %v2635_v54, %v2634_v33  ;;  %v2535_v38 = vadd.f32 %v2534_v4, %v2533_v51 }
 0x2c1   : > { %v2638_v41 = vadd.f32 %v2637_v11, %v2636_v13 }
 0x2d0   : > { %v2898_v28 = vpop.f32.mrb[0].mxu1 }
 0x2d1   : > { %v2400_v35 = vadd.f32 %v2898_v28, %v4014_v6  ;;  %v2394_v24 = vpop.f32.mrb[1].mxu1 }
 0x2d2   : > { %v2395_v17 = vadd.f32 %v4014_v6, %v2394_v24 }
 0x2d3   : > { %2490 = vst.msk [vmem:[%s4024_s26 + $0x88] sm:$0xff] %vm405_vm0, %v2400_v35  ;;  %v2593_v7 = vmul.f32 %v2400_v35, %v2400_v35  ;;  %v2538_v30 = vsel %vm405_vm0, %v2400_v35, 0.0 }
 0x2d4   : > { %2489 = vst.msk [vmem:[%s4024_s26 + $0x80] sm:$0xff] %vm405_vm0, %v2395_v17  ;;  %v2536_v8 = vsel %vm405_vm0, %v2395_v17, 0.0  ;;  %v2592_v50 = vmul.f32 %v2395_v17, %v2395_v17 }
 0x2d5   : > { %v2537_v1 = vadd.f32 %v2536_v8, %v2535_v38  ;;  %v2641_v48 = vsel %vm405_vm0, %v2593_v7, 0.0 }
 0x2d6   : > { %v2639_v58 = vsel %vm405_vm0, %v2592_v50, 0.0 }
 0x2d7   : > { %v2640_v15 = vadd.f32 %v2639_v58, %v2638_v41  ;;  %v2539_v22 = vadd.f32 %v2538_v30, %v2537_v1 }
 0x2d9   : > { %v2642_v34 = vadd.f32 %v2641_v48, %v2640_v15 }
 0x2e8   : > { %v2901_v37 = vpop.f32.mrb[2].mxu1 }
 0x2e9   : > { %v2410_v32 = vadd.f32 %v2901_v37, %v4014_v6  ;;  %v2404_v29 = vpop.f32.mrb[3].mxu1 }
 0x2ea   : > { %v2405_v40 = vadd.f32 %v4014_v6, %v2404_v29 }
 0x2eb   : > { %2492 = vst.msk [vmem:[%s4024_s26 + $0x98] sm:$0xff] %vm405_vm0, %v2410_v32  ;;  %v2595_v43 = vmul.f32 %v2410_v32, %v2410_v32  ;;  %v2542_v25 = vsel %vm405_vm0, %v2410_v32, 0.0 }
 0x2ec   : > { %2491 = vst.msk [vmem:[%s4024_s26 + $0x90] sm:$0xff] %vm405_vm0, %v2405_v40  ;;  %v2540_v52 = vsel %vm405_vm0, %v2405_v40, 0.0  ;;  %v2594_v56 = vmul.f32 %v2405_v40, %v2405_v40 }
 0x2ed   : > { %v2541_v2 = vadd.f32 %v2540_v52, %v2539_v22  ;;  %v2645_v10 = vsel %vm405_vm0, %v2595_v43, 0.0 }
 0x2ee   : > { %v2643_v12 = vsel %vm405_vm0, %v2594_v56, 0.0 }
 0x2ef   : > { %v2644_v20 = vadd.f32 %v2643_v12, %v2642_v34  ;;  %v2543_v31 = vadd.f32 %v2542_v25, %v2541_v2 }
 0x2f1   : > { %v2646_v57 = vadd.f32 %v2645_v10, %v2644_v20 }
 0x300   : > { %v2904_v60 = vpop.f32.mrb[4].mxu1 }
 0x301   : > { %v2420_v45 = vadd.f32 %v2904_v60, %v4014_v6  ;;  %v2414_v42 = vpop.f32.mrb[5].mxu1 }
 0x302   : > { %v2415_v59 = vadd.f32 %v4014_v6, %v2414_v42 }
 0x303   : > { %2494 = vst.msk [vmem:[%s4024_s26 + $0xa8] sm:$0xff] %vm405_vm0, %v2420_v45  ;;  %v2597_v27 = vmul.f32 %v2420_v45, %v2420_v45  ;;  %v2546_v16 = vsel %vm405_vm0, %v2420_v45, 0.0 }
 0x304   : > { %2493 = vst.msk [vmem:[%s4024_s26 + $0xa0] sm:$0xff] %vm405_vm0, %v2415_v59  ;;  %v2544_v36 = vsel %vm405_vm0, %v2415_v59, 0.0  ;;  %v2596_v39 = vmul.f32 %v2415_v59, %v2415_v59 }
 0x305   : > { %v2545_v47 = vadd.f32 %v2544_v36, %v2543_v31  ;;  %v2649_v9 = vsel %vm405_vm0, %v2597_v27, 0.0 }
 0x306   : > { %v2647_v21 = vsel %vm405_vm0, %v2596_v39, 0.0 }
 0x307   : > { %v2648_v53 = vadd.f32 %v2647_v21, %v2646_v57  ;;  %v2547_v61 = vadd.f32 %v2546_v16, %v2545_v47 }
 0x309   : > { %v2650_v44 = vadd.f32 %v2649_v9, %v2648_v53 }
 0x318   : > { %v2907_v62 = vpop.f32.mrb[6].mxu1 }
 0x319   : > { %v2430_v63 = vadd.f32 %v2907_v62, %v4014_v6  ;;  %v2424_v49 = vpop.f32.mrb[7].mxu1 }
 0x31a   : > { %v2425_v14 = vadd.f32 %v4014_v6, %v2424_v49 }
 0x31b   : > { %2496 = vst.msk [vmem:[%s4024_s26 + $0xb8] sm:$0xff] %vm405_vm0, %v2430_v63  ;;  %v2599_v0 = vmul.f32 %v2430_v63, %v2430_v63  ;;  %v2550_v26 = vsel %vm405_vm0, %v2430_v63, 0.0 }
 0x31c   : > { %2495 = vst.msk [vmem:[%s4024_s26 + $0xb0] sm:$0xff] %vm405_vm0, %v2425_v14  ;;  %v2548_v33 = vsel %vm405_vm0, %v2425_v14, 0.0  ;;  %v2598_v23 = vmul.f32 %v2425_v14, %v2425_v14 }
 0x31d   : > { %v2549_v18 = vadd.f32 %v2548_v33, %v2547_v61  ;;  %v2653_v19 = vsel %vm405_vm0, %v2599_v0, 0.0 }
 0x31e   : > { %v2651_v55 = vsel %vm405_vm0, %v2598_v23, 0.0 }
 0x31f   : > { %v2652_v3 = vadd.f32 %v2651_v55, %v2650_v44  ;;  %v2551_v4 = vadd.f32 %v2550_v26, %v2549_v18 }
 0x321   : > { %v2654_v46 = vadd.f32 %v2653_v19, %v2652_v3 }
 0x330   : > { %v2910_v5 = vpop.f32.mrb[8].mxu1 }
 0x331   : > { %v2440_v51 = vadd.f32 %v2910_v5, %v4014_v6  ;;  %v2434_v11 = vpop.f32.mrb[9].mxu1 }
 0x332   : > { %v2435_v54 = vadd.f32 %v4014_v6, %v2434_v11 }
 0x333   : > { %2498 = vst.msk [vmem:[%s4024_s26 + $0xc8] sm:$0xff] %vm405_vm0, %v2440_v51  ;;  %v2601_v13 = vmul.f32 %v2440_v51, %v2440_v51  ;;  %v2554_v38 = vsel %vm405_vm0, %v2440_v51, 0.0 }
 0x334   : > { %2497 = vst.msk [vmem:[%s4024_s26 + $0xc0] sm:$0xff] %vm405_vm0, %v2435_v54  ;;  %v2552_v41 = vsel %vm405_vm0, %v2435_v54, 0.0  ;;  %v2600_v28 = vmul.f32 %v2435_v54, %v2435_v54 }
 0x335   : > { %v2553_v35 = vadd.f32 %v2552_v41, %v2551_v4  ;;  %v2657_v24 = vsel %vm405_vm0, %v2601_v13, 0.0 }
 0x336   : > { %v2655_v17 = vsel %vm405_vm0, %v2600_v28, 0.0 }
 0x337   : > { %v2656_v7 = vadd.f32 %v2655_v17, %v2654_v46  ;;  %v2555_v30 = vadd.f32 %v2554_v38, %v2553_v35 }
 0x339   : > { %v2658_v8 = vadd.f32 %v2657_v24, %v2656_v7 }
 0x348   : > { %v2913_v50 = vpop.f32.mrb[10].mxu1 }
 0x349   : > { %v2450_v1 = vadd.f32 %v2913_v50, %v4014_v6  ;;  %v2444_v48 = vpop.f32.mrb[11].mxu1 }
 0x34a   : > { %v2445_v58 = vadd.f32 %v4014_v6, %v2444_v48 }
 0x34b   : > { %2500 = vst.msk [vmem:[%s4024_s26 + $0xd8] sm:$0xff] %vm405_vm0, %v2450_v1  ;;  %v2603_v15 = vmul.f32 %v2450_v1, %v2450_v1  ;;  %v2558_v22 = vsel %vm405_vm0, %v2450_v1, 0.0 }
 0x34c   : > { %2499 = vst.msk [vmem:[%s4024_s26 + $0xd0] sm:$0xff] %vm405_vm0, %v2445_v58  ;;  %v2556_v34 = vsel %vm405_vm0, %v2445_v58, 0.0  ;;  %v2602_v37 = vmul.f32 %v2445_v58, %v2445_v58 }
 0x34d   : > { %v2557_v32 = vadd.f32 %v2556_v34, %v2555_v30  ;;  %v2661_v29 = vsel %vm405_vm0, %v2603_v15, 0.0 }
 0x34e   : > { %v2659_v40 = vsel %vm405_vm0, %v2602_v37, 0.0 }
 0x34f   : > { %v2660_v43 = vadd.f32 %v2659_v40, %v2658_v8  ;;  %v2559_v25 = vadd.f32 %v2558_v22, %v2557_v32 }
 0x351   : > { %v2662_v52 = vadd.f32 %v2661_v29, %v2660_v43 }
 0x360   : > { %v2916_v56 = vpop.f32.mrb[12].mxu1 }
 0x361   : > { %v2460_v2 = vadd.f32 %v2916_v56, %v4014_v6  ;;  %v2454_v10 = vpop.f32.mrb[13].mxu1 }
 0x362   : > { %v2455_v12 = vadd.f32 %v4014_v6, %v2454_v10 }
 0x363   : > { %2502 = vst.msk [vmem:[%s4024_s26 + $0xe8] sm:$0xff] %vm405_vm0, %v2460_v2  ;;  %v2605_v20 = vmul.f32 %v2460_v2, %v2460_v2  ;;  %v2562_v31 = vsel %vm405_vm0, %v2460_v2, 0.0 }
 0x364   : > { %2501 = vst.msk [vmem:[%s4024_s26 + $0xe0] sm:$0xff] %vm405_vm0, %v2455_v12  ;;  %v2560_v57 = vsel %vm405_vm0, %v2455_v12, 0.0  ;;  %v2604_v60 = vmul.f32 %v2455_v12, %v2455_v12 }
 0x365   : > { %v2561_v45 = vadd.f32 %v2560_v57, %v2559_v25  ;;  %v2665_v42 = vsel %vm405_vm0, %v2605_v20, 0.0 }
 0x366   : > { %v2663_v59 = vsel %vm405_vm0, %v2604_v60, 0.0 }
 0x367   : > { %v2664_v27 = vadd.f32 %v2663_v59, %v2662_v52  ;;  %v2563_v16 = vadd.f32 %v2562_v31, %v2561_v45 }
 0x369   : > { %v2666_v36 = vadd.f32 %v2665_v42, %v2664_v27 }
 0x373   : > { %v2919_v39 = vpop.f32.mrb[14].mxu1 }
 0x374   : > { %v2470_v47 = vadd.f32 %v2919_v39, %v4014_v6  ;;  %v2464_v9 = vpop.f32.mrb[15].mxu1 }
 0x375   : > { %v2465_v21 = vadd.f32 %v4014_v6, %v2464_v9 }
 0x376   : > { %2504 = vst.msk [vmem:[%s4024_s26 + $0xf8] sm:$0xff] %vm405_vm0, %v2470_v47  ;;  %v2607_v53 = vmul.f32 %v2470_v47, %v2470_v47  ;;  %v2566_v63 = vsel %vm405_vm0, %v2470_v47, 0.0 }
 0x377   : > { %2503 = vst.msk [vmem:[%s4024_s26 + $0xf0] sm:$0xff] %vm405_vm0, %v2465_v21  ;;  %v2564_v61 = vsel %vm405_vm0, %v2465_v21, 0.0  ;;  %v2606_v44 = vmul.f32 %v2465_v21, %v2465_v21 }
 0x378   : > { %v2565_v62 = vadd.f32 %v2564_v61, %v2563_v16  ;;  %v2669_v26 = vsel %vm405_vm0, %v2607_v53, 0.0 }
 0x379   : > { %v2667_v49 = vsel %vm405_vm0, %v2606_v44, 0.0 }
 0x37a   : > { %v2567_v14 = vadd.f32 %v2566_v63, %v2565_v62  ;;  %v2668_v0 = vadd.f32 %v2667_v49, %v2666_v36 }
 0x37c   : > { %v2568_v33 = vrot.slane %v2567_v14, 4  ;;  %v2670_v6 = vadd.f32 %v2669_v26, %v2668_v0 }
 0x37e   : > { %v2569_v23 = vadd.f32 %v2568_v33, %v2567_v14  ;;  %v2671_v18 = vrot.slane %v2670_v6, 4 }
 0x380   : > { %v2570_v19 = vrot.slane %v2569_v23, 2  ;;  %v2672_v55 = vadd.f32 %v2671_v18, %v2670_v6 }
 0x382   : > { %v2571_v3 = vadd.f32 %v2570_v19, %v2569_v23  ;;  %v2673_v4 = vrot.slane %v2672_v55, 2 }
 0x384   : > { %v2572_v46 = vrot.slane %v2571_v3, 1  ;;  %v2674_v5 = vadd.f32 %v2673_v4, %v2672_v55 }
 0x386   : > { %v2573_v51 = vadd.f32 %v2572_v46, %v2571_v3  ;;  %v2675_v11 = vrot.slane %v2674_v5, 1 }
 0x388   : > { %2575 = vst.msk [vmem:[%s262_s27] sm:$0x1] %vm2574_vm11, %v2573_v51  ;;  %v2676_v54 = vadd.f32 %v2675_v11, %v2674_v5 }
 0x38a   : > { %2677 = vst.msk [vmem:[%s262_s27 + $0x1] sm:$0x1] %vm2574_vm11, %v2676_v54 }
 0x38b PF: > { %s17_s21 = sadd.s32 1, %s2971_s21  }
 0x38c   : > { %p14_p4 = scmp.ge.s32.totalorder %s17_s21, 4  }
 0x38e   :  { %16 = sbr.rel (!%p14_p4) target bundleno = 1 (0x1), region = 84 }

// kernel: decoder_block_forward.5
= control target key start
LH: loop header
LB: loop body
LE: loop exit
PB: predicated region body
PF: predicated region fallthrough
CT: control target
= control target key end

     0   :  { %s3278_s30 = smov 0   ;;  %s4839_s0 = inlined_call_operand.vmem [shape: f32[2,16,16,8], index: 0, kind: input, shape index: {}]   ;;  %s4840_s1 = inlined_call_operand.vmem [shape: f32[2,16,16,8], index: 1, kind: input, shape index: {}]   ;;  %s4841_s2 = inlined_call_operand.vmem [shape: f32[1,8], index: 2, kind: input, shape index: {}]   ;;  %s4842_s3 = inlined_call_operand.vmem [shape: f32[1,8], index: 3, kind: input, shape index: {}]   ;;  %s4843_s4 = inlined_call_operand.vmem [shape: f32[1,8], index: 4, kind: input, shape index: {}]   ;;  %s4844_s5 = inlined_call_operand.vmem [shape: f32[1,8], index: 5, kind: input, shape index: {}]   ;;  %s4845_s6 = inlined_call_operand.vmem [shape: f32[144,8], index: 6, kind: input, shape index: {}]   ;;  %s4846_s7 = inlined_call_operand.vmem [shape: f32[1,8], index: 7, kind: input, shape index: {}]   ;;  %s4847_s8 = inlined_call_operand.vmem [shape: f32[2,16,16,8], index: 8, kind: output, shape index: {0}]   ;;  %s4848_s9 = inlined_call_operand.vmem [shape: f32[2,2,8], index: 9, kind: output, shape index: {1}]  }
   0x1 LB: > { %s3092_s10 = sadd.s32 4294967295, %s3216_s30   ;;  %p3096_p0 = scmp.ge.s32.totalorder %s3216_s30, 1  ;;  %s3216_s30 = sphi %s3278_s30, %s20_s30  }
   0x2   : > { %p300_p1 = scmp.lt.s32.totalorder %s3216_s30, 3 }
   0x4   : > { %p301_p2 = pnand %p3096_p0, %p300_p1 }
   0x6   : > { %304 = sbr.rel (%p301_p2) target bundleno = 946 (0x3b2), region = 52 }
   0xd   : > { %p345_p3 = scmp.lt.s32.totalorder %s3092_s10, 1  ;;  %vm648_vm0 = vcmask 130048   ;;  %v3218_v0 = vmov 0.0   ;;  %vm651_vm1 = vcmask 123904   ;;  %v3348_v1 = vld [vmem:[%s4843_s4] ss:$0 sm:$0xff] }
   0xe   : > { %656 = vst.msk [vmem:[#allocation2 + $0x30] sm:$0xff] %vm648_vm0, %v3218_v0  ;;  %657 = vst.msk [vmem:[#allocation2 + $0x38] sm:$0xff] %vm648_vm0, %v3218_v0  ;;  %v3359_v2 = vld [vmem:[%s4844_s5] ss:$0 sm:$0xff]  ;;  %s3219_s19 = smov 8   ;;  %vm705_vm2 = vcmask 64512  }
   0xf   : > { %s4858_s10 = smov (!%p345_p3, %s3092_s10), 1  ;;  %649 = vst.msk [vmem:[#allocation2] sm:$0xff] %vm648_vm0, %v3218_v0  ;;  %650 = vst.msk [vmem:[#allocation2 + $0x8] sm:$0xff] %vm648_vm0, %v3218_v0  ;;  %s3220_s27 = smov 16   ;;  %vm866_vm3 = vcmask 130112   ;;  %vm1123_vm4 = vcmask 261248  }
  0x10   : > { %653 = vst.msk [vmem:[#allocation2 + $0x18] sm:$0xff] %vm648_vm0, %v3218_v0  ;;  %654 = vst.msk [vmem:[#allocation2 + $0x20] sm:$0xff] %vm648_vm0, %v3218_v0  ;;  %s3343_s11 = sshll.u32 %s4858_s10, 8  ;;  %s3221_s28 = smov 32   ;;  %vm1316_vm5 = vcmask 392448   ;;  %vm1509_vm6 = vcmask 523648  }
  0x11   : > { %659 = vst.msk [vmem:[#allocation2 + $0x48] sm:$0xff] %vm648_vm0, %v3218_v0  ;;  %660 = vst.msk [vmem:[#allocation2 + $0x50] sm:$0xff] %vm648_vm0, %v3218_v0  ;;  %s3354_s16 = scalar_lea.vmem %s4840_s1, %s3343_s11  ;;  %s3434_s22 = scalar_lea.vmem %s4839_s0, %s3343_s11  ;;  %vm1702_vm7 = vcmask 654848   ;;  %vm1895_vm8 = vcmask 786048   ;;  %vm2089_vm9 = vcmask 917248   ;;  %vm2282_vm10 = vcmask 1048448  }
  0x12   : > { %662 = vst.msk [vmem:[#allocation2 + $0x60] sm:$0xff] %vm648_vm0, %v3218_v0  ;;  %663 = vst.msk [vmem:[#allocation2 + $0x68] sm:$0xff] %vm648_vm0, %v3218_v0  ;;  %v508_v3 = vld [vmem:[%s3354_s16 + $0x10] sm:$0xff]  ;;  %v506_v4 = vld [vmem:[%s3354_s16] sm:$0xff]  ;;  %s3223_s25 = smov 64   ;;  %s3224_s26 = smov 48  }
  0x13   : > { %665 = vst.msk [vmem:[#allocation2 + $0x78] sm:$0xff] %vm648_vm0, %v3218_v0  ;;  %666 = vst.msk [vmem:[#allocation2 + $0x80] sm:$0xff] %vm648_vm0, %v3218_v0  ;;  %v509_v5 = vld [vmem:[%s3354_s16 + $0x18] sm:$0xff]  ;;  %v547_v6 = vmul.f32 %v3348_v1, %v508_v3  ;;  %v545_v7 = vmul.f32 %v3348_v1, %v506_v4  ;;  %v507_v9 = vld [vmem:[%s3354_s16 + $0x8] sm:$0xff]  ;;  %s3225_s15 = smov 80   ;;  %s3226_s18 = smov 96  }
  0x14   : > { %668 = vst.msk [vmem:[#allocation2 + $0x90] sm:$0xff] %vm648_vm0, %v3218_v0  ;;  %669 = vst.msk [vmem:[#allocation2 + $0x98] sm:$0xff] %vm648_vm0, %v3218_v0  ;;  %v548_v8 = vmul.f32 %v3348_v1, %v509_v5  ;;  %v511_v10 = vld [vmem:[%s3354_s16 + $0x28] sm:$0xff]  ;;  %v510_v11 = vld [vmem:[%s3354_s16 + $0x20] sm:$0xff]  ;;  %v546_v12 = vmul.f32 %v3348_v1, %v507_v9  ;;  %s4527_s24 = scalar_lea.vmem %s4847_s8, %s3343_s11  ;;  %vm2890_vm11 = vcmask 57344  }
  0x15   : > { %671 = vst.msk [vmem:[#allocation2 + $0xa8] sm:$0xff] %vm648_vm0, %v3218_v0  ;;  %672 = vst.msk [vmem:[#allocation2 + $0xb0] sm:$0xff] %vm648_vm0, %v3218_v0  ;;  %v550_v13 = vmul.f32 %v3348_v1, %v511_v10  ;;  %v513_v14 = vld [vmem:[%s3354_s16 + $0x38] sm:$0xff]  ;;  %v586_v15 = vadd.f32 %v3359_v2, %v547_v6  ;;  %v584_v16 = vadd.f32 %v3359_v2, %v545_v7  ;;  %v512_v20 = vld [vmem:[%s3354_s16 + $0x30] sm:$0xff] }
  0x16   : > { %674 = vst.msk [vmem:[#allocation2 + $0xc0] sm:$0xff] %vm648_vm0, %v3218_v0  ;;  %675 = vst.msk [vmem:[#allocation2 + $0xc8] sm:$0xff] %vm648_vm0, %v3218_v0  ;;  %v587_v17 = vadd.f32 %v3359_v2, %v548_v8  ;;  %v549_v18 = vmul.f32 %v3348_v1, %v510_v11  ;;  %v585_v19 = vadd.f32 %v3359_v2, %v546_v12  ;;  %v515_v29 = vld [vmem:[%s3354_s16 + $0x48] sm:$0xff]  ;;  %v514_v30 = vld [vmem:[%s3354_s16 + $0x40] sm:$0xff] }
  0x17   : > { %677 = vst.msk [vmem:[#allocation2 + $0xd8] sm:$0xff] %vm648_vm0, %v3218_v0  ;;  %678 = vst.msk [vmem:[#allocation2 + $0xe0] sm:$0xff] %vm648_vm0, %v3218_v0  ;;  %v618_v21 = vmax.f32 %v586_v15, 0.0  ;;  %v616_v22 = vmax.f32 %v584_v16, 0.0  ;;  %v552_v23 = vmul.f32 %v3348_v1, %v513_v14  ;;  %v589_v24 = vadd.f32 %v3359_v2, %v550_v13  ;;  %v517_v34 = vld [vmem:[%s3354_s16 + $0x58] sm:$0xff]  ;;  %v516_v35 = vld [vmem:[%s3354_s16 + $0x50] sm:$0xff] }
  0x18   : > { %680 = vst.msk [vmem:[#allocation2 + $0xf0] sm:$0xff] %vm648_vm0, %v3218_v0  ;;  %681 = vst.msk [vmem:[#allocation2 + $0xf8] sm:$0xff] %vm648_vm0, %v3218_v0  ;;  %v619_v25 = vmax.f32 %v587_v17, 0.0  ;;  %v617_v26 = vmax.f32 %v585_v19, 0.0  ;;  %v588_v27 = vadd.f32 %v3359_v2, %v549_v18  ;;  %v551_v28 = vmul.f32 %v3348_v1, %v512_v20  ;;  %v519_v36 = vld [vmem:[%s3354_s16 + $0x68] sm:$0xff]  ;;  %v518_v40 = vld [vmem:[%s3354_s16 + $0x60] sm:$0xff] }
  0x19   : > { %683 = vst.msk [vmem:[#allocation2 + $0x108] sm:$0xff] %vm648_vm0, %v3218_v0  ;;  %684 = vst.msk [vmem:[#allocation2 + $0x110] sm:$0xff] %vm648_vm0, %v3218_v0  ;;  %774 = vrot.lane.b32.xlu1 %v618_v21, %s3219_s19  ;;  %770 = vrot.lane.b32.xlu0 %v616_v22, %s3219_s19  ;;  %v591_v31 = vadd.f32 %v3359_v2, %v552_v23  ;;  %v554_v32 = vmul.f32 %v3348_v1, %v515_v29  ;;  %v621_v37 = vmax.f32 %v589_v24, 0.0  ;;  %v521_v41 = vld [vmem:[%s3354_s16 + $0x78] sm:$0xff]  ;;  %v520_v42 = vld [vmem:[%s3354_s16 + $0x70] sm:$0xff] }
  0x1a   : > { %686 = vst.msk [vmem:[#allocation2 + $0x120] sm:$0xff] %vm648_vm0, %v3218_v0  ;;  %687 = vst.msk [vmem:[#allocation2 + $0x128] sm:$0xff] %vm648_vm0, %v3218_v0  ;;  %v553_v33 = vmul.f32 %v3348_v1, %v514_v30  ;;  %v620_v38 = vmax.f32 %v588_v27, 0.0  ;;  %v590_v39 = vadd.f32 %v3359_v2, %v551_v28  ;;  %v523_v43 = vld [vmem:[%s3354_s16 + $0x88] sm:$0xff]  ;;  %v522_v44 = vld [vmem:[%s3354_s16 + $0x80] sm:$0xff]  ;;  %v556_v46 = vmul.f32 %v3348_v1, %v517_v34 }
  0x1b   : > { %689 = vst.msk [vmem:[#allocation2 + $0x138] sm:$0xff] %vm648_vm0, %v3218_v0  ;;  %690 = vst.msk [vmem:[#allocation2 + $0x140] sm:$0xff] %vm648_vm0, %v3218_v0  ;;  %v623_v45 = vmax.f32 %v591_v31, 0.0  ;;  %v555_v47 = vmul.f32 %v3348_v1, %v516_v35  ;;  %v525_v48 = vld [vmem:[%s3354_s16 + $0x98] sm:$0xff]  ;;  %v524_v49 = vld [vmem:[%s3354_s16 + $0x90] sm:$0xff]  ;;  %v593_v51 = vadd.f32 %v3359_v2, %v554_v32  ;;  %v558_v53 = vmul.f32 %v3348_v1, %v519_v36 }
  0x1c   : > { %692 = vst.msk [vmem:[#allocation2 + $0x150] sm:$0xff] %vm648_vm0, %v3218_v0  ;;  %693 = vst.msk [vmem:[#allocation2 + $0x158] sm:$0xff] %vm648_vm0, %v3218_v0  ;;  %v527_v50 = vld [vmem:[%s3354_s16 + $0xa8] sm:$0xff]  ;;  %v592_v52 = vadd.f32 %v3359_v2, %v553_v33  ;;  %v557_v54 = vmul.f32 %v3348_v1, %v518_v40  ;;  %v526_v55 = vld [vmem:[%s3354_s16 + $0xa0] sm:$0xff]  ;;  %v622_v56 = vmax.f32 %v590_v39, 0.0  ;;  %v560_v57 = vmul.f32 %v3348_v1, %v521_v41 }
  0x1d   : > { %695 = vst.msk [vmem:[#allocation2 + $0x168] sm:$0xff] %vm648_vm0, %v3218_v0  ;;  %696 = vst.msk [vmem:[#allocation2 + $0x170] sm:$0xff] %vm648_vm0, %v3218_v0  ;;  %776 = vrot.lane.b32.xlu1 %v619_v25, %s3219_s19  ;;  %772 = vrot.lane.b32.xlu0 %v617_v26, %s3219_s19  ;;  %v559_v58 = vmul.f32 %v3348_v1, %v520_v42  ;;  %v562_v59 = vmul.f32 %v3348_v1, %v523_v43  ;;  %v625_v4 = vmax.f32 %v593_v51, 0.0  ;;  %v529_v8 = vld [vmem:[%s3354_s16 + $0xb8] sm:$0xff]  ;;  %v528_v13 = vld [vmem:[%s3354_s16 + $0xb0] sm:$0xff] }
  0x1e   : > { %698 = vst.msk [vmem:[#allocation2 + $0x180] sm:$0xff] %vm648_vm0, %v3218_v0  ;;  %699 = vst.msk [vmem:[#allocation2 + $0x188] sm:$0xff] %vm648_vm0, %v3218_v0  ;;  %v561_v60 = vmul.f32 %v3348_v1, %v522_v44  ;;  %v564_v61 = vmul.f32 %v3348_v1, %v525_v48  ;;  %v563_v62 = vmul.f32 %v3348_v1, %v524_v49  ;;  %v624_v9 = vmax.f32 %v592_v52, 0.0  ;;  %v366_v18 = vld [vmem:[%s3434_s22 + $0x10] sm:$0xff]  ;;  %v3468_v22 = vld [vmem:[%s4841_s2] ss:$0 sm:$0xff] }
  0x1f   : > { %701 = vst.msk [vmem:[#allocation2 + $0x198] sm:$0xff] %vm648_vm0, %v3218_v0  ;;  %702 = vst.msk [vmem:[#allocation2 + $0x1a0] sm:$0xff] %vm648_vm0, %v3218_v0  ;;  %v566_v63 = vmul.f32 %v3348_v1, %v527_v50  ;;  %v565_v3 = vmul.f32 %v3348_v1, %v526_v55  ;;  %v594_v5 = vadd.f32 %v3359_v2, %v555_v47  ;;  %v3476_v27 = vld [vmem:[%s4842_s3] ss:$0 sm:$0xff]  ;;  %v367_v29 = vld [vmem:[%s3434_s22 + $0x18] sm:$0xff] }
  0x20   : > { %652 = vst.msk [vmem:[#allocation2 + $0x10] sm:$0x3] %vm651_vm1, %v3218_v0  ;;  %655 = vst.msk [vmem:[#allocation2 + $0x28] sm:$0x3] %vm651_vm1, %v3218_v0  ;;  %v3424_v6 = vadd.f32 %v3359_v2, %v558_v53  ;;  %v3427_v7 = vadd.f32 %v3359_v2, %v557_v54  ;;  %v3439_v10 = vadd.f32 %v3359_v2, %v560_v57  ;;  %v364_v28 = vld [vmem:[%s3434_s22] sm:$0xff]  ;;  %v365_v34 = vld [vmem:[%s3434_s22 + $0x8] sm:$0xff] }
  0x21   : > { %658 = vst.msk [vmem:[#allocation2 + $0x40] sm:$0x3] %vm651_vm1, %v3218_v0  ;;  %661 = vst.msk [vmem:[#allocation2 + $0x58] sm:$0x3] %vm651_vm1, %v3218_v0  ;;  %780 = vrot.lane.b32.xlu1 %v621_v37, %s3219_s19  ;;  %778 = vrot.lane.b32.xlu0 %v620_v38, %s3219_s19  ;;  %v3442_v11 = vadd.f32 %v3359_v2, %v559_v58  ;;  %v3445_v12 = vadd.f32 %v3359_v2, %v562_v59  ;;  %v626_v23 = vmax.f32 %v594_v5, 0.0  ;;  %v369_v35 = vld [vmem:[%s3434_s22 + $0x28] sm:$0xff] }
  0x22   : > { %664 = vst.msk [vmem:[#allocation2 + $0x70] sm:$0x3] %vm651_vm1, %v3218_v0  ;;  %667 = vst.msk [vmem:[#allocation2 + $0x88] sm:$0x3] %vm651_vm1, %v3218_v0  ;;  %v3449_v14 = vadd.f32 %v3359_v2, %v561_v60  ;;  %v3452_v15 = vadd.f32 %v3359_v2, %v564_v61  ;;  %v3455_v16 = vadd.f32 %v3359_v2, %v563_v62  ;;  %v629_v24 = vmax.f32 %v3424_v6, 0.0  ;;  %v531_v40 = vld [vmem:[%s3354_s16 + $0xc8] sm:$0xff] }
  0x23   : > { %670 = vst.msk [vmem:[#allocation2 + $0xa0] sm:$0x3] %vm651_vm1, %v3218_v0  ;;  %673 = vst.msk [vmem:[#allocation2 + $0xb8] sm:$0x3] %vm651_vm1, %v3218_v0  ;;  %v3458_v17 = vadd.f32 %v3359_v2, %v566_v63  ;;  %v3462_v20 = vadd.f32 %v3359_v2, %v565_v3  ;;  %v568_v21 = vmul.f32 %v3348_v1, %v529_v8  ;;  %v628_v25 = vmax.f32 %v3427_v7, 0.0  ;;  %v368_v41 = vld [vmem:[%s3434_s22 + $0x20] sm:$0xff] }
  0x24   : > { %676 = vst.msk [vmem:[#allocation2 + $0xd0] sm:$0x3] %vm651_vm1, %v3218_v0  ;;  %679 = vst.msk [vmem:[#allocation2 + $0xe8] sm:$0x3] %vm651_vm1, %v3218_v0  ;;  %v567_v26 = vmul.f32 %v3348_v1, %v528_v13  ;;  %v631_v30 = vmax.f32 %v3439_v10, 0.0  ;;  %v630_v31 = vmax.f32 %v3442_v11, 0.0  ;;  %v405_v33 = vmul.f32 %v3468_v22, %v366_v18 }
  0x25   : > { %682 = vst.msk [vmem:[#allocation2 + $0x100] sm:$0x3] %vm651_vm1, %v3218_v0  ;;  %685 = vst.msk [vmem:[#allocation2 + $0x118] sm:$0x3] %vm651_vm1, %v3218_v0  ;;  %784 = vrot.lane.b32.xlu1 %v623_v45, %s3219_s19  ;;  %782 = vrot.lane.b32.xlu0 %v622_v56, %s3219_s19  ;;  %v633_v32 = vmax.f32 %v3445_v12, 0.0  ;;  %v632_v36 = vmax.f32 %v3449_v14, 0.0  ;;  %v3496_v43 = vadd.f32 %v3359_v2, %v568_v21 }
  0x26   : > { %688 = vst.msk [vmem:[#allocation2 + $0x130] sm:$0x3] %vm651_vm1, %v3218_v0  ;;  %691 = vst.msk [vmem:[#allocation2 + $0x148] sm:$0x3] %vm651_vm1, %v3218_v0  ;;  %v635_v37 = vmax.f32 %v3452_v15, 0.0  ;;  %v634_v38 = vmax.f32 %v3455_v16, 0.0  ;;  %v444_v44 = vadd.f32 %v3476_v27, %v405_v33  ;;  %v403_v45 = vmul.f32 %v3468_v22, %v364_v28 }
  0x27   : > { %694 = vst.msk [vmem:[#allocation2 + $0x160] sm:$0x3] %vm651_vm1, %v3218_v0  ;;  %697 = vst.msk [vmem:[#allocation2 + $0x178] sm:$0x3] %vm651_vm1, %v3218_v0  ;;  %v637_v39 = vmax.f32 %v3458_v17, 0.0  ;;  %v636_v42 = vmax.f32 %v3462_v20, 0.0  ;;  %v3502_v47 = vadd.f32 %v3359_v2, %v567_v26  ;;  %v406_v49 = vmul.f32 %v3468_v22, %v367_v29 }
  0x28   : > { %700 = vst.msk [vmem:[#allocation2 + $0x190] sm:$0x3] %vm651_vm1, %v3218_v0  ;;  %703 = vst.msk [vmem:[#allocation2 + $0x1a8] sm:$0x3] %vm651_vm1, %v3218_v0  ;;  %v595_v0 = vadd.f32 %v3359_v2, %v556_v46  ;;  %v371_v46 = vld [vmem:[%s3434_s22 + $0x38] sm:$0xff]  ;;  %v530_v48 = vld [vmem:[%s3354_s16 + $0xc0] sm:$0xff]  ;;  %v404_v50 = vmul.f32 %v3468_v22, %v365_v34  ;;  %v408_v51 = vmul.f32 %v3468_v22, %v369_v35 }
  0x29   : > { %788 = vrot.lane.b32.xlu1 %v625_v4, %s3219_s19  ;;  %786 = vrot.lane.b32.xlu0 %v624_v9, %s3219_s19  ;;  %v370_v52 = vld [vmem:[%s3434_s22 + $0x30] sm:$0xff]  ;;  %v3512_v53 = vmul.f32 %v3348_v1, %v531_v40  ;;  %v476_v54 = vmax.f32 %v444_v44, 0.0  ;;  %v442_v55 = vadd.f32 %v3476_v27, %v403_v45  ;;  %v407_v56 = vmul.f32 %v3468_v22, %v368_v41  ;;  %v373_v61 = vld [vmem:[%s3434_s22 + $0x48] sm:$0xff] }
  0x2a   : > { %v627_v19 = vmax.f32 %v595_v0, 0.0  ;;  %v445_v57 = vadd.f32 %v3476_v27, %v406_v49  ;;  %v443_v58 = vadd.f32 %v3476_v27, %v404_v50  ;;  %v447_v59 = vadd.f32 %v3476_v27, %v408_v51  ;;  %v372_v62 = vld [vmem:[%s3434_s22 + $0x40] sm:$0xff]  ;;  %v375_v5 = vld [vmem:[%s3434_s22 + $0x58] sm:$0xff]  ;;  %v374_v6 = vld [vmem:[%s3434_s22 + $0x50] sm:$0xff] }
  0x2b   : > { %v410_v60 = vmul.f32 %v3468_v22, %v371_v46  ;;  %v3523_v63 = vmul.f32 %v3348_v1, %v530_v48  ;;  %708 = vst.msk [vmem:[#allocation2 + $0x31] sm:$0xff] %vm705_vm2, %v476_v54  ;;  %v474_v0 = vmax.f32 %v442_v55, 0.0  ;;  %v446_v3 = vadd.f32 %v3476_v27, %v407_v56  ;;  %v377_v7 = vld [vmem:[%s3434_s22 + $0x68] sm:$0xff]  ;;  %v379_v29 = vld [vmem:[%s3434_s22 + $0x78] sm:$0xff]  ;;  %v378_v35 = vld [vmem:[%s3434_s22 + $0x70] sm:$0xff] }
  0x2c   : > { %v409_v4 = vmul.f32 %v3468_v22, %v370_v52  ;;  %v477_v8 = vmax.f32 %v445_v57, 0.0  ;;  %v475_v9 = vmax.f32 %v443_v58, 0.0  ;;  %v479_v13 = vmax.f32 %v447_v59, 0.0  ;;  %v381_v51 = vld [vmem:[%s3434_s22 + $0x88] sm:$0xff]  ;;  %v380_v52 = vld [vmem:[%s3434_s22 + $0x80] sm:$0xff]  ;;  %v383_v54 = vld [vmem:[%s3434_s22 + $0x98] sm:$0xff] }
  0x2d   : > { %792 = vrot.lane.b32.xlu1 %v627_v19, %s3219_s19  ;;  %790 = vrot.lane.b32.xlu0 %v626_v23, %s3219_s19  ;;  %v449_v18 = vadd.f32 %v3476_v27, %v410_v60  ;;  %v376_v19 = vld [vmem:[%s3434_s22 + $0x60] sm:$0xff]  ;;  %706 = vst.msk [vmem:[#allocation2 + $0x19] sm:$0xff] %vm705_vm2, %v474_v0  ;;  %v478_v21 = vmax.f32 %v446_v3, 0.0  ;;  %v412_v26 = vmul.f32 %v3468_v22, %v373_v61  ;;  %v382_v59 = vld [vmem:[%s3434_s22 + $0x90] sm:$0xff] }
  0x2e   : > { %v448_v23 = vadd.f32 %v3476_v27, %v409_v4  ;;  %v411_v28 = vmul.f32 %v3468_v22, %v372_v62  ;;  %709 = vst.msk [vmem:[#allocation2 + $0x39] sm:$0xff] %vm705_vm2, %v477_v8  ;;  %707 = vst.msk [vmem:[#allocation2 + $0x21] sm:$0xff] %vm705_vm2, %v475_v9  ;;  %v413_v33 = vmul.f32 %v3468_v22, %v374_v6  ;;  %v385_v60 = vld [vmem:[%s3434_s22 + $0xa8] sm:$0xff] }
  0x2f   : > { %711 = vst.msk [vmem:[#allocation2 + $0x51] sm:$0xff] %vm705_vm2, %v479_v13  ;;  %v416_v34 = vmul.f32 %v3468_v22, %v377_v7  ;;  %710 = vst.msk [vmem:[#allocation2 + $0x49] sm:$0xff] %vm705_vm2, %v478_v21  ;;  %v451_v41 = vadd.f32 %v3476_v27, %v412_v26  ;;  %v415_v45 = vmul.f32 %v3468_v22, %v376_v19  ;;  %v386_v13 = vld [vmem:[%s3434_s22 + $0xb0] sm:$0xff] }
  0x30   : > { %v480_v40 = vmax.f32 %v448_v23, 0.0  ;;  %v450_v44 = vadd.f32 %v3476_v27, %v411_v28  ;;  %v452_v48 = vadd.f32 %v3476_v27, %v413_v33  ;;  %v418_v50 = vmul.f32 %v3468_v22, %v379_v29  ;;  %v388_v28 = vld [vmem:[%s3434_s22 + $0xc0] sm:$0xff] }
  0x31   : > { %796 = vrot.lane.b32.xlu1 %v629_v24, %s3219_s19  ;;  %794 = vrot.lane.b32.xlu0 %v628_v25, %s3219_s19  ;;  %v481_v24 = vmax.f32 %v449_v18, 0.0  ;;  %v414_v25 = vmul.f32 %v3468_v22, %v375_v5  ;;  %v455_v49 = vadd.f32 %v3476_v27, %v416_v34  ;;  %v483_v55 = vmax.f32 %v451_v41, 0.0  ;;  %v387_v5 = vld [vmem:[%s3434_s22 + $0xb8] sm:$0xff] }
  0x32   : > { %712 = vst.msk [vmem:[#allocation2 + $0x61] sm:$0xff] %vm705_vm2, %v480_v40  ;;  %v482_v56 = vmax.f32 %v450_v44, 0.0  ;;  %v454_v57 = vadd.f32 %v3476_v27, %v415_v45  ;;  %v417_v58 = vmul.f32 %v3468_v22, %v378_v35  ;;  %v484_v62 = vmax.f32 %v452_v48, 0.0  ;;  %v533_v44 = vld [vmem:[%s3354_s16 + $0xd8] sm:$0xff]  ;;  %v532_v45 = vld [vmem:[%s3354_s16 + $0xd0] sm:$0xff] }
  0x33   : > { %713 = vst.msk [vmem:[#allocation2 + $0x69] sm:$0xff] %vm705_vm2, %v481_v24  ;;  %v453_v46 = vadd.f32 %v3476_v27, %v414_v25  ;;  %v487_v0 = vmax.f32 %v455_v49, 0.0  ;;  %v457_v10 = vadd.f32 %v3476_v27, %v418_v50  ;;  %715 = vst.msk [vmem:[#allocation2 + $0x81] sm:$0xff] %vm705_vm2, %v483_v55  ;;  %v420_v3 = vmul.f32 %v3468_v22, %v381_v51 }
  0x34   : > { %714 = vst.msk [vmem:[#allocation2 + $0x79] sm:$0xff] %vm705_vm2, %v482_v56  ;;  %v486_v11 = vmax.f32 %v454_v57, 0.0  ;;  %v419_v4 = vmul.f32 %v3468_v22, %v380_v52  ;;  %716 = vst.msk [vmem:[#allocation2 + $0x91] sm:$0xff] %vm705_vm2, %v484_v62  ;;  %v422_v7 = vmul.f32 %v3468_v22, %v383_v54  ;;  %v421_v8 = vmul.f32 %v3468_v22, %v382_v59  ;;  %v534_v59 = vld [vmem:[%s3354_s16 + $0xe0] sm:$0xff] }
  0x35   : > { %800 = vrot.lane.b32.xlu1 %v631_v30, %s3219_s19  ;;  %798 = vrot.lane.b32.xlu0 %v630_v31, %s3219_s19  ;;  %v485_v61 = vmax.f32 %v453_v46, 0.0  ;;  %v384_v30 = vld [vmem:[%s3434_s22 + $0xa0] sm:$0xff]  ;;  %v456_v31 = vadd.f32 %v3476_v27, %v417_v58  ;;  %719 = vst.msk [vmem:[#allocation2 + $0xb1] sm:$0xff] %vm705_vm2, %v487_v0  ;;  %v489_v6 = vmax.f32 %v457_v10, 0.0  ;;  %v424_v9 = vmul.f32 %v3468_v22, %v385_v60 }
  0x36   : > { %718 = vst.msk [vmem:[#allocation2 + $0xa9] sm:$0xff] %vm705_vm2, %v486_v11  ;;  %v459_v19 = vadd.f32 %v3476_v27, %v420_v3  ;;  %v458_v21 = vadd.f32 %v3476_v27, %v419_v4  ;;  %v423_v23 = vmul.f32 %v3468_v22, %v384_v30  ;;  %v461_v26 = vadd.f32 %v3476_v27, %v422_v7 }
  0x37   : > { %717 = vst.msk [vmem:[#allocation2 + $0x99] sm:$0xff] %vm705_vm2, %v485_v61  ;;  %v488_v18 = vmax.f32 %v456_v31, 0.0  ;;  %721 = vst.msk [vmem:[#allocation2 + $0xc9] sm:$0xff] %vm705_vm2, %v489_v6  ;;  %v460_v12 = vadd.f32 %v3476_v27, %v421_v8  ;;  %v426_v14 = vmul.f32 %v3468_v22, %v387_v5  ;;  %v425_v33 = vmul.f32 %v3468_v22, %v386_v13  ;;  %v536_v61 = vld [vmem:[%s3354_s16 + $0xf0] sm:$0xff] }
  0x38   : > { %v491_v29 = vmax.f32 %v459_v19, 0.0  ;;  %v490_v24 = vmax.f32 %v458_v21, 0.0  ;;  %v462_v25 = vadd.f32 %v3476_v27, %v423_v23  ;;  %v493_v34 = vmax.f32 %v461_v26, 0.0  ;;  %v1157_v13 = vld [vmem:[#allocation2 + $0xa] sm:$0xff] }
  0x39   : > { %804 = vrot.lane.b32.xlu1 %v633_v32, %s3219_s19  ;;  %802 = vrot.lane.b32.xlu0 %v632_v36, %s3219_s19  ;;  %v463_v32 = vadd.f32 %v3476_v27, %v424_v9  ;;  %v389_v36 = vld [vmem:[%s3434_s22 + $0xc8] sm:$0xff]  ;;  %720 = vst.msk [vmem:[#allocation2 + $0xc1] sm:$0xff] %vm705_vm2, %v488_v18  ;;  %v492_v35 = vmax.f32 %v460_v12, 0.0  ;;  %v465_v41 = vadd.f32 %v3476_v27, %v426_v14  ;;  %v639_v51 = vmax.f32 %v3496_v43, 0.0  ;;  %v391_v18 = vld [vmem:[%s3434_s22 + $0xd8] sm:$0xff] }
  0x3a   : > { %723 = vst.msk [vmem:[#allocation2 + $0xe1] sm:$0xff] %vm705_vm2, %v491_v29  ;;  %722 = vst.msk [vmem:[#allocation2 + $0xd9] sm:$0xff] %vm705_vm2, %v490_v24  ;;  %v494_v46 = vmax.f32 %v462_v25, 0.0  ;;  %v464_v48 = vadd.f32 %v3476_v27, %v425_v33  ;;  %v428_v49 = vmul.f32 %v3468_v22, %v389_v36  ;;  %v427_v50 = vmul.f32 %v3468_v22, %v388_v28  ;;  %v963_v9 = vld [vmem:[#allocation2 + $0x1] sm:$0xff]  ;;  %v390_v21 = vld [vmem:[%s3434_s22 + $0xd0] sm:$0xff] }
  0x3b   : > { %v495_v40 = vmax.f32 %v463_v32, 0.0  ;;  %725 = vst.msk [vmem:[#allocation2 + $0xf9] sm:$0xff] %vm705_vm2, %v493_v34  ;;  %724 = vst.msk [vmem:[#allocation2 + $0xf1] sm:$0xff] %vm705_vm2, %v492_v35  ;;  %v497_v15 = vmax.f32 %v465_v41, 0.0  ;;  %v638_v52 = vmax.f32 %v3502_v47, 0.0  ;;  %v572_v54 = vmul.f32 %v3348_v1, %v533_v44  ;;  %v535_v47 = vld [vmem:[%s3354_s16 + $0xe8] sm:$0xff] }
  0x3c   : > { %726 = vst.msk [vmem:[#allocation2 + $0x109] sm:$0xff] %vm705_vm2, %v494_v46  ;;  %v496_v16 = vmax.f32 %v464_v48, 0.0  ;;  %v571_v55 = vmul.f32 %v3348_v1, %v532_v45  ;;  %v609_v56 = vadd.f32 %v3359_v2, %v3512_v53  ;;  %v608_v43 = vadd.f32 %v3359_v2, %v3523_v63  ;;  %v537_v63 = vld [vmem:[%s3354_s16 + $0xf8] sm:$0xff]  ;;  %v393_v12 = vld [vmem:[%s3434_s22 + $0xe8] sm:$0xff]  ;;  %v392_v28 = vld [vmem:[%s3434_s22 + $0xe0] sm:$0xff] }
  0x3d   : > { %808 = vrot.lane.b32.xlu1 %v635_v37, %s3219_s19  ;;  %806 = vrot.lane.b32.xlu0 %v634_v38, %s3219_s19  ;;  %727 = vst.msk [vmem:[#allocation2 + $0x111] sm:$0xff] %vm705_vm2, %v495_v40  ;;  %v467_v37 = vadd.f32 %v3476_v27, %v428_v49  ;;  %v466_v38 = vadd.f32 %v3476_v27, %v427_v50  ;;  %729 = vst.msk [vmem:[#allocation2 + $0x129] sm:$0xff] %vm705_vm2, %v497_v15  ;;  %v395_v33 = vld [vmem:[%s3434_s22 + $0xf8] sm:$0xff]  ;;  %v394_v41 = vld [vmem:[%s3434_s22 + $0xf0] sm:$0xff] }
  0x3e   : > { %728 = vst.msk [vmem:[#allocation2 + $0x121] sm:$0xff] %vm705_vm2, %v496_v16  ;;  %v611_v17 = vadd.f32 %v3359_v2, %v572_v54  ;;  %v574_v20 = vmul.f32 %v3348_v1, %v535_v47  ;;  %v610_v53 = vadd.f32 %v3359_v2, %v571_v55  ;;  %v573_v60 = vmul.f32 %v3348_v1, %v534_v59  ;;  %v900_v48 = vld [vmem:[#allocation2 + $0x8] sm:$0xff]  ;;  %v899_v16 = vld [vmem:[#allocation2] sm:$0xff] }
  0x3f   : > { %v499_v57 = vmax.f32 %v467_v37, 0.0  ;;  %v498_v58 = vmax.f32 %v466_v38, 0.0  ;;  %v576_v0 = vmul.f32 %v3348_v1, %v537_v63  ;;  %v575_v31 = vmul.f32 %v3348_v1, %v536_v61  ;;  %v964_v1 = vld [vmem:[#allocation2 + $0x9] sm:$0xff]  ;;  %932 = vst.msk [vmem:[#allocation3 + $0x10] sm:$0xff] %vm648_vm0, %v900_v48  ;;  %931 = vst.msk [vmem:[#allocation3] sm:$0xff] %vm648_vm0, %v899_v16 }
  0x40   : > { %v613_v62 = vadd.f32 %v3359_v2, %v574_v20  ;;  %v643_v10 = vmax.f32 %v611_v17, 0.0  ;;  %v642_v30 = vmax.f32 %v610_v53, 0.0  ;;  %v612_v11 = vadd.f32 %v3359_v2, %v573_v60 }
  0x41   : > { %812 = vrot.lane.b32.xlu1 %v637_v39, %s3219_s19  ;;  %810 = vrot.lane.b32.xlu0 %v636_v42, %s3219_s19  ;;  %731 = vst.msk [vmem:[#allocation2 + $0x141] sm:$0xff] %vm705_vm2, %v499_v57  ;;  %730 = vst.msk [vmem:[#allocation2 + $0x139] sm:$0xff] %vm705_vm2, %v498_v58  ;;  %v641_v39 = vmax.f32 %v609_v56, 0.0  ;;  %v640_v42 = vmax.f32 %v608_v43, 0.0  ;;  %v615_v4 = vadd.f32 %v3359_v2, %v576_v0  ;;  %v3222_v48 = vmov 0.0|0.0  }
  0x42   : > { %v645_v3 = vmax.f32 %v613_v62, 0.0  ;;  %v644_v5 = vmax.f32 %v612_v11, 0.0  ;;  %v614_v6 = vadd.f32 %v3359_v2, %v575_v31  ;;  %v1156_v2 = vld [vmem:[#allocation2 + $0x2] sm:$0xff]  ;;  %v430_v19 = vmul.f32 %v3468_v22, %v391_v18  ;;  %3146 = vmatprep.subr.bf16.mxu0 %v3222_v48  ;;  %3173 = vmatprep.subr.bf16.mxu1 %v3222_v48 }
  0x43   : > { %v647_v7 = vmax.f32 %v615_v4, 0.0  ;;  %v429_v23 = vmul.f32 %v3468_v22, %v390_v21  ;;  %v432_v36 = vmul.f32 %v3468_v22, %v393_v12  ;;  %v431_v24 = vmul.f32 %v3468_v22, %v392_v28 }
  0x44   : > { %v646_v8 = vmax.f32 %v614_v6, 0.0  ;;  %v469_v26 = vadd.f32 %v3476_v27, %v430_v19  ;;  %v434_v40 = vmul.f32 %v3468_v22, %v395_v33  ;;  %v433_v45 = vmul.f32 %v3468_v22, %v394_v41 }
  0x45   : > { %816 = vrot.lane.b32.xlu1 %v639_v51, %s3219_s19  ;;  %814 = vrot.lane.b32.xlu0 %v638_v52, %s3219_s19  ;;  %v468_v32 = vadd.f32 %v3476_v27, %v429_v23  ;;  %v471_v25 = vadd.f32 %v3476_v27, %v432_v36  ;;  %v470_v34 = vadd.f32 %v3476_v27, %v431_v24 }
  0x46   : > { %v501_v14 = vmax.f32 %v469_v26, 0.0  ;;  %v473_v46 = vadd.f32 %v3476_v27, %v434_v40  ;;  %v472_v49 = vadd.f32 %v3476_v27, %v433_v45 }
  0x47   : > { %v500_v29 = vmax.f32 %v468_v32, 0.0  ;;  %v503_v35 = vmax.f32 %v471_v25, 0.0  ;;  %v502_v44 = vmax.f32 %v470_v34, 0.0 }
  0x48   : > { %733 = vst.msk [vmem:[#allocation2 + $0x159] sm:$0xff] %vm705_vm2, %v501_v14  ;;  %v505_v50 = vmax.f32 %v473_v46, 0.0  ;;  %v504_v15 = vmax.f32 %v472_v49, 0.0  ;;  %v2443_v49 = vld [vmem:[%s4845_s6] sm:$0xff] }
  0x49   : > { %820 = vrot.lane.b32.xlu1 %v641_v39, %s3219_s19  ;;  %818 = vrot.lane.b32.xlu0 %v640_v42, %s3219_s19  ;;  %732 = vst.msk [vmem:[#allocation2 + $0x151] sm:$0xff] %vm705_vm2, %v500_v29  ;;  %735 = vst.msk [vmem:[#allocation2 + $0x171] sm:$0xff] %vm705_vm2, %v503_v35 }
  0x4a   : > { %734 = vst.msk [vmem:[#allocation2 + $0x169] sm:$0xff] %vm705_vm2, %v502_v44  ;;  %737 = vst.msk [vmem:[#allocation2 + $0x189] sm:$0xff] %vm705_vm2, %v505_v50  ;;  %v2444_v50 = vld [vmem:[%s4845_s6 + $0x8] sm:$0xff] }
  0x4b   : > { %736 = vst.msk [vmem:[#allocation2 + $0x181] sm:$0xff] %vm705_vm2, %v504_v15  ;;  %v3147_v15 = vpack.c.bf16 %v2444_v50, %v2443_v49 }
  0x4d   : > { %824 = vrot.lane.b32.xlu1 %v643_v10, %s3219_s19  ;;  %822 = vrot.lane.b32.xlu0 %v642_v30, %s3219_s19 }
  0x4e   : > { %3148 = vmatpush1.bf16.msra.mxu0 %v3147_v15  ;;  %3182 = vmatpush1.bf16.msra.mxu1 %v3147_v15 }
  0x4f   : > { %3149 = vmatprep.subr.bf16.mxu0 %v3222_v48  ;;  %3174 = vmatprep.subr.bf16.mxu1 %v3222_v48 }
  0x51   : > { %828 = vrot.lane.b32.xlu1 %v645_v3, %s3219_s19  ;;  %826 = vrot.lane.b32.xlu0 %v644_v5, %s3219_s19 }
  0x55   : > { %832 = vrot.lane.b32.xlu1 %v647_v7, %s3219_s19  ;;  %830 = vrot.lane.b32.xlu0 %v646_v8, %s3219_s19  ;;  %s3227_s19 = smov 112  }
  0x59   : > { %1029 = vrot.lane.b32.xlu1 %v964_v1, %s3220_s27  ;;  %1027 = vrot.lane.b32.xlu0 %v963_v9, %s3220_s27 }
  0x5d   : > { %1220 = vrot.lane.b32.xlu1 %v1156_v2, %s3221_s28 }
  0x61   : > { %1222 = vrot.lane.b32.xlu1 %v1157_v13, %s3221_s28 }
  0x8b   : > { %v775_v22 = vpop.permute.xlu1 %774  ;;  %v771_v37 = vpop.permute.xlu0 %770 }
  0x8c   : > { %869 = vst.msk [vmem:[#allocation2 + $0x31] sm:$0xff] %vm866_vm3, %v775_v22  ;;  %867 = vst.msk [vmem:[#allocation2 + $0x19] sm:$0xff] %vm866_vm3, %v771_v37 }
  0x8f   : > { %v777_v38 = vpop.permute.xlu1 %776  ;;  %v773_v27 = vpop.permute.xlu0 %772 }
  0x90   : > { %870 = vst.msk [vmem:[#allocation2 + $0x39] sm:$0xff] %vm866_vm3, %v777_v38  ;;  %868 = vst.msk [vmem:[#allocation2 + $0x21] sm:$0xff] %vm866_vm3, %v773_v27 }
  0x93   : > { %v781_v51 = vpop.permute.xlu1 %780  ;;  %v779_v52 = vpop.permute.xlu0 %778  ;;  %v3701_v54 = vld [vmem:[#allocation2 + $0x19] sm:$0xff]  ;;  %v3709_v56 = vld [vmem:[#allocation2 + $0x30] sm:$0xff] }
  0x94   : > { %v3703_v55 = vld [vmem:[#allocation2 + $0x18] sm:$0xff]  ;;  %872 = vst.msk [vmem:[#allocation2 + $0x51] sm:$0xff] %vm866_vm3, %v781_v51  ;;  %871 = vst.msk [vmem:[#allocation2 + $0x49] sm:$0xff] %vm866_vm3, %v779_v52  ;;  %1031 = vrot.lane.b32.xlu0 %v3701_v54, %s3220_s27 }
  0x95   : > { %933 = vst.msk [vmem:[#allocation3 + $0x20] sm:$0xff] %vm648_vm0, %v3703_v55  ;;  %v3713_v43 = vld [vmem:[#allocation2 + $0x31] sm:$0xff]  ;;  %935 = vst.msk [vmem:[#allocation3 + $0x40] sm:$0xff] %vm648_vm0, %v3709_v56 }
  0x97   : > { %v3717_v47 = vld [vmem:[#allocation2 + $0x3a] sm:$0xff]  ;;  %v785_v57 = vpop.permute.xlu1 %784  ;;  %v783_v58 = vpop.permute.xlu0 %782  ;;  %v3729_v17 = vld [vmem:[#allocation2 + $0x32] sm:$0xff] }
  0x98   : > { %v3719_v59 = vld [vmem:[#allocation2 + $0x21] sm:$0xff]  ;;  %2348 = vst.msk [vmem:[#allocation3 + $0x18] sm:$0xff] %vm648_vm0, %v3717_v47  ;;  %1035 = vrot.lane.b32.xlu0 %v3713_v43, %s3220_s27  ;;  %v3733_v39 = vld [vmem:[#allocation2 + $0x39] sm:$0xff]  ;;  %2347 = vst.msk [vmem:[#allocation3 + $0x8] sm:$0xff] %vm648_vm0, %v3729_v17 }
  0x99   : > { %874 = vst.msk [vmem:[#allocation2 + $0x69] sm:$0xff] %vm866_vm3, %v785_v57  ;;  %873 = vst.msk [vmem:[#allocation2 + $0x61] sm:$0xff] %vm866_vm3, %v783_v58  ;;  %1033 = vrot.lane.b32.xlu1 %v3719_v59, %s3220_s27  ;;  %v3731_v20 = vld [vmem:[#allocation2 + $0x20] sm:$0xff]  ;;  %v3737_v42 = vld [vmem:[#allocation2 + $0x38] sm:$0xff] }
  0x9a   : > { %934 = vst.msk [vmem:[#allocation3 + $0x30] sm:$0xff] %vm648_vm0, %v3731_v20  ;;  %936 = vst.msk [vmem:[#allocation3 + $0x50] sm:$0xff] %vm648_vm0, %v3737_v42  ;;  %v2445_v58 = vld [vmem:[%s4845_s6 + $0x10] sm:$0xff] }
  0x9b   : > { %v3743_v53 = vld [vmem:[#allocation2 + $0x52] sm:$0xff]  ;;  %v3745_v63 = vld [vmem:[#allocation2 + $0x4a] sm:$0xff]  ;;  %v789_v60 = vpop.permute.xlu1 %788  ;;  %v787_v61 = vpop.permute.xlu0 %786 }
  0x9c   : > { %v3747_v62 = vld [vmem:[#allocation2 + $0x49] sm:$0xff]  ;;  %2350 = vst.msk [vmem:[#allocation3 + $0x38] sm:$0xff] %vm648_vm0, %v3743_v53  ;;  %2349 = vst.msk [vmem:[#allocation3 + $0x28] sm:$0xff] %vm648_vm0, %v3745_v63  ;;  %v3763_v30 = vld [vmem:[#allocation2 + $0x51] sm:$0xff] }
  0x9d   : > { %876 = vst.msk [vmem:[#allocation2 + $0x81] sm:$0xff] %vm866_vm3, %v789_v60  ;;  %875 = vst.msk [vmem:[#allocation2 + $0x79] sm:$0xff] %vm866_vm3, %v787_v61  ;;  %1037 = vrot.lane.b32.xlu1 %v3733_v39, %s3220_s27  ;;  %1039 = vrot.lane.b32.xlu0 %v3747_v62, %s3220_s27  ;;  %v3759_v0 = vld [vmem:[#allocation2 + $0x48] sm:$0xff]  ;;  %v3761_v10 = vld [vmem:[#allocation2 + $0x50] sm:$0xff] }
  0x9e   : > { %937 = vst.msk [vmem:[#allocation3 + $0x60] sm:$0xff] %vm648_vm0, %v3759_v0  ;;  %938 = vst.msk [vmem:[#allocation3 + $0x70] sm:$0xff] %vm648_vm0, %v3761_v10  ;;  %v2446_v60 = vld [vmem:[%s4845_s6 + $0x18] sm:$0xff] }
  0x9f   : > { %v793_v3 = vpop.permute.xlu1 %792  ;;  %v791_v4 = vpop.permute.xlu0 %790  ;;  %v2380_v6 = vld [vmem:[#allocation3 + $0x8] sm:$0xff]  ;;  %v3150_v61 = vpack.c.bf16 %v2446_v60, %v2445_v58 }
  0xa0   : > { %v3769_v11 = vld [vmem:[#allocation2 + $0x6a] sm:$0xff]  ;;  %v3771_v31 = vld [vmem:[#allocation2 + $0x62] sm:$0xff]  ;;  %878 = vst.msk [vmem:[#allocation2 + $0x99] sm:$0xff] %vm866_vm3, %v793_v3  ;;  %877 = vst.msk [vmem:[#allocation2 + $0x91] sm:$0xff] %vm866_vm3, %v791_v4  ;;  %3109 = vmatprep.mubr.msk.f32.mxu0 %vm648_vm0, %v2380_v6 }
  0xa1   : > { %v3773_v5 = vld [vmem:[#allocation2 + $0x61] sm:$0xff]  ;;  %2352 = vst.msk [vmem:[#allocation3 + $0x58] sm:$0xff] %vm648_vm0, %v3769_v11  ;;  %2351 = vst.msk [vmem:[#allocation3 + $0x48] sm:$0xff] %vm648_vm0, %v3771_v31  ;;  %1041 = vrot.lane.b32.xlu1 %v3763_v30, %s3220_s27  ;;  %v3788_v8 = vld [vmem:[#allocation2 + $0x69] sm:$0xff]  ;;  %3151 = vmatpush1.bf16.msra.mxu0 %v3150_v61 }
  0xa2   : > { %1043 = vrot.lane.b32.xlu0 %v3773_v5, %s3220_s27  ;;  %v3785_v7 = vld [vmem:[#allocation2 + $0x60] sm:$0xff]  ;;  %v3790_v1 = vld [vmem:[#allocation2 + $0x68] sm:$0xff]  ;;  %3183 = vmatpush1.bf16.msra.mxu1 %v3150_v61 }
  0xa3   : > { %939 = vst.msk [vmem:[#allocation3 + $0x80] sm:$0xff] %vm648_vm0, %v3785_v7  ;;  %940 = vst.msk [vmem:[#allocation3 + $0x90] sm:$0xff] %vm648_vm0, %v3790_v1  ;;  %v797_v13 = vpop.permute.xlu1 %796  ;;  %v795_v18 = vpop.permute.xlu0 %794  ;;  %3152 = vmatprep.subr.bf16.mxu0 %v3222_v48  ;;  %3175 = vmatprep.subr.bf16.mxu1 %v3222_v48 }
  0xa4   : > { %v2322_v9 = vld [vmem:[#allocation2 + $0x82] sm:$0xff]  ;;  %v3796_v2 = vld [vmem:[#allocation2 + $0x7a] sm:$0xff]  ;;  %880 = vst.msk [vmem:[#allocation2 + $0xb1] sm:$0xff] %vm866_vm3, %v797_v13  ;;  %879 = vst.msk [vmem:[#allocation2 + $0xa9] sm:$0xff] %vm866_vm3, %v795_v18 }
  0xa5   : > { %v3798_v19 = vld [vmem:[#allocation2 + $0x79] sm:$0xff]  ;;  %2354 = vst.msk [vmem:[#allocation3 + $0x78] sm:$0xff] %vm648_vm0, %v2322_v9  ;;  %2353 = vst.msk [vmem:[#allocation3 + $0x68] sm:$0xff] %vm648_vm0, %v3796_v2  ;;  %1045 = vrot.lane.b32.xlu1 %v3788_v8, %s3220_s27  ;;  %v3813_v26 = vld [vmem:[#allocation2 + $0x81] sm:$0xff] }
  0xa6   : > { %1047 = vrot.lane.b32.xlu0 %v3798_v19, %s3220_s27  ;;  %v3809_v21 = vld [vmem:[#allocation2 + $0x78] sm:$0xff]  ;;  %v3811_v23 = vld [vmem:[#allocation2 + $0x80] sm:$0xff] }
  0xa7   : > { %941 = vst.msk [vmem:[#allocation3 + $0xa0] sm:$0xff] %vm648_vm0, %v3809_v21  ;;  %942 = vst.msk [vmem:[#allocation3 + $0xb0] sm:$0xff] %vm648_vm0, %v3811_v23  ;;  %v2324_v12 = vld [vmem:[#allocation2 + $0x9a] sm:$0xff]  ;;  %v2323_v32 = vld [vmem:[#allocation2 + $0x92] sm:$0xff]  ;;  %v801_v14 = vpop.permute.xlu1 %800  ;;  %v799_v36 = vpop.permute.xlu0 %798 }
  0xa8   : > { %v3819_v28 = vld [vmem:[#allocation2 + $0x91] sm:$0xff]  ;;  %2356 = vst.msk [vmem:[#allocation3 + $0x98] sm:$0xff] %vm648_vm0, %v2324_v12  ;;  %2355 = vst.msk [vmem:[#allocation3 + $0x88] sm:$0xff] %vm648_vm0, %v2323_v32  ;;  %v3833_v25 = vld [vmem:[#allocation2 + $0x99] sm:$0xff] }
  0xa9   : > { %882 = vst.msk [vmem:[#allocation2 + $0xc9] sm:$0xff] %vm866_vm3, %v801_v14  ;;  %881 = vst.msk [vmem:[#allocation2 + $0xc1] sm:$0xff] %vm866_vm3, %v799_v36  ;;  %1049 = vrot.lane.b32.xlu1 %v3813_v26, %s3220_s27  ;;  %v3829_v29 = vld [vmem:[#allocation2 + $0x90] sm:$0xff]  ;;  %v3831_v24 = vld [vmem:[#allocation2 + $0x98] sm:$0xff] }
  0xaa   : > { %1051 = vrot.lane.b32.xlu0 %v3819_v28, %s3220_s27  ;;  %943 = vst.msk [vmem:[#allocation3 + $0xc0] sm:$0xff] %vm648_vm0, %v3829_v29  ;;  %944 = vst.msk [vmem:[#allocation3 + $0xd0] sm:$0xff] %vm648_vm0, %v3831_v24  ;;  %v2447_v14 = vld [vmem:[%s4845_s6 + $0x20] sm:$0xff]  ;;  %v2448_v36 = vld [vmem:[%s4845_s6 + $0x28] sm:$0xff] }
  0xab   : > { %v2326_v33 = vld [vmem:[#allocation2 + $0xb2] sm:$0xff]  ;;  %v2325_v34 = vld [vmem:[#allocation2 + $0xaa] sm:$0xff]  ;;  %v805_v35 = vpop.permute.xlu1 %804  ;;  %v803_v40 = vpop.permute.xlu0 %802 }
  0xac   : > { %v977_v41 = vld [vmem:[#allocation2 + $0xa9] sm:$0xff]  ;;  %2358 = vst.msk [vmem:[#allocation3 + $0xb8] sm:$0xff] %vm648_vm0, %v2326_v33  ;;  %2357 = vst.msk [vmem:[#allocation3 + $0xa8] sm:$0xff] %vm648_vm0, %v2325_v34  ;;  %v978_v46 = vld [vmem:[#allocation2 + $0xb1] sm:$0xff]  ;;  %v3153_v33 = vpack.c.bf16 %v2448_v36, %v2447_v14 }
  0xad   : > { %884 = vst.msk [vmem:[#allocation2 + $0xe1] sm:$0xff] %vm866_vm3, %v805_v35  ;;  %883 = vst.msk [vmem:[#allocation2 + $0xd9] sm:$0xff] %vm866_vm3, %v803_v40  ;;  %1053 = vrot.lane.b32.xlu1 %v3833_v25, %s3220_s27  ;;  %v3846_v44 = vld [vmem:[#allocation2 + $0xa8] sm:$0xff]  ;;  %v3848_v45 = vld [vmem:[#allocation2 + $0xb0] sm:$0xff] }
  0xae   : > { %1055 = vrot.lane.b32.xlu0 %v977_v41, %s3220_s27  ;;  %945 = vst.msk [vmem:[#allocation3 + $0xe0] sm:$0xff] %vm648_vm0, %v3846_v44  ;;  %946 = vst.msk [vmem:[#allocation3 + $0xf0] sm:$0xff] %vm648_vm0, %v3848_v45  ;;  %3154 = vmatpush1.bf16.msra.mxu0 %v3153_v33 }
  0xaf   : > { %v809_v37 = vpop.permute.xlu1 %808  ;;  %v807_v38 = vpop.permute.xlu0 %806  ;;  %3184 = vmatpush1.bf16.msra.mxu1 %v3153_v33  ;;  %3155 = vmatprep.subr.bf16.mxu0 %v3222_v48  ;;  %v2451_v33 = vld [vmem:[%s4845_s6 + $0x40] sm:$0xff] }
  0xb0   : > { %v3862_v16 = vld [vmem:[#allocation2 + $0xca] sm:$0xff]  ;;  %v3864_v22 = vld [vmem:[#allocation2 + $0xc2] sm:$0xff]  ;;  %886 = vst.msk [vmem:[#allocation2 + $0xf9] sm:$0xff] %vm866_vm3, %v809_v37  ;;  %885 = vst.msk [vmem:[#allocation2 + $0xf1] sm:$0xff] %vm866_vm3, %v807_v38  ;;  %3176 = vmatprep.subr.bf16.mxu1 %v3222_v48 }
  0xb1   : > { %v979_v27 = vld [vmem:[#allocation2 + $0xc1] sm:$0xff]  ;;  %2360 = vst.msk [vmem:[#allocation3 + $0xd8] sm:$0xff] %vm648_vm0, %v3862_v16  ;;  %2359 = vst.msk [vmem:[#allocation3 + $0xc8] sm:$0xff] %vm648_vm0, %v3864_v22  ;;  %1057 = vrot.lane.b32.xlu1 %v978_v46, %s3220_s27  ;;  %v980_v57 = vld [vmem:[#allocation2 + $0xc9] sm:$0xff] }
  0xb2   : > { %1059 = vrot.lane.b32.xlu0 %v979_v27, %s3220_s27  ;;  %v3874_v51 = vld [vmem:[#allocation2 + $0xc0] sm:$0xff]  ;;  %v3876_v52 = vld [vmem:[#allocation2 + $0xc8] sm:$0xff]  ;;  %v2449_v37 = vld [vmem:[%s4845_s6 + $0x30] sm:$0xff] }
  0xb3   : > { %947 = vst.msk [vmem:[#allocation3 + $0x100] sm:$0xff] %vm648_vm0, %v3874_v51  ;;  %948 = vst.msk [vmem:[#allocation3 + $0x110] sm:$0xff] %vm648_vm0, %v3876_v52  ;;  %v813_v6 = vpop.permute.xlu1 %812  ;;  %v811_v9 = vpop.permute.xlu0 %810  ;;  %v2450_v38 = vld [vmem:[%s4845_s6 + $0x38] sm:$0xff] }
  0xb4   : > { %v3890_v3 = vld [vmem:[#allocation2 + $0xe2] sm:$0xff]  ;;  %v3892_v4 = vld [vmem:[#allocation2 + $0xda] sm:$0xff]  ;;  %888 = vst.msk [vmem:[#allocation2 + $0x111] sm:$0xff] %vm866_vm3, %v813_v6  ;;  %887 = vst.msk [vmem:[#allocation2 + $0x109] sm:$0xff] %vm866_vm3, %v811_v9  ;;  %v3156_v27 = vpack.c.bf16 %v2450_v38, %v2449_v37 }
  0xb5   : > { %v3894_v13 = vld [vmem:[#allocation2 + $0xd9] sm:$0xff]  ;;  %2362 = vst.msk [vmem:[#allocation3 + $0xf8] sm:$0xff] %vm648_vm0, %v3890_v3  ;;  %2361 = vst.msk [vmem:[#allocation3 + $0xe8] sm:$0xff] %vm648_vm0, %v3892_v4  ;;  %1061 = vrot.lane.b32.xlu1 %v980_v57, %s3220_s27  ;;  %v3909_v32 = vld [vmem:[#allocation2 + $0xe1] sm:$0xff] }
  0xb6   : > { %1063 = vrot.lane.b32.xlu0 %v3894_v13, %s3220_s27  ;;  %v3905_v18 = vld [vmem:[#allocation2 + $0xd8] sm:$0xff]  ;;  %v3907_v12 = vld [vmem:[#allocation2 + $0xe0] sm:$0xff]  ;;  %3157 = vmatpush1.bf16.msra.mxu0 %v3156_v27 }
  0xb7   : > { %949 = vst.msk [vmem:[#allocation3 + $0x120] sm:$0xff] %vm648_vm0, %v3905_v18  ;;  %950 = vst.msk [vmem:[#allocation3 + $0x130] sm:$0xff] %vm648_vm0, %v3907_v12  ;;  %v2332_v34 = vld [vmem:[#allocation2 + $0xfa] sm:$0xff]  ;;  %v817_v35 = vpop.permute.xlu1 %816  ;;  %v815_v40 = vpop.permute.xlu0 %814  ;;  %v3923_v41 = vld [vmem:[#allocation2 + $0xf1] sm:$0xff]  ;;  %3185 = vmatpush1.bf16.msra.mxu1 %v3156_v27  ;;  %3158 = vmatprep.subr.bf16.mxu0 %v3222_v48 }
  0xb8   : > { %2364 = vst.msk [vmem:[#allocation3 + $0x118] sm:$0xff] %vm648_vm0, %v2332_v34  ;;  %v3932_v46 = vld [vmem:[#allocation2 + $0xf2] sm:$0xff]  ;;  %v2452_v34 = vld [vmem:[%s4845_s6 + $0x48] sm:$0xff]  ;;  %3177 = vmatprep.subr.bf16.mxu1 %v3222_v48 }
  0xb9   : > { %890 = vst.msk [vmem:[#allocation2 + $0x129] sm:$0xff] %vm866_vm3, %v817_v35  ;;  %889 = vst.msk [vmem:[#allocation2 + $0x121] sm:$0xff] %vm866_vm3, %v815_v40  ;;  %1065 = vrot.lane.b32.xlu1 %v3909_v32, %s3220_s27  ;;  %v3934_v49 = vld [vmem:[#allocation2 + $0xf0] sm:$0xff]  ;;  %v3936_v50 = vld [vmem:[#allocation2 + $0xf8] sm:$0xff]  ;;  %v3159_v35 = vpack.c.bf16 %v2452_v34, %v2451_v33 }
  0xba   : > { %1067 = vrot.lane.b32.xlu0 %v3923_v41, %s3220_s27  ;;  %v3938_v15 = vld [vmem:[#allocation2 + $0xf9] sm:$0xff]  ;;  %2363 = vst.msk [vmem:[#allocation3 + $0x108] sm:$0xff] %vm648_vm0, %v3932_v46  ;;  %951 = vst.msk [vmem:[#allocation3 + $0x140] sm:$0xff] %vm648_vm0, %v3934_v49 }
  0xbb   : > { %952 = vst.msk [vmem:[#allocation3 + $0x150] sm:$0xff] %vm648_vm0, %v3936_v50  ;;  %v2334_v57 = vld [vmem:[#allocation2 + $0x112] sm:$0xff]  ;;  %v2333_v58 = vld [vmem:[#allocation2 + $0x10a] sm:$0xff]  ;;  %v821_v60 = vpop.permute.xlu1 %820  ;;  %v819_v61 = vpop.permute.xlu0 %818  ;;  %3160 = vmatpush1.bf16.msra.mxu0 %v3159_v35  ;;  %3186 = vmatpush1.bf16.msra.mxu1 %v3159_v35 }
  0xbc   : > { %v3954_v6 = vld [vmem:[#allocation2 + $0x109] sm:$0xff]  ;;  %2366 = vst.msk [vmem:[#allocation3 + $0x138] sm:$0xff] %vm648_vm0, %v2334_v57  ;;  %2365 = vst.msk [vmem:[#allocation3 + $0x128] sm:$0xff] %vm648_vm0, %v2333_v58  ;;  %v986_v36 = vld [vmem:[#allocation2 + $0x111] sm:$0xff]  ;;  %3161 = vmatprep.subr.bf16.mxu0 %v3222_v48  ;;  %3178 = vmatprep.subr.bf16.mxu1 %v3222_v48 }
  0xbd   : > { %892 = vst.msk [vmem:[#allocation2 + $0x141] sm:$0xff] %vm866_vm3, %v821_v60  ;;  %891 = vst.msk [vmem:[#allocation2 + $0x139] sm:$0xff] %vm866_vm3, %v819_v61  ;;  %1069 = vrot.lane.b32.xlu1 %v3938_v15, %s3220_s27  ;;  %v3964_v9 = vld [vmem:[#allocation2 + $0x108] sm:$0xff]  ;;  %v3966_v14 = vld [vmem:[#allocation2 + $0x110] sm:$0xff] }
  0xbe   : > { %1071 = vrot.lane.b32.xlu0 %v3954_v6, %s3220_s27  ;;  %953 = vst.msk [vmem:[#allocation3 + $0x160] sm:$0xff] %vm648_vm0, %v3964_v9  ;;  %954 = vst.msk [vmem:[#allocation3 + $0x170] sm:$0xff] %vm648_vm0, %v3966_v14  ;;  %v2454_v34 = vld [vmem:[%s4845_s6 + $0x58] sm:$0xff] }
  0xbf   : > { %v825_v57 = vpop.permute.xlu1 %824  ;;  %v823_v58 = vpop.permute.xlu0 %822 }
  0xc0   : > { %v2336_v40 = vld [vmem:[#allocation2 + $0x12a] sm:$0xff]  ;;  %v2335_v37 = vld [vmem:[#allocation2 + $0x122] sm:$0xff]  ;;  %894 = vst.msk [vmem:[#allocation2 + $0x159] sm:$0xff] %vm866_vm3, %v825_v57  ;;  %893 = vst.msk [vmem:[#allocation2 + $0x151] sm:$0xff] %vm866_vm3, %v823_v58 }
  0xc1   : > { %v987_v38 = vld [vmem:[#allocation2 + $0x121] sm:$0xff]  ;;  %2368 = vst.msk [vmem:[#allocation3 + $0x158] sm:$0xff] %vm648_vm0, %v2336_v40  ;;  %2367 = vst.msk [vmem:[#allocation3 + $0x148] sm:$0xff] %vm648_vm0, %v2335_v37  ;;  %v2412_v60 = vld [vmem:[#allocation3 + $0x108] sm:$0xff]  ;;  %1073 = vrot.lane.b32.xlu1 %v986_v36, %s3220_s27 }
  0xc2   : > { %1075 = vrot.lane.b32.xlu0 %v987_v38, %s3220_s27  ;;  %v988_v27 = vld [vmem:[#allocation2 + $0x129] sm:$0xff]  ;;  %v3986_v61 = vld [vmem:[#allocation2 + $0x120] sm:$0xff]  ;;  %3125 = vmatprep.mubr.msk.f32.mxu1 %vm648_vm0, %v2412_v60 }
  0xc3   : > { %955 = vst.msk [vmem:[#allocation3 + $0x180] sm:$0xff] %vm648_vm0, %v3986_v61  ;;  %v3991_v33 = vld [vmem:[#allocation2 + $0x128] sm:$0xff]  ;;  %v2453_v36 = vld [vmem:[%s4845_s6 + $0x50] sm:$0xff]  ;;  %v829_v58 = vpop.permute.xlu1 %828  ;;  %v827_v60 = vpop.permute.xlu0 %826 }
  0xc4   : > { %4853 = vst [vmem:[#allocation4_spill] sm:$0xff] %v3991_v33  ;;  %956 = vst.msk [vmem:[#allocation3 + $0x190] sm:$0xff] %vm648_vm0, %v3991_v33  ;;  %v3162_v40 = vpack.c.bf16 %v2454_v34, %v2453_v36  ;;  %v2338_v37 = vld [vmem:[#allocation2 + $0x142] sm:$0xff]  ;;  %v2337_v38 = vld [vmem:[#allocation2 + $0x13a] sm:$0xff] }
  0xc5   : > { %v989_v57 = vld [vmem:[#allocation2 + $0x139] sm:$0xff]  ;;  %2370 = vst.msk [vmem:[#allocation3 + $0x178] sm:$0xff] %vm648_vm0, %v2338_v37  ;;  %2369 = vst.msk [vmem:[#allocation3 + $0x168] sm:$0xff] %vm648_vm0, %v2337_v38  ;;  %1077 = vrot.lane.b32.xlu1 %v988_v27, %s3220_s27  ;;  %v2456_v34 = vld [vmem:[%s4845_s6 + $0x68] sm:$0xff] }
  0xc6   : > { %1079 = vrot.lane.b32.xlu0 %v989_v57, %s3220_s27  ;;  %896 = vst.msk [vmem:[#allocation2 + $0x171] sm:$0xff] %vm866_vm3, %v829_v58  ;;  %895 = vst.msk [vmem:[#allocation2 + $0x169] sm:$0xff] %vm866_vm3, %v827_v60  ;;  %v4009_v35 = vld [vmem:[#allocation2 + $0x138] sm:$0xff]  ;;  %v2455_v36 = vld [vmem:[%s4845_s6 + $0x60] sm:$0xff]  ;;  %3163 = vmatpush1.bf16.msra.mxu0 %v3162_v40 }
  0xc7   : > { %957 = vst.msk [vmem:[#allocation3 + $0x1a0] sm:$0xff] %vm648_vm0, %v4009_v35  ;;  %v3165_v27 = vpack.c.bf16 %v2456_v34, %v2455_v36  ;;  %3164 = vmatprep.subr.bf16.mxu0 %v3222_v48  ;;  %3187 = vmatpush1.bf16.msra.mxu1 %v3162_v40  ;;  %v4020_v37 = vld [vmem:[#allocation2 + $0x140] sm:$0xff]  ;;  %v2339_v57 = vld [vmem:[#allocation2 + $0x152] sm:$0xff]  ;;  %v833_v58 = vpop.permute.xlu1 %832  ;;  %v831_v60 = vpop.permute.xlu0 %830 }
  0xc8   : > { %4854 = vst [vmem:[#allocation5_spill] sm:$0xff] %v4020_v37  ;;  %v2340_v38 = vld [vmem:[#allocation2 + $0x15a] sm:$0xff]  ;;  %v2457_v33 = vld [vmem:[%s4845_s6 + $0x70] sm:$0xff]  ;;  %3179 = vmatprep.subr.bf16.mxu1 %v3222_v48  ;;  %958 = vst.msk [vmem:[#allocation3 + $0x1b0] sm:$0xff] %vm648_vm0, %v4020_v37 }
  0xc9   : > { %1606 = vrot.lane.b32.xlu1 %v3701_v54, %s3223_s25  ;;  %2372 = vst.msk [vmem:[#allocation3 + $0x198] sm:$0xff] %vm648_vm0, %v2340_v38  ;;  %2371 = vst.msk [vmem:[#allocation3 + $0x188] sm:$0xff] %vm648_vm0, %v2339_v57  ;;  %v2458_v40 = vld [vmem:[%s4845_s6 + $0x78] sm:$0xff]  ;;  %v4039_v54 = vld [vmem:[#allocation2 + $0x150] sm:$0xff] }
  0xca   : > { %1413 = vrot.lane.b32.xlu0 %v3703_v55, %s3224_s26  ;;  %898 = vst.msk [vmem:[#allocation2 + $0x189] sm:$0xff] %vm866_vm3, %v833_v58  ;;  %897 = vst.msk [vmem:[#allocation2 + $0x181] sm:$0xff] %vm866_vm3, %v831_v60  ;;  %3166 = vmatpush1.bf16.msra.mxu0 %v3165_v27  ;;  %v3168_v36 = vpack.c.bf16 %v2458_v40, %v2457_v33  ;;  %v1735_v34 = vld [vmem:[#allocation2 + $0x1a] sm:$0xff]  ;;  %v2460_v33 = vld [vmem:[%s4845_s6 + $0x88] sm:$0xff] }
  0xcb   : > { %3167 = vmatprep.subr.bf16.mxu0 %v3222_v48  ;;  %3188 = vmatpush1.bf16.msra.mxu1 %v3165_v27  ;;  %v4042_v55 = vld [vmem:[#allocation2 + $0x158] sm:$0xff]  ;;  %959 = vst.msk [vmem:[#allocation3 + $0x1c0] sm:$0xff] %vm648_vm0, %v4039_v54  ;;  %v1030_v58 = vpop.permute.xlu1 %1029  ;;  %v1028_v60 = vpop.permute.xlu0 %1027  ;;  %v2459_v37 = vld [vmem:[%s4845_s6 + $0x80] sm:$0xff] }
  0xcc   : > { %3180 = vmatprep.subr.bf16.mxu1 %v3222_v48  ;;  %960 = vst.msk [vmem:[#allocation3 + $0x1d0] sm:$0xff] %vm648_vm0, %v4042_v55  ;;  %v3171_v27 = vpack.c.bf16 %v2460_v33, %v2459_v37 }
  0xcd   : > { %v2342_v38 = vld [vmem:[#allocation2 + $0x172] sm:$0xff]  ;;  %v2341_v57 = vld [vmem:[#allocation2 + $0x16a] sm:$0xff]  ;;  %1415 = vrot.lane.b32.xlu1 %v3731_v20, %s3224_s26  ;;  %1125 = vst.msk [vmem:[#allocation3 + $0x10] sm:$0xff] %vm1123_vm4, %v1030_v58  ;;  %1124 = vst.msk [vmem:[#allocation3] sm:$0xff] %vm1123_vm4, %v1028_v60 }
  0xce   : > { %1799 = vrot.lane.b32.xlu0 %v1735_v34, %s3225_s15  ;;  %2374 = vst.msk [vmem:[#allocation3 + $0x1b8] sm:$0xff] %vm648_vm0, %v2342_v38  ;;  %2373 = vst.msk [vmem:[#allocation3 + $0x1a8] sm:$0xff] %vm648_vm0, %v2341_v57  ;;  %3169 = vmatpush1.bf16.msra.mxu0 %v3168_v36  ;;  %v4062_v40 = vld [vmem:[#allocation2 + $0x168] sm:$0xff]  ;;  %v4065_v20 = vld [vmem:[#allocation2 + $0x170] sm:$0xff] }
  0xcf   : > { %3170 = vmatprep.subr.bf16.mxu0 %v3222_v48  ;;  %3189 = vmatpush1.bf16.msra.mxu1 %v3168_v36  ;;  %961 = vst.msk [vmem:[#allocation3 + $0x1e0] sm:$0xff] %vm648_vm0, %v4062_v40  ;;  %v1221_v58 = vpop.permute.xlu1 %1220  ;;  %962 = vst.msk [vmem:[#allocation3 + $0x1f0] sm:$0xff] %vm648_vm0, %v4065_v20 }
  0xd0   : > { %3181 = vmatprep.subr.bf16.mxu1 %v3222_v48  ;;  %1317 = vst.msk [vmem:[#allocation3] sm:$0xff] %vm1316_vm5, %v1221_v58 }
  0xd1   : > { %v2344_v38 = vld [vmem:[#allocation2 + $0x18a] sm:$0xff]  ;;  %v2343_v57 = vld [vmem:[#allocation2 + $0x182] sm:$0xff]  ;;  %1608 = vrot.lane.b32.xlu1 %v3719_v59, %s3223_s25 }
  0xd2   : > { %1993 = vrot.lane.b32.xlu0 %v3709_v56, %s3226_s18  ;;  %2376 = vst.msk [vmem:[#allocation3 + $0x1d8] sm:$0xff] %vm648_vm0, %v2344_v38  ;;  %2375 = vst.msk [vmem:[#allocation3 + $0x1c8] sm:$0xff] %vm648_vm0, %v2343_v57  ;;  %3172 = vmatpush1.bf16.msra.mxu0 %v3171_v27  ;;  %v1736_v59 = vld [vmem:[#allocation2 + $0x22] sm:$0xff] }
  0xd3   : > { %3190 = vmatpush1.bf16.msra.mxu1 %v3171_v27  ;;  %v1223_v37 = vpop.permute.xlu1 %1222  ;;  %v1744_v27 = vld [vmem:[#allocation2 + $0x82] sm:$0xff] }
  0xd4   : > { %1318 = vst.msk [vmem:[#allocation3 + $0x10] sm:$0xff] %vm1316_vm5, %v1223_v37 }
  0xd5   : > { %1224 = vrot.lane.b32.xlu1 %v1735_v34, %s3221_s28 }
  0xd6   : > { %2186 = vrot.lane.b32.xlu0 %v3713_v43, %s3227_s19 }
  0xd9   : > { %1417 = vrot.lane.b32.xlu1 %v3709_v56, %s3224_s26 }
  0xda   : > { %1801 = vrot.lane.b32.xlu0 %v1736_v59, %s3225_s15 }
  0xdd   : > { %1610 = vrot.lane.b32.xlu1 %v3713_v43, %s3223_s25 }
  0xde   : > { %1995 = vrot.lane.b32.xlu0 %v3737_v42, %s3226_s18 }
  0xe1   : > { %1226 = vrot.lane.b32.xlu1 %v1736_v59, %s3221_s28 }
  0xe2   : > { %2188 = vrot.lane.b32.xlu0 %v3733_v39, %s3227_s19 }
  0xe5   : > { %1419 = vrot.lane.b32.xlu1 %v3737_v42, %s3224_s26 }
  0xe6   : > { %1803 = vrot.lane.b32.xlu0 %v3729_v17, %s3225_s15 }
  0xe9   : > { %1612 = vrot.lane.b32.xlu1 %v3733_v39, %s3223_s25 }
  0xea   : > { %1997 = vrot.lane.b32.xlu0 %v3759_v0, %s3226_s18 }
  0xed   : > { %1228 = vrot.lane.b32.xlu1 %v3729_v17, %s3221_s28 }
  0xee   : > { %2190 = vrot.lane.b32.xlu0 %v3747_v62, %s3227_s19 }
  0xf1   : > { %1421 = vrot.lane.b32.xlu1 %v3759_v0, %s3224_s26 }
  0xf2   : > { %1805 = vrot.lane.b32.xlu0 %v3717_v47, %s3225_s15 }
  0xf5   : > { %1614 = vrot.lane.b32.xlu1 %v3747_v62, %s3223_s25 }
  0xf6   : > { %1999 = vrot.lane.b32.xlu0 %v3761_v10, %s3226_s18 }
  0xf9   : > { %1230 = vrot.lane.b32.xlu1 %v3717_v47, %s3221_s28 }
  0xfa   : > { %2192 = vrot.lane.b32.xlu0 %v3763_v30, %s3227_s19 }
  0xfd   : > { %1423 = vrot.lane.b32.xlu1 %v3761_v10, %s3224_s26 }
  0xfe   : > { %1807 = vrot.lane.b32.xlu0 %v3745_v63, %s3225_s15 }
 0x101   : > { %1616 = vrot.lane.b32.xlu1 %v3763_v30, %s3223_s25 }
 0x102   : > { %2001 = vrot.lane.b32.xlu0 %v3785_v7, %s3226_s18 }
 0x105   : > { %1232 = vrot.lane.b32.xlu1 %v3745_v63, %s3221_s28 }
 0x106   : > { %2194 = vrot.lane.b32.xlu0 %v3773_v5, %s3227_s19  ;;  %v1032_v56 = vpop.permute.xlu0 %1031 }
 0x107   : > { %1126 = vst.msk [vmem:[#allocation3 + $0x20] sm:$0xff] %vm1123_vm4, %v1032_v56 }
 0x109   : > { %1425 = vrot.lane.b32.xlu1 %v3785_v7, %s3224_s26 }
 0x10a   : > { %1809 = vrot.lane.b32.xlu0 %v3743_v53, %s3225_s15  ;;  %v1036_v47 = vpop.permute.xlu0 %1035 }
 0x10b   : > { %v1034_v43 = vpop.permute.xlu1 %1033  ;;  %1128 = vst.msk [vmem:[#allocation3 + $0x40] sm:$0xff] %vm1123_vm4, %v1036_v47 }
 0x10c   : > { %1127 = vst.msk [vmem:[#allocation3 + $0x30] sm:$0xff] %vm1123_vm4, %v1034_v43 }
 0x10d   : > { %1618 = vrot.lane.b32.xlu1 %v3773_v5, %s3223_s25 }
 0x10e   : > { %2003 = vrot.lane.b32.xlu0 %v3790_v1, %s3226_s18 }
 0x10f   : > { %v1038_v17 = vpop.permute.xlu1 %1037  ;;  %v1040_v39 = vpop.permute.xlu0 %1039 }
 0x110   : > { %1129 = vst.msk [vmem:[#allocation3 + $0x50] sm:$0xff] %vm1123_vm4, %v1038_v17  ;;  %1130 = vst.msk [vmem:[#allocation3 + $0x60] sm:$0xff] %vm1123_vm4, %v1040_v39 }
 0x111   : > { %1234 = vrot.lane.b32.xlu1 %v3743_v53, %s3221_s28 }
 0x112   : > { %2196 = vrot.lane.b32.xlu0 %v3788_v8, %s3227_s19 }
 0x113   : > { %v1042_v42 = vpop.permute.xlu1 %1041 }
 0x114   : > { %v1044_v63 = vpop.permute.xlu0 %1043  ;;  %1131 = vst.msk [vmem:[#allocation3 + $0x70] sm:$0xff] %vm1123_vm4, %v1042_v42 }
 0x115   : > { %1132 = vst.msk [vmem:[#allocation3 + $0x80] sm:$0xff] %vm1123_vm4, %v1044_v63  ;;  %1427 = vrot.lane.b32.xlu1 %v3790_v1, %s3224_s26 }
 0x116   : > { %1811 = vrot.lane.b32.xlu0 %v3771_v31, %s3225_s15 }
 0x117   : > { %v1046_v62 = vpop.permute.xlu1 %1045 }
 0x118   : > { %v1048_v0 = vpop.permute.xlu0 %1047  ;;  %1133 = vst.msk [vmem:[#allocation3 + $0x90] sm:$0xff] %vm1123_vm4, %v1046_v62  ;;  %v2384_v62 = vld [vmem:[#allocation3 + $0x28] sm:$0xff] }
 0x119   : > { %1134 = vst.msk [vmem:[#allocation3 + $0xa0] sm:$0xff] %vm1123_vm4, %v1048_v0  ;;  %1620 = vrot.lane.b32.xlu1 %v3788_v8, %s3223_s25 }
 0x11a   : > { %2005 = vrot.lane.b32.xlu0 %v3809_v21, %s3226_s18 }
 0x11b   : > { %v1050_v53 = vpop.permute.xlu1 %1049 }
 0x11c   : > { %v1052_v10 = vpop.permute.xlu0 %1051  ;;  %1135 = vst.msk [vmem:[#allocation3 + $0xb0] sm:$0xff] %vm1123_vm4, %v1050_v53 }
 0x11d   : > { %1136 = vst.msk [vmem:[#allocation3 + $0xc0] sm:$0xff] %vm1123_vm4, %v1052_v10  ;;  %1236 = vrot.lane.b32.xlu1 %v3771_v31, %s3221_s28 }
 0x11e   : > { %2198 = vrot.lane.b32.xlu0 %v3798_v19, %s3227_s19 }
 0x11f   : > { %v1054_v30 = vpop.permute.xlu1 %1053 }
 0x120   : > { %v1056_v5 = vpop.permute.xlu0 %1055  ;;  %1137 = vst.msk [vmem:[#allocation3 + $0xd0] sm:$0xff] %vm1123_vm4, %v1054_v30 }
 0x121   : > { %1138 = vst.msk [vmem:[#allocation3 + $0xe0] sm:$0xff] %vm1123_vm4, %v1056_v5  ;;  %2007 = vrot.lane.b32.xlu1 %v3811_v23, %s3226_s18 }
 0x122   : > { %1813 = vrot.lane.b32.xlu0 %v3769_v11, %s3225_s15 }
 0x123   : > { %v1058_v7 = vpop.permute.xlu1 %1057 }
 0x124   : > { %v1060_v8 = vpop.permute.xlu0 %1059  ;;  %1139 = vst.msk [vmem:[#allocation3 + $0xf0] sm:$0xff] %vm1123_vm4, %v1058_v7 }
 0x125   : > { %1140 = vst.msk [vmem:[#allocation3 + $0x100] sm:$0xff] %vm1123_vm4, %v1060_v8  ;;  %1445 = vrot.lane.b32.xlu1 %v3905_v18, %s3224_s26  ;;  %v2386_v8 = vld [vmem:[#allocation3 + $0x38] sm:$0xff] }
 0x126   : > { %1252 = vrot.lane.b32.xlu0 %v3864_v22, %s3221_s28 }
 0x127   : > { %v1062_v31 = vpop.permute.xlu1 %1061 }
 0x128   : > { %v1064_v1 = vpop.permute.xlu0 %1063  ;;  %1141 = vst.msk [vmem:[#allocation3 + $0x110] sm:$0xff] %vm1123_vm4, %v1062_v31 }
 0x129   : > { %1142 = vst.msk [vmem:[#allocation3 + $0x120] sm:$0xff] %vm1123_vm4, %v1064_v1  ;;  %1622 = vrot.lane.b32.xlu1 %v3798_v19, %s3223_s25 }
 0x12a   : > { %1429 = vrot.lane.b32.xlu0 %v3809_v21, %s3224_s26 }
 0x12b   : > { %v1066_v48 = vpop.permute.xlu1 %1065 }
 0x12c   : > { %v1068_v36 = vpop.permute.xlu0 %1067  ;;  %1143 = vst.msk [vmem:[#allocation3 + $0x130] sm:$0xff] %vm1123_vm4, %v1066_v48  ;;  %v2132_v48 = vld [vmem:[#allocation2 + $0xa9] sm:$0xff] }
 0x12d   : > { %1144 = vst.msk [vmem:[#allocation3 + $0x140] sm:$0xff] %vm1123_vm4, %v1068_v36  ;;  %1815 = vrot.lane.b32.xlu1 %v3796_v2, %s3225_s15 }
 0x12e   : > { %2200 = vrot.lane.b32.xlu0 %v3813_v26, %s3227_s19 }
 0x12f   : > { %v1070_v22 = vpop.permute.xlu1 %1069 }
 0x130   : > { %v1072_v34 = vpop.permute.xlu0 %1071  ;;  %1145 = vst.msk [vmem:[#allocation3 + $0x150] sm:$0xff] %vm1123_vm4, %v1070_v22 }
 0x131   : > { %1146 = vst.msk [vmem:[#allocation3 + $0x160] sm:$0xff] %vm1123_vm4, %v1072_v34  ;;  %1238 = vrot.lane.b32.xlu1 %v3769_v11, %s3221_s28 }
 0x132   : > { %1638 = vrot.lane.b32.xlu0 %v3894_v13, %s3223_s25 }
 0x133   : > { %v1074_v19 = vpop.permute.xlu1 %1073 }
 0x134   : > { %v1076_v21 = vpop.permute.xlu0 %1075  ;;  %1147 = vst.msk [vmem:[#allocation3 + $0x170] sm:$0xff] %vm1123_vm4, %v1074_v19 }
 0x135   : > { %1148 = vst.msk [vmem:[#allocation3 + $0x180] sm:$0xff] %vm1123_vm4, %v1076_v21  ;;  %2009 = vrot.lane.b32.xlu1 %v3829_v29, %s3226_s18 }
 0x136   : > { %1831 = vrot.lane.b32.xlu0 %v3892_v4, %s3225_s15 }
 0x137   : > { %v1078_v2 = vpop.permute.xlu1 %1077 }
 0x138   : > { %v1080_v60 = vpop.permute.xlu0 %1079  ;;  %1149 = vst.msk [vmem:[#allocation3 + $0x190] sm:$0xff] %vm1123_vm4, %v1078_v2  ;;  %v1746_v2 = vld [vmem:[#allocation2 + $0x9a] sm:$0xff] }
 0x139   : > { %1150 = vst.msk [vmem:[#allocation3 + $0x1a0] sm:$0xff] %vm1123_vm4, %v1080_v60  ;;  %1431 = vrot.lane.b32.xlu1 %v3811_v23, %s3224_s26  ;;  %v2388_v60 = vld [vmem:[#allocation3 + $0x48] sm:$0xff] }
 0x13a   : > { %1254 = vrot.lane.b32.xlu0 %v3862_v16, %s3221_s28 }
 0x13b   : > { %v1607_v11 = vpop.permute.xlu1 %1606 }
 0x13c   : > { %v1414_v13 = vpop.permute.xlu0 %1413 }
 0x13d   : > { %1510 = vst.msk [vmem:[#allocation3] sm:$0xff] %vm1509_vm6, %v1414_v13  ;;  %2202 = vrot.lane.b32.xlu1 %v3819_v28, %s3227_s19 }
 0x13e   : > { %2025 = vrot.lane.b32.xlu0 %v3934_v49, %s3226_s18  ;;  %1703 = vst.msk [vmem:[#allocation3] sm:$0xff] %vm1702_vm7, %v1607_v11 }
 0x13f   : > { %v1416_v33 = vpop.permute.xlu1 %1415 }
 0x140   : > { %v1800_v23 = vpop.permute.xlu0 %1799  ;;  %1511 = vst.msk [vmem:[#allocation3 + $0x10] sm:$0xff] %vm1509_vm6, %v1416_v33 }
 0x141   : > { %1896 = vst.msk [vmem:[#allocation3] sm:$0xff] %vm1895_vm8, %v1800_v23  ;;  %1624 = vrot.lane.b32.xlu1 %v3813_v26, %s3223_s25  ;;  %v1166_v26 = vld [vmem:[#allocation2 + $0x7a] sm:$0xff] }
 0x142   : > { %1447 = vrot.lane.b32.xlu0 %v3907_v12, %s3224_s26 }
 0x143   : > { %v1609_v28 = vpop.permute.xlu1 %1608 }
 0x144   : > { %v1994_v16 = vpop.permute.xlu0 %1993  ;;  %1704 = vst.msk [vmem:[#allocation3 + $0x10] sm:$0xff] %vm1702_vm7, %v1609_v28 }
 0x145   : > { %2090 = vst.msk [vmem:[#allocation3] sm:$0xff] %vm2089_vm9, %v1994_v16  ;;  %1817 = vrot.lane.b32.xlu1 %v1744_v27, %s3225_s15 }
 0x146   : > { %2218 = vrot.lane.b32.xlu0 %v3923_v41, %s3227_s19 }
 0x147   : > { %v1225_v38 = vpop.permute.xlu1 %1224 }
 0x148   : > { %v2187_v57 = vpop.permute.xlu0 %2186  ;;  %1319 = vst.msk [vmem:[#allocation3 + $0x20] sm:$0xff] %vm1316_vm5, %v1225_v38 }
 0x149   : > { %2283 = vst.msk [vmem:[#allocation3] sm:$0xff] %vm2282_vm10, %v2187_v57  ;;  %1240 = vrot.lane.b32.xlu1 %v1166_v26, %s3221_s28  ;;  %v2133_v57 = vld [vmem:[#allocation2 + $0xb1] sm:$0xff] }
 0x14a   : > { %1640 = vrot.lane.b32.xlu0 %v3909_v32, %s3223_s25  ;;  %v2382_v32 = vld [vmem:[#allocation3 + $0x18] sm:$0xff] }
 0x14b   : > { %v1418_v58 = vpop.permute.xlu1 %1417 }
 0x14c   : > { %v1802_v37 = vpop.permute.xlu0 %1801  ;;  %1512 = vst.msk [vmem:[#allocation3 + $0x20] sm:$0xff] %vm1509_vm6, %v1418_v58 }
 0x14d   : > { %1897 = vst.msk [vmem:[#allocation3 + $0x10] sm:$0xff] %vm1895_vm8, %v1802_v37  ;;  %2011 = vrot.lane.b32.xlu1 %v3831_v24, %s3226_s18 }
 0x14e   : > { %1833 = vrot.lane.b32.xlu0 %v3890_v3, %s3225_s15 }
 0x14f   : > { %v1611_v59 = vpop.permute.xlu1 %1610 }
 0x150   : > { %v1996_v56 = vpop.permute.xlu0 %1995  ;;  %v2379_v43 = vld [vmem:[#allocation3] sm:$0xff]  ;;  %1705 = vst.msk [vmem:[#allocation3 + $0x20] sm:$0xff] %vm1702_vm7, %v1611_v59 }
 0x151   : > { %2091 = vst.msk [vmem:[#allocation3 + $0x10] sm:$0xff] %vm2089_vm9, %v1996_v56  ;;  %2629 = vmatmul.mubr.f32.vlgmr.msra.gmra.mrb[0].mxu0 %v2379_v43  ;;  %1433 = vrot.lane.b32.xlu1 %v3829_v29, %s3224_s26  ;;  %v1747_v59 = vld [vmem:[#allocation2 + $0xaa] sm:$0xff]  ;;  %v2392_v43 = vld [vmem:[#allocation3 + $0x68] sm:$0xff] }
 0x152   : > { %1256 = vrot.lane.b32.xlu0 %v3892_v4, %s3221_s28  ;;  %3110 = vmatprep.mubr.msk.f32.mxu0 %vm648_vm0, %v2382_v32  ;;  %v1552_v4 = vld [vmem:[#allocation2 + $0x91] sm:$0xff] }
 0x153   : > { %v1227_v47 = vpop.permute.xlu1 %1226  ;;  %v2141_v56 = vld [vmem:[#allocation2 + $0x111] sm:$0xff] }
 0x154   : > { %v2189_v17 = vpop.permute.xlu0 %2188  ;;  %1320 = vst.msk [vmem:[#allocation3 + $0x30] sm:$0xff] %vm1316_vm5, %v1227_v47 }
 0x155   : > { %2284 = vst.msk [vmem:[#allocation3 + $0x10] sm:$0xff] %vm2282_vm10, %v2189_v17  ;;  %2204 = vrot.lane.b32.xlu1 %v3833_v25, %s3227_s19  ;;  %v1745_v25 = vld [vmem:[#allocation2 + $0x92] sm:$0xff] }
 0x156   : > { %2027 = vrot.lane.b32.xlu0 %v3936_v50, %s3226_s18 }
 0x157   : > { %v1420_v3 = vpop.permute.xlu1 %1419 }
 0x158   : > { %v1804_v29 = vpop.permute.xlu0 %1803  ;;  %1513 = vst.msk [vmem:[#allocation3 + $0x30] sm:$0xff] %vm1509_vm6, %v1420_v3 }
 0x159   : > { %1898 = vst.msk [vmem:[#allocation3 + $0x20] sm:$0xff] %vm1895_vm8, %v1804_v29  ;;  %1626 = vrot.lane.b32.xlu1 %v1552_v4, %s3223_s25  ;;  %v1755_v29 = vld [vmem:[#allocation2 + $0x10a] sm:$0xff] }
 0x15a   : > { %1449 = vrot.lane.b32.xlu0 %v3934_v49, %s3224_s26 }
 0x15b   : > { %v1613_v39 = vpop.permute.xlu1 %1612 }
 0x15c   : > { %v1998_v42 = vpop.permute.xlu0 %1997  ;;  %v2381_v63 = vld [vmem:[#allocation3 + $0x10] sm:$0xff]  ;;  %1706 = vst.msk [vmem:[#allocation3 + $0x30] sm:$0xff] %vm1702_vm7, %v1613_v39 }
 0x15d   : > { %2092 = vst.msk [vmem:[#allocation3 + $0x20] sm:$0xff] %vm2089_vm9, %v1998_v42  ;;  %2634 = vmatmul.mubr.f32.gmra.mrb[2].mxu0 %v2381_v63  ;;  %1819 = vrot.lane.b32.xlu1 %v1745_v25, %s3225_s15  ;;  %v2394_v63 = vld [vmem:[#allocation3 + $0x78] sm:$0xff] }
 0x15e   : > { %2220 = vrot.lane.b32.xlu0 %v3938_v15, %s3227_s19  ;;  %3111 = vmatprep.mubr.msk.f32.mxu0 %vm648_vm0, %v2384_v62 }
 0x15f   : > { %v1229_v0 = vpop.permute.xlu1 %1228 }
 0x160   : > { %v2191_v53 = vpop.permute.xlu0 %2190  ;;  %1321 = vst.msk [vmem:[#allocation3 + $0x40] sm:$0xff] %vm1316_vm5, %v1229_v0  ;;  %v2134_v0 = vld [vmem:[#allocation2 + $0xc1] sm:$0xff] }
 0x161   : > { %2285 = vst.msk [vmem:[#allocation3 + $0x20] sm:$0xff] %vm2282_vm10, %v2191_v53  ;;  %1242 = vrot.lane.b32.xlu1 %v1744_v27, %s3221_s28 }
 0x162   : > { %1642 = vrot.lane.b32.xlu0 %v3923_v41, %s3223_s25  ;;  %v1175_v41 = vld [vmem:[#allocation2 + $0xe2] sm:$0xff] }
 0x163   : > { %v1422_v49 = vpop.permute.xlu1 %1421 }
 0x164   : > { %v1806_v10 = vpop.permute.xlu0 %1805  ;;  %1514 = vst.msk [vmem:[#allocation3 + $0x40] sm:$0xff] %vm1509_vm6, %v1422_v49 }
 0x165   : > { %1899 = vst.msk [vmem:[#allocation3 + $0x30] sm:$0xff] %vm1895_vm8, %v1806_v10  ;;  %2013 = vrot.lane.b32.xlu1 %v3846_v44, %s3226_s18 }
 0x166   : > { %1835 = vrot.lane.b32.xlu0 %v3932_v46, %s3225_s15 }
 0x167   : > { %v1615_v30 = vpop.permute.xlu1 %1614 }
 0x168   : > { %v2000_v5 = vpop.permute.xlu0 %1999  ;;  %v2383_v7 = vld [vmem:[#allocation3 + $0x20] sm:$0xff]  ;;  %1707 = vst.msk [vmem:[#allocation3 + $0x40] sm:$0xff] %vm1702_vm7, %v1615_v30 }
 0x169   : > { %2093 = vst.msk [vmem:[#allocation3 + $0x30] sm:$0xff] %vm2089_vm9, %v2000_v5  ;;  %2639 = vmatmul.mubr.f32.gmra.mrb[4].mxu0 %v2383_v7  ;;  %1435 = vrot.lane.b32.xlu1 %v3831_v24, %s3224_s26  ;;  %v1553_v24 = vld [vmem:[#allocation2 + $0x99] sm:$0xff]  ;;  %v2142_v5 = vld [vmem:[#allocation2 + $0x121] sm:$0xff] }
 0x16a   : > { %1258 = vrot.lane.b32.xlu0 %v1175_v41, %s3221_s28  ;;  %3112 = vmatprep.mubr.msk.f32.mxu0 %vm648_vm0, %v2386_v8  ;;  %v1748_v30 = vld [vmem:[#allocation2 + $0xb2] sm:$0xff] }
 0x16b   : > { %v1231_v31 = vpop.permute.xlu1 %1230 }
 0x16c   : > { %v2193_v1 = vpop.permute.xlu0 %2192  ;;  %1322 = vst.msk [vmem:[#allocation3 + $0x50] sm:$0xff] %vm1316_vm5, %v1231_v31 }
 0x16d   : > { %2286 = vst.msk [vmem:[#allocation3 + $0x30] sm:$0xff] %vm2282_vm10, %v2193_v1  ;;  %2206 = vrot.lane.b32.xlu1 %v2132_v48, %s3227_s19 }
 0x16e   : > { %2029 = vrot.lane.b32.xlu0 %v3964_v9, %s3226_s18 }
 0x16f   : > { %v1424_v36 = vpop.permute.xlu1 %1423 }
 0x170   : > { %v1808_v22 = vpop.permute.xlu0 %1807  ;;  %1515 = vst.msk [vmem:[#allocation3 + $0x50] sm:$0xff] %vm1509_vm6, %v1424_v36 }
 0x171   : > { %1900 = vst.msk [vmem:[#allocation3 + $0x40] sm:$0xff] %vm1895_vm8, %v1808_v22  ;;  %1628 = vrot.lane.b32.xlu1 %v1553_v24, %s3223_s25 }
 0x172   : > { %1451 = vrot.lane.b32.xlu0 %v3936_v50, %s3224_s26 }
 0x173   : > { %v1617_v34 = vpop.permute.xlu1 %1616 }
 0x174   : > { %v2002_v19 = vpop.permute.xlu0 %2001  ;;  %v2385_v21 = vld [vmem:[#allocation3 + $0x30] sm:$0xff]  ;;  %1708 = vst.msk [vmem:[#allocation3 + $0x50] sm:$0xff] %vm1702_vm7, %v1617_v34 }
 0x175   : > { %2094 = vst.msk [vmem:[#allocation3 + $0x40] sm:$0xff] %vm2089_vm9, %v2002_v19  ;;  %2644 = vmatmul.mubr.f32.gmra.mrb[6].mxu0 %v2385_v21  ;;  %1821 = vrot.lane.b32.xlu1 %v1746_v2, %s3225_s15  ;;  %v2135_v19 = vld [vmem:[#allocation2 + $0xc9] sm:$0xff] }
 0x176   : > { %2222 = vrot.lane.b32.xlu0 %v3954_v6, %s3227_s19  ;;  %3113 = vmatprep.mubr.msk.f32.mxu0 %vm648_vm0, %v2388_v60  ;;  %v1754_v6 = vld [vmem:[#allocation2 + $0xfa] sm:$0xff]  ;;  %v4855_v21 = vld [vmem:[#allocation4_spill] sm:$0xff] }
 0x177   : > { %v1233_v11 = vpop.permute.xlu1 %1232 }
 0x178   : > { %v2195_v13 = vpop.permute.xlu0 %2194  ;;  %1323 = vst.msk [vmem:[#allocation3 + $0x60] sm:$0xff] %vm1316_vm5, %v1233_v11 }
 0x179   : > { %2287 = vst.msk [vmem:[#allocation3 + $0x40] sm:$0xff] %vm2282_vm10, %v2195_v13  ;;  %1244 = vrot.lane.b32.xlu1 %v1745_v25, %s3221_s28 }
 0x17a   : > { %1644 = vrot.lane.b32.xlu0 %v3938_v15, %s3223_s25  ;;  %v2390_v15 = vld [vmem:[#allocation3 + $0x58] sm:$0xff] }
 0x17b   : > { %v1426_v50 = vpop.permute.xlu1 %1425 }
 0x17c   : > { %v1810_v33 = vpop.permute.xlu0 %1809  ;;  %1516 = vst.msk [vmem:[#allocation3 + $0x60] sm:$0xff] %vm1509_vm6, %v1426_v50 }
 0x17d   : > { %1901 = vst.msk [vmem:[#allocation3 + $0x50] sm:$0xff] %vm1895_vm8, %v1810_v33  ;;  %2015 = vrot.lane.b32.xlu1 %v3848_v45, %s3226_s18  ;;  %v1749_v33 = vld [vmem:[#allocation2 + $0xc2] sm:$0xff] }
 0x17e   : > { %1837 = vrot.lane.b32.xlu0 %v1754_v6, %s3225_s15 }
 0x17f   : > { %v1619_v23 = vpop.permute.xlu1 %1618 }
 0x180   : > { %v2004_v28 = vpop.permute.xlu0 %2003  ;;  %v2387_v16 = vld [vmem:[#allocation3 + $0x40] sm:$0xff]  ;;  %1709 = vst.msk [vmem:[#allocation3 + $0x60] sm:$0xff] %vm1702_vm7, %v1619_v23 }
 0x181   : > { %2095 = vst.msk [vmem:[#allocation3 + $0x50] sm:$0xff] %vm2089_vm9, %v2004_v28  ;;  %2649 = vmatmul.mubr.f32.gmra.mrb[8].mxu0 %v2387_v16  ;;  %1437 = vrot.lane.b32.xlu1 %v3846_v44, %s3224_s26 }
 0x182   : > { %1260 = vrot.lane.b32.xlu0 %v3932_v46, %s3221_s28  ;;  %3114 = vmatprep.mubr.msk.f32.mxu0 %vm648_vm0, %v2390_v15 }
 0x183   : > { %v1235_v27 = vpop.permute.xlu1 %1234 }
 0x184   : > { %v2197_v38 = vpop.permute.xlu0 %2196  ;;  %1324 = vst.msk [vmem:[#allocation3 + $0x70] sm:$0xff] %vm1316_vm5, %v1235_v27 }
 0x185   : > { %2288 = vst.msk [vmem:[#allocation3 + $0x50] sm:$0xff] %vm2282_vm10, %v2197_v38  ;;  %2208 = vrot.lane.b32.xlu1 %v2133_v57, %s3227_s19  ;;  %v1757_v38 = vld [vmem:[#allocation2 + $0x122] sm:$0xff] }
 0x186   : > { %2031 = vrot.lane.b32.xlu0 %v3966_v14, %s3226_s18 }
 0x187   : > { %v1428_v26 = vpop.permute.xlu1 %1427 }
 0x188   : > { %v1812_v44 = vpop.permute.xlu0 %1811  ;;  %1517 = vst.msk [vmem:[#allocation3 + $0x70] sm:$0xff] %vm1509_vm6, %v1428_v26 }
 0x189   : > { %1902 = vst.msk [vmem:[#allocation3 + $0x60] sm:$0xff] %vm1895_vm8, %v1812_v44  ;;  %1630 = vrot.lane.b32.xlu1 %v2132_v48, %s3223_s25  ;;  %v1756_v48 = vld [vmem:[#allocation2 + $0x112] sm:$0xff] }
 0x18a   : > { %1453 = vrot.lane.b32.xlu0 %v3964_v9, %s3224_s26  ;;  %v1562_v9 = vld [vmem:[#allocation2 + $0x109] sm:$0xff] }
 0x18b   : > { %v1621_v46 = vpop.permute.xlu1 %1620 }
 0x18c   : > { %v2006_v58 = vpop.permute.xlu0 %2005  ;;  %v2389_v37 = vld [vmem:[#allocation3 + $0x50] sm:$0xff]  ;;  %1710 = vst.msk [vmem:[#allocation3 + $0x70] sm:$0xff] %vm1702_vm7, %v1621_v46 }
 0x18d   : > { %2096 = vst.msk [vmem:[#allocation3 + $0x60] sm:$0xff] %vm2089_vm9, %v2006_v58  ;;  %2654 = vmatmul.mubr.f32.gmra.mrb[10].mxu0 %v2389_v37  ;;  %1823 = vrot.lane.b32.xlu1 %v1747_v59, %s3225_s15 }
 0x18e   : > { %2224 = vrot.lane.b32.xlu0 %v2141_v56, %s3227_s19  ;;  %3115 = vmatprep.mubr.msk.f32.mxu0 %vm648_vm0, %v2392_v43 }
 0x18f   : > { %v1237_v32 = vpop.permute.xlu1 %1236 }
 0x190   : > { %v2199_v47 = vpop.permute.xlu0 %2198  ;;  %1325 = vst.msk [vmem:[#allocation3 + $0x80] sm:$0xff] %vm1316_vm5, %v1237_v32  ;;  %v1750_v32 = vld [vmem:[#allocation2 + $0xca] sm:$0xff] }
 0x191   : > { %2289 = vst.msk [vmem:[#allocation3 + $0x60] sm:$0xff] %vm2282_vm10, %v2199_v47  ;;  %1246 = vrot.lane.b32.xlu1 %v1746_v2, %s3221_s28  ;;  %v2144_v47 = vld [vmem:[#allocation2 + $0x139] sm:$0xff] }
 0x192   : > { %1646 = vrot.lane.b32.xlu0 %v1562_v9, %s3223_s25 }
 0x193   : > { %v2008_v17 = vpop.permute.xlu1 %2007 }
 0x194   : > { %v1814_v3 = vpop.permute.xlu0 %1813 }
 0x195   : > { %1903 = vst.msk [vmem:[#allocation3 + $0x70] sm:$0xff] %vm1895_vm8, %v1814_v3  ;;  %2017 = vrot.lane.b32.xlu1 %v3874_v51, %s3226_s18 }
 0x196   : > { %2097 = vst.msk [vmem:[#allocation3 + $0x70] sm:$0xff] %vm2089_vm9, %v2008_v17  ;;  %1839 = vrot.lane.b32.xlu0 %v1755_v29, %s3225_s15 }
 0x197   : > { %v1446_v4 = vpop.permute.xlu1 %1445 }
 0x198   : > { %v1253_v39 = vpop.permute.xlu0 %1252  ;;  %v2391_v42 = vld [vmem:[#allocation3 + $0x60] sm:$0xff] }
 0x199   : > { %1333 = vst.msk [vmem:[#allocation3 + $0x100] sm:$0xff] %vm1316_vm5, %v1253_v39  ;;  %2659 = vmatmul.mubr.f32.gmra.mrb[12].mxu0 %v2391_v42  ;;  %1439 = vrot.lane.b32.xlu1 %v3848_v45, %s3224_s26  ;;  %v1758_v42 = vld [vmem:[#allocation2 + $0x12a] sm:$0xff] }
 0x19a   : > { %1526 = vst.msk [vmem:[#allocation3 + $0x100] sm:$0xff] %vm1509_vm6, %v1446_v4  ;;  %1262 = vrot.lane.b32.xlu0 %v1754_v6, %s3221_s28  ;;  %3116 = vmatprep.mubr.msk.f32.mxu0 %vm648_vm0, %v2394_v63  ;;  %v2143_v6 = vld [vmem:[#allocation2 + $0x129] sm:$0xff]  ;;  %v4856_v63 = vld [vmem:[#allocation5_spill] sm:$0xff] }
 0x19b   : > { %v1623_v25 = vpop.permute.xlu1 %1622 }
 0x19c   : > { %v1430_v62 = vpop.permute.xlu0 %1429 }
 0x19d   : > { %1518 = vst.msk [vmem:[#allocation3 + $0x80] sm:$0xff] %vm1509_vm6, %v1430_v62  ;;  %2210 = vrot.lane.b32.xlu1 %v2134_v0, %s3227_s19 }
 0x19e   : > { %1711 = vst.msk [vmem:[#allocation3 + $0x80] sm:$0xff] %vm1702_vm7, %v1623_v25  ;;  %2033 = vrot.lane.b32.xlu0 %v3986_v61, %s3226_s18 }
 0x19f   : > { %v1816_v53 = vpop.permute.xlu1 %1815 }
 0x1a0   : > { %v2201_v49 = vpop.permute.xlu0 %2200  ;;  %1904 = vst.msk [vmem:[#allocation3 + $0x80] sm:$0xff] %vm1895_vm8, %v1816_v53 }
 0x1a1   : > { %2290 = vst.msk [vmem:[#allocation3 + $0x70] sm:$0xff] %vm2282_vm10, %v2201_v49  ;;  %1632 = vrot.lane.b32.xlu1 %v2133_v57, %s3223_s25 }
 0x1a2   : > { %1455 = vrot.lane.b32.xlu0 %v3966_v14, %s3224_s26  ;;  %v2396_v14 = vld [vmem:[#allocation3 + $0x88] sm:$0xff] }
 0x1a3   : > { %v1239_v45 = vpop.permute.xlu1 %1238 }
 0x1a4   : > { %v1639_v10 = vpop.permute.xlu0 %1638  ;;  %1326 = vst.msk [vmem:[#allocation3 + $0x90] sm:$0xff] %vm1316_vm5, %v1239_v45 }
 0x1a5   : > { %1719 = vst.msk [vmem:[#allocation3 + $0x100] sm:$0xff] %vm1702_vm7, %v1639_v10  ;;  %1825 = vrot.lane.b32.xlu1 %v1748_v30, %s3225_s15 }
 0x1a6   : > { %2226 = vrot.lane.b32.xlu0 %v2142_v5, %s3227_s19 }
 0x1a7   : > { %v2010_v7 = vpop.permute.xlu1 %2009 }
 0x1a8   : > { %v1832_v41 = vpop.permute.xlu0 %1831  ;;  %v2393_v8 = vld [vmem:[#allocation3 + $0x70] sm:$0xff]  ;;  %2098 = vst.msk [vmem:[#allocation3 + $0x80] sm:$0xff] %vm2089_vm9, %v2010_v7 }
 0x1a9   : > { %1912 = vst.msk [vmem:[#allocation3 + $0x100] sm:$0xff] %vm1895_vm8, %v1832_v41  ;;  %2664 = vmatmul.mubr.f32.gmra.mrb[14].mxu0 %v2393_v8  ;;  %1248 = vrot.lane.b32.xlu1 %v1747_v59, %s3221_s28 }
 0x1aa   : > { %1648 = vrot.lane.b32.xlu0 %v2141_v56, %s3223_s25  ;;  %3117 = vmatprep.mubr.msk.f32.mxu0 %vm648_vm0, %v2396_v14 }
 0x1ab   : > { %v1432_v31 = vpop.permute.xlu1 %1431 }
 0x1ac   : > { %v1255_v1 = vpop.permute.xlu0 %1254  ;;  %1519 = vst.msk [vmem:[#allocation3 + $0x90] sm:$0xff] %vm1509_vm6, %v1432_v31 }
 0x1ad   : > { %1334 = vst.msk [vmem:[#allocation3 + $0x110] sm:$0xff] %vm1316_vm5, %v1255_v1  ;;  %2019 = vrot.lane.b32.xlu1 %v3876_v52, %s3226_s18  ;;  %v2418_v1 = vld [vmem:[#allocation3 + $0x138] sm:$0xff] }
 0x1ae   : > { %1841 = vrot.lane.b32.xlu0 %v1756_v48, %s3225_s15 }
 0x1af   : > { %v2203_v36 = vpop.permute.xlu1 %2202 }
 0x1b0   : > { %v2026_v22 = vpop.permute.xlu0 %2025  ;;  %2291 = vst.msk [vmem:[#allocation3 + $0x80] sm:$0xff] %vm2282_vm10, %v2203_v36 }
 0x1b1   : > { %2106 = vst.msk [vmem:[#allocation3 + $0x100] sm:$0xff] %vm2089_vm9, %v2026_v22  ;;  %1441 = vrot.lane.b32.xlu1 %v3874_v51, %s3224_s26  ;;  %v2398_v51 = vld [vmem:[#allocation3 + $0x98] sm:$0xff]  ;;  %v2146_v22 = vld [vmem:[#allocation2 + $0x151] sm:$0xff] }
 0x1b2   : > { %1264 = vrot.lane.b32.xlu0 %v1755_v29, %s3221_s28  ;;  %v2416_v29 = vld [vmem:[#allocation3 + $0x128] sm:$0xff] }
 0x1b3   : > { %v1625_v24 = vpop.permute.xlu1 %1624 }
 0x1b4   : > { %v1448_v34 = vpop.permute.xlu0 %1447  ;;  %1712 = vst.msk [vmem:[#allocation3 + $0x90] sm:$0xff] %vm1702_vm7, %v1625_v24 }
 0x1b5   : > { %1527 = vst.msk [vmem:[#allocation3 + $0x110] sm:$0xff] %vm1509_vm6, %v1448_v34  ;;  %2212 = vrot.lane.b32.xlu1 %v2135_v19, %s3227_s19 }
 0x1b6   : > { %2035 = vrot.lane.b32.xlu0 %v4855_v21, %s3226_s18 }
 0x1b7   : > { %v1818_v2 = vpop.permute.xlu1 %1817  ;;  %v2395_v11 = vld [vmem:[#allocation3 + $0x80] sm:$0xff] }
 0x1b8   : > { %v2219_v60 = vpop.permute.xlu0 %2218  ;;  %1905 = vst.msk [vmem:[#allocation3 + $0x90] sm:$0xff] %vm1895_vm8, %v1818_v2  ;;  %2669 = vmatmul.mubr.f32.gmra.mrb[16].mxu0 %v2395_v11 }
 0x1b9   : > { %2299 = vst.msk [vmem:[#allocation3 + $0x100] sm:$0xff] %vm2282_vm10, %v2219_v60  ;;  %1634 = vrot.lane.b32.xlu1 %v2134_v0, %s3223_s25  ;;  %3118 = vmatprep.mubr.msk.f32.mxu0 %vm648_vm0, %v2398_v51  ;;  %v2137_v0 = vld [vmem:[#allocation2 + $0xe1] sm:$0xff] }
 0x1ba   : > { %1457 = vrot.lane.b32.xlu0 %v3986_v61, %s3224_s26  ;;  %v2414_v61 = vld [vmem:[#allocation3 + $0x118] sm:$0xff] }
 0x1bb   : > { %v1241_v13 = vpop.permute.xlu1 %1240 }
 0x1bc   : > { %v1641_v50 = vpop.permute.xlu0 %1640  ;;  %1327 = vst.msk [vmem:[#allocation3 + $0xa0] sm:$0xff] %vm1316_vm5, %v1241_v13  ;;  %v4464_v13 = vld [vmem:[#allocation2 + $0x159] sm:$0xff] }
 0x1bd   : > { %1720 = vst.msk [vmem:[#allocation3 + $0x110] sm:$0xff] %vm1702_vm7, %v1641_v50  ;;  %1827 = vrot.lane.b32.xlu1 %v1749_v33, %s3225_s15  ;;  %v2404_v50 = vld [vmem:[#allocation3 + $0xc8] sm:$0xff] }
 0x1be   : > { %2228 = vrot.lane.b32.xlu0 %v2143_v6, %s3227_s19 }
 0x1bf   : > { %v2012_v23 = vpop.permute.xlu1 %2011 }
 0x1c0   : > { %v1834_v28 = vpop.permute.xlu0 %1833  ;;  %v2411_v16 = vld [vmem:[#allocation3 + $0x100] sm:$0xff]  ;;  %2099 = vst.msk [vmem:[#allocation3 + $0x90] sm:$0xff] %vm2089_vm9, %v2012_v23 }
 0x1c1   : > { %1913 = vst.msk [vmem:[#allocation3 + $0x110] sm:$0xff] %vm1895_vm8, %v1834_v28  ;;  %2709 = vmatmul.mubr.f32.vlgmr.msra.gmra.mrb[0].mxu1 %v2411_v16  ;;  %1250 = vrot.lane.b32.xlu1 %v1748_v30, %s3221_s28 }
 0x1c2   : > { %1650 = vrot.lane.b32.xlu0 %v2142_v5, %s3223_s25  ;;  %3126 = vmatprep.mubr.msk.f32.mxu1 %vm648_vm0, %v2414_v61  ;;  %v2402_v5 = vld [vmem:[#allocation3 + $0xb8] sm:$0xff] }
 0x1c3   : > { %v1434_v15 = vpop.permute.xlu1 %1433  ;;  %v4477_v61 = vld [vmem:[#allocation2 + $0x169] sm:$0xff] }
 0x1c4   : > { %v1257_v27 = vpop.permute.xlu0 %1256  ;;  %1520 = vst.msk [vmem:[#allocation3 + $0xa0] sm:$0xff] %vm1509_vm6, %v1434_v15  ;;  %v2420_v15 = vld [vmem:[#allocation3 + $0x148] sm:$0xff] }
 0x1c5   : > { %1335 = vst.msk [vmem:[#allocation3 + $0x120] sm:$0xff] %vm1316_vm5, %v1257_v27  ;;  %2021 = vrot.lane.b32.xlu1 %v3905_v18, %s3226_s18  ;;  %v2136_v18 = vld [vmem:[#allocation2 + $0xd9] sm:$0xff] }
 0x1c6   : > { %1843 = vrot.lane.b32.xlu0 %v1757_v38, %s3225_s15 }
 0x1c7   : > { %v2205_v57 = vpop.permute.xlu1 %2204 }
 0x1c8   : > { %v2028_v26 = vpop.permute.xlu0 %2027  ;;  %2292 = vst.msk [vmem:[#allocation3 + $0x90] sm:$0xff] %vm2282_vm10, %v2205_v57 }
 0x1c9   : > { %2107 = vst.msk [vmem:[#allocation3 + $0x110] sm:$0xff] %vm2089_vm9, %v2028_v26  ;;  %1443 = vrot.lane.b32.xlu1 %v3876_v52, %s3224_s26  ;;  %v2400_v52 = vld [vmem:[#allocation3 + $0xa8] sm:$0xff] }
 0x1ca   : > { %1266 = vrot.lane.b32.xlu0 %v1756_v48, %s3221_s28 }
 0x1cb   : > { %v1627_v44 = vpop.permute.xlu1 %1626 }
 0x1cc   : > { %v1450_v46 = vpop.permute.xlu0 %1449  ;;  %1713 = vst.msk [vmem:[#allocation3 + $0xa0] sm:$0xff] %vm1702_vm7, %v1627_v44 }
 0x1cd   : > { %1528 = vst.msk [vmem:[#allocation3 + $0x120] sm:$0xff] %vm1509_vm6, %v1450_v46  ;;  %2214 = vrot.lane.b32.xlu1 %v2136_v18, %s3227_s19  ;;  %v1762_v18 = vld [vmem:[#allocation2 + $0x15a] sm:$0xff] }
 0x1ce   : > { %2037 = vrot.lane.b32.xlu0 %v4009_v35, %s3226_s18 }
 0x1cf   : > { %v1820_v58 = vpop.permute.xlu1 %1819  ;;  %v2397_v59 = vld [vmem:[#allocation3 + $0x90] sm:$0xff] }
 0x1d0   : > { %v2221_v37 = vpop.permute.xlu0 %2220  ;;  %1906 = vst.msk [vmem:[#allocation3 + $0xa0] sm:$0xff] %vm1895_vm8, %v1820_v58  ;;  %2674 = vmatmul.mubr.f32.gmra.mrb[18].mxu0 %v2397_v59  ;;  %v2406_v59 = vld [vmem:[#allocation3 + $0xd8] sm:$0xff] }
 0x1d1   : > { %2300 = vst.msk [vmem:[#allocation3 + $0x110] sm:$0xff] %vm2282_vm10, %v2221_v37  ;;  %1636 = vrot.lane.b32.xlu1 %v2135_v19, %s3223_s25  ;;  %3119 = vmatprep.mubr.msk.f32.mxu0 %vm648_vm0, %v2400_v52  ;;  %v1760_v19 = vld [vmem:[#allocation2 + $0x142] sm:$0xff] }
 0x1d2   : > { %1459 = vrot.lane.b32.xlu0 %v4855_v21, %s3224_s26 }
 0x1d3   : > { %v1243_v56 = vpop.permute.xlu1 %1242 }
 0x1d4   : > { %v1643_v43 = vpop.permute.xlu0 %1642  ;;  %1328 = vst.msk [vmem:[#allocation3 + $0xb0] sm:$0xff] %vm1316_vm5, %v1243_v56  ;;  %v1763_v56 = vld [vmem:[#allocation2 + $0x16a] sm:$0xff] }
 0x1d5   : > { %1721 = vst.msk [vmem:[#allocation3 + $0x120] sm:$0xff] %vm1702_vm7, %v1643_v43  ;;  %1829 = vrot.lane.b32.xlu1 %v1750_v32, %s3225_s15  ;;  %v4507_v43 = vld [vmem:[#allocation2 + $0x171] sm:$0xff] }
 0x1d6   : > { %2230 = vrot.lane.b32.xlu0 %v2144_v47, %s3227_s19 }
 0x1d7   : > { %v2014_v9 = vpop.permute.xlu1 %2013 }
 0x1d8   : > { %v1836_v17 = vpop.permute.xlu0 %1835  ;;  %v2413_v3 = vld [vmem:[#allocation3 + $0x110] sm:$0xff]  ;;  %2100 = vst.msk [vmem:[#allocation3 + $0xa0] sm:$0xff] %vm2089_vm9, %v2014_v9 }
 0x1d9   : > { %1914 = vst.msk [vmem:[#allocation3 + $0x120] sm:$0xff] %vm1895_vm8, %v1836_v17  ;;  %2714 = vmatmul.mubr.f32.gmra.mrb[2].mxu1 %v2413_v3  ;;  %1268 = vrot.lane.b32.xlu1 %v1757_v38, %s3221_s28  ;;  %v1957_v17 = vld [vmem:[#allocation2 + $0x180] sm:$0xff]  ;;  %v2422_v3 = vld [vmem:[#allocation3 + $0x158] sm:$0xff] }
 0x1da   : > { %1652 = vrot.lane.b32.xlu0 %v2143_v6, %s3223_s25  ;;  %3127 = vmatprep.mubr.msk.f32.mxu1 %vm648_vm0, %v2416_v29  ;;  %v4520_v29 = vld [vmem:[%s4846_s7] ss:$0 sm:$0xff] }
 0x1db   : > { %v1436_v4 = vpop.permute.xlu1 %1435 }
 0x1dc   : > { %v1259_v39 = vpop.permute.xlu0 %1258  ;;  %1521 = vst.msk [vmem:[#allocation3 + $0xb0] sm:$0xff] %vm1509_vm6, %v1436_v4 }
 0x1dd   : > { %1336 = vst.msk [vmem:[#allocation3 + $0x130] sm:$0xff] %vm1316_vm5, %v1259_v39  ;;  %2039 = vrot.lane.b32.xlu1 %v4856_v63, %s3226_s18 }
 0x1de   : > { %1845 = vrot.lane.b32.xlu0 %v1758_v42, %s3225_s15 }
 0x1df   : > { %v2207_v25 = vpop.permute.xlu1 %2206 }
 0x1e0   : > { %v2030_v62 = vpop.permute.xlu0 %2029  ;;  %2293 = vst.msk [vmem:[#allocation3 + $0xa0] sm:$0xff] %vm2282_vm10, %v2207_v25 }
 0x1e1   : > { %2108 = vst.msk [vmem:[#allocation3 + $0x120] sm:$0xff] %vm2089_vm9, %v2030_v62  ;;  %2216 = vrot.lane.b32.xlu1 %v2137_v0, %s3227_s19  ;;  %v2150_v62 = vld [vmem:[#allocation2 + $0x181] sm:$0xff] }
 0x1e2   : > { %2023 = vrot.lane.b32.xlu0 %v3907_v12, %s3226_s18  ;;  %v2145_v12 = vld [vmem:[#allocation2 + $0x141] sm:$0xff] }
 0x1e3   : > { %v1629_v53 = vpop.permute.xlu1 %1628 }
 0x1e4   : > { %v1452_v49 = vpop.permute.xlu0 %1451  ;;  %1714 = vst.msk [vmem:[#allocation3 + $0xb0] sm:$0xff] %vm1702_vm7, %v1629_v53 }
 0x1e5   : > { %1529 = vst.msk [vmem:[#allocation3 + $0x130] sm:$0xff] %vm1509_vm6, %v1452_v49  ;;  %1654 = vrot.lane.b32.xlu1 %v2144_v47, %s3223_s25 }
 0x1e6   : > { %1461 = vrot.lane.b32.xlu0 %v4009_v35, %s3224_s26  ;;  %v1759_v35 = vld [vmem:[#allocation2 + $0x13a] sm:$0xff] }
 0x1e7   : > { %v1822_v45 = vpop.permute.xlu1 %1821  ;;  %v2399_v30 = vld [vmem:[#allocation3 + $0xa0] sm:$0xff] }
 0x1e8   : > { %v2223_v10 = vpop.permute.xlu0 %2222  ;;  %1907 = vst.msk [vmem:[#allocation3 + $0xb0] sm:$0xff] %vm1895_vm8, %v1822_v45  ;;  %2679 = vmatmul.mubr.f32.gmra.mrb[20].mxu0 %v2399_v30 }
 0x1e9   : > { %2301 = vst.msk [vmem:[#allocation3 + $0x120] sm:$0xff] %vm2282_vm10, %v2223_v10  ;;  %1270 = vrot.lane.b32.xlu1 %v1758_v42, %s3221_s28  ;;  %3120 = vmatprep.mubr.msk.f32.mxu0 %vm648_vm0, %v2402_v5 }
 0x1ea   : > { %2232 = vrot.lane.b32.xlu0 %v2145_v12, %s3227_s19 }
 0x1eb   : > { %v1245_v7 = vpop.permute.xlu1 %1244 }
 0x1ec   : > { %v1645_v41 = vpop.permute.xlu0 %1644  ;;  %1329 = vst.msk [vmem:[#allocation3 + $0xc0] sm:$0xff] %vm1316_vm5, %v1245_v7 }
 0x1ed   : > { %1722 = vst.msk [vmem:[#allocation3 + $0x130] sm:$0xff] %vm1702_vm7, %v1645_v41  ;;  %1463 = vrot.lane.b32.xlu1 %v4856_v63, %s3224_s26 }
 0x1ee   : > { %1847 = vrot.lane.b32.xlu0 %v1759_v35, %s3225_s15 }
 0x1ef   : > { %v2016_v8 = vpop.permute.xlu1 %2015 }
 0x1f0   : > { %v1838_v14 = vpop.permute.xlu0 %1837  ;;  %v2415_v31 = vld [vmem:[#allocation3 + $0x120] sm:$0xff]  ;;  %2101 = vst.msk [vmem:[#allocation3 + $0xb0] sm:$0xff] %vm2089_vm9, %v2016_v8  ;;  %v2408_v8 = vld [vmem:[#allocation3 + $0xe8] sm:$0xff] }
 0x1f1   : > { %1915 = vst.msk [vmem:[#allocation3 + $0x130] sm:$0xff] %vm1895_vm8, %v1838_v14  ;;  %2719 = vmatmul.mubr.f32.gmra.mrb[4].mxu1 %v2415_v31  ;;  %1656 = vrot.lane.b32.xlu1 %v2145_v12, %s3223_s25 }
 0x1f2   : > { %2041 = vrot.lane.b32.xlu0 %v4039_v54, %s3226_s18  ;;  %3128 = vmatprep.mubr.msk.f32.mxu1 %vm648_vm0, %v2418_v1 }
 0x1f3   : > { %v1438_v48 = vpop.permute.xlu1 %1437 }
 0x1f4   : > { %v1261_v36 = vpop.permute.xlu0 %1260  ;;  %1522 = vst.msk [vmem:[#allocation3 + $0xc0] sm:$0xff] %vm1509_vm6, %v1438_v48 }
 0x1f5   : > { %1337 = vst.msk [vmem:[#allocation3 + $0x140] sm:$0xff] %vm1316_vm5, %v1261_v36  ;;  %1272 = vrot.lane.b32.xlu1 %v1759_v35, %s3221_s28  ;;  %v1764_v35 = vld [vmem:[#allocation2 + $0x172] sm:$0xff] }
 0x1f6   : > { %2234 = vrot.lane.b32.xlu0 %v2146_v22, %s3227_s19 }
 0x1f7   : > { %v2209_v24 = vpop.permute.xlu1 %2208 }
 0x1f8   : > { %v2032_v34 = vpop.permute.xlu0 %2031  ;;  %2294 = vst.msk [vmem:[#allocation3 + $0xb0] sm:$0xff] %vm2282_vm10, %v2209_v24 }
 0x1f9   : > { %2109 = vst.msk [vmem:[#allocation3 + $0x130] sm:$0xff] %vm2089_vm9, %v2032_v34  ;;  %1465 = vrot.lane.b32.xlu1 %v4039_v54, %s3224_s26  ;;  %v1761_v54 = vld [vmem:[#allocation2 + $0x152] sm:$0xff] }
 0x1fa   : > { %1849 = vrot.lane.b32.xlu0 %v1760_v19, %s3225_s15 }
 0x1fb   : > { %v1631_v21 = vpop.permute.xlu1 %1630 }
 0x1fc   : > { %v1454_v2 = vpop.permute.xlu0 %1453  ;;  %1715 = vst.msk [vmem:[#allocation3 + $0xc0] sm:$0xff] %vm1702_vm7, %v1631_v21 }
 0x1fd   : > { %1530 = vst.msk [vmem:[#allocation3 + $0x140] sm:$0xff] %vm1509_vm6, %v1454_v2  ;;  %1658 = vrot.lane.b32.xlu1 %v2146_v22, %s3223_s25 }
 0x1fe   : > { %2043 = vrot.lane.b32.xlu0 %v4042_v55, %s3226_s18 }
 0x1ff   : > { %v1824_v60 = vpop.permute.xlu1 %1823  ;;  %v2401_v51 = vld [vmem:[#allocation3 + $0xb0] sm:$0xff] }
 0x200   : > { %v2225_v11 = vpop.permute.xlu0 %2224  ;;  %1908 = vst.msk [vmem:[#allocation3 + $0xc0] sm:$0xff] %vm1895_vm8, %v1824_v60  ;;  %2684 = vmatmul.mubr.f32.gmra.mrb[22].mxu0 %v2401_v51  ;;  %v1765_v51 = vld [vmem:[#allocation2 + $0x182] sm:$0xff] }
 0x201   : > { %2302 = vst.msk [vmem:[#allocation3 + $0x130] sm:$0xff] %vm2282_vm10, %v2225_v11  ;;  %1851 = vrot.lane.b32.xlu1 %v1761_v54, %s3225_s15  ;;  %3121 = vmatprep.mubr.msk.f32.mxu0 %vm648_vm0, %v2404_v50  ;;  %v2345_v50 = vld [vmem:[#allocation2 + $0x19a] sm:$0xff] }
 0x202   : > { %2236 = vrot.lane.b32.xlu0 %v4464_v13, %s3227_s19  ;;  %2377 = vst.msk [vmem:[#allocation3 + $0x1e8] sm:$0xff] %vm648_vm0, %v2345_v50 }
 0x203   : > { %v1247_v33 = vpop.permute.xlu1 %1246 }
 0x204   : > { %v1647_v6 = vpop.permute.xlu0 %1646  ;;  %1330 = vst.msk [vmem:[#allocation3 + $0xd0] sm:$0xff] %vm1316_vm5, %v1247_v33  ;;  %v1959_v33 = vld [vmem:[#allocation2 + $0x198] sm:$0xff] }
 0x205   : > { %1723 = vst.msk [vmem:[#allocation3 + $0x140] sm:$0xff] %vm1702_vm7, %v1647_v6  ;;  %2045 = vrot.lane.b32.xlu1 %v4062_v40, %s3226_s18 }
 0x206   : > { %1081 = vrot.lane.b32.xlu0 %v2145_v12, %s3220_s27 }
 0x207   : > { %v2018_v23 = vpop.permute.xlu1 %2017 }
 0x208   : > { %v1840_v28 = vpop.permute.xlu0 %1839  ;;  %v2417_v16 = vld [vmem:[#allocation3 + $0x130] sm:$0xff]  ;;  %2102 = vst.msk [vmem:[#allocation3 + $0xc0] sm:$0xff] %vm2089_vm9, %v2018_v23 }
 0x209   : > { %1916 = vst.msk [vmem:[#allocation3 + $0x140] sm:$0xff] %vm1895_vm8, %v1840_v28  ;;  %2724 = vmatmul.mubr.f32.gmra.mrb[6].mxu1 %v2417_v16  ;;  %2238 = vrot.lane.b32.xlu1 %v4477_v61, %s3227_s19 }
 0x20a   : > { %1274 = vrot.lane.b32.xlu0 %v1760_v19, %s3221_s28  ;;  %3129 = vmatprep.mubr.msk.f32.mxu1 %vm648_vm0, %v2420_v15  ;;  %v1958_v19 = vld [vmem:[#allocation2 + $0x188] sm:$0xff] }
 0x20b   : > { %v1440_v27 = vpop.permute.xlu1 %1439 }
 0x20c   : > { %v1263_v38 = vpop.permute.xlu0 %1262  ;;  %1523 = vst.msk [vmem:[#allocation3 + $0xd0] sm:$0xff] %vm1509_vm6, %v1440_v27 }
 0x20d   : > { %1338 = vst.msk [vmem:[#allocation3 + $0x150] sm:$0xff] %vm1316_vm5, %v1263_v38  ;;  %1083 = vrot.lane.b32.xlu1 %v2146_v22, %s3220_s27  ;;  %v2152_v38 = vld [vmem:[#allocation2 + $0x199] sm:$0xff] }
 0x20e   : > { %1467 = vrot.lane.b32.xlu0 %v4042_v55, %s3224_s26 }
 0x20f   : > { %v2211_v57 = vpop.permute.xlu1 %2210 }
 0x210   : > { %v2034_v26 = vpop.permute.xlu0 %2033  ;;  %2295 = vst.msk [vmem:[#allocation3 + $0xc0] sm:$0xff] %vm2282_vm10, %v2211_v57 }
 0x211   : > { %2110 = vst.msk [vmem:[#allocation3 + $0x140] sm:$0xff] %vm2089_vm9, %v2034_v26  ;;  %1276 = vrot.lane.b32.xlu1 %v1761_v54, %s3221_s28  ;;  %v2151_v54 = vld [vmem:[#allocation2 + $0x189] sm:$0xff] }
 0x212   : > { %1660 = vrot.lane.b32.xlu0 %v4464_v13, %s3223_s25 }
 0x213   : > { %v1633_v44 = vpop.permute.xlu1 %1632 }
 0x214   : > { %v1456_v46 = vpop.permute.xlu0 %1455  ;;  %1716 = vst.msk [vmem:[#allocation3 + $0xd0] sm:$0xff] %vm1702_vm7, %v1633_v44 }
 0x215   : > { %1531 = vst.msk [vmem:[#allocation3 + $0x150] sm:$0xff] %vm1509_vm6, %v1456_v46  ;;  %1469 = vrot.lane.b32.xlu1 %v4062_v40, %s3224_s26 }
 0x216   : > { %1853 = vrot.lane.b32.xlu0 %v1762_v18, %s3225_s15 }
 0x217   : > { %v1826_v55 = vpop.permute.xlu1 %1825  ;;  %v2403_v37 = vld [vmem:[#allocation3 + $0xc0] sm:$0xff] }
 0x218   : > { %v2227_v58 = vpop.permute.xlu0 %2226  ;;  %1909 = vst.msk [vmem:[#allocation3 + $0xd0] sm:$0xff] %vm1895_vm8, %v1826_v55  ;;  %2689 = vmatmul.mubr.f32.gmra.mrb[24].mxu0 %v2403_v37  ;;  %v1766_v37 = vld [vmem:[#allocation2 + $0x18a] sm:$0xff] }
 0x219   : > { %2303 = vst.msk [vmem:[#allocation3 + $0x140] sm:$0xff] %vm2282_vm10, %v2227_v58  ;;  %1662 = vrot.lane.b32.xlu1 %v4477_v61, %s3223_s25  ;;  %3122 = vmatprep.mubr.msk.f32.mxu0 %vm648_vm0, %v2406_v59  ;;  %v2153_v59 = vld [vmem:[#allocation2 + $0x1a1] sm:$0xff] }
 0x21a   : > { %2047 = vrot.lane.b32.xlu0 %v4065_v20, %s3226_s18 }
 0x21b   : > { %v1249_v40 = vpop.permute.xlu1 %1248 }
 0x21c   : > { %v1649_v52 = vpop.permute.xlu0 %1648  ;;  %1331 = vst.msk [vmem:[#allocation3 + $0xe0] sm:$0xff] %vm1316_vm5, %v1249_v40 }
 0x21d   : > { %1724 = vst.msk [vmem:[#allocation3 + $0x150] sm:$0xff] %vm1702_vm7, %v1649_v52  ;;  %1855 = vrot.lane.b32.xlu1 %v1763_v56, %s3225_s15 }
 0x21e   : > { %2240 = vrot.lane.b32.xlu0 %v4507_v43, %s3227_s19 }
 0x21f   : > { %v2020_v32 = vpop.permute.xlu1 %2019 }
 0x220   : > { %v1842_v47 = vpop.permute.xlu0 %1841  ;;  %v2419_v9 = vld [vmem:[#allocation3 + $0x140] sm:$0xff]  ;;  %2103 = vst.msk [vmem:[#allocation3 + $0xd0] sm:$0xff] %vm2089_vm9, %v2020_v32 }
 0x221   : > { %1917 = vst.msk [vmem:[#allocation3 + $0x150] sm:$0xff] %vm1895_vm8, %v1842_v47  ;;  %2729 = vmatmul.mubr.f32.gmra.mrb[8].mxu1 %v2419_v9  ;;  %2049 = vrot.lane.b32.xlu1 %v1957_v17, %s3226_s18  ;;  %v2410_v9 = vld [vmem:[#allocation3 + $0xf8] sm:$0xff] }
 0x222   : > { %1085 = vrot.lane.b32.xlu0 %v4464_v13, %s3220_s27  ;;  %3130 = vmatprep.mubr.msk.f32.mxu1 %vm648_vm0, %v2422_v3  ;;  %v2424_v13 = vld [vmem:[#allocation3 + $0x168] sm:$0xff] }
 0x223   : > { %v1442_v4 = vpop.permute.xlu1 %1441 }
 0x224   : > { %v2630_v39 = vpop.f32.mrb[0].mxu0  ;;  %1524 = vst.msk [vmem:[#allocation3 + $0xe0] sm:$0xff] %vm1509_vm6, %v1442_v4  ;;  %v1265_v63 = vpop.permute.xlu0 %1264 }
 0x225   : > { %v2631_v42 = vadd.f32 %v4520_v29, %v2630_v39  ;;  %v2632_v25 = vpop.f32.mrb[1].mxu0  ;;  %1339 = vst.msk [vmem:[#allocation3 + $0x160] sm:$0xff] %vm1316_vm5, %v1265_v63  ;;  %2242 = vrot.lane.b32.xlu1 %v2150_v62, %s3227_s19  ;;  %v1960_v63 = vld [vmem:[#allocation2 + $0x1a0] sm:$0xff] }
 0x226   : > { %1278 = vrot.lane.b32.xlu0 %v1762_v18, %s3221_s28 }
 0x227   : > { %2789 = vst.msk [vmem:[%s4527_s24] sm:$0xff] %vm705_vm2, %v2631_v42  ;;  %v2213_v0 = vpop.permute.xlu1 %2212  ;;  %v2892_v5 = vmul.f32 %v2631_v42, %v2631_v42  ;;  %v2821_v14 = vsel %vm705_vm2, %v2631_v42, 0.0 }
 0x228   : > { %2296 = vst.msk [vmem:[#allocation3 + $0xd0] sm:$0xff] %vm2282_vm10, %v2213_v0  ;;  %v2036_v53 = vpop.permute.xlu0 %2035 }
 0x229   : > { %2111 = vst.msk [vmem:[#allocation3 + $0x150] sm:$0xff] %vm2089_vm9, %v2036_v53  ;;  %1087 = vrot.lane.b32.xlu1 %v4477_v61, %s3220_s27  ;;  %v2924_v22 = vsel %vm705_vm2, %v2892_v5, 0.0 }
 0x22a   : > { %1471 = vrot.lane.b32.xlu0 %v4065_v20, %s3224_s26 }
 0x22b   : > { %v1635_v49 = vpop.permute.xlu1 %1634 }
 0x22c   : > { %1717 = vst.msk [vmem:[#allocation3 + $0xe0] sm:$0xff] %vm1702_vm7, %v1635_v49  ;;  %v1458_v45 = vpop.permute.xlu0 %1457 }
 0x22d   : > { %1532 = vst.msk [vmem:[#allocation3 + $0x160] sm:$0xff] %vm1509_vm6, %v1458_v45  ;;  %1280 = vrot.lane.b32.xlu1 %v1763_v56, %s3221_s28 }
 0x22e   : > { %1664 = vrot.lane.b32.xlu0 %v4507_v43, %s3223_s25 }
 0x22f   : > { %v1828_v10 = vpop.permute.xlu1 %1827  ;;  %v2405_v12 = vld [vmem:[#allocation3 + $0xd0] sm:$0xff] }
 0x230   : > { %v2635_v30 = vpop.f32.mrb[2].mxu0  ;;  %1910 = vst.msk [vmem:[#allocation3 + $0xe0] sm:$0xff] %vm1895_vm8, %v1828_v10  ;;  %v2229_v7 = vpop.permute.xlu0 %2228  ;;  %2694 = vmatmul.mubr.f32.gmra.mrb[26].mxu0 %v2405_v12  ;;  %v2426_v10 = vld [vmem:[#allocation3 + $0x178] sm:$0xff] }
 0x231   : > { %v2636_v20 = vadd.f32 %v4520_v29, %v2635_v30  ;;  %v2637_v41 = vpop.f32.mrb[3].mxu0  ;;  %2304 = vst.msk [vmem:[#allocation3 + $0x150] sm:$0xff] %vm2282_vm10, %v2229_v7  ;;  %1473 = vrot.lane.b32.xlu1 %v1957_v17, %s3224_s26  ;;  %3123 = vmatprep.mubr.msk.f32.mxu0 %vm648_vm0, %v2408_v8  ;;  %v2346_v17 = vld [vmem:[#allocation2 + $0x1a2] sm:$0xff] }
 0x232   : > { %1857 = vrot.lane.b32.xlu0 %v1764_v35, %s3225_s15  ;;  %2378 = vst.msk [vmem:[#allocation3 + $0x1f8] sm:$0xff] %vm648_vm0, %v2346_v17 }
 0x233   : > { %2790 = vst.msk [vmem:[%s4527_s24 + $0x8] sm:$0xff] %vm705_vm2, %v2636_v20  ;;  %v2822_v31 = vsel %vm705_vm2, %v2636_v20, 0.0  ;;  %v2893_v1 = vmul.f32 %v2636_v20, %v2636_v20  ;;  %v1251_v36 = vpop.permute.xlu1 %1250 }
 0x234   : > { %v2823_v48 = vadd.f32 %v2822_v31, %v2821_v14  ;;  %1332 = vst.msk [vmem:[#allocation3 + $0xf0] sm:$0xff] %vm1316_vm5, %v1251_v36  ;;  %v1651_v34 = vpop.permute.xlu0 %1650 }
 0x235   : > { %v2925_v24 = vsel %vm705_vm2, %v2893_v1, 0.0  ;;  %1725 = vst.msk [vmem:[#allocation3 + $0x160] sm:$0xff] %vm1702_vm7, %v1651_v34  ;;  %1666 = vrot.lane.b32.xlu1 %v2150_v62, %s3223_s25 }
 0x236   : > { %v2926_v21 = vadd.f32 %v2925_v24, %v2924_v22  ;;  %2051 = vrot.lane.b32.xlu0 %v1958_v19, %s3226_s18 }
 0x237   : > { %v2022_v2 = vpop.permute.xlu1 %2021 }
 0x238   : > { %2104 = vst.msk [vmem:[#allocation3 + $0xe0] sm:$0xff] %vm2089_vm9, %v2022_v2  ;;  %v1844_v60 = vpop.permute.xlu0 %1843  ;;  %v2421_v11 = vld [vmem:[#allocation3 + $0x150] sm:$0xff] }
 0x239   : > { %1918 = vst.msk [vmem:[#allocation3 + $0x160] sm:$0xff] %vm1895_vm8, %v1844_v60  ;;  %2734 = vmatmul.mubr.f32.gmra.mrb[10].mxu1 %v2421_v11  ;;  %1859 = vrot.lane.b32.xlu1 %v1765_v51, %s3225_s15 }
 0x23a   : > { %2244 = vrot.lane.b32.xlu0 %v2151_v54, %s3227_s19  ;;  %3131 = vmatprep.mubr.msk.f32.mxu1 %vm648_vm0, %v2424_v13 }
 0x23b   : > { %v1444_v6 = vpop.permute.xlu1 %1443 }
 0x23c   : > { %v2640_v23 = vpop.f32.mrb[4].mxu0  ;;  %1525 = vst.msk [vmem:[#allocation3 + $0xf0] sm:$0xff] %vm1509_vm6, %v1444_v6  ;;  %v1267_v28 = vpop.permute.xlu0 %1266 }
 0x23d   : > { %v2641_v16 = vadd.f32 %v4520_v29, %v2640_v23  ;;  %v2642_v61 = vpop.f32.mrb[5].mxu0  ;;  %1340 = vst.msk [vmem:[#allocation3 + $0x170] sm:$0xff] %vm1316_vm5, %v1267_v28  ;;  %2053 = vrot.lane.b32.xlu1 %v1959_v33, %s3226_s18  ;;  %v2428_v28 = vld [vmem:[#allocation3 + $0x188] sm:$0xff] }
 0x23e   : > { %1089 = vrot.lane.b32.xlu0 %v4507_v43, %s3220_s27 }
 0x23f   : > { %2791 = vst.msk [vmem:[%s4527_s24 + $0x10] sm:$0xff] %vm705_vm2, %v2641_v16  ;;  %v2824_v15 = vsel %vm705_vm2, %v2641_v16, 0.0  ;;  %v2894_v27 = vmul.f32 %v2641_v16, %v2641_v16  ;;  %v2215_v26 = vpop.permute.xlu1 %2214 }
 0x240   : > { %v2825_v57 = vadd.f32 %v2824_v15, %v2823_v48  ;;  %2297 = vst.msk [vmem:[#allocation3 + $0xe0] sm:$0xff] %vm2282_vm10, %v2215_v26  ;;  %v2038_v46 = vpop.permute.xlu0 %2037 }
 0x241   : > { %v2927_v44 = vsel %vm705_vm2, %v2894_v27, 0.0  ;;  %2112 = vst.msk [vmem:[#allocation3 + $0x160] sm:$0xff] %vm2089_vm9, %v2038_v46  ;;  %2246 = vrot.lane.b32.xlu1 %v2152_v38, %s3227_s19 }
 0x242   : > { %v2928_v18 = vadd.f32 %v2927_v44, %v2926_v21  ;;  %1282 = vrot.lane.b32.xlu0 %v1764_v35, %s3221_s28  ;;  %s3103_s28 = sshll.u32 %s4858_s10, 1 }
 0x243   : > { %v1637_v55 = vpop.permute.xlu1 %1636  ;;  %s363_s29 = scalar_lea.vmem %s4848_s9, %s3103_s28 }
 0x244   : > { %1718 = vst.msk [vmem:[#allocation3 + $0xf0] sm:$0xff] %vm1702_vm7, %v1637_v55  ;;  %v1460_v58 = vpop.permute.xlu0 %1459 }
 0x245   : > { %1533 = vst.msk [vmem:[#allocation3 + $0x170] sm:$0xff] %vm1509_vm6, %v1460_v58  ;;  %1861 = vrot.lane.b32.xlu1 %v1766_v37, %s3225_s15 }
 0x246   : > { %1475 = vrot.lane.b32.xlu0 %v1958_v19, %s3224_s26 }
 0x247   : > { %v1830_v40 = vpop.permute.xlu1 %1829  ;;  %v2407_v56 = vld [vmem:[#allocation3 + $0xe0] sm:$0xff] }
 0x248   : > { %v2645_v52 = vpop.f32.mrb[6].mxu0  ;;  %1911 = vst.msk [vmem:[#allocation3 + $0xf0] sm:$0xff] %vm1895_vm8, %v1830_v40  ;;  %v2231_v43 = vpop.permute.xlu0 %2230  ;;  %2699 = vmatmul.mubr.f32.gmra.mrb[28].mxu0 %v2407_v56 }
 0x249   : > { %v2646_v32 = vadd.f32 %v4520_v29, %v2645_v52  ;;  %v2647_v47 = vpop.f32.mrb[7].mxu0  ;;  %2305 = vst.msk [vmem:[#allocation3 + $0x160] sm:$0xff] %vm2282_vm10, %v2231_v43  ;;  %3124 = vmatprep.mubr.msk.f32.mxu0 %vm648_vm0, %v2410_v9  ;;  %2248 = vrot.lane.b32.xlu1 %v2153_v59, %s3227_s19  ;;  %v2430_v52 = vld [vmem:[#allocation3 + $0x198] sm:$0xff] }
 0x24a   : > { %1668 = vrot.lane.b32.xlu0 %v2151_v54, %s3223_s25 }
 0x24b   : > { %2792 = vst.msk [vmem:[%s4527_s24 + $0x18] sm:$0xff] %vm705_vm2, %v2646_v32  ;;  %v2826_v3 = vsel %vm705_vm2, %v2646_v32, 0.0  ;;  %v2895_v4 = vmul.f32 %v2646_v32, %v2646_v32  ;;  %v1269_v42 = vpop.permute.xlu1 %1268 }
 0x24c   : > { %v2827_v39 = vadd.f32 %v2826_v3, %v2825_v57  ;;  %1341 = vst.msk [vmem:[#allocation3 + $0x180] sm:$0xff] %vm1316_vm5, %v1269_v42  ;;  %v1653_v62 = vpop.permute.xlu0 %1652 }
 0x24d   : > { %v2929_v25 = vsel %vm705_vm2, %v2895_v4, 0.0  ;;  %1726 = vst.msk [vmem:[#allocation3 + $0x170] sm:$0xff] %vm1702_vm7, %v1653_v62 }
 0x24e   : > { %v2930_v0 = vadd.f32 %v2929_v25, %v2928_v18  ;;  %2055 = vrot.lane.b32.xlu0 %v1960_v63, %s3226_s18  ;;  %v2432_v63 = vld [vmem:[#allocation3 + $0x1a8] sm:$0xff] }
 0x24f   : > { %v2040_v53 = vpop.permute.xlu1 %2039 }
 0x250   : > { %v1846_v49 = vpop.permute.xlu0 %1845  ;;  %v2423_v45 = vld [vmem:[#allocation3 + $0x160] sm:$0xff] }
 0x251   : > { %1919 = vst.msk [vmem:[#allocation3 + $0x170] sm:$0xff] %vm1895_vm8, %v1846_v49  ;;  %2739 = vmatmul.mubr.f32.gmra.mrb[12].mxu1 %v2423_v45 }
 0x252   : > { %2113 = vst.msk [vmem:[#allocation3 + $0x170] sm:$0xff] %vm2089_vm9, %v2040_v53  ;;  %3132 = vmatprep.mubr.msk.f32.mxu1 %vm648_vm0, %v2426_v10 }
 0x253   : > { %v2217_v30 = vpop.permute.xlu1 %2216 }
 0x254   : > { %v2650_v12 = vpop.f32.mrb[8].mxu0  ;;  %v2024_v5 = vpop.permute.xlu0 %2023 }
 0x255   : > { %v2651_v20 = vadd.f32 %v4520_v29, %v2650_v12  ;;  %v2652_v7 = vpop.f32.mrb[9].mxu0  ;;  %2105 = vst.msk [vmem:[#allocation3 + $0xf0] sm:$0xff] %vm2089_vm9, %v2024_v5 }
 0x256   : > { %2298 = vst.msk [vmem:[#allocation3 + $0xf0] sm:$0xff] %vm2282_vm10, %v2217_v30 }
 0x257   : > { %2793 = vst.msk [vmem:[%s4527_s24 + $0x20] sm:$0xff] %vm705_vm2, %v2651_v20  ;;  %v2828_v41 = vsel %vm705_vm2, %v2651_v20, 0.0  ;;  %v2896_v35 = vmul.f32 %v2651_v20, %v2651_v20  ;;  %v1655_v14 = vpop.permute.xlu1 %1654  ;;  %v2434_v20 = vld [vmem:[#allocation3 + $0x1b8] sm:$0xff] }
 0x258   : > { %v2829_v8 = vadd.f32 %v2828_v41, %v2827_v39  ;;  %v1462_v1 = vpop.permute.xlu0 %1461 }
 0x259   : > { %v2931_v31 = vsel %vm705_vm2, %v2896_v35, 0.0  ;;  %1534 = vst.msk [vmem:[#allocation3 + $0x180] sm:$0xff] %vm1509_vm6, %v1462_v1 }
 0x25a   : > { %v2932_v48 = vadd.f32 %v2931_v31, %v2930_v0  ;;  %1727 = vst.msk [vmem:[#allocation3 + $0x180] sm:$0xff] %vm1702_vm7, %v1655_v14 }
 0x25b   : > { %v1271_v36 = vpop.permute.xlu1 %1270 }
 0x25c   : > { %1342 = vst.msk [vmem:[#allocation3 + $0x190] sm:$0xff] %vm1316_vm5, %v1271_v36  ;;  %v2233_v22 = vpop.permute.xlu0 %2232 }
 0x25d   : > { %2306 = vst.msk [vmem:[#allocation3 + $0x170] sm:$0xff] %vm2282_vm10, %v2233_v22  ;;  %v2409_v24 = vld [vmem:[#allocation3 + $0xf0] sm:$0xff] }
 0x25e   : > { %2704 = vmatmul.mubr.f32.gmra.mrb[30].mxu0 %v2409_v24 }
 0x25f   : > { %v1464_v34 = vpop.permute.xlu1 %1463 }
 0x260   : > { %v2655_v19 = vpop.f32.mrb[10].mxu0  ;;  %1535 = vst.msk [vmem:[#allocation3 + $0x190] sm:$0xff] %vm1509_vm6, %v1464_v34  ;;  %v1848_v21 = vpop.permute.xlu0 %1847 }
 0x261   : > { %v2656_v2 = vadd.f32 %v4520_v29, %v2655_v19  ;;  %v2657_v60 = vpop.f32.mrb[11].mxu0  ;;  %1920 = vst.msk [vmem:[#allocation3 + $0x180] sm:$0xff] %vm1895_vm8, %v1848_v21 }
 0x263   : > { %2794 = vst.msk [vmem:[%s4527_s24 + $0x28] sm:$0xff] %vm705_vm2, %v2656_v2  ;;  %v2830_v11 = vsel %vm705_vm2, %v2656_v2, 0.0  ;;  %v2897_v51 = vmul.f32 %v2656_v2, %v2656_v2  ;;  %v1657_v13 = vpop.permute.xlu1 %1656 }
 0x264   : > { %v2831_v54 = vadd.f32 %v2830_v11, %v2829_v8  ;;  %1728 = vst.msk [vmem:[#allocation3 + $0x190] sm:$0xff] %vm1702_vm7, %v1657_v13  ;;  %v2042_v33 = vpop.permute.xlu0 %2041  ;;  %v2425_v6 = vld [vmem:[#allocation3 + $0x170] sm:$0xff] }
 0x265   : > { %v2933_v50 = vsel %vm705_vm2, %v2897_v51, 0.0  ;;  %2114 = vst.msk [vmem:[#allocation3 + $0x180] sm:$0xff] %vm2089_vm9, %v2042_v33  ;;  %2744 = vmatmul.mubr.f32.gmra.mrb[14].mxu1 %v2425_v6  ;;  %v2436_v6 = vld [vmem:[#allocation3 + $0x1c8] sm:$0xff] }
 0x266   : > { %v2934_v23 = vadd.f32 %v2933_v50, %v2932_v48  ;;  %3133 = vmatprep.mubr.msk.f32.mxu1 %vm648_vm0, %v2428_v28 }
 0x267   : > { %v1273_v16 = vpop.permute.xlu1 %1272 }
 0x268   : > { %1343 = vst.msk [vmem:[#allocation3 + $0x1a0] sm:$0xff] %vm1316_vm5, %v1273_v16  ;;  %v2235_v61 = vpop.permute.xlu0 %2234 }
 0x269   : > { %2307 = vst.msk [vmem:[#allocation3 + $0x180] sm:$0xff] %vm2282_vm10, %v2235_v61 }
 0x26b   : > { %v1466_v15 = vpop.permute.xlu1 %1465 }
 0x26c   : > { %v2660_v27 = vpop.f32.mrb[12].mxu0  ;;  %1536 = vst.msk [vmem:[#allocation3 + $0x1a0] sm:$0xff] %vm1509_vm6, %v1466_v15  ;;  %v1850_v38 = vpop.permute.xlu0 %1849 }
 0x26d   : > { %v2661_v57 = vadd.f32 %v4520_v29, %v2660_v27  ;;  %v2662_v26 = vpop.f32.mrb[13].mxu0  ;;  %1921 = vst.msk [vmem:[#allocation3 + $0x190] sm:$0xff] %vm1895_vm8, %v1850_v38  ;;  %v2438_v27 = vld [vmem:[#allocation3 + $0x1d8] sm:$0xff] }
 0x26f   : > { %2795 = vst.msk [vmem:[%s4527_s24 + $0x30] sm:$0xff] %vm705_vm2, %v2661_v57  ;;  %v2832_v44 = vsel %vm705_vm2, %v2661_v57, 0.0  ;;  %v2898_v46 = vmul.f32 %v2661_v57, %v2661_v57  ;;  %v1659_v55 = vpop.permute.xlu1 %1658 }
 0x270   : > { %v2833_v18 = vadd.f32 %v2832_v44, %v2831_v54  ;;  %1729 = vst.msk [vmem:[#allocation3 + $0x1a0] sm:$0xff] %vm1702_vm7, %v1659_v55  ;;  %v2044_v37 = vpop.permute.xlu0 %2043  ;;  %v2427_v59 = vld [vmem:[#allocation3 + $0x180] sm:$0xff] }
 0x271   : > { %v2935_v58 = vsel %vm705_vm2, %v2898_v46, 0.0  ;;  %2115 = vst.msk [vmem:[#allocation3 + $0x190] sm:$0xff] %vm2089_vm9, %v2044_v37  ;;  %2749 = vmatmul.mubr.f32.gmra.mrb[16].mxu1 %v2427_v59 }
 0x272   : > { %v2936_v40 = vadd.f32 %v2935_v58, %v2934_v23  ;;  %3134 = vmatprep.mubr.msk.f32.mxu1 %vm648_vm0, %v2430_v52 }
 0x273   : > { %v1852_v56 = vpop.permute.xlu1 %1851 }
 0x274   : > { %1922 = vst.msk [vmem:[#allocation3 + $0x1a0] sm:$0xff] %vm1895_vm8, %v1852_v56  ;;  %v2237_v43 = vpop.permute.xlu0 %2236 }
 0x275   : > { %2308 = vst.msk [vmem:[#allocation3 + $0x190] sm:$0xff] %vm2282_vm10, %v2237_v43 }
 0x277   : > { %v2046_v32 = vpop.permute.xlu1 %2045 }
 0x278   : > { %2116 = vst.msk [vmem:[#allocation3 + $0x1a0] sm:$0xff] %vm2089_vm9, %v2046_v32  ;;  %v1082_v47 = vpop.permute.xlu0 %1081 }
 0x279   : > { %1151 = vst.msk [vmem:[#allocation3 + $0x1b0] sm:$0xff] %vm1123_vm4, %v1082_v47 }
 0x27b   : > { %v2239_v9 = vpop.permute.xlu1 %2238 }
 0x27c   : > { %v2665_v17 = vpop.f32.mrb[14].mxu0  ;;  %2309 = vst.msk [vmem:[#allocation3 + $0x1a0] sm:$0xff] %vm2282_vm10, %v2239_v9  ;;  %v1275_v3 = vpop.permute.xlu0 %1274  ;;  %v2429_v42 = vld [vmem:[#allocation3 + $0x190] sm:$0xff] }
 0x27d   : > { %v2666_v4 = vadd.f32 %v4520_v29, %v2665_v17  ;;  %v2667_v39 = vpop.f32.mrb[15].mxu0  ;;  %1344 = vst.msk [vmem:[#allocation3 + $0x1b0] sm:$0xff] %vm1316_vm5, %v1275_v3  ;;  %2754 = vmatmul.mubr.f32.gmra.mrb[18].mxu1 %v2429_v42 }
 0x27e   : > { %3135 = vmatprep.mubr.msk.f32.mxu1 %vm648_vm0, %v2432_v63  ;;  %v2440_v39 = vld [vmem:[#allocation3 + $0x1e8] sm:$0xff] }
 0x27f   : > { %2796 = vst.msk [vmem:[%s4527_s24 + $0x38] sm:$0xff] %vm705_vm2, %v2666_v4  ;;  %v2834_v25 = vsel %vm705_vm2, %v2666_v4, 0.0  ;;  %v2899_v62 = vmul.f32 %v2666_v4, %v2666_v4  ;;  %v1084_v53 = vpop.permute.xlu1 %1083 }
 0x280   : > { %v2835_v0 = vadd.f32 %v2834_v25, %v2833_v18  ;;  %1152 = vst.msk [vmem:[#allocation3 + $0x1c0] sm:$0xff] %vm1123_vm4, %v1084_v53  ;;  %v1468_v45 = vpop.permute.xlu0 %1467 }
 0x281   : > { %v2937_v49 = vsel %vm705_vm2, %v2899_v62, 0.0  ;;  %1537 = vst.msk [vmem:[#allocation3 + $0x1b0] sm:$0xff] %vm1509_vm6, %v1468_v45  ;;  %v2442_v62 = vld [vmem:[#allocation3 + $0x1f8] sm:$0xff] }
 0x282   : > { %v2938_v10 = vadd.f32 %v2937_v49, %v2936_v40 }
 0x283   : > { %v1277_v30 = vpop.permute.xlu1 %1276  ;;  %v2431_v12 = vld [vmem:[#allocation3 + $0x1a0] sm:$0xff] }
 0x284   : > { %1345 = vst.msk [vmem:[#allocation3 + $0x1c0] sm:$0xff] %vm1316_vm5, %v1277_v30  ;;  %v1661_v5 = vpop.permute.xlu0 %1660  ;;  %2759 = vmatmul.mubr.f32.gmra.mrb[20].mxu1 %v2431_v12 }
 0x285   : > { %1730 = vst.msk [vmem:[#allocation3 + $0x1b0] sm:$0xff] %vm1702_vm7, %v1661_v5  ;;  %3136 = vmatprep.mubr.msk.f32.mxu1 %vm648_vm0, %v2434_v20 }
 0x287   : > { %v1470_v7 = vpop.permute.xlu1 %1469 }
 0x288   : > { %1538 = vst.msk [vmem:[#allocation3 + $0x1c0] sm:$0xff] %vm1509_vm6, %v1470_v7  ;;  %v1854_v41 = vpop.permute.xlu0 %1853 }
 0x289   : > { %1923 = vst.msk [vmem:[#allocation3 + $0x1b0] sm:$0xff] %vm1895_vm8, %v1854_v41 }
 0x28b   : > { %v1663_v35 = vpop.permute.xlu1 %1662  ;;  %v2670_v8 = vpop.f32.mrb[16].mxu0 }
 0x28c   : > { %1731 = vst.msk [vmem:[#allocation3 + $0x1c0] sm:$0xff] %vm1702_vm7, %v1663_v35  ;;  %v2048_v14 = vpop.permute.xlu0 %2047  ;;  %v2671_v31 = vadd.f32 %v4520_v29, %v2670_v8  ;;  %v2672_v1 = vpop.f32.mrb[17].mxu0 }
 0x28d   : > { %2117 = vst.msk [vmem:[#allocation3 + $0x1b0] sm:$0xff] %vm2089_vm9, %v2048_v14 }
 0x28e   : > { %2797 = vst.msk [vmem:[%s4527_s24 + $0x40] sm:$0xff] %vm705_vm2, %v2671_v31  ;;  %v2836_v48 = vsel %vm705_vm2, %v2671_v31, 0.0  ;;  %v2900_v36 = vmul.f32 %v2671_v31, %v2671_v31 }
 0x28f   : > { %v2837_v22 = vadd.f32 %v2836_v48, %v2835_v0  ;;  %v1856_v24 = vpop.permute.xlu1 %1855 }
 0x290   : > { %v2939_v34 = vsel %vm705_vm2, %v2900_v36, 0.0  ;;  %1924 = vst.msk [vmem:[#allocation3 + $0x1c0] sm:$0xff] %vm1895_vm8, %v1856_v24  ;;  %v2241_v19 = vpop.permute.xlu0 %2240 }
 0x291   : > { %v2940_v21 = vadd.f32 %v2939_v34, %v2938_v10  ;;  %2310 = vst.msk [vmem:[#allocation3 + $0x1b0] sm:$0xff] %vm2282_vm10, %v2241_v19 }
 0x293   : > { %v2050_v2 = vpop.permute.xlu1 %2049 }
 0x294   : > { %v2710_v60 = vpop.f32.mrb[0].mxu1  ;;  %2118 = vst.msk [vmem:[#allocation3 + $0x1c0] sm:$0xff] %vm2089_vm9, %v2050_v2  ;;  %v1086_v51 = vpop.permute.xlu0 %1085 }
 0x295   : > { %v4667_v11 = vadd.f32 %v4520_v29, %v2710_v60  ;;  %v2712_v54 = vpop.f32.mrb[1].mxu1  ;;  %1153 = vst.msk [vmem:[#allocation3 + $0x1d0] sm:$0xff] %vm1123_vm4, %v1086_v51 }
 0x297   : > { %2805 = vst.msk [vmem:[%s4527_s24 + $0x80] sm:$0xff] %vm705_vm2, %v4667_v11  ;;  %v2243_v13 = vpop.permute.xlu1 %2242 }
 0x298   : > { %2311 = vst.msk [vmem:[#allocation3 + $0x1c0] sm:$0xff] %vm2282_vm10, %v2243_v13  ;;  %v1279_v50 = vpop.permute.xlu0 %1278  ;;  %v2433_v33 = vld [vmem:[#allocation3 + $0x1b0] sm:$0xff] }
 0x299   : > { %1346 = vst.msk [vmem:[#allocation3 + $0x1d0] sm:$0xff] %vm1316_vm5, %v1279_v50  ;;  %2764 = vmatmul.mubr.f32.gmra.mrb[22].mxu1 %v2433_v33 }
 0x29a   : > { %3137 = vmatprep.mubr.msk.f32.mxu1 %vm648_vm0, %v2436_v6 }
 0x29b   : > { %v1088_v23 = vpop.permute.xlu1 %1087 }
 0x29c   : > { %1154 = vst.msk [vmem:[#allocation3 + $0x1e0] sm:$0xff] %vm1123_vm4, %v1088_v23  ;;  %v1472_v28 = vpop.permute.xlu0 %1471 }
 0x29d   : > { %1539 = vst.msk [vmem:[#allocation3 + $0x1d0] sm:$0xff] %vm1509_vm6, %v1472_v28 }
 0x29f   : > { %v1281_v16 = vpop.permute.xlu1 %1280  ;;  %v2435_v61 = vld [vmem:[#allocation3 + $0x1c0] sm:$0xff] }
 0x2a0   : > { %1347 = vst.msk [vmem:[#allocation3 + $0x1e0] sm:$0xff] %vm1316_vm5, %v1281_v16  ;;  %v1665_v15 = vpop.permute.xlu0 %1664  ;;  %2769 = vmatmul.mubr.f32.gmra.mrb[24].mxu1 %v2435_v61 }
 0x2a1   : > { %1732 = vst.msk [vmem:[#allocation3 + $0x1d0] sm:$0xff] %vm1702_vm7, %v1665_v15  ;;  %3138 = vmatprep.mubr.msk.f32.mxu1 %vm648_vm0, %v2438_v27 }
 0x2a3   : > { %v1474_v38 = vpop.permute.xlu1 %1473  ;;  %v2675_v57 = vpop.f32.mrb[18].mxu0 }
 0x2a4   : > { %1540 = vst.msk [vmem:[#allocation3 + $0x1e0] sm:$0xff] %vm1509_vm6, %v1474_v38  ;;  %v1858_v26 = vpop.permute.xlu0 %1857  ;;  %v2676_v44 = vadd.f32 %v4520_v29, %v2675_v57  ;;  %v2677_v46 = vpop.f32.mrb[19].mxu0 }
 0x2a5   : > { %1925 = vst.msk [vmem:[#allocation3 + $0x1d0] sm:$0xff] %vm1895_vm8, %v1858_v26 }
 0x2a6   : > { %2798 = vst.msk [vmem:[%s4527_s24 + $0x48] sm:$0xff] %vm705_vm2, %v2676_v44  ;;  %v2838_v18 = vsel %vm705_vm2, %v2676_v44, 0.0  ;;  %v2901_v55 = vmul.f32 %v2676_v44, %v2676_v44 }
 0x2a7   : > { %v2839_v58 = vadd.f32 %v2838_v18, %v2837_v22  ;;  %v1667_v37 = vpop.permute.xlu1 %1666 }
 0x2a8   : > { %v2941_v59 = vsel %vm705_vm2, %v2901_v55, 0.0  ;;  %1733 = vst.msk [vmem:[#allocation3 + $0x1e0] sm:$0xff] %vm1702_vm7, %v1667_v37  ;;  %v2052_v40 = vpop.permute.xlu0 %2051 }
 0x2a9   : > { %v2942_v52 = vadd.f32 %v2941_v59, %v2940_v21  ;;  %2119 = vst.msk [vmem:[#allocation3 + $0x1d0] sm:$0xff] %vm2089_vm9, %v2052_v40 }
 0x2ab   : > { %v1860_v56 = vpop.permute.xlu1 %1859 }
 0x2ac   : > { %v2715_v43 = vpop.f32.mrb[2].mxu1  ;;  %1926 = vst.msk [vmem:[#allocation3 + $0x1e0] sm:$0xff] %vm1895_vm8, %v1860_v56  ;;  %v2245_v47 = vpop.permute.xlu0 %2244 }
 0x2ad   : > { %v4692_v32 = vadd.f32 %v4520_v29, %v2715_v43  ;;  %v2717_v9 = vpop.f32.mrb[3].mxu1  ;;  %2312 = vst.msk [vmem:[#allocation3 + $0x1d0] sm:$0xff] %vm2282_vm10, %v2245_v47 }
 0x2af   : > { %2806 = vst.msk [vmem:[%s4527_s24 + $0x88] sm:$0xff] %vm705_vm2, %v4692_v32  ;;  %v2054_v17 = vpop.permute.xlu1 %2053 }
 0x2b0   : > { %2120 = vst.msk [vmem:[#allocation3 + $0x1e0] sm:$0xff] %vm2089_vm9, %v2054_v17  ;;  %v1090_v3 = vpop.permute.xlu0 %1089 }
 0x2b1   : > { %1155 = vst.msk [vmem:[#allocation3 + $0x1f0] sm:$0xff] %vm1123_vm4, %v1090_v3 }
 0x2b3   : > { %v2247_v4 = vpop.permute.xlu1 %2246 }
 0x2b4   : > { %2313 = vst.msk [vmem:[#allocation3 + $0x1e0] sm:$0xff] %vm2282_vm10, %v2247_v4  ;;  %v1283_v42 = vpop.permute.xlu0 %1282  ;;  %v2437_v63 = vld [vmem:[#allocation3 + $0x1d0] sm:$0xff] }
 0x2b5   : > { %1348 = vst.msk [vmem:[#allocation3 + $0x1f0] sm:$0xff] %vm1316_vm5, %v1283_v42  ;;  %2774 = vmatmul.mubr.f32.gmra.mrb[26].mxu1 %v2437_v63 }
 0x2b6   : > { %3139 = vmatprep.mubr.msk.f32.mxu1 %vm648_vm0, %v2440_v39 }
 0x2b7   : > { %v1862_v0 = vpop.permute.xlu1 %1861 }
 0x2b8   : > { %v1476_v25 = vpop.permute.xlu0 %1475 }
 0x2b9   : > { %1541 = vst.msk [vmem:[#allocation3 + $0x1f0] sm:$0xff] %vm1509_vm6, %v1476_v25 }
 0x2bb   : > { %v2680_v53 = vpop.f32.mrb[20].mxu0  ;;  %v2439_v49 = vld [vmem:[#allocation3 + $0x1e0] sm:$0xff]  ;;  %v2249_v7 = vpop.permute.xlu1 %2248 }
 0x2bc   : > { %v1669_v45 = vpop.permute.xlu0 %1668  ;;  %v2681_v10 = vadd.f32 %v4520_v29, %v2680_v53  ;;  %v2682_v30 = vpop.f32.mrb[21].mxu0  ;;  %2779 = vmatmul.mubr.f32.gmra.mrb[28].mxu1 %v2439_v49 }
 0x2bd   : > { %1734 = vst.msk [vmem:[#allocation3 + $0x1f0] sm:$0xff] %vm1702_vm7, %v1669_v45  ;;  %3140 = vmatprep.mubr.msk.f32.mxu1 %vm648_vm0, %v2442_v62  ;;  %v2908_v45 = vmul.f32 %v4667_v11, %v4667_v11 }
 0x2be   : > { %1927 = vst.msk [vmem:[#allocation3 + $0x1f0] sm:$0xff] %vm1895_vm8, %v1862_v0  ;;  %v2840_v12 = vsel %vm705_vm2, %v2681_v10, 0.0  ;;  %v2902_v5 = vmul.f32 %v2681_v10, %v2681_v10 }
 0x2bf   : > { %2799 = vst.msk [vmem:[%s4527_s24 + $0x50] sm:$0xff] %vm705_vm2, %v2681_v10  ;;  %v2841_v20 = vadd.f32 %v2840_v12, %v2839_v58 }
 0x2c0   : > { %v2943_v41 = vsel %vm705_vm2, %v2902_v5, 0.0  ;;  %v2056_v35 = vpop.permute.xlu0 %2055  ;;  %v2852_v5 = vsel %vm705_vm2, %v4667_v11, 0.0 }
 0x2c1   : > { %v2944_v8 = vadd.f32 %v2943_v41, %v2942_v52  ;;  %2121 = vst.msk [vmem:[#allocation3 + $0x1f0] sm:$0xff] %vm2089_vm9, %v2056_v35 }
 0x2c2   : > { %2314 = vst.msk [vmem:[#allocation3 + $0x1f0] sm:$0xff] %vm2282_vm10, %v2249_v7 }
 0x2c4   : > { %v2720_v14 = vpop.f32.mrb[4].mxu1 }
 0x2c5   : > { %v4715_v31 = vadd.f32 %v4520_v29, %v2720_v14  ;;  %v2722_v1 = vpop.f32.mrb[5].mxu1  ;;  %v2854_v14 = vsel %vm705_vm2, %v4692_v32, 0.0 }
 0x2c7   : > { %2807 = vst.msk [vmem:[%s4527_s24 + $0x90] sm:$0xff] %vm705_vm2, %v4715_v31  ;;  %v2910_v1 = vmul.f32 %v4715_v31, %v4715_v31 }
 0x2c9   : > { %v2441_v48 = vld [vmem:[#allocation3 + $0x1f0] sm:$0xff] }
 0x2ca   : > { %2784 = vmatmul.mubr.f32.gmra.mrb[30].mxu1 %v2441_v48 }
 0x2d3   : > { %v2685_v36 = vpop.f32.mrb[22].mxu0 }
 0x2d4   : > { %v2686_v22 = vadd.f32 %v4520_v29, %v2685_v36  ;;  %v2687_v24 = vpop.f32.mrb[23].mxu0 }
 0x2d6   : > { %2800 = vst.msk [vmem:[%s4527_s24 + $0x58] sm:$0xff] %vm705_vm2, %v2686_v22  ;;  %v2842_v34 = vsel %vm705_vm2, %v2686_v22, 0.0  ;;  %v2903_v19 = vmul.f32 %v2686_v22, %v2686_v22 }
 0x2d7   : > { %v2843_v21 = vadd.f32 %v2842_v34, %v2841_v20  ;;  %v2909_v20 = vmul.f32 %v4692_v32, %v4692_v32  ;;  %v2959_v32 = vsel %vm705_vm2, %v2910_v1, 0.0 }
 0x2d8   : > { %v2945_v2 = vsel %vm705_vm2, %v2903_v19, 0.0  ;;  %v2856_v19 = vsel %vm705_vm2, %v4715_v31, 0.0 }
 0x2d9   : > { %v2946_v60 = vadd.f32 %v2945_v2, %v2944_v8  ;;  %v2955_v8 = vsel %vm705_vm2, %v2908_v45, 0.0  ;;  %v2957_v34 = vsel %vm705_vm2, %v2909_v20, 0.0 }
 0x2dc   : > { %v2725_v51 = vpop.f32.mrb[6].mxu1 }
 0x2dd   : > { %v4726_v54 = vadd.f32 %v4520_v29, %v2725_v51  ;;  %v2727_v13 = vpop.f32.mrb[7].mxu1 }
 0x2df   : > { %2808 = vst.msk [vmem:[%s4527_s24 + $0x98] sm:$0xff] %vm705_vm2, %v4726_v54  ;;  %v2858_v51 = vsel %vm705_vm2, %v4726_v54, 0.0 }
 0x2eb   : > { %v2690_v50 = vpop.f32.mrb[24].mxu0 }
 0x2ec   : > { %v2691_v33 = vadd.f32 %v4520_v29, %v2690_v50  ;;  %v2692_v6 = vpop.f32.mrb[25].mxu0 }
 0x2ee   : > { %2801 = vst.msk [vmem:[%s4527_s24 + $0x60] sm:$0xff] %vm705_vm2, %v2691_v33  ;;  %v2844_v23 = vsel %vm705_vm2, %v2691_v33, 0.0  ;;  %v2904_v28 = vmul.f32 %v2691_v33, %v2691_v33 }
 0x2ef   : > { %v2845_v16 = vadd.f32 %v2844_v23, %v2843_v21  ;;  %v2911_v21 = vmul.f32 %v4726_v54, %v4726_v54 }
 0x2f0   : > { %v2947_v61 = vsel %vm705_vm2, %v2904_v28, 0.0 }
 0x2f1   : > { %v2948_v15 = vadd.f32 %v2947_v61, %v2946_v60  ;;  %v2961_v6 = vsel %vm705_vm2, %v2911_v21, 0.0 }
 0x2f4   : > { %v2730_v27 = vpop.f32.mrb[8].mxu1 }
 0x2f5   : > { %v2731_v38 = vadd.f32 %v4520_v29, %v2730_v27  ;;  %v2732_v57 = vpop.f32.mrb[9].mxu1 }
 0x2f7   : > { %2809 = vst.msk [vmem:[%s4527_s24 + $0xa0] sm:$0xff] %vm705_vm2, %v2731_v38  ;;  %v2912_v13 = vmul.f32 %v2731_v38, %v2731_v38  ;;  %v2860_v23 = vsel %vm705_vm2, %v2731_v38, 0.0 }
 0x2f9   : > { %v2963_v61 = vsel %vm705_vm2, %v2912_v13, 0.0 }
 0x303   : > { %v2695_v26 = vpop.f32.mrb[26].mxu0 }
 0x304   : > { %v2696_v44 = vadd.f32 %v4520_v29, %v2695_v26  ;;  %v2697_v46 = vpop.f32.mrb[27].mxu0 }
 0x306   : > { %2802 = vst.msk [vmem:[%s4527_s24 + $0x68] sm:$0xff] %vm705_vm2, %v2696_v44  ;;  %v2846_v18 = vsel %vm705_vm2, %v2696_v44, 0.0  ;;  %v2905_v55 = vmul.f32 %v2696_v44, %v2696_v44 }
 0x307   : > { %v2847_v58 = vadd.f32 %v2846_v18, %v2845_v16 }
 0x308   : > { %v2949_v37 = vsel %vm705_vm2, %v2905_v55, 0.0 }
 0x309   : > { %v2950_v59 = vadd.f32 %v2949_v37, %v2948_v15 }
 0x30c   : > { %v2735_v40 = vpop.f32.mrb[10].mxu1 }
 0x30d   : > { %v2736_v52 = vadd.f32 %v4520_v29, %v2735_v40  ;;  %v2737_v56 = vpop.f32.mrb[11].mxu1 }
 0x30f   : > { %2810 = vst.msk [vmem:[%s4527_s24 + $0xa8] sm:$0xff] %vm705_vm2, %v2736_v52  ;;  %v2913_v31 = vmul.f32 %v2736_v52, %v2736_v52  ;;  %v2862_v15 = vsel %vm705_vm2, %v2736_v52, 0.0 }
 0x311   : > { %v2965_v54 = vsel %vm705_vm2, %v2913_v31, 0.0 }
 0x31b   : > { %v2700_v43 = vpop.f32.mrb[28].mxu0 }
 0x31c   : > { %v2701_v47 = vadd.f32 %v4520_v29, %v2700_v43  ;;  %v2702_v9 = vpop.f32.mrb[29].mxu0 }
 0x31e   : > { %2803 = vst.msk [vmem:[%s4527_s24 + $0x70] sm:$0xff] %vm705_vm2, %v2701_v47  ;;  %v2848_v17 = vsel %vm705_vm2, %v2701_v47, 0.0  ;;  %v2906_v3 = vmul.f32 %v2701_v47, %v2701_v47 }
 0x31f   : > { %v2849_v4 = vadd.f32 %v2848_v17, %v2847_v58 }
 0x320   : > { %v2951_v39 = vsel %vm705_vm2, %v2906_v3, 0.0 }
 0x321   : > { %v2952_v42 = vadd.f32 %v2951_v39, %v2950_v59 }
 0x324   : > { %v2740_v63 = vpop.f32.mrb[12].mxu1 }
 0x325   : > { %v2741_v25 = vadd.f32 %v4520_v29, %v2740_v63  ;;  %v2742_v62 = vpop.f32.mrb[13].mxu1 }
 0x327   : > { %2811 = vst.msk [vmem:[%s4527_s24 + $0xb0] sm:$0xff] %vm705_vm2, %v2741_v25  ;;  %v2914_v27 = vmul.f32 %v2741_v25, %v2741_v25  ;;  %v2864_v44 = vsel %vm705_vm2, %v2741_v25, 0.0 }
 0x329   : > { %v2967_v38 = vsel %vm705_vm2, %v2914_v27, 0.0  ;;  %v3209_v27 = vld [vmem:[%s4846_s7] ss:$0 sm:$0xff] }
 0x331   : > { %v2705_v0 = vpop.f32.mrb[30].mxu0 }
 0x332   : > { %v2706_v53 = vadd.f32 %v4520_v29, %v2705_v0  ;;  %v2707_v49 = vpop.f32.mrb[31].mxu0 }
 0x334   : > { %2804 = vst.msk [vmem:[%s4527_s24 + $0x78] sm:$0xff] %vm705_vm2, %v2706_v53  ;;  %v2850_v10 = vsel %vm705_vm2, %v2706_v53, 0.0  ;;  %v2907_v30 = vmul.f32 %v2706_v53, %v2706_v53 }
 0x335   : > { %v2851_v12 = vadd.f32 %v2850_v10, %v2849_v4 }
 0x336   : > { %v2953_v7 = vsel %vm705_vm2, %v2907_v30, 0.0 }
 0x337   : > { %v2853_v41 = vadd.f32 %v2852_v5, %v2851_v12  ;;  %v2954_v35 = vadd.f32 %v2953_v7, %v2952_v42 }
 0x338   : > { %v2745_v48 = vpop.f32.mrb[14].mxu1 }
 0x339   : > { %v2855_v36 = vadd.f32 %v2854_v14, %v2853_v41  ;;  %v2956_v22 = vadd.f32 %v2955_v8, %v2954_v35  ;;  %v2746_v11 = vadd.f32 %v4520_v29, %v2745_v48  ;;  %v2747_v24 = vpop.f32.mrb[15].mxu1 }
 0x33b   : > { %v2857_v2 = vadd.f32 %v2856_v19, %v2855_v36  ;;  %v2958_v60 = vadd.f32 %v2957_v34, %v2956_v22  ;;  %2812 = vst.msk [vmem:[%s4527_s24 + $0xb8] sm:$0xff] %vm705_vm2, %v2746_v11  ;;  %v2915_v46 = vmul.f32 %v2746_v11, %v2746_v11  ;;  %v2866_v58 = vsel %vm705_vm2, %v2746_v11, 0.0 }
 0x33d   : > { %v2960_v50 = vadd.f32 %v2959_v32, %v2958_v60  ;;  %v2859_v33 = vadd.f32 %v2858_v51, %v2857_v2  ;;  %v2969_v43 = vsel %vm705_vm2, %v2915_v46, 0.0 }
 0x33f   : > { %v2861_v28 = vadd.f32 %v2860_v23, %v2859_v33  ;;  %v2962_v16 = vadd.f32 %v2961_v6, %v2960_v50 }
 0x341   : > { %v2863_v57 = vadd.f32 %v2862_v15, %v2861_v28  ;;  %v2964_v26 = vadd.f32 %v2963_v61, %v2962_v16 }
 0x343   : > { %v2865_v18 = vadd.f32 %v2864_v44, %v2863_v57  ;;  %v2966_v55 = vadd.f32 %v2965_v54, %v2964_v26 }
 0x344   : > { %v2750_v37 = vpop.f32.mrb[16].mxu1 }
 0x345   : > { %v2867_v59 = vadd.f32 %v2866_v58, %v2865_v18  ;;  %v2968_v40 = vadd.f32 %v2967_v38, %v2966_v55  ;;  %v2751_v52 = vadd.f32 %v4520_v29, %v2750_v37  ;;  %v2752_v56 = vpop.f32.mrb[17].mxu1 }
 0x347   : > { %v2970_v47 = vadd.f32 %v2969_v43, %v2968_v40  ;;  %2813 = vst.msk [vmem:[%s4527_s24 + $0xc0] sm:$0xff] %vm705_vm2, %v2751_v52  ;;  %v2868_v9 = vsel %vm705_vm2, %v2751_v52, 0.0  ;;  %v2916_v17 = vmul.f32 %v2751_v52, %v2751_v52 }
 0x348   : > { %v2869_v3 = vadd.f32 %v2868_v9, %v2867_v59 }
 0x349   : > { %v2971_v4 = vsel %vm705_vm2, %v2916_v17, 0.0 }
 0x34a   : > { %v2972_v39 = vadd.f32 %v2971_v4, %v2970_v47 }
 0x350   : > { %v2755_v42 = vpop.f32.mrb[18].mxu1 }
 0x351   : > { %v2756_v63 = vadd.f32 %v4520_v29, %v2755_v42  ;;  %v2757_v25 = vpop.f32.mrb[19].mxu1 }
 0x353   : > { %2814 = vst.msk [vmem:[%s4527_s24 + $0xc8] sm:$0xff] %vm705_vm2, %v2756_v63  ;;  %v2870_v62 = vsel %vm705_vm2, %v2756_v63, 0.0  ;;  %v2917_v0 = vmul.f32 %v2756_v63, %v2756_v63 }
 0x354   : > { %v2871_v53 = vadd.f32 %v2870_v62, %v2869_v3 }
 0x355   : > { %v2973_v49 = vsel %vm705_vm2, %v2917_v0, 0.0 }
 0x356   : > { %v2974_v45 = vadd.f32 %v2973_v49, %v2972_v39 }
 0x357   : > { %v2760_v10 = vpop.f32.mrb[20].mxu1 }
 0x358   : > { %v2761_v30 = vadd.f32 %v4520_v29, %v2760_v10  ;;  %v2762_v12 = vpop.f32.mrb[21].mxu1 }
 0x35a   : > { %2815 = vst.msk [vmem:[%s4527_s24 + $0xd0] sm:$0xff] %vm705_vm2, %v2761_v30  ;;  %v2872_v5 = vsel %vm705_vm2, %v2761_v30, 0.0  ;;  %v2918_v20 = vmul.f32 %v2761_v30, %v2761_v30 }
 0x35b   : > { %v2873_v7 = vadd.f32 %v2872_v5, %v2871_v53 }
 0x35c   : > { %v2975_v41 = vsel %vm705_vm2, %v2918_v20, 0.0 }
 0x35d   : > { %v2976_v35 = vadd.f32 %v2975_v41, %v2974_v45 }
 0x36c   : > { %v2765_v8 = vpop.f32.mrb[22].mxu1 }
 0x36d   : > { %v2766_v14 = vadd.f32 %v4520_v29, %v2765_v8  ;;  %v2767_v1 = vpop.f32.mrb[23].mxu1 }
 0x36f   : > { %2816 = vst.msk [vmem:[%s4527_s24 + $0xd8] sm:$0xff] %vm705_vm2, %v2766_v14  ;;  %v2874_v48 = vsel %vm705_vm2, %v2766_v14, 0.0  ;;  %v2919_v36 = vmul.f32 %v2766_v14, %v2766_v14 }
 0x370   : > { %v2875_v22 = vadd.f32 %v2874_v48, %v2873_v7 }
 0x371   : > { %v2977_v11 = vsel %vm705_vm2, %v2919_v36, 0.0 }
 0x372   : > { %v2978_v24 = vadd.f32 %v2977_v11, %v2976_v35 }
 0x373   : > { %v2770_v34 = vpop.f32.mrb[24].mxu1 }
 0x374   : > { %v2771_v19 = vadd.f32 %v4520_v29, %v2770_v34  ;;  %v2772_v21 = vpop.f32.mrb[25].mxu1 }
 0x376   : > { %2817 = vst.msk [vmem:[%s4527_s24 + $0xe0] sm:$0xff] %vm705_vm2, %v2771_v19  ;;  %v2876_v2 = vsel %vm705_vm2, %v2771_v19, 0.0  ;;  %v2920_v60 = vmul.f32 %v2771_v19, %v2771_v19 }
 0x377   : > { %v2877_v32 = vadd.f32 %v2876_v2, %v2875_v22 }
 0x378   : > { %v2979_v51 = vsel %vm705_vm2, %v2920_v60, 0.0 }
 0x379   : > { %v2980_v13 = vadd.f32 %v2979_v51, %v2978_v24 }
 0x388   : > { %v2775_v50 = vpop.f32.mrb[26].mxu1 }
 0x389   : > { %v2776_v33 = vadd.f32 %v4520_v29, %v2775_v50  ;;  %v2777_v6 = vpop.f32.mrb[27].mxu1 }
 0x38b   : > { %2818 = vst.msk [vmem:[%s4527_s24 + $0xe8] sm:$0xff] %vm705_vm2, %v2776_v33  ;;  %v2878_v23 = vsel %vm705_vm2, %v2776_v33, 0.0  ;;  %v2921_v31 = vmul.f32 %v2776_v33, %v2776_v33 }
 0x38c   : > { %v2879_v28 = vadd.f32 %v2878_v23, %v2877_v32 }
 0x38d   : > { %v2981_v16 = vsel %vm705_vm2, %v2921_v31, 0.0 }
 0x38e   : > { %v2982_v61 = vadd.f32 %v2981_v16, %v2980_v13 }
 0x38f   : > { %v2780_v15 = vpop.f32.mrb[28].mxu1 }
 0x390   : > { %v2781_v57 = vadd.f32 %v3209_v27, %v2780_v15  ;;  %v2782_v26 = vpop.f32.mrb[29].mxu1 }
 0x392   : > { %2819 = vst.msk [vmem:[%s4527_s24 + $0xf0] sm:$0xff] %vm705_vm2, %v2781_v57  ;;  %v2880_v29 = vsel %vm705_vm2, %v2781_v57, 0.0  ;;  %v2922_v54 = vmul.f32 %v2781_v57, %v2781_v57 }
 0x393   : > { %v2881_v44 = vadd.f32 %v2880_v29, %v2879_v28 }
 0x394   : > { %v2983_v46 = vsel %vm705_vm2, %v2922_v54, 0.0 }
 0x395   : > { %v2984_v18 = vadd.f32 %v2983_v46, %v2982_v61 }
 0x39d   : > { %v2785_v55 = vpop.f32.mrb[30].mxu1 }
 0x39e   : > { %v2786_v38 = vadd.f32 %v3209_v27, %v2785_v55  ;;  %v2787_v58 = vpop.f32.mrb[31].mxu1 }
 0x3a0   : > { %2820 = vst.msk [vmem:[%s4527_s24 + $0xf8] sm:$0xff] %vm705_vm2, %v2786_v38  ;;  %v2882_v37 = vsel %vm705_vm2, %v2786_v38, 0.0  ;;  %v2923_v59 = vmul.f32 %v2786_v38, %v2786_v38 }
 0x3a1   : > { %v2883_v40 = vadd.f32 %v2882_v37, %v2881_v44 }
 0x3a2   : > { %v2985_v52 = vsel %vm705_vm2, %v2923_v59, 0.0 }
 0x3a3   : > { %v2884_v56 = vrot.slane %v2883_v40, 4  ;;  %v2986_v43 = vadd.f32 %v2985_v52, %v2984_v18 }
 0x3a5   : > { %v2885_v47 = vadd.f32 %v2884_v56, %v2883_v40  ;;  %v2987_v9 = vrot.slane %v2986_v43, 4 }
 0x3a7   : > { %v2886_v17 = vrot.slane %v2885_v47, 2  ;;  %v2988_v3 = vadd.f32 %v2987_v9, %v2986_v43 }
 0x3a9   : > { %v2887_v4 = vadd.f32 %v2886_v17, %v2885_v47  ;;  %v2989_v39 = vrot.slane %v2988_v3, 2 }
 0x3ab   : > { %v2888_v42 = vrot.slane %v2887_v4, 1  ;;  %v2990_v63 = vadd.f32 %v2989_v39, %v2988_v3 }
 0x3ad   : > { %v2889_v25 = vadd.f32 %v2888_v42, %v2887_v4  ;;  %v2991_v62 = vrot.slane %v2990_v63, 1 }
 0x3af   : > { %2891 = vst.msk [vmem:[%s363_s29] sm:$0x1] %vm2890_vm11, %v2889_v25  ;;  %v2992_v0 = vadd.f32 %v2991_v62, %v2990_v63 }
 0x3b1   : > { %2993 = vst.msk [vmem:[%s363_s29 + $0x1] sm:$0x1] %vm2890_vm11, %v2992_v0 }
 0x3b2 PF: > { %s20_s30 = sadd.s32 1, %s3216_s30  }
 0x3b3   : > { %p17_p4 = scmp.ge.s32.totalorder %s20_s30, 4  }
 0x3b5   :  { %19 = sbr.rel (!%p17_p4) target bundleno = 1 (0x1), region = 99 }

</bundles_post_ra>
